<compile_context>
chip_gen: v7x
topology: tpu7x:2x2x1
jax: 0.10.0
libtpu: 0.0.40
codegen_flags: <defaults>
</compile_context>

<pallas_src>
import jax
import jax.numpy as jnp
import numpy as np
from jax.experimental import pallas as pl
from jax.experimental.pallas import tpu as pltpu


# ----------------------------------------------------------------------------
# Activations (match the PyTorch reference: relu6-based hard swish / sigmoid)
# ----------------------------------------------------------------------------
def _hswish(x):
    return x * jnp.clip(x + 3.0, 0.0, 6.0) * (1.0 / 6.0)


def _hsigmoid(x):
    return jnp.clip(x + 3.0, 0.0, 6.0) * (1.0 / 6.0)


def _relu6(x):
    return jnp.clip(x, 0.0, 6.0)


def _round_up(v, m):
    return ((v + m - 1) // m) * m


def _pad_to(a, shape):
    widths = [(0, t - s) for s, t in zip(a.shape, shape)]
    return jnp.pad(a, widths)


def _device_kind():
    try:
        return jax.devices()[0].device_kind.lower()
    except Exception:  # pragma: no cover
        return ""


def _default_vmem_limit_bytes():
    kind = _device_kind()
    if "v7" in kind:
        return 56 * 1024 * 1024      # 64 MiB part: leave headroom
    return 100 * 1024 * 1024         # v5e / v6e have 128 MiB physical VMEM


_PARAM_ORDER = ("wx", "b1", "wdw", "b2", "wse1", "bse1",
                "wse2", "bse2", "w3", "b3", "bsc")


# ----------------------------------------------------------------------------
# Kernel
# ----------------------------------------------------------------------------
def make_bottleneck_kernel(Nb, H, W, Cinp, Cp, Coutp, K, stride, pad,
                           Hout, Wout, mode, nl, use_se, sdt):
    """mode: 'conv_sc' | 'identity_sc' | 'none'.  sdt: scratch/elementwise dtype."""
    nlin = _hswish if nl == "HS" else _relu6
    Hp, Wp = H + 2 * pad, W + 2 * pad
    HWin, HWout = H * W, Hout * Wout
    bf16, f32 = jnp.bfloat16, jnp.float32

    def kernel(x_ref, wx_ref, b1_ref, wdw_ref, b2_ref,
               wse1_ref, bse1_ref, wse2_ref, bse2_ref,
               w3_ref, b3_ref, bsc_ref, out_ref, pscr):
        # ---- fused 1x1 expansion (+ conv-shortcut) matmul, BN1/BNsc folded --
        x2d = x_ref[...].reshape(Nb * HWin, Cinp)               # f32, lane-dense
        y = jnp.dot(x2d.astype(bf16), wx_ref[...],
                    preferred_element_type=f32)
        if mode == "conv_sc":
            h_pre = y[:, :Cp] + b1_ref[...]
            sc = y[:, Cp:] + bsc_ref[...]                       # (M, Coutp) f32
        else:
            h_pre = y + b1_ref[...]
        h = nlin(h_pre.astype(sdt))                             # (Nb*H*W, Cp)

        # ---- depthwise KxK conv (BN2 folded) --------------------------------
        # Only the thin halo border is re-zeroed each step (parallel-grid safe);
        # the interior is fully overwritten.
        if pad > 0:
            zrow = jnp.zeros((Nb, pad, Wp, Cp), sdt)
            pscr[:, 0:pad, :, :] = zrow
            pscr[:, pl.ds(pad + H, pad), :, :] = zrow
            zcol = jnp.zeros((Nb, H, pad, Cp), sdt)
            pscr[:, pl.ds(pad, H), 0:pad, :] = zcol
            pscr[:, pl.ds(pad, H), pl.ds(pad + W, pad), :] = zcol
        pscr[:, pl.ds(pad, H), pl.ds(pad, W), :] = h.reshape(Nb, H, W, Cp)

        acc = None
        for di in range(K):
            for dj in range(K):
                if stride == 1:
                    win = pscr[:, pl.ds(di, Hout), pl.ds(dj, Wout), :]
                else:
                    # Strided reads straight from the scratch ref: no full
                    # padded-image materialization, no parity copies.
                    win = pscr[:, pl.ds(di, Hout, stride=stride),
                               pl.ds(dj, Wout, stride=stride), :]
                tap = win * wdw_ref[di * K + dj].astype(sdt)
                acc = tap if acc is None else acc + tap
        d = acc.astype(f32) + b2_ref[...]                       # (Nb,Hout,Wout,Cp)
        d2 = d.reshape(Nb, HWout, Cp)

        # ---- Squeeze-and-Excite (pool -> FC -> ReLU -> FC -> Hsigmoid) ------
        if use_se:
            pooled = jnp.mean(d2, axis=1)                       # (Nb, Cp) f32
            y1 = jnp.maximum(
                jnp.dot(pooled.astype(bf16), wse1_ref[...],
                        preferred_element_type=f32) + bse1_ref[...], 0.0)
            gate = _hsigmoid(
                jnp.dot(y1.astype(bf16), wse2_ref[...],
                        preferred_element_type=f32) + bse2_ref[...])
            a = nlin(d2.astype(sdt) * gate.astype(sdt).reshape(Nb, 1, Cp))
        else:
            a = nlin(d2.astype(sdt))

        # ---- 1x1 projection (BN3 folded) + shortcut --------------------------
        o = jnp.dot(a.reshape(Nb * HWout, Cp).astype(bf16), w3_ref[...],
                    preferred_element_type=f32) + b3_ref[...]
        if mode == "conv_sc":
            o = o + sc
        elif mode == "identity_sc":
            o = o + x2d                                         # f32 residual
        out_ref[...] = o.reshape(Nb, Hout, Wout, Coutp).astype(out_ref.dtype)

    return kernel


# ----------------------------------------------------------------------------
# Parameter preparation: fold eval-mode BN into conv weights, pad all channel
# dims to multiples of 128 (lane-dense), cast matmul weights to bf16, fuse the
# expansion and conv-shortcut 1x1 weights into a single matrix.
# ----------------------------------------------------------------------------
def prepare_inference_params(params, *, in_channels, out_channels, stride):
    (w1, s1, b1, wdw, s2, b2, wse1, bse1, wse2, bse2,
     w3, s3, b3, wsc, ssc, bsc) = params
    exp_channels = w1.shape[1]
    K = wdw.shape[0]
    red = wse1.shape[1]
    Cinp = _round_up(in_channels, 128)
    Cp = _round_up(exp_channels, 128)
    Coutp = _round_up(out_channels, 128)
    Rp = _round_up(red, 128)
    bf16 = jnp.bfloat16

    w1f = _pad_to(w1 * s1[None, :], (Cinp, Cp)).astype(bf16)
    b1p = _pad_to(b1[None, :], (1, Cp))
    wdwf = _pad_to(wdw * s2[None, None, :], (K, K, Cp)).reshape(K * K, 1, Cp)
    b2p = _pad_to(b2[None, :], (1, Cp))
    wse1p = _pad_to(wse1, (Cp, Rp)).astype(bf16)
    bse1p = _pad_to(bse1[None, :], (1, Rp))
    wse2p = _pad_to(wse2, (Rp, Cp)).astype(bf16)
    bse2p = _pad_to(bse2[None, :], (1, Cp))
    w3f = _pad_to(w3 * s3[None, :], (Cp, Coutp)).astype(bf16)
    b3p = _pad_to(b3[None, :], (1, Coutp))

    if stride == 1 and in_channels != out_channels:
        mode = "conv_sc"
        wscf = _pad_to(wsc * ssc[None, :], (Cinp, Coutp)).astype(bf16)
        wx = jnp.concatenate([w1f, wscf], axis=1)          # (Cinp, Cp + Coutp)
        bscp = _pad_to(bsc[None, :], (1, Coutp))
    elif stride == 1:
        mode = "identity_sc"                                # f32 identity add
        wx = w1f
        bscp = jnp.zeros((1, Coutp), jnp.float32)
    else:
        mode = "none"
        wx = w1f
        bscp = jnp.zeros((1, Coutp), jnp.float32)

    return dict(wx=wx, b1=b1p, wdw=wdwf, b2=b2p, wse1=wse1p, bse1=bse1p,
                wse2=wse2p, bse2=bse2p, w3=w3f, b3=b3p, bsc=bscp,
                mode=mode, Cinp=Cinp, Cp=Cp, Coutp=Coutp)


# ----------------------------------------------------------------------------
# Wrapper
# ----------------------------------------------------------------------------
def _auto_batch_block(N, H, W, Hout, Wout, Cinp, Cp, Coutp, pad,
                      sdt, out_dtype, vmem_limit):
    ss = jnp.dtype(sdt).itemsize
    oi = jnp.dtype(out_dtype).itemsize
    Hp, Wp = H + 2 * pad, W + 2 * pad
    per_img = (Hp * Wp * Cp * ss                 # padded depthwise scratch
               + 2 * H * W * Cinp * 4            # double-buffered input block
               + 2 * Hout * Wout * Coutp * oi    # double-buffered output block
               + Hout * Wout * Cp * (8 + ss)     # d (f32) + a (sdt) temporaries
               + H * W * Cp * 4)                 # expansion result
    budget = int(0.5 * vmem_limit)
    best = 1
    for nb in range(1, N + 1):
        if N % nb:
            continue
        if N >= 2 and N // nb < 2:               # keep grid >= 2 (v7x megacore)
            break
        if nb * per_img > budget:
            break
        best = nb
    return best


def bottleneck_forward(x, prep, *, kernel_size, stride, out_channels,
                       nl="HS", use_se=True, batch_block=None,
                       storage_dtype=jnp.float32, out_dtype=jnp.float32,
                       slice_output=True, vmem_limit_bytes=None):
    # storage_dtype=jnp.bfloat16 halves scratch VMEM and depthwise vld count
    # (recommended on v6e/v7x per review); keep float32 on v5e (no bf16 VPU).
    N, H, W, Cin = x.shape
    Cinp, Cp, Coutp = prep["Cinp"], prep["Cp"], prep["Coutp"]
    mode = prep["mode"]
    K = kernel_size
    pad = (K - 1) // 2
    Hout = (H + 2 * pad - K) // stride + 1
    Wout = (W + 2 * pad - K) // stride + 1
    sdt = storage_dtype
    vmem_limit = vmem_limit_bytes or _default_vmem_limit_bytes()

    # Lane-dense input: pad channels to a multiple of 128 (carried between
    # layers in a real network instead of re-padding here).
    if Cin < Cinp:
        x = jnp.pad(x, ((0, 0), (0, 0), (0, 0), (0, Cinp - Cin)))

    if batch_block is None:
        batch_block = _auto_batch_block(N, H, W, Hout, Wout, Cinp, Cp, Coutp,
                                        pad, sdt, out_dtype, vmem_limit)
    Nb = batch_block
    assert N % Nb == 0, "batch_block must divide the batch size"

    kernel = make_bottleneck_kernel(Nb, H, W, Cinp, Cp, Coutp, K, stride, pad,
                                    Hout, Wout, mode, nl, use_se, sdt)

    ops = [prep[k] for k in _PARAM_ORDER]

    def full_spec(arr):
        nd = arr.ndim
        # Weights never change block index; VMEM-resident for the whole call.
        # TODO(synk): on v7x, single-buffer these via pipeline_mode once
        # pl.Buffered(1) is confirmed supported, to reclaim ~their size in VMEM.
        return pl.BlockSpec(arr.shape, lambda b, _nd=nd: (0,) * _nd)

    in_specs = [pl.BlockSpec((Nb, H, W, Cinp), lambda b: (b, 0, 0, 0))]
    in_specs += [full_spec(a) for a in ops]
    out_spec = pl.BlockSpec((Nb, Hout, Wout, Coutp), lambda b: (b, 0, 0, 0))

    out = pl.pallas_call(
        kernel,
        out_shape=jax.ShapeDtypeStruct((N, Hout, Wout, Coutp), out_dtype),
        grid_spec=pltpu.PrefetchScalarGridSpec(
            num_scalar_prefetch=0,
            grid=(N // Nb,),
            in_specs=in_specs,
            out_specs=out_spec,
            scratch_shapes=[pltpu.VMEM((Nb, H + 2 * pad, W + 2 * pad, Cp),
                                       sdt)]),
        compiler_params=pltpu.CompilerParams(
            dimension_semantics=("parallel",),
            vmem_limit_bytes=vmem_limit),
    )(x, *ops)

    if slice_output and out_channels < Coutp:
        # In a real network, keep the 128-padded channel layout between layers
        # (and write bf16) to halve HBM writeback and skip this extra copy.
        out = out[..., :out_channels]
    return out


# ----------------------------------------------------------------------------
# Synthetic parameters (eval-mode BatchNorm as per-channel scale/bias).
# PyTorch conv1 weight (exp,in,1,1) maps to the (in,exp) matrix used here.
# ----------------------------------------------------------------------------
def init_params(key, in_ch, out_ch, exp_ch, kernel_size):
    eps = 1e-5
    ks = jax.random.split(key, 12)

    def bn(k, c):
        k1, k2, k3, k4 = jax.random.split(k, 4)
        gamma = 1.0 + 0.1 * jax.random.normal(k1, (c,), jnp.float32)
        beta = 0.1 * jax.random.normal(k2, (c,), jnp.float32)
        mean = 0.05 * jax.random.normal(k3, (c,), jnp.float32)
        var = 1.0 + 0.1 * jnp.abs(jax.random.normal(k4, (c,), jnp.float32))
        scale = gamma / jnp.sqrt(var + eps)
        bias = beta - mean * scale
        return scale, bias

    w1 = 0.1 * jax.random.normal(ks[0], (in_ch, exp_ch), jnp.float32)
    s1, b1 = bn(ks[1], exp_ch)
    wdw = 0.1 * jax.random.normal(ks[2], (kernel_size, kernel_size, exp_ch),
                                  jnp.float32)
    s2, b2 = bn(ks[3], exp_ch)
    # TODO(synk): the SE module definition is not in the provided source; a
    # standard squeeze-excite (pool -> FC(C->C/4) -> ReLU -> FC(C/4->C) ->
    # Hsigmoid -> channel scale) is assumed here.
    red = max(exp_ch // 4, 1)
    wse1 = 0.1 * jax.random.normal(ks[4], (exp_ch, red), jnp.float32)
    bse1 = 0.1 * jax.random.normal(ks[5], (red,), jnp.float32)
    wse2 = 0.1 * jax.random.normal(ks[6], (red, exp_ch), jnp.float32)
    bse2 = 0.1 * jax.random.normal(ks[7], (exp_ch,), jnp.float32)
    w3 = 0.1 * jax.random.normal(ks[8], (exp_ch, out_ch), jnp.float32)
    s3, b3 = bn(ks[9], out_ch)
    wsc = 0.1 * jax.random.normal(ks[10], (in_ch, out_ch), jnp.float32)
    ssc, bsc = bn(ks[11], out_ch)
    return (w1, s1, b1, wdw, s2, b2, wse1, bse1, wse2, bse2,
            w3, s3, b3, wsc, ssc, bsc)


# ----------------------------------------------------------------------------
# Plain-JAX reference mirroring the kernel math (same folded/padded weights,
# same dtypes) for validation.
# ----------------------------------------------------------------------------
def reference_forward(x, prep, *, kernel_size, stride, out_channels, nl="HS",
                      use_se=True, storage_dtype=jnp.float32,
                      slice_output=True):
    nlin = _hswish if nl == "HS" else _relu6
    bf16, f32 = jnp.bfloat16, jnp.float32
    sdt = storage_dtype
    mode = prep["mode"]
    Cinp, Cp, Coutp = prep["Cinp"], prep["Cp"], prep["Coutp"]
    N, H, W, Cin = x.shape
    K = kernel_size
    pad = (K - 1) // 2
    Hout = (H + 2 * pad - K) // stride + 1
    Wout = (W + 2 * pad - K) // stride + 1

    if Cin < Cinp:
        x = jnp.pad(x, ((0, 0), (0, 0), (0, 0), (0, Cinp - Cin)))
    x2d = x.reshape(N * H * W, Cinp)
    y = jnp.dot(x2d.astype(bf16), prep["wx"], preferred_element_type=f32)
    if mode == "conv_sc":
        h_pre = y[:, :Cp] + prep["b1"]
        sc = y[:, Cp:] + prep["bsc"]
    else:
        h_pre = y + prep["b1"]
    h = nlin(h_pre.astype(sdt)).reshape(N, H, W, Cp)
    hp = jnp.pad(h, ((0, 0), (pad, pad), (pad, pad), (0, 0)))
    acc = None
    for di in range(K):
        for dj in range(K):
            win = hp[:, di:di + (Hout - 1) * stride + 1:stride,
                     dj:dj + (Wout - 1) * stride + 1:stride, :]
            tap = win * prep["wdw"][di * K + dj].astype(sdt)
            acc = tap if acc is None else acc + tap
    d = acc.astype(f32) + prep["b2"]
    d2 = d.reshape(N, Hout * Wout, Cp)
    if use_se:
        pooled = jnp.mean(d2, axis=1)
        y1 = jnp.maximum(jnp.dot(pooled.astype(bf16), prep["wse1"],
                                 preferred_element_type=f32) + prep["bse1"],
                         0.0)
        gate = _hsigmoid(jnp.dot(y1.astype(bf16), prep["wse2"],
                                 preferred_element_type=f32) + prep["bse2"])
        a = nlin(d2.astype(sdt) * gate.astype(sdt)[:, None, :])
    else:
        a = nlin(d2.astype(sdt))
    o = jnp.dot(a.reshape(N * Hout * Wout, Cp).astype(bf16), prep["w3"],
                preferred_element_type=f32) + prep["b3"]
    if mode == "conv_sc":
        o = o + sc
    elif mode == "identity_sc":
        o = o + x2d
    out = o.reshape(N, Hout, Wout, Coutp)
    if slice_output and out_channels < Coutp:
        out = out[..., :out_channels]
    return out


if __name__ == "__main__":
    key = jax.random.PRNGKey(0)

    # ---- Config 1: stride=1, in != out  -> conv shortcut (fused matmul) ----
    k1, k2, key = jax.random.split(key, 3)
    N, H, W = 4, 16, 16
    in_ch, out_ch, exp_ch, K, stride = 8, 16, 32, 3, 1
    x = jax.random.normal(k1, (N, H, W, in_ch), jnp.float32)
    params = init_params(k2, in_ch, out_ch, exp_ch, K)
    prep = prepare_inference_params(params, in_channels=in_ch,
                                    out_channels=out_ch, stride=stride)
    out = bottleneck_forward(x, prep, kernel_size=K, stride=stride,
                             out_channels=out_ch, nl="HS", batch_block=2)
    out = jax.block_until_ready(out)
    ref = reference_forward(x, prep, kernel_size=K, stride=stride,
                            out_channels=out_ch, nl="HS")
    np.testing.assert_allclose(np.asarray(out), np.asarray(ref),
                               rtol=1e-2, atol=1e-2)

    # ---- Config 2: stride=1, in == out -> identity residual (f32 add), RE --
    k1, k2, key = jax.random.split(key, 3)
    N2, H2, W2 = 2, 8, 8
    in2, out2, exp2 = 16, 16, 48
    x2 = jax.random.normal(k1, (N2, H2, W2, in2), jnp.float32)
    params2 = init_params(k2, in2, out2, exp2, K)
    prep2 = prepare_inference_params(params2, in_channels=in2,
                                     out_channels=out2, stride=1)
    out2_ = bottleneck_forward(x2, prep2, kernel_size=K, stride=1,
                               out_channels=out2, nl="RE")  # batch_block auto
    out2_ = jax.block_until_ready(out2_)
    ref2 = reference_forward(x2, prep2, kernel_size=K, stride=1,
                             out_channels=out2, nl="RE")
    np.testing.assert_allclose(np.asarray(out2_), np.asarray(ref2),
                               rtol=1e-2, atol=1e-2)

    print("KERNEL_OK")
</pallas_src>

<mosaic_0001>
module attributes {stable_mosaic.version = 11 : i64} {
  func.func @kernel(%arg0: i32, %arg1: memref<2x16x16x128xf32, #tpu.memory_space<vmem>>, %arg2: memref<128x256xbf16, #tpu.memory_space<vmem>>, %arg3: memref<1x128xf32, #tpu.memory_space<vmem>>, %arg4: memref<9x1x128xf32, #tpu.memory_space<vmem>>, %arg5: memref<1x128xf32, #tpu.memory_space<vmem>>, %arg6: memref<128x128xbf16, #tpu.memory_space<vmem>>, %arg7: memref<1x128xf32, #tpu.memory_space<vmem>>, %arg8: memref<128x128xbf16, #tpu.memory_space<vmem>>, %arg9: memref<1x128xf32, #tpu.memory_space<vmem>>, %arg10: memref<128x128xbf16, #tpu.memory_space<vmem>>, %arg11: memref<1x128xf32, #tpu.memory_space<vmem>>, %arg12: memref<1x128xf32, #tpu.memory_space<vmem>>, %arg13: memref<2x16x16x128xf32, #tpu.memory_space<vmem>>, %arg14: memref<2x18x18x128xf32, #tpu.memory_space<vmem>>) attributes {dimension_semantics = [#tpu.dimension_semantics<parallel>], iteration_bounds = array<i64: 2>, scalar_prefetch = 0 : i64, scratch_operands = 1 : i64, tpu.core_type = #tpu.core_type<tc>, window_params = [{transform_indices = @transform_0, window_bounds = array<i64: 2, 16, 16, 128>}, {pipeline_mode = #tpu.pipeline_mode<synchronous>, transform_indices = @transform_1, window_bounds = array<i64: 128, 256>}, {pipeline_mode = #tpu.pipeline_mode<synchronous>, transform_indices = @transform_2, window_bounds = array<i64: 1, 128>}, {pipeline_mode = #tpu.pipeline_mode<synchronous>, transform_indices = @transform_3, window_bounds = array<i64: 9, 1, 128>}, {pipeline_mode = #tpu.pipeline_mode<synchronous>, transform_indices = @transform_4, window_bounds = array<i64: 1, 128>}, {pipeline_mode = #tpu.pipeline_mode<synchronous>, transform_indices = @transform_5, window_bounds = array<i64: 128, 128>}, {pipeline_mode = #tpu.pipeline_mode<synchronous>, transform_indices = @transform_6, window_bounds = array<i64: 1, 128>}, {pipeline_mode = #tpu.pipeline_mode<synchronous>, transform_indices = @transform_7, window_bounds = array<i64: 128, 128>}, {pipeline_mode = #tpu.pipeline_mode<synchronous>, transform_indices = @transform_8, window_bounds = array<i64: 1, 128>}, {pipeline_mode = #tpu.pipeline_mode<synchronous>, transform_indices = @transform_9, window_bounds = array<i64: 128, 128>}, {pipeline_mode = #tpu.pipeline_mode<synchronous>, transform_indices = @transform_10, window_bounds = array<i64: 1, 128>}, {pipeline_mode = #tpu.pipeline_mode<synchronous>, transform_indices = @transform_11, window_bounds = array<i64: 1, 128>}, {transform_indices = @transform_12, window_bounds = array<i64: 2, 16, 16, 128>}]} {
    %c0 = arith.constant 0 : index
    %c0_0 = arith.constant 0 : index
    %c0_1 = arith.constant 0 : index
    %c0_2 = arith.constant 0 : index
    %0 = vector.load %arg1[%c0, %c0_0, %c0_1, %c0_2] : memref<2x16x16x128xf32, #tpu.memory_space<vmem>>, vector<2x16x16x128xf32>
    %1 = vector.shape_cast %0 : vector<2x16x16x128xf32> to vector<512x128xf32>
    %2 = arith.truncf %1 : vector<512x128xf32> to vector<512x128xbf16>
    %c0_3 = arith.constant 0 : index
    %c0_4 = arith.constant 0 : index
    %3 = vector.load %arg2[%c0_3, %c0_4] : memref<128x256xbf16, #tpu.memory_space<vmem>>, vector<128x256xbf16>
    %cst = arith.constant dense<0.000000e+00> : vector<512x256xf32>
    %4 = tpu.matmul %2, %3, %cst {dimension_numbers = #tpu.dot_dimension_numbers<[1], [0], [0], [1], [0, 0, 1, 1], [], []>} : vector<512x128xbf16>, vector<128x256xbf16>, vector<512x256xf32> -> vector<512x256xf32>
    %5 = vector.extract_strided_slice %4 {offsets = [0, 0], sizes = [512, 128], strides = [1, 1]} : vector<512x256xf32> to vector<512x128xf32>
    %c0_5 = arith.constant 0 : index
    %c0_6 = arith.constant 0 : index
    %6 = vector.load %arg3[%c0_5, %c0_6] : memref<1x128xf32, #tpu.memory_space<vmem>>, vector<1x128xf32>
    %7 = vector.broadcast %6 : vector<1x128xf32> to vector<512x128xf32>
    %8 = arith.addf %5, %7 : vector<512x128xf32>
    %9 = vector.extract_strided_slice %4 {offsets = [0, 128], sizes = [512, 128], strides = [1, 1]} : vector<512x256xf32> to vector<512x128xf32>
    %c0_7 = arith.constant 0 : index
    %c0_8 = arith.constant 0 : index
    %10 = vector.load %arg12[%c0_7, %c0_8] : memref<1x128xf32, #tpu.memory_space<vmem>>, vector<1x128xf32>
    %11 = vector.broadcast %10 : vector<1x128xf32> to vector<512x128xf32>
    %12 = arith.addf %9, %11 : vector<512x128xf32>
    %cst_9 = arith.constant 3.000000e+00 : f32
    %13 = vector.broadcast %cst_9 : f32 to vector<512x128xf32>
    %14 = arith.addf %8, %13 : vector<512x128xf32>
    %cst_10 = arith.constant 0.000000e+00 : f32
    %cst_11 = arith.constant 6.000000e+00 : f32
    %15 = vector.broadcast %cst_10 : f32 to vector<512x128xf32>
    %16 = arith.maximumf %15, %14 : vector<512x128xf32>
    %17 = vector.broadcast %cst_11 : f32 to vector<512x128xf32>
    %18 = arith.minimumf %17, %16 : vector<512x128xf32>
    %19 = arith.mulf %8, %18 : vector<512x128xf32>
    %cst_12 = arith.constant 0.166666672 : f32
    %20 = vector.broadcast %cst_12 : f32 to vector<512x128xf32>
    %21 = arith.mulf %19, %20 : vector<512x128xf32>
    %cst_13 = arith.constant 0.000000e+00 : f32
    %22 = vector.broadcast %cst_13 : f32 to vector<2x1x18x128xf32>
    %c0_14 = arith.constant 0 : index
    %c0_15 = arith.constant 0 : index
    %c0_16 = arith.constant 0 : index
    %c0_17 = arith.constant 0 : index
    %23 = vector.load %arg14[%c0_14, %c0_15, %c0_16, %c0_17] : memref<2x18x18x128xf32, #tpu.memory_space<vmem>>, vector<2x1x18x128xf32>
    tpu.vector_store %arg14[%c0_14, %c0_15, %c0_16, %c0_17], %22 {strides = array<i32>} : memref<2x18x18x128xf32, #tpu.memory_space<vmem>>, vector<2x1x18x128xf32>,
    %c0_18 = arith.constant 0 : index
    %c17 = arith.constant 17 : index
    %c0_19 = arith.constant 0 : index
    %c0_20 = arith.constant 0 : index
    %24 = vector.load %arg14[%c0_18, %c17, %c0_19, %c0_20] : memref<2x18x18x128xf32, #tpu.memory_space<vmem>>, vector<2x1x18x128xf32>
    tpu.vector_store %arg14[%c0_18, %c17, %c0_19, %c0_20], %22 {strides = array<i32>} : memref<2x18x18x128xf32, #tpu.memory_space<vmem>>, vector<2x1x18x128xf32>,
    %cst_21 = arith.constant 0.000000e+00 : f32
    %25 = vector.broadcast %cst_21 : f32 to vector<2x16x1x128xf32>
    %c0_22 = arith.constant 0 : index
    %c1 = arith.constant 1 : index
    %c0_23 = arith.constant 0 : index
    %c0_24 = arith.constant 0 : index
    %26 = vector.load %arg14[%c0_22, %c1, %c0_23, %c0_24] : memref<2x18x18x128xf32, #tpu.memory_space<vmem>>, vector<2x16x1x128xf32>
    tpu.vector_store %arg14[%c0_22, %c1, %c0_23, %c0_24], %25 {strides = array<i32>} : memref<2x18x18x128xf32, #tpu.memory_space<vmem>>, vector<2x16x1x128xf32>,
    %c0_25 = arith.constant 0 : index
    %c1_26 = arith.constant 1 : index
    %c17_27 = arith.constant 17 : index
    %c0_28 = arith.constant 0 : index
    %27 = vector.load %arg14[%c0_25, %c1_26, %c17_27, %c0_28] : memref<2x18x18x128xf32, #tpu.memory_space<vmem>>, vector<2x16x1x128xf32>
    tpu.vector_store %arg14[%c0_25, %c1_26, %c17_27, %c0_28], %25 {strides = array<i32>} : memref<2x18x18x128xf32, #tpu.memory_space<vmem>>, vector<2x16x1x128xf32>,
    %28 = vector.shape_cast %21 : vector<512x128xf32> to vector<2x16x16x128xf32>
    %c0_29 = arith.constant 0 : index
    %c1_30 = arith.constant 1 : index
    %c1_31 = arith.constant 1 : index
    %c0_32 = arith.constant 0 : index
    %29 = vector.load %arg14[%c0_29, %c1_30, %c1_31, %c0_32] : memref<2x18x18x128xf32, #tpu.memory_space<vmem>>, vector<2x16x16x128xf32>
    tpu.vector_store %arg14[%c0_29, %c1_30, %c1_31, %c0_32], %28 {strides = array<i32>} : memref<2x18x18x128xf32, #tpu.memory_space<vmem>>, vector<2x16x16x128xf32>,
    %c0_33 = arith.constant 0 : index
    %c0_34 = arith.constant 0 : index
    %c0_35 = arith.constant 0 : index
    %c0_36 = arith.constant 0 : index
    %30 = vector.load %arg14[%c0_33, %c0_34, %c0_35, %c0_36] : memref<2x18x18x128xf32, #tpu.memory_space<vmem>>, vector<2x16x16x128xf32>
    %c0_37 = arith.constant 0 : index
    %c0_38 = arith.constant 0 : index
    %c0_39 = arith.constant 0 : index
    %31 = vector.load %arg4[%c0_37, %c0_38, %c0_39] : memref<9x1x128xf32, #tpu.memory_space<vmem>>, vector<1x1x128xf32>
    %32 = vector.shape_cast %31 : vector<1x1x128xf32> to vector<1x128xf32>
    %33 = vector.shape_cast %32 : vector<1x128xf32> to vector<1x1x1x128xf32>
    %34 = vector.broadcast %33 : vector<1x1x1x128xf32> to vector<2x16x16x128xf32>
    %35 = arith.mulf %30, %34 : vector<2x16x16x128xf32>
    %c0_40 = arith.constant 0 : index
    %c0_41 = arith.constant 0 : index
    %c1_42 = arith.constant 1 : index
    %c0_43 = arith.constant 0 : index
    %36 = vector.load %arg14[%c0_40, %c0_41, %c1_42, %c0_43] : memref<2x18x18x128xf32, #tpu.memory_space<vmem>>, vector<2x16x16x128xf32>
    %c1_44 = arith.constant 1 : index
    %c0_45 = arith.constant 0 : index
    %c0_46 = arith.constant 0 : index
    %37 = vector.load %arg4[%c1_44, %c0_45, %c0_46] : memref<9x1x128xf32, #tpu.memory_space<vmem>>, vector<1x1x128xf32>
    %38 = vector.shape_cast %37 : vector<1x1x128xf32> to vector<1x128xf32>
    %39 = vector.shape_cast %38 : vector<1x128xf32> to vector<1x1x1x128xf32>
    %40 = vector.broadcast %39 : vector<1x1x1x128xf32> to vector<2x16x16x128xf32>
    %41 = arith.mulf %36, %40 : vector<2x16x16x128xf32>
    %42 = arith.addf %35, %41 : vector<2x16x16x128xf32>
    %c0_47 = arith.constant 0 : index
    %c0_48 = arith.constant 0 : index
    %c2 = arith.constant 2 : index
    %c0_49 = arith.constant 0 : index
    %43 = vector.load %arg14[%c0_47, %c0_48, %c2, %c0_49] : memref<2x18x18x128xf32, #tpu.memory_space<vmem>>, vector<2x16x16x128xf32>
    %c2_50 = arith.constant 2 : index
    %c0_51 = arith.constant 0 : index
    %c0_52 = arith.constant 0 : index
    %44 = vector.load %arg4[%c2_50, %c0_51, %c0_52] : memref<9x1x128xf32, #tpu.memory_space<vmem>>, vector<1x1x128xf32>
    %45 = vector.shape_cast %44 : vector<1x1x128xf32> to vector<1x128xf32>
    %46 = vector.shape_cast %45 : vector<1x128xf32> to vector<1x1x1x128xf32>
    %47 = vector.broadcast %46 : vector<1x1x1x128xf32> to vector<2x16x16x128xf32>
    %48 = arith.mulf %43, %47 : vector<2x16x16x128xf32>
    %49 = arith.addf %42, %48 : vector<2x16x16x128xf32>
    %c0_53 = arith.constant 0 : index
    %c1_54 = arith.constant 1 : index
    %c0_55 = arith.constant 0 : index
    %c0_56 = arith.constant 0 : index
    %50 = vector.load %arg14[%c0_53, %c1_54, %c0_55, %c0_56] : memref<2x18x18x128xf32, #tpu.memory_space<vmem>>, vector<2x16x16x128xf32>
    %c3 = arith.constant 3 : index
    %c0_57 = arith.constant 0 : index
    %c0_58 = arith.constant 0 : index
    %51 = vector.load %arg4[%c3, %c0_57, %c0_58] : memref<9x1x128xf32, #tpu.memory_space<vmem>>, vector<1x1x128xf32>
    %52 = vector.shape_cast %51 : vector<1x1x128xf32> to vector<1x128xf32>
    %53 = vector.shape_cast %52 : vector<1x128xf32> to vector<1x1x1x128xf32>
    %54 = vector.broadcast %53 : vector<1x1x1x128xf32> to vector<2x16x16x128xf32>
    %55 = arith.mulf %50, %54 : vector<2x16x16x128xf32>
    %56 = arith.addf %49, %55 : vector<2x16x16x128xf32>
    %c0_59 = arith.constant 0 : index
    %c1_60 = arith.constant 1 : index
    %c1_61 = arith.constant 1 : index
    %c0_62 = arith.constant 0 : index
    %57 = vector.load %arg14[%c0_59, %c1_60, %c1_61, %c0_62] : memref<2x18x18x128xf32, #tpu.memory_space<vmem>>, vector<2x16x16x128xf32>
    %c4 = arith.constant 4 : index
    %c0_63 = arith.constant 0 : index
    %c0_64 = arith.constant 0 : index
    %58 = vector.load %arg4[%c4, %c0_63, %c0_64] : memref<9x1x128xf32, #tpu.memory_space<vmem>>, vector<1x1x128xf32>
    %59 = vector.shape_cast %58 : vector<1x1x128xf32> to vector<1x128xf32>
    %60 = vector.shape_cast %59 : vector<1x128xf32> to vector<1x1x1x128xf32>
    %61 = vector.broadcast %60 : vector<1x1x1x128xf32> to vector<2x16x16x128xf32>
    %62 = arith.mulf %57, %61 : vector<2x16x16x128xf32>
    %63 = arith.addf %56, %62 : vector<2x16x16x128xf32>
    %c0_65 = arith.constant 0 : index
    %c1_66 = arith.constant 1 : index
    %c2_67 = arith.constant 2 : index
    %c0_68 = arith.constant 0 : index
    %64 = vector.load %arg14[%c0_65, %c1_66, %c2_67, %c0_68] : memref<2x18x18x128xf32, #tpu.memory_space<vmem>>, vector<2x16x16x128xf32>
    %c5 = arith.constant 5 : index
    %c0_69 = arith.constant 0 : index
    %c0_70 = arith.constant 0 : index
    %65 = vector.load %arg4[%c5, %c0_69, %c0_70] : memref<9x1x128xf32, #tpu.memory_space<vmem>>, vector<1x1x128xf32>
    %66 = vector.shape_cast %65 : vector<1x1x128xf32> to vector<1x128xf32>
    %67 = vector.shape_cast %66 : vector<1x128xf32> to vector<1x1x1x128xf32>
    %68 = vector.broadcast %67 : vector<1x1x1x128xf32> to vector<2x16x16x128xf32>
    %69 = arith.mulf %64, %68 : vector<2x16x16x128xf32>
    %70 = arith.addf %63, %69 : vector<2x16x16x128xf32>
    %c0_71 = arith.constant 0 : index
    %c2_72 = arith.constant 2 : index
    %c0_73 = arith.constant 0 : index
    %c0_74 = arith.constant 0 : index
    %71 = vector.load %arg14[%c0_71, %c2_72, %c0_73, %c0_74] : memref<2x18x18x128xf32, #tpu.memory_space<vmem>>, vector<2x16x16x128xf32>
    %c6 = arith.constant 6 : index
    %c0_75 = arith.constant 0 : index
    %c0_76 = arith.constant 0 : index
    %72 = vector.load %arg4[%c6, %c0_75, %c0_76] : memref<9x1x128xf32, #tpu.memory_space<vmem>>, vector<1x1x128xf32>
    %73 = vector.shape_cast %72 : vector<1x1x128xf32> to vector<1x128xf32>
    %74 = vector.shape_cast %73 : vector<1x128xf32> to vector<1x1x1x128xf32>
    %75 = vector.broadcast %74 : vector<1x1x1x128xf32> to vector<2x16x16x128xf32>
    %76 = arith.mulf %71, %75 : vector<2x16x16x128xf32>
    %77 = arith.addf %70, %76 : vector<2x16x16x128xf32>
    %c0_77 = arith.constant 0 : index
    %c2_78 = arith.constant 2 : index
    %c1_79 = arith.constant 1 : index
    %c0_80 = arith.constant 0 : index
    %78 = vector.load %arg14[%c0_77, %c2_78, %c1_79, %c0_80] : memref<2x18x18x128xf32, #tpu.memory_space<vmem>>, vector<2x16x16x128xf32>
    %c7 = arith.constant 7 : index
    %c0_81 = arith.constant 0 : index
    %c0_82 = arith.constant 0 : index
    %79 = vector.load %arg4[%c7, %c0_81, %c0_82] : memref<9x1x128xf32, #tpu.memory_space<vmem>>, vector<1x1x128xf32>
    %80 = vector.shape_cast %79 : vector<1x1x128xf32> to vector<1x128xf32>
    %81 = vector.shape_cast %80 : vector<1x128xf32> to vector<1x1x1x128xf32>
    %82 = vector.broadcast %81 : vector<1x1x1x128xf32> to vector<2x16x16x128xf32>
    %83 = arith.mulf %78, %82 : vector<2x16x16x128xf32>
    %84 = arith.addf %77, %83 : vector<2x16x16x128xf32>
    %c0_83 = arith.constant 0 : index
    %c2_84 = arith.constant 2 : index
    %c2_85 = arith.constant 2 : index
    %c0_86 = arith.constant 0 : index
    %85 = vector.load %arg14[%c0_83, %c2_84, %c2_85, %c0_86] : memref<2x18x18x128xf32, #tpu.memory_space<vmem>>, vector<2x16x16x128xf32>
    %c8 = arith.constant 8 : index
    %c0_87 = arith.constant 0 : index
    %c0_88 = arith.constant 0 : index
    %86 = vector.load %arg4[%c8, %c0_87, %c0_88] : memref<9x1x128xf32, #tpu.memory_space<vmem>>, vector<1x1x128xf32>
    %87 = vector.shape_cast %86 : vector<1x1x128xf32> to vector<1x128xf32>
    %88 = vector.shape_cast %87 : vector<1x128xf32> to vector<1x1x1x128xf32>
    %89 = vector.broadcast %88 : vector<1x1x1x128xf32> to vector<2x16x16x128xf32>
    %90 = arith.mulf %85, %89 : vector<2x16x16x128xf32>
    %91 = arith.addf %84, %90 : vector<2x16x16x128xf32>
    %c0_89 = arith.constant 0 : index
    %c0_90 = arith.constant 0 : index
    %92 = vector.load %arg5[%c0_89, %c0_90] : memref<1x128xf32, #tpu.memory_space<vmem>>, vector<1x128xf32>
    %93 = vector.shape_cast %92 : vector<1x128xf32> to vector<1x1x1x128xf32>
    %94 = vector.broadcast %93 : vector<1x1x1x128xf32> to vector<2x16x16x128xf32>
    %95 = arith.addf %91, %94 : vector<2x16x16x128xf32>
    %96 = vector.shape_cast %95 : vector<2x16x16x128xf32> to vector<2x256x128xf32>
    %cst_91 = arith.constant dense<0.000000e+00> : vector<2x128xf32>
    %97 = vector.multi_reduction <add>, %96, %cst_91 [1] : vector<2x256x128xf32> to vector<2x128xf32>
    %cst_92 = arith.constant 2.560000e+02 : f32
    %98 = vector.broadcast %cst_92 : f32 to vector<2x128xf32>
    %99 = arith.divf %97, %98 : vector<2x128xf32>
    %100 = arith.truncf %99 : vector<2x128xf32> to vector<2x128xbf16>
    %c0_93 = arith.constant 0 : index
    %c0_94 = arith.constant 0 : index
    %101 = vector.load %arg6[%c0_93, %c0_94] : memref<128x128xbf16, #tpu.memory_space<vmem>>, vector<128x128xbf16>
    %cst_95 = arith.constant dense<0.000000e+00> : vector<2x128xf32>
    %102 = tpu.matmul %100, %101, %cst_95 {dimension_numbers = #tpu.dot_dimension_numbers<[1], [0], [0], [1], [0, 0, 1, 1], [], []>} : vector<2x128xbf16>, vector<128x128xbf16>, vector<2x128xf32> -> vector<2x128xf32>
    %c0_96 = arith.constant 0 : index
    %c0_97 = arith.constant 0 : index
    %103 = vector.load %arg7[%c0_96, %c0_97] : memref<1x128xf32, #tpu.memory_space<vmem>>, vector<1x128xf32>
    %104 = vector.broadcast %103 : vector<1x128xf32> to vector<2x128xf32>
    %105 = arith.addf %102, %104 : vector<2x128xf32>
    %cst_98 = arith.constant 0.000000e+00 : f32
    %106 = vector.broadcast %cst_98 : f32 to vector<2x128xf32>
    %107 = arith.maximumf %105, %106 : vector<2x128xf32>
    %108 = arith.truncf %107 : vector<2x128xf32> to vector<2x128xbf16>
    %c0_99 = arith.constant 0 : index
    %c0_100 = arith.constant 0 : index
    %109 = vector.load %arg8[%c0_99, %c0_100] : memref<128x128xbf16, #tpu.memory_space<vmem>>, vector<128x128xbf16>
    %cst_101 = arith.constant dense<0.000000e+00> : vector<2x128xf32>
    %110 = tpu.matmul %108, %109, %cst_101 {dimension_numbers = #tpu.dot_dimension_numbers<[1], [0], [0], [1], [0, 0, 1, 1], [], []>} : vector<2x128xbf16>, vector<128x128xbf16>, vector<2x128xf32> -> vector<2x128xf32>
    %c0_102 = arith.constant 0 : index
    %c0_103 = arith.constant 0 : index
    %111 = vector.load %arg9[%c0_102, %c0_103] : memref<1x128xf32, #tpu.memory_space<vmem>>, vector<1x128xf32>
    %112 = vector.broadcast %111 : vector<1x128xf32> to vector<2x128xf32>
    %113 = arith.addf %110, %112 : vector<2x128xf32>
    %cst_104 = arith.constant 3.000000e+00 : f32
    %114 = vector.broadcast %cst_104 : f32 to vector<2x128xf32>
    %115 = arith.addf %113, %114 : vector<2x128xf32>
    %cst_105 = arith.constant 0.000000e+00 : f32
    %cst_106 = arith.constant 6.000000e+00 : f32
    %116 = vector.broadcast %cst_105 : f32 to vector<2x128xf32>
    %117 = arith.maximumf %116, %115 : vector<2x128xf32>
    %118 = vector.broadcast %cst_106 : f32 to vector<2x128xf32>
    %119 = arith.minimumf %118, %117 : vector<2x128xf32>
    %cst_107 = arith.constant 0.166666672 : f32
    %120 = vector.broadcast %cst_107 : f32 to vector<2x128xf32>
    %121 = arith.mulf %119, %120 : vector<2x128xf32>
    %122 = vector.shape_cast %121 : vector<2x128xf32> to vector<2x1x128xf32>
    %123 = vector.broadcast %122 : vector<2x1x128xf32> to vector<2x256x128xf32>
    %124 = arith.mulf %96, %123 : vector<2x256x128xf32>
    %cst_108 = arith.constant 3.000000e+00 : f32
    %125 = vector.broadcast %cst_108 : f32 to vector<2x256x128xf32>
    %126 = arith.addf %124, %125 : vector<2x256x128xf32>
    %cst_109 = arith.constant 0.000000e+00 : f32
    %cst_110 = arith.constant 6.000000e+00 : f32
    %127 = vector.broadcast %cst_109 : f32 to vector<2x256x128xf32>
    %128 = arith.maximumf %127, %126 : vector<2x256x128xf32>
    %129 = vector.broadcast %cst_110 : f32 to vector<2x256x128xf32>
    %130 = arith.minimumf %129, %128 : vector<2x256x128xf32>
    %131 = arith.mulf %124, %130 : vector<2x256x128xf32>
    %cst_111 = arith.constant 0.166666672 : f32
    %132 = vector.broadcast %cst_111 : f32 to vector<2x256x128xf32>
    %133 = arith.mulf %131, %132 : vector<2x256x128xf32>
    %134 = vector.shape_cast %133 : vector<2x256x128xf32> to vector<512x128xf32>
    %135 = arith.truncf %134 : vector<512x128xf32> to vector<512x128xbf16>
    %c0_112 = arith.constant 0 : index
    %c0_113 = arith.constant 0 : index
    %136 = vector.load %arg10[%c0_112, %c0_113] : memref<128x128xbf16, #tpu.memory_space<vmem>>, vector<128x128xbf16>
    %cst_114 = arith.constant dense<0.000000e+00> : vector<512x128xf32>
    %137 = tpu.matmul %135, %136, %cst_114 {dimension_numbers = #tpu.dot_dimension_numbers<[1], [0], [0], [1], [0, 0, 1, 1], [], []>} : vector<512x128xbf16>, vector<128x128xbf16>, vector<512x128xf32> -> vector<512x128xf32>
    %c0_115 = arith.constant 0 : index
    %c0_116 = arith.constant 0 : index
    %138 = vector.load %arg11[%c0_115, %c0_116] : memref<1x128xf32, #tpu.memory_space<vmem>>, vector<1x128xf32>
    %139 = vector.broadcast %138 : vector<1x128xf32> to vector<512x128xf32>
    %140 = arith.addf %137, %139 : vector<512x128xf32>
    %141 = arith.addf %140, %12 : vector<512x128xf32>
    %142 = vector.shape_cast %141 : vector<512x128xf32> to vector<2x16x16x128xf32>
    %c0_117 = arith.constant 0 : index
    %c0_118 = arith.constant 0 : index
    %c0_119 = arith.constant 0 : index
    %c0_120 = arith.constant 0 : index
    %143 = vector.load %arg13[%c0_117, %c0_118, %c0_119, %c0_120] : memref<2x16x16x128xf32, #tpu.memory_space<vmem>>, vector<2x16x16x128xf32>
    tpu.vector_store %arg13[%c0_117, %c0_118, %c0_119, %c0_120], %142 {strides = array<i32>} : memref<2x16x16x128xf32, #tpu.memory_space<vmem>>, vector<2x16x16x128xf32>,
    return
  }
  func.func @transform_0(%arg0: i32) -> (i32, i32, i32, i32) {
    %c0_i32 = arith.constant 0 : i32
    %c0_i32_0 = arith.constant 0 : i32
    %c0_i32_1 = arith.constant 0 : i32
    %c0_i32_2 = arith.constant 0 : i32
    return %arg0, %c0_i32, %c0_i32_0, %c0_i32_1 : i32, i32, i32, i32
  }
  func.func @transform_1(%arg0: i32) -> (i32, i32) {
    %c0_i32 = arith.constant 0 : i32
    %c0_i32_0 = arith.constant 0 : i32
    %c0_i32_1 = arith.constant 0 : i32
    return %c0_i32, %c0_i32_0 : i32, i32
  }
  func.func @transform_2(%arg0: i32) -> (i32, i32) {
    %c0_i32 = arith.constant 0 : i32
    %c0_i32_0 = arith.constant 0 : i32
    %c0_i32_1 = arith.constant 0 : i32
    return %c0_i32, %c0_i32_0 : i32, i32
  }
  func.func @transform_3(%arg0: i32) -> (i32, i32, i32) {
    %c0_i32 = arith.constant 0 : i32
    %c0_i32_0 = arith.constant 0 : i32
    %c0_i32_1 = arith.constant 0 : i32
    %c0_i32_2 = arith.constant 0 : i32
    return %c0_i32, %c0_i32_0, %c0_i32_1 : i32, i32, i32
  }
  func.func @transform_4(%arg0: i32) -> (i32, i32) {
    %c0_i32 = arith.constant 0 : i32
    %c0_i32_0 = arith.constant 0 : i32
    %c0_i32_1 = arith.constant 0 : i32
    return %c0_i32, %c0_i32_0 : i32, i32
  }
  func.func @transform_5(%arg0: i32) -> (i32, i32) {
    %c0_i32 = arith.constant 0 : i32
    %c0_i32_0 = arith.constant 0 : i32
    %c0_i32_1 = arith.constant 0 : i32
    return %c0_i32, %c0_i32_0 : i32, i32
  }
  func.func @transform_6(%arg0: i32) -> (i32, i32) {
    %c0_i32 = arith.constant 0 : i32
    %c0_i32_0 = arith.constant 0 : i32
    %c0_i32_1 = arith.constant 0 : i32
    return %c0_i32, %c0_i32_0 : i32, i32
  }
  func.func @transform_7(%arg0: i32) -> (i32, i32) {
    %c0_i32 = arith.constant 0 : i32
    %c0_i32_0 = arith.constant 0 : i32
    %c0_i32_1 = arith.constant 0 : i32
    return %c0_i32, %c0_i32_0 : i32, i32
  }
  func.func @transform_8(%arg0: i32) -> (i32, i32) {
    %c0_i32 = arith.constant 0 : i32
    %c0_i32_0 = arith.constant 0 : i32
    %c0_i32_1 = arith.constant 0 : i32
    return %c0_i32, %c0_i32_0 : i32, i32
  }
  func.func @transform_9(%arg0: i32) -> (i32, i32) {
    %c0_i32 = arith.constant 0 : i32
    %c0_i32_0 = arith.constant 0 : i32
    %c0_i32_1 = arith.constant 0 : i32
    return %c0_i32, %c0_i32_0 : i32, i32
  }
  func.func @transform_10(%arg0: i32) -> (i32, i32) {
    %c0_i32 = arith.constant 0 : i32
    %c0_i32_0 = arith.constant 0 : i32
    %c0_i32_1 = arith.constant 0 : i32
    return %c0_i32, %c0_i32_0 : i32, i32
  }
  func.func @transform_11(%arg0: i32) -> (i32, i32) {
    %c0_i32 = arith.constant 0 : i32
    %c0_i32_0 = arith.constant 0 : i32
    %c0_i32_1 = arith.constant 0 : i32
    return %c0_i32, %c0_i32_0 : i32, i32
  }
  func.func @transform_12(%arg0: i32) -> (i32, i32, i32, i32) {
    %c0_i32 = arith.constant 0 : i32
    %c0_i32_0 = arith.constant 0 : i32
    %c0_i32_1 = arith.constant 0 : i32
    %c0_i32_2 = arith.constant 0 : i32
    return %arg0, %c0_i32, %c0_i32_0, %c0_i32_1 : i32, i32, i32, i32
  }
}

</mosaic_0001>

<bundles_post_ra>
// kernel: tpu_custom_call.1
= control target key start
LH: loop header
LB: loop body
LE: loop exit
PB: predicated region body
PF: predicated region fallthrough
CT: control target
= control target key end

     0   :  { %s9526_s0 = inlined_call_operand.hbm [shape: f32[4,16,16,128], index: 0, kind: input, shape index: {}]   ;;  %s9527_s1 = inlined_call_operand.hbm [shape: bf16[128,256], index: 1, kind: input, shape index: {}]   ;;  %s9528_s2 = inlined_call_operand.hbm [shape: f32[1,128], index: 2, kind: input, shape index: {}]   ;;  %s9529_s3 = inlined_call_operand.hbm [shape: f32[9,1,128], index: 3, kind: input, shape index: {}]   ;;  %s9530_s4 = inlined_call_operand.hbm [shape: f32[1,128], index: 4, kind: input, shape index: {}]   ;;  %s9531_s5 = inlined_call_operand.hbm [shape: bf16[128,128], index: 5, kind: input, shape index: {}]   ;;  %s9532_s6 = inlined_call_operand.hbm [shape: f32[1,128], index: 6, kind: input, shape index: {}]   ;;  %s9533_s7 = inlined_call_operand.hbm [shape: bf16[128,128], index: 7, kind: input, shape index: {}]   ;;  %s9534_s8 = inlined_call_operand.hbm [shape: f32[1,128], index: 8, kind: input, shape index: {}]   ;;  %s9535_s9 = inlined_call_operand.hbm [shape: bf16[128,128], index: 9, kind: input, shape index: {}]   ;;  %s9536_s10 = inlined_call_operand.hbm [shape: f32[1,128], index: 10, kind: input, shape index: {}]   ;;  %s9537_s11 = inlined_call_operand.hbm [shape: f32[1,128], index: 11, kind: input, shape index: {}]   ;;  %s9538_s12 = inlined_call_operand.hbm [shape: f32[4,16,16,128], index: 12, kind: output, shape index: {}]  }
   0x1   :  { %9602 = sst [smem:[#allocation173_spill]] %s9526_s0 }
   0x2   :  { %9603 = sst [smem:[#allocation174_spill]] %s9527_s1 }
   0x3   :  { %9604 = sst [smem:[#allocation175_spill]] %s9529_s3 }
   0x4   :  { %9605 = sst [smem:[#allocation176_spill]] %s9538_s12 }
   0x5   :  { %17 = vsyncpa [#allocation4], 0 }
   0x6   :  { %19 = vsyncpa [#allocation4 + $0x1], 0 }
   0x7   :  { %20 = vsyncpa [#allocation7], 0 }
   0x8   :  { %21 = vsyncpa [#allocation10], 0 }
   0x9   :  { %22 = vsyncpa [#allocation13], 0 }
   0xa   :  { %23 = vsyncpa [#allocation16], 0 }
   0xb   :  { %24 = vsyncpa [#allocation19], 0 }
   0xc   :  { %25 = vsyncpa [#allocation22], 0 }
   0xd   :  { %26 = vsyncpa [#allocation5], 0 }
   0xe   :  { %28 = vsyncpa [#allocation5 + $0x1], 0  ;;  %s6050_s21 = smov 0   ;;  %s6052_s22 = smov 0  }
   0xf   :  { %s6054_s23 = smov 0   ;;  %s6056_s24 = smov 0  }
  0x10 LB: > { %s5960_s25 = smov [#allocation6]   ;;  %s6071_s27 = sadd.s32 4294967295, %s5958_s24   ;;  %s5958_s24 = sphi %s6056_s24, %s9995_s24   ;;  %s5954_s23 = sphi %s6054_s23, %s9994_s23   ;;  %s5950_s22 = sphi %s6052_s22, %s9993_s22   ;;  %s5946_s21 = sphi %s6050_s21, %s9992_s21  }
  0x11   : > { %s334_s26 = sshll.u32 %s5960_s25, 4  ;;  %9606 = sst [smem:[#allocation32_spill]] %s6071_s27  ;;  %s6076_s26 = int_to_ptr.vmem [resolvable:$true] %s334_s26 }
  0x12   : > { %p4986_p0 = scmp.ge.s32.totalorder %s5958_s24, 1  ;;  %p9546_p1 = scmp.eq.s32.totalorder %s6071_s27, 0 }
  0x13   : > { %p322_p2 = scmp.lt.s32.totalorder %s5958_s24, 3  ;;  %s5961_s29 = smov [#allocation9]  }
  0x14   : > { %s358_s30 = sshll.u32 %s5961_s29, 4  ;;  %s5962_s14 = smov [#allocation12]   ;;  %s6091_s30 = int_to_ptr.vmem [resolvable:$true] %s358_s30 }
  0x15   : > { %p6078_p3 = pnand %p4986_p0, %p322_p2  ;;  %s6093_s15 = sshll.u32 %s5962_s14, 4  ;;  %s383_s15 = int_to_ptr.vmem [resolvable:$true] %s6093_s15 }
  0x16   : > { %s9610_s1 = sld [smem:[#allocation174_spill]] }
  0x17   : > { %s9607_s28 = scalar_select %p6078_p3, 1, 0 }
  0x18   : > { %p5324_p5 = pneg %p6078_p3 }
  0x19   : > { %9608 = sst [smem:[#allocation33_spill]] %s9607_s28 }
  0x1a   : > { %p6087_p6 = pnand %p5324_p5, %p9546_p1 }
  0x1c   : > { %s5530_s18 = scalar_lea.hbm %s9610_s1, 2048  ;;  %p6103_p8 = pneg %p6087_p6 }
  0x1d   : > { %p5531_p7 = scmp.ne.s32.totalorder %s9610_s1, %s5530_s18  ;;  %p5537_p11 = scmp.lt.u32.totalorder %s5530_s18, %s9610_s1 }
  0x1f   : > { %p5533_p9 = pnand %p6103_p8, %p5531_p7 }
  0x21   : > { %p5534_p10 = pneg %p5533_p9 }
  0x23   : > { %p5539_p12 = pnand %p5537_p11, %p5534_p10 }
  0x25   : > { %5542 = shalt.err (!%p5539_p12)
}
  0x26   : > { %s5543_s16 = scalar_lea.vmem %s6076_s26, 2048  ;;  %p5551_p5 = scmp.lt.s32.totalorder %s6076_s26, %s6076_s26 }
  0x27   : > { %p5544_p13 = scmp.ne.s32.totalorder %s6076_s26, %s5543_s16  ;;  %p5552_p4 = scmp.lt.s32.totalorder %s5543_s16, %s5543_s16 }
  0x29   : > { %p5546_p0 = pnand %p5544_p13, %p6103_p8  ;;  %p5553_p7 = por %p5552_p4, %p5551_p5 }
  0x2b   : > { %p5547_p2 = pneg %p5546_p0 }
  0x2d   : > { %p5554_p9 = pnand %p5553_p7, %p5547_p2 }
  0x2f   : > { %5557 = shalt.err (!%p5554_p9)
}
  0x30   : > { %s9545_s17 = smov 128   ;;  %s9548_s18 = smov 8  }
  0x31   : > { %5327 = dma.hbm_to_vmem [thread:$0]  (!%p6087_p6), %s9610_s1, 2048, %s6076_s26, [#allocation7], %s9545_s17, %s9545_s17, %s9548_s18  }
  0x32   : > { %s9612_s3 = sld [smem:[#allocation175_spill]] }
  0x38   : > { %s5558_s16 = scalar_lea.hbm %s9612_s3, 144 }
  0x39   : > { %p5559_p4 = scmp.ne.s32.totalorder %s9612_s3, %s5558_s16  ;;  %p5565_p12 = scmp.lt.u32.totalorder %s5558_s16, %s9612_s3 }
  0x3b   : > { %p5561_p10 = pnand %p5559_p4, %p6103_p8 }
  0x3d   : > { %p5562_p11 = pneg %p5561_p10 }
  0x3f   : > { %p5567_p13 = pnand %p5565_p12, %p5562_p11 }
  0x41   : > { %5570 = shalt.err (!%p5567_p13)
}
  0x42   : > { %s5571_s26 = scalar_lea.vmem %s6091_s30, 144  ;;  %s5578_s12 = scalar_lea.vmem %s6091_s30, 160 }
  0x43   : > { %p5572_p0 = scmp.ne.s32.totalorder %s6091_s30, %s5571_s26  ;;  %p5579_p7 = scmp.lt.s32.totalorder %s6091_s30, %s6091_s30 }
  0x44   : > { %p5580_p9 = scmp.lt.s32.totalorder %s5578_s12, %s5571_s26 }
  0x45   : > { %p5574_p2 = pnand %p5572_p0, %p6103_p8 }
  0x46   : > { %p5581_p4 = por %p5580_p9, %p5579_p7 }
  0x47   : > { %p5575_p5 = pneg %p5574_p2 }
  0x49   : > { %p5582_p10 = pnand %p5581_p4, %p5575_p5 }
  0x4b   : > { %5585 = shalt.err (!%p5582_p10)
}
  0x4c   : > { %s5965_s0 = smov 16   ;;  %s5966_s27 = smov 1  }
  0x4d   : > { %5333 = dma.hbm_to_vmem [thread:$0]  (!%p6087_p6), %s9612_s3, 144, %s6091_s30, [#allocation10], %s5965_s0, %s5965_s0, %s5966_s27  }
  0x4e   : > { %s5586_s14 = scalar_lea.hbm %s9531_s5, 1024 }
  0x4f   : > { %p5587_p11 = scmp.ne.s32.totalorder %s9531_s5, %s5586_s14  ;;  %p5593_p0 = scmp.lt.u32.totalorder %s5586_s14, %s9531_s5 }
  0x51   : > { %p5589_p12 = pnand %p5587_p11, %p6103_p8 }
  0x53   : > { %p5590_p13 = pneg %p5589_p12 }
  0x55   : > { %p5595_p2 = pnand %p5593_p0, %p5590_p13 }
  0x57   : > { %5598 = shalt.err (!%p5595_p2)
}
  0x58   : > { %s5599_s28 = scalar_lea.vmem %s383_s15, 1024  ;;  %p5607_p4 = scmp.lt.s32.totalorder %s383_s15, %s383_s15 }
  0x59   : > { %p5600_p5 = scmp.ne.s32.totalorder %s383_s15, %s5599_s28  ;;  %p5608_p10 = scmp.lt.s32.totalorder %s5599_s28, %s5599_s28 }
  0x5b   : > { %p5602_p7 = pnand %p5600_p5, %p6103_p8  ;;  %p5609_p1 = por %p5608_p10, %p5607_p4 }
  0x5d   : > { %p5603_p9 = pneg %p5602_p7 }
  0x5f   : > { %p5610_p3 = pnand %p5609_p1, %p5603_p9 }
  0x61   : > { %5613 = shalt.err (!%p5610_p3)
}
  0x62   : > { %s5967_s30 = smov 64   ;;  %s5968_s0 = smov 4  }
  0x63   : > { %5339 = dma.hbm_to_vmem [thread:$0]  (!%p6087_p6), %s9531_s5, 1024, %s383_s15, [#allocation13], %s5967_s30, %s5967_s30, %s5968_s0  }
  0x64   : > { %s5969_s19 = smov [#allocation15]   ;;  %s5970_s29 = smov [#allocation18]  }
  0x65   : > { %s406_s20 = sshll.u32 %s5969_s19, 4  ;;  %s430_s14 = sshll.u32 %s5970_s29, 4  ;;  %s407_s20 = int_to_ptr.vmem [resolvable:$true] %s406_s20  ;;  %s431_s14 = int_to_ptr.vmem [resolvable:$true] %s430_s14 }
  0x66   : > { %s5614_s12 = scalar_lea.hbm %s9533_s7, 1024 }
  0x67   : > { %p5615_p1 = scmp.ne.s32.totalorder %s9533_s7, %s5614_s12  ;;  %p5621_p12 = scmp.lt.u32.totalorder %s5614_s12, %s9533_s7 }
  0x69   : > { %p5617_p3 = pnand %p5615_p1, %p6103_p8 }
  0x6b   : > { %p5618_p11 = pneg %p5617_p3 }
  0x6d   : > { %p5623_p13 = pnand %p5621_p12, %p5618_p11 }
  0x6f   : > { %5626 = shalt.err (!%p5623_p13)
}
  0x70   : > { %s5627_s15 = scalar_lea.vmem %s407_s20, 1024  ;;  %p5635_p7 = scmp.lt.s32.totalorder %s407_s20, %s407_s20 }
  0x71   : > { %p5628_p0 = scmp.ne.s32.totalorder %s407_s20, %s5627_s15  ;;  %p5636_p9 = scmp.lt.s32.totalorder %s5627_s15, %s5627_s15 }
  0x73   : > { %p5630_p2 = pnand %p5628_p0, %p6103_p8  ;;  %p5637_p4 = por %p5636_p9, %p5635_p7 }
  0x75   : > { %p5631_p5 = pneg %p5630_p2 }
  0x77   : > { %p5638_p10 = pnand %p5637_p4, %p5631_p5 }
  0x79   : > { %5641 = shalt.err (!%p5638_p10)
}
  0x7a   : > { %5345 = dma.hbm_to_vmem [thread:$0]  (!%p6087_p6), %s9533_s7, 1024, %s407_s20, [#allocation16], %s5967_s30, %s5967_s30, %s5968_s0  }
  0x7b   : > { %s5642_s27 = scalar_lea.hbm %s9535_s9, 1024 }
  0x7c   : > { %p5643_p1 = scmp.ne.s32.totalorder %s9535_s9, %s5642_s27  ;;  %p5649_p12 = scmp.lt.u32.totalorder %s5642_s27, %s9535_s9 }
  0x7e   : > { %p5645_p3 = pnand %p5643_p1, %p6103_p8 }
  0x80   : > { %p5646_p11 = pneg %p5645_p3 }
  0x82   : > { %p5651_p13 = pnand %p5649_p12, %p5646_p11 }
  0x84   : > { %5654 = shalt.err (!%p5651_p13)
}
  0x85   : > { %s5655_s12 = scalar_lea.vmem %s431_s14, 1024  ;;  %p5663_p7 = scmp.lt.s32.totalorder %s431_s14, %s431_s14 }
  0x86   : > { %p5656_p0 = scmp.ne.s32.totalorder %s431_s14, %s5655_s12  ;;  %p5664_p9 = scmp.lt.s32.totalorder %s5655_s12, %s5655_s12 }
  0x88   : > { %p5658_p2 = pnand %p5656_p0, %p6103_p8  ;;  %p5665_p4 = por %p5664_p9, %p5663_p7 }
  0x8a   : > { %p5659_p5 = pneg %p5658_p2 }
  0x8c   : > { %p5666_p10 = pnand %p5665_p4, %p5659_p5 }
  0x8e   : > { %5669 = shalt.err (!%p5666_p10)
}
  0x8f   : > { %5351 = dma.hbm_to_vmem [thread:$0]  (!%p6087_p6), %s9535_s9, 1024, %s431_s14, [#allocation19], %s5967_s30, %s5967_s30, %s5968_s0  }
  0x90   : > { %s5971_s15 = smov [#allocation8]   ;;  %s5972_s3 = smov [#allocation11]  }
  0x91   : > { %s348_s1 = sshll.u32 %s5971_s15, 4  ;;  %s372_s18 = sshll.u32 %s5972_s3, 4  ;;  %s349_s1 = int_to_ptr.vmem [resolvable:$true] %s348_s1  ;;  %s373_s18 = int_to_ptr.vmem [resolvable:$true] %s372_s18 }
  0x92   : > { %s5670_s19 = scalar_lea.hbm %s9528_s2, 16 }
  0x93   : > { %p5671_p1 = scmp.ne.s32.totalorder %s9528_s2, %s5670_s19  ;;  %p5677_p12 = scmp.lt.u32.totalorder %s5670_s19, %s9528_s2 }
  0x95   : > { %p5673_p3 = pnand %p5671_p1, %p6103_p8 }
  0x97   : > { %p5674_p11 = pneg %p5673_p3 }
  0x99   : > { %p5679_p13 = pnand %p5677_p12, %p5674_p11 }
  0x9b   : > { %5682 = shalt.err (!%p5679_p13)
}
  0x9c   : > { %s5683_s30 = scalar_lea.vmem %s349_s1, 16  ;;  %s5690_s0 = scalar_lea.vmem %s349_s1, 32 }
  0x9d   : > { %p5684_p0 = scmp.ne.s32.totalorder %s349_s1, %s5683_s30  ;;  %p5691_p7 = scmp.lt.s32.totalorder %s349_s1, %s349_s1 }
  0x9e   : > { %p5692_p9 = scmp.lt.s32.totalorder %s5690_s0, %s5683_s30 }
  0x9f   : > { %p5686_p2 = pnand %p5684_p0, %p6103_p8 }
  0xa0   : > { %p5693_p4 = por %p5692_p9, %p5691_p7 }
  0xa1   : > { %p5687_p5 = pneg %p5686_p2 }
  0xa3   : > { %p5694_p10 = pnand %p5693_p4, %p5687_p5 }
  0xa5   : > { %5697 = shalt.err (!%p5694_p10)
}
  0xa6   : > { %5330 = dma.hbm_to_vmem [thread:$0]  (!%p6087_p6), %s9528_s2, 16, %s349_s1, [#allocation7]  }
  0xa7   : > { %s5698_s3 = scalar_lea.hbm %s9530_s4, 16 }
  0xa8   : > { %p5699_p1 = scmp.ne.s32.totalorder %s9530_s4, %s5698_s3  ;;  %p5705_p12 = scmp.lt.u32.totalorder %s5698_s3, %s9530_s4 }
  0xaa   : > { %p5701_p3 = pnand %p5699_p1, %p6103_p8 }
  0xac   : > { %p5702_p11 = pneg %p5701_p3 }
  0xae   : > { %p5707_p13 = pnand %p5705_p12, %p5702_p11 }
  0xb0   : > { %5710 = shalt.err (!%p5707_p13)
}
  0xb1   : > { %s5711_s16 = scalar_lea.vmem %s373_s18, 16  ;;  %s5718_s1 = scalar_lea.vmem %s373_s18, 32 }
  0xb2   : > { %p5712_p0 = scmp.ne.s32.totalorder %s373_s18, %s5711_s16  ;;  %p5719_p7 = scmp.lt.s32.totalorder %s373_s18, %s373_s18 }
  0xb3   : > { %p5720_p9 = scmp.lt.s32.totalorder %s5718_s1, %s5711_s16 }
  0xb4   : > { %p5714_p2 = pnand %p5712_p0, %p6103_p8 }
  0xb5   : > { %p5721_p4 = por %p5720_p9, %p5719_p7 }
  0xb6   : > { %p5715_p5 = pneg %p5714_p2 }
  0xb8   : > { %p5722_p10 = pnand %p5721_p4, %p5715_p5 }
  0xba   : > { %5725 = shalt.err (!%p5722_p10)
}
  0xbb   : > { %5336 = dma.hbm_to_vmem [thread:$0]  (!%p6087_p6), %s9530_s4, 16, %s373_s18, [#allocation10]  }
  0xbc   : > { %s5973_s30 = smov [#allocation14]   ;;  %s5974_s14 = smov [#allocation17]  }
  0xbd   : > { %s396_s0 = sshll.u32 %s5973_s30, 4  ;;  %s420_s20 = sshll.u32 %s5974_s14, 4  ;;  %s397_s0 = int_to_ptr.vmem [resolvable:$true] %s396_s0  ;;  %s421_s20 = int_to_ptr.vmem [resolvable:$true] %s420_s20 }
  0xbe   : > { %s5726_s3 = scalar_lea.hbm %s9532_s6, 16 }
  0xbf   : > { %p5727_p1 = scmp.ne.s32.totalorder %s9532_s6, %s5726_s3  ;;  %p5733_p12 = scmp.lt.u32.totalorder %s5726_s3, %s9532_s6 }
  0xc1   : > { %p5729_p3 = pnand %p5727_p1, %p6103_p8 }
  0xc3   : > { %p5730_p11 = pneg %p5729_p3 }
  0xc5   : > { %p5735_p13 = pnand %p5733_p12, %p5730_p11 }
  0xc7   : > { %5738 = shalt.err (!%p5735_p13)
}
  0xc8   : > { %s5739_s18 = scalar_lea.vmem %s397_s0, 16  ;;  %s5746_s16 = scalar_lea.vmem %s397_s0, 32 }
  0xc9   : > { %p5740_p0 = scmp.ne.s32.totalorder %s397_s0, %s5739_s18  ;;  %p5747_p7 = scmp.lt.s32.totalorder %s397_s0, %s397_s0 }
  0xca   : > { %p5748_p9 = scmp.lt.s32.totalorder %s5746_s16, %s5739_s18 }
  0xcb   : > { %p5742_p2 = pnand %p5740_p0, %p6103_p8 }
  0xcc   : > { %p5749_p4 = por %p5748_p9, %p5747_p7 }
  0xcd   : > { %p5743_p5 = pneg %p5742_p2 }
  0xcf   : > { %p5750_p10 = pnand %p5749_p4, %p5743_p5 }
  0xd1   : > { %5753 = shalt.err (!%p5750_p10)
}
  0xd2   : > { %5342 = dma.hbm_to_vmem [thread:$0]  (!%p6087_p6), %s9532_s6, 16, %s397_s0, [#allocation13]  }
  0xd3   : > { %s5754_s14 = scalar_lea.hbm %s9534_s8, 16 }
  0xd4   : > { %p5755_p1 = scmp.ne.s32.totalorder %s9534_s8, %s5754_s14  ;;  %p5761_p12 = scmp.lt.u32.totalorder %s5754_s14, %s9534_s8 }
  0xd6   : > { %p5757_p3 = pnand %p5755_p1, %p6103_p8 }
  0xd8   : > { %p5758_p11 = pneg %p5757_p3 }
  0xda   : > { %p5763_p13 = pnand %p5761_p12, %p5758_p11 }
  0xdc   : > { %5766 = shalt.err (!%p5763_p13)
}
  0xdd   : > { %s5767_s27 = scalar_lea.vmem %s421_s20, 16  ;;  %s5774_s0 = scalar_lea.vmem %s421_s20, 32 }
  0xde   : > { %p5768_p0 = scmp.ne.s32.totalorder %s421_s20, %s5767_s27  ;;  %p5775_p7 = scmp.lt.s32.totalorder %s421_s20, %s421_s20 }
  0xdf   : > { %p5776_p9 = scmp.lt.s32.totalorder %s5774_s0, %s5767_s27 }
  0xe0   : > { %p5770_p2 = pnand %p5768_p0, %p6103_p8 }
  0xe1   : > { %p5777_p4 = por %p5776_p9, %p5775_p7 }
  0xe2   : > { %p5771_p5 = pneg %p5770_p2 }
  0xe4   : > { %p5778_p10 = pnand %p5777_p4, %p5771_p5 }
  0xe6   : > { %5781 = shalt.err (!%p5778_p10)
}
  0xe7   : > { %5348 = dma.hbm_to_vmem [thread:$0]  (!%p6087_p6), %s9534_s8, 16, %s421_s20, [#allocation16]  }
  0xe8   : > { %s5975_s18 = smov [#allocation20]   ;;  %s5976_s1 = smov [#allocation21]  }
  0xe9   : > { %s444_s16 = sshll.u32 %s5975_s18, 4  ;;  %s455_s26 = sshll.u32 %s5976_s1, 4  ;;  %s445_s16 = int_to_ptr.vmem [resolvable:$true] %s444_s16  ;;  %s456_s26 = int_to_ptr.vmem [resolvable:$true] %s455_s26 }
  0xea   : > { %s5782_s14 = scalar_lea.hbm %s9536_s10, 16 }
  0xeb   : > { %p5783_p1 = scmp.ne.s32.totalorder %s9536_s10, %s5782_s14  ;;  %p5789_p12 = scmp.lt.u32.totalorder %s5782_s14, %s9536_s10 }
  0xed   : > { %p5785_p3 = pnand %p5783_p1, %p6103_p8 }
  0xef   : > { %p5786_p11 = pneg %p5785_p3 }
  0xf1   : > { %p5791_p13 = pnand %p5789_p12, %p5786_p11 }
  0xf3   : > { %5794 = shalt.err (!%p5791_p13)
}
  0xf4   : > { %s5795_s20 = scalar_lea.vmem %s445_s16, 16  ;;  %s5802_s27 = scalar_lea.vmem %s445_s16, 32 }
  0xf5   : > { %p5796_p0 = scmp.ne.s32.totalorder %s445_s16, %s5795_s20  ;;  %p5803_p7 = scmp.lt.s32.totalorder %s445_s16, %s445_s16 }
  0xf6   : > { %p5804_p9 = scmp.lt.s32.totalorder %s5802_s27, %s5795_s20 }
  0xf7   : > { %p5798_p2 = pnand %p5796_p0, %p6103_p8 }
  0xf8   : > { %p5805_p4 = por %p5804_p9, %p5803_p7 }
  0xf9   : > { %p5799_p5 = pneg %p5798_p2 }
  0xfb   : > { %p5806_p10 = pnand %p5805_p4, %p5799_p5 }
  0xfd   : > { %5809 = shalt.err (!%p5806_p10)
}
  0xfe   : > { %5354 = dma.hbm_to_vmem [thread:$0]  (!%p6087_p6), %s9536_s10, 16, %s445_s16, [#allocation19]  }
  0xff   : > { %s5810_s1 = scalar_lea.hbm %s9537_s11, 16 }
 0x100   : > { %p5811_p1 = scmp.ne.s32.totalorder %s9537_s11, %s5810_s1  ;;  %p5817_p12 = scmp.lt.u32.totalorder %s5810_s1, %s9537_s11 }
 0x102   : > { %p5813_p3 = pnand %p5811_p1, %p6103_p8 }
 0x104   : > { %p5814_p11 = pneg %p5813_p3 }
 0x106   : > { %p5819_p13 = pnand %p5817_p12, %p5814_p11 }
 0x108   : > { %5822 = shalt.err (!%p5819_p13)
}
 0x109   : > { %s5823_s15 = scalar_lea.vmem %s456_s26, 16  ;;  %s5830_s16 = scalar_lea.vmem %s456_s26, 32 }
 0x10a   : > { %p5824_p0 = scmp.ne.s32.totalorder %s456_s26, %s5823_s15  ;;  %p5831_p7 = scmp.lt.s32.totalorder %s456_s26, %s456_s26 }
 0x10b   : > { %p5832_p9 = scmp.lt.s32.totalorder %s5830_s16, %s5823_s15 }
 0x10c   : > { %p5826_p2 = pnand %p5824_p0, %p6103_p8 }
 0x10d   : > { %p5833_p4 = por %p5832_p9, %p5831_p7 }
 0x10e   : > { %p5827_p5 = pneg %p5826_p2 }
 0x110   : > { %p5834_p10 = pnand %p5833_p4, %p5827_p5 }
 0x112   : > { %5837 = shalt.err (!%p5834_p10)
}
 0x113   : > { %s9613_s25 = sld [smem:[#allocation32_spill]]  ;;  %s4985_s20 = sadd.s32 4294967294, %s5958_s24  }
 0x114   : > { %5357 = dma.hbm_to_vmem [thread:$0]  (!%p6087_p6), %s9537_s11, 16, %s456_s26, [#allocation22]  }
 0x115   : > { %s6325_s13 = sadd.s32 1, %s5958_s24   ;;  %s41_s27 = sadd.s32 1, %s5954_s23 }
 0x116   : > { %s38_s0 = ssub.s32 %s5958_s24, %s6325_s13  ;;  %p48_p8 = scmp.ne.s32.totalorder %s5954_s23, %s5950_s22 }
 0x117   : > { %p39_p1 = scmp.eq.s32.totalorder %s38_s0, 0  ;;  %p49_p3 = scmp.eq.s32.totalorder %s5958_s24, 0 }
 0x118   : > { %p54_p11 = scmp.ne.s32.totalorder %s5950_s22, %s5946_s21  ;;  %p315_p5 = scmp.eq.s32.totalorder %s4985_s20, 1 }
 0x119   : > { %p309_p12 = scmp.eq.s32.totalorder %s9613_s25, 1  ;;  %p50_p13 = por %p49_p3, %p48_p8 }
 0x11a   : > { %s6337_s19 = scalar_select %p39_p1, %s5954_s23, %s41_s27  }
 0x11b   : > { %p9614_p0 = scmp.eq.s32.totalorder %s9613_s25, 0  ;;  %p6345_p6 = por %p309_p12, %p48_p8 }
 0x11c   : > { %p5377_p7 = scmp.lt.s32.totalorder %s5958_s24, 2  ;;  %s466_s18 = sand.u32 1, %s5954_s23  }
 0x11d   : > { %p6341_p2 = por %p9614_p0, %p54_p11  ;;  %p6351_p9 = por %p315_p5, %p54_p11 }
 0x11e   : > { %s9616_s26 = scalar_select %p6345_p6, 1, 0 }
 0x11f   : > { %s9617_s1 = scalar_select %p6351_p9, 1, 0 }
 0x120   : > { %s4999_s12 = sshll.u32 %s466_s18, 9  ;;  %s5079_s30 = sshll.u32 %s5958_s24, 13 }
 0x121   : > { %s9618_s15 = sld [smem:[#allocation173_spill]]  ;;  %s470_s3 = scalar_lea.vmem [#allocation3], %s4999_s12 }
 0x122   : > { %s478_s17 = sshll.u32 %s470_s3, 4  ;;  %p6361_p4 = pnand %p5377_p7, %p50_p13  ;;  %s6365_s17 = int_to_ptr.vmem [resolvable:$true] %s478_s17 }
 0x123   : > { %s6367_s20 = scalar_lea.sflag [#allocation4], %s466_s18 }
 0x124   : > { %p5840_p8 = pneg %p6361_p4 }
 0x127   : > { %s6359_s16 = scalar_lea.hbm %s9618_s15, %s5079_s30  ;;  %s5843_s30 = scalar_lea.hbm %s9618_s15, 16384 }
 0x128   : > { %s5838_s27 = scalar_lea.hbm %s6359_s16, 8192  ;;  %p5844_p11 = scmp.lt.u32.totalorder %s6359_s16, %s9618_s15 }
 0x129   : > { %p5839_p10 = scmp.ne.s32.totalorder %s6359_s16, %s5838_s27  ;;  %p5845_p12 = scmp.lt.u32.totalorder %s5843_s30, %s5838_s27 }
 0x12a   : > { %p5847_p0 = scmp.lt.u32.totalorder %s5838_s27, %s6359_s16 }
 0x12b   : > { %p5841_p1 = pnand %p5840_p8, %p5839_p10  ;;  %p5846_p13 = por %p5845_p12, %p5844_p11 }
 0x12d   : > { %p5842_p3 = pneg %p5841_p1  ;;  %p5848_p5 = por %p5847_p0, %p5846_p13 }
 0x12f   : > { %p5849_p7 = pnand %p5848_p5, %p5842_p3 }
 0x131   : > { %5852 = shalt.err (!%p5849_p7)
}
 0x132   : > { %s5853_s18 = scalar_lea.vmem %s6365_s17, 8192  ;;  %s5977_s3 = smov [#allocation3]  }
 0x133   : > { %p5854_p10 = scmp.ne.s32.totalorder %s6365_s17, %s5853_s18  ;;  %s5858_s0 = sshll.u32 %s5977_s3, 4  ;;  %s5859_s0 = int_to_ptr.vmem [resolvable:$false] %s5858_s0 }
 0x134   : > { %s5860_s12 = scalar_lea.vmem %s5859_s0, 16384  ;;  %p5861_p6 = scmp.lt.s32.totalorder %s6365_s17, %s5859_s0 }
 0x135   : > { %p5856_p1 = pnand %p5854_p10, %p5840_p8  ;;  %p5862_p11 = scmp.lt.s32.totalorder %s5860_s12, %s5853_s18 }
 0x137   : > { %p5857_p9 = pneg %p5856_p1  ;;  %p5863_p12 = por %p5862_p11, %p5861_p6 }
 0x139   : > { %p5864_p13 = pnand %p5863_p12, %p5857_p9 }
 0x13b   : > { %5867 = shalt.err (!%p5864_p13)
}
 0x13c   : > { %s9620_s27 = smov 8   ;;  %s9621_s30 = smov 128  }
 0x13d   : > { %5361 = dma.hbm_to_vmem [thread:$0]  (!%p6361_p4), %s6359_s16, 8192, %s6365_s17, %s6367_s20, %s9621_s30, %s9621_s30, %s9620_s27  }
 0x13e   : > { %s9622_s14 = sld [smem:[#allocation33_spill]] }
 0x144   : > { %p9623_p8 = scmp.ne.s32.totalorder %s9622_s14, 0 }
 0x146   : > { %490 = sbr.rel (%p9623_p8) target bundleno = 1877 (0x755), region = 68 }
 0x14d   : > { %s6401_s28 = sand.u32 1, %s5950_s22  }
 0x14e   : > { %s5004_s18 = sshll.u32 %s6401_s28, 9  ;;  %s493_s3 = scalar_lea.sflag [#allocation4], %s6401_s28 }
 0x14f   : > { %s6407_s25 = scalar_lea.vmem [#allocation3], %s5004_s18 }
 0x150   : > { %5913 = dma.done.wait (%p6341_p2), %s493_s3, 8192  }
 0x151   : > { %5915 = vsyncadd (%p6341_p2), %s493_s3, 4294959104  ;;  %s9624_s16 = sld [smem:[#allocation32_spill]] }
 0x157   : > { %p9625_p6 = scmp.eq.s32.totalorder %s9624_s16, 0 }
 0x159   : > { %5917 = dma.done.wait (%p9625_p6), [#allocation7], 2064   ;;  %p9626_p9 = pmov %p9625_p6 }
 0x15a   : > { %p9627_p4 = pmov %p9625_p6 }
 0x15b   : > { %5919 = vsyncadd (%p9626_p9), [#allocation7], 4294965232 }
 0x15c   : > { %5921 = dma.done.wait (%p9627_p4), [#allocation10], 160   ;;  %p9628_p3 = pmov %p9627_p4 }
 0x15e   : > { %5923 = vsyncadd (%p9628_p3), [#allocation10], 4294967136  ;;  %p9629_p0 = pmov %p9628_p3 }
 0x160   : > { %5925 = dma.done.wait (%p9629_p0), [#allocation13], 1040   ;;  %p9630_p5 = pmov %p9629_p0 }
 0x161   : > { %p9631_p2 = pmov %p9629_p0 }
 0x162   : > { %5927 = vsyncadd (%p9630_p5), [#allocation13], 4294966256 }
 0x163   : > { %5929 = dma.done.wait (%p9631_p2), [#allocation16], 1040   ;;  %p9632_p7 = pmov %p9629_p0 }
 0x164   : > { %p9633_p10 = pmov %p9629_p0 }
 0x165   : > { %5931 = vsyncadd (%p9632_p7), [#allocation16], 4294966256 }
 0x166   : > { %5933 = dma.done.wait (%p9633_p10), [#allocation19], 1040   ;;  %p9634_p1 = pmov %p9629_p0 }
 0x167   : > { %p9635_p11 = pmov %p9629_p0 }
 0x168   : > { %5935 = vsyncadd (%p9634_p1), [#allocation19], 4294966256 }
 0x169   : > { %5937 = dma.done.wait (%p9635_p11), [#allocation22], 16   ;;  %p9636_p12 = pmov %p9629_p0 }
 0x16a   : > { %v5978_v0 = vmov 0   ;;  %v5445_v1 = vld [vmem:[#allocation6 + $0x4] ss:$8 sps:$4 sm:$0xff]   ;;  %v5447_v2 = vld [vmem:[#allocation6] ss:$8 sps:$4 sm:$0xff]   ;;  %v586_v20 = vld [vmem:[%s6407_s25 + $0x10] sm:$0xff] }
 0x16b   : > { %5939 = vsyncadd (%p9636_p12), [#allocation22], 4294967280  ;;  %808 = vmatprep.mubr.bf16.mxu0 %v5978_v0  ;;  %1088 = vmatprep.mubr.bf16.mxu1 %v5978_v0  ;;  %v5448_v3 = vld [vmem:[#allocation6 + $0x14] ss:$8 sps:$4 sm:$0xff]   ;;  %v5450_v4 = vld [vmem:[#allocation6 + $0x10] ss:$8 sps:$4 sm:$0xff]  }
 0x16c   : > { %776 = vmatprep.subr.bf16.mxu0 %v5445_v1  ;;  %5260 = vmatprep.subr.bf16.mxu1 %v5445_v1  ;;  %v5451_v5 = vld [vmem:[#allocation6 + $0x24] ss:$8 sps:$4 sm:$0xff]   ;;  %v5453_v6 = vld [vmem:[#allocation6 + $0x20] ss:$8 sps:$4 sm:$0xff]   ;;  %v5454_v7 = vld [vmem:[#allocation6 + $0x34] ss:$8 sps:$4 sm:$0xff]  }
 0x16d   : > { %777 = vmatpush1.bf16.msra.mxu0 %v5447_v2  ;;  %5268 = vmatpush1.bf16.msra.mxu1 %v5447_v2  ;;  %v5456_v8 = vld [vmem:[#allocation6 + $0x30] ss:$8 sps:$4 sm:$0xff]   ;;  %v5457_v9 = vld [vmem:[#allocation6 + $0x44] ss:$8 sps:$4 sm:$0xff]   ;;  %v5459_v10 = vld [vmem:[#allocation6 + $0x40] ss:$8 sps:$4 sm:$0xff]  }
 0x16e   : > { %778 = vmatprep.subr.bf16.mxu0 %v5448_v3  ;;  %5261 = vmatprep.subr.bf16.mxu1 %v5448_v3  ;;  %v5460_v11 = vld [vmem:[#allocation6 + $0x54] ss:$8 sps:$4 sm:$0xff]   ;;  %v5462_v12 = vld [vmem:[#allocation6 + $0x50] ss:$8 sps:$4 sm:$0xff]   ;;  %v5463_v13 = vld [vmem:[#allocation6 + $0x64] ss:$8 sps:$4 sm:$0xff]  }
 0x16f   : > { %v5465_v14 = vld [vmem:[#allocation6 + $0x60] ss:$8 sps:$4 sm:$0xff]   ;;  %v5466_v15 = vld [vmem:[#allocation6 + $0x74] ss:$8 sps:$4 sm:$0xff]   ;;  %v5468_v16 = vld [vmem:[#allocation6 + $0x70] ss:$8 sps:$4 sm:$0xff]  }
 0x170   : > { %v584_v17 = vld [vmem:[%s6407_s25] sm:$0xff]  ;;  %v585_v18 = vld [vmem:[%s6407_s25 + $0x8] sm:$0xff]  ;;  %v587_v21 = vld [vmem:[%s6407_s25 + $0x18] sm:$0xff]  ;;  %vm5980_vm0 = vmmov 0   ;;  %vm3646_vm1 = vcmask 1041409   ;;  %s9229_s29 = scalar_lea.vmem [#allocation23], %s5004_s18 }
 0x171   : > { %779 = vmatpush1.bf16.msra.mxu0 %v5450_v4  ;;  %5269 = vmatpush1.bf16.msra.mxu1 %v5450_v4  ;;  %v648_v19 = vpack.c.bf16 %v585_v18, %v584_v17  ;;  %v649_v22 = vpack.c.bf16 %v587_v21, %v586_v20  ;;  %v588_v23 = vld [vmem:[%s6407_s25 + $0x20] sm:$0xff]  ;;  %v589_v24 = vld [vmem:[%s6407_s25 + $0x28] sm:$0xff]  ;;  %v590_v26 = vld [vmem:[%s6407_s25 + $0x30] sm:$0xff]  ;;  %s5081_s17 = sshll.u32 %s9624_s16, 13  ;;  %s4807_s20 = sshll.u32 %s9229_s29, 4  ;;  %s9479_s20 = int_to_ptr.vmem [resolvable:$true] %s4807_s20 }
 0x172   : > { %780 = vmatprep.subr.bf16.mxu0 %v5451_v5  ;;  %5262 = vmatprep.subr.bf16.mxu1 %v5451_v5  ;;  %v650_v25 = vpack.c.bf16 %v589_v24, %v588_v23  ;;  %v591_v27 = vld [vmem:[%s6407_s25 + $0x38] sm:$0xff]  ;;  %v592_v29 = vld [vmem:[%s6407_s25 + $0x40] sm:$0xff]  ;;  %v593_v30 = vld [vmem:[%s6407_s25 + $0x48] sm:$0xff]  ;;  %v5979_v5 = vmov 0.0   ;;  %s9988_s27 = sld [smem:[#allocation176_spill]]  ;;  %s4793_s14 = scalar_lea.sflag [#allocation5], %s6401_s28 }
 0x173   : > { %v651_v28 = vpack.c.bf16 %v591_v27, %v590_v26  ;;  %v652_v31 = vpack.c.bf16 %v593_v30, %v592_v29  ;;  %v594_v32 = vld [vmem:[%s6407_s25 + $0x50] sm:$0xff]  ;;  %v595_v33 = vld [vmem:[%s6407_s25 + $0x58] sm:$0xff]  ;;  %v596_v35 = vld [vmem:[%s6407_s25 + $0x60] sm:$0xff]  ;;  %1591 = vst [vmem:[#allocation2] sm:$0xff] %v5979_v5  ;;  %s5868_s18 = scalar_lea.vmem %s9479_s20, 8192  ;;  %p9989_p8 = scmp.ne.s32.totalorder %s9616_s26, 0 }
 0x174   : > { %v653_v34 = vpack.c.bf16 %v595_v33, %v594_v32  ;;  %v597_v36 = vld [vmem:[%s6407_s25 + $0x68] sm:$0xff]  ;;  %v598_v38 = vld [vmem:[%s6407_s25 + $0x70] sm:$0xff]  ;;  %v599_v39 = vld [vmem:[%s6407_s25 + $0x78] sm:$0xff]  ;;  %1592 = vst [vmem:[#allocation2 + $0x8] sm:$0xff] %v5979_v5  ;;  %p5869_p13 = scmp.ne.s32.totalorder %s9479_s20, %s5868_s18  ;;  %s5982_s3 = smov [#allocation23]  }
 0x175   : > { %781 = vmatpush1.bf16.msra.mxu0 %v5453_v6  ;;  %5270 = vmatpush1.bf16.msra.mxu1 %v5453_v6  ;;  %v654_v37 = vpack.c.bf16 %v597_v36, %v596_v35  ;;  %v655_v40 = vpack.c.bf16 %v599_v39, %v598_v38  ;;  %v640_v41 = vld [vmem:[%s6407_s25 + $0x1c0] sm:$0xff]  ;;  %v641_v42 = vld [vmem:[%s6407_s25 + $0x1c8] sm:$0xff]  ;;  %v642_v47 = vld [vmem:[%s6407_s25 + $0x1d0] sm:$0xff]  ;;  %1605 = vst [vmem:[#allocation2 + $0x18] sm:$0x1] %v5979_v5 }
 0x176   : > { %782 = vmatprep.subr.bf16.mxu0 %v5454_v7  ;;  %5263 = vmatprep.subr.bf16.mxu1 %v5454_v7  ;;  %v676_v43 = vpack.c.bf16 %v641_v42, %v640_v41  ;;  %v600_v44 = vld [vmem:[%s6407_s25 + $0x80] sm:$0xff]  ;;  %v601_v45 = vld [vmem:[%s6407_s25 + $0x88] sm:$0xff]  ;;  %v643_v48 = vld [vmem:[%s6407_s25 + $0x1d8] sm:$0xff]  ;;  %1593 = vst [vmem:[#allocation2 + $0x10] sm:$0x3] %v5979_v5  ;;  %p5870_p6 = pnand %p5869_p13, %p9989_p8 }
 0x177   : > { %v656_v46 = vpack.c.bf16 %v601_v45, %v600_v44  ;;  %v677_v49 = vpack.c.bf16 %v643_v48, %v642_v47  ;;  %v602_v50 = vld [vmem:[%s6407_s25 + $0x90] sm:$0xff]  ;;  %v603_v51 = vld [vmem:[%s6407_s25 + $0x98] sm:$0xff]  ;;  %v644_v53 = vld [vmem:[%s6407_s25 + $0x1e0] sm:$0xff]  ;;  %1594 = vst [vmem:[#allocation2 + $0x1b0] sm:$0xff] %v5979_v5 }
 0x178   : > { %v657_v52 = vpack.c.bf16 %v603_v51, %v602_v50  ;;  %v645_v54 = vld [vmem:[%s6407_s25 + $0x1e8] sm:$0xff]  ;;  %v604_v56 = vld [vmem:[%s6407_s25 + $0xa0] sm:$0xff]  ;;  %v646_v59 = vld [vmem:[%s6407_s25 + $0x1f0] sm:$0xff]  ;;  %1595 = vst [vmem:[#allocation2 + $0x1b8] sm:$0xff] %v5979_v5  ;;  %s9477_s30 = scalar_lea.hbm %s9988_s27, %s5081_s17  ;;  %p5871_p9 = pneg %p5870_p6 }
 0x179   : > { %783 = vmatpush1.bf16.msra.mxu0 %v5456_v8  ;;  %5271 = vmatpush1.bf16.msra.mxu1 %v5456_v8  ;;  %v678_v55 = vpack.c.bf16 %v645_v54, %v644_v53  ;;  %v605_v57 = vld [vmem:[%s6407_s25 + $0xa8] sm:$0xff]  ;;  %v647_v60 = vld [vmem:[%s6407_s25 + $0x1f8] sm:$0xff]  ;;  %v606_v61 = vld [vmem:[%s6407_s25 + $0xb0] sm:$0xff]  ;;  %1596 = vst [vmem:[#allocation2 + $0x1c0] sm:$0x3] %v5979_v5 }
 0x17a   : > { %784 = vmatprep.subr.bf16.mxu0 %v5457_v9  ;;  %5264 = vmatprep.subr.bf16.mxu1 %v5457_v9  ;;  %v658_v58 = vpack.c.bf16 %v605_v57, %v604_v56  ;;  %v607_v62 = vld [vmem:[%s6407_s25 + $0xb8] sm:$0xff]  ;;  %v679_v63 = vpack.c.bf16 %v647_v60, %v646_v59  ;;  %v6487_v2 = vld [vmem:[%s6407_s25 + $0xc0] sm:$0xff]  ;;  %v6490_v3 = vld [vmem:[%s6407_s25 + $0xc8] sm:$0xff]  ;;  %1598 = vst [vmem:[#allocation2 + $0x198] sm:$0xff] %v5979_v5 }
 0x17b   : > { %v659_v1 = vpack.c.bf16 %v607_v62, %v606_v61  ;;  %v660_v4 = vpack.c.bf16 %v6490_v3, %v6487_v2  ;;  %1599 = vst [vmem:[#allocation2 + $0x1a0] sm:$0xff] %v5979_v5  ;;  %1600 = vst [vmem:[#allocation2 + $0x1a8] sm:$0x3] %v5979_v5  ;;  %v610_v6 = vld [vmem:[%s6407_s25 + $0xd0] sm:$0xff]  ;;  %v611_v7 = vld [vmem:[%s6407_s25 + $0xd8] sm:$0xff] }
 0x17c   : > { %1601 = vst [vmem:[#allocation2 + $0x348] sm:$0xff] %v5979_v5  ;;  %1602 = vst [vmem:[#allocation2 + $0x350] sm:$0xff] %v5979_v5  ;;  %v661_v8 = vpack.c.bf16 %v611_v7, %v610_v6  ;;  %v612_v9 = vld [vmem:[%s6407_s25 + $0xe0] sm:$0xff]  ;;  %v618_v18 = vld [vmem:[%s6407_s25 + $0x110] sm:$0xff] }
 0x17d   : > { %785 = vmatpush1.bf16.msra.mxu0 %v5459_v10  ;;  %5272 = vmatpush1.bf16.msra.mxu1 %v5459_v10  ;;  %1603 = vst [vmem:[#allocation2 + $0x358] sm:$0x3] %v5979_v5  ;;  %1606 = vst [vmem:[#allocation2 + $0x30] sm:$0x1] %v5979_v5  ;;  %v613_v10 = vld [vmem:[%s6407_s25 + $0xe8] sm:$0xff]  ;;  %v620_v21 = vld [vmem:[%s6407_s25 + $0x120] sm:$0xff] }
 0x17e   : > { %786 = vmatprep.subr.bf16.mxu0 %v5460_v11  ;;  %5265 = vmatprep.subr.bf16.mxu1 %v5460_v11  ;;  %1607 = vst [vmem:[#allocation2 + $0x48] sm:$0x1] %v5979_v5  ;;  %1608 = vst [vmem:[#allocation2 + $0x60] sm:$0x1] %v5979_v5  ;;  %v662_v11 = vpack.c.bf16 %v613_v10, %v612_v9  ;;  %v622_v24 = vld [vmem:[%s6407_s25 + $0x130] sm:$0xff]  ;;  %v624_v27 = vld [vmem:[%s6407_s25 + $0x140] sm:$0xff] }
 0x17f   : > { %1609 = vst [vmem:[#allocation2 + $0x78] sm:$0x1] %v5979_v5  ;;  %1610 = vst [vmem:[#allocation2 + $0x90] sm:$0x1] %v5979_v5  ;;  %v626_v30 = vld [vmem:[%s6407_s25 + $0x150] sm:$0xff]  ;;  %v628_v33 = vld [vmem:[%s6407_s25 + $0x160] sm:$0xff] }
 0x180   : > { %1611 = vst [vmem:[#allocation2 + $0xa8] sm:$0x1] %v5979_v5  ;;  %1612 = vst [vmem:[#allocation2 + $0xc0] sm:$0x1] %v5979_v5  ;;  %v630_v36 = vld [vmem:[%s6407_s25 + $0x170] sm:$0xff]  ;;  %v632_v39 = vld [vmem:[%s6407_s25 + $0x180] sm:$0xff] }
 0x181   : > { %787 = vmatpush1.bf16.msra.mxu0 %v5462_v12  ;;  %5273 = vmatpush1.bf16.msra.mxu1 %v5462_v12  ;;  %1613 = vst [vmem:[#allocation2 + $0xd8] sm:$0x1] %v5979_v5  ;;  %1614 = vst [vmem:[#allocation2 + $0xf0] sm:$0x1] %v5979_v5  ;;  %v614_v12 = vld [vmem:[%s6407_s25 + $0xf0] sm:$0xff]  ;;  %v636_v45 = vld [vmem:[%s6407_s25 + $0x1a0] sm:$0xff] }
 0x182   : > { %788 = vmatprep.subr.bf16.mxu0 %v5463_v13  ;;  %5266 = vmatprep.subr.bf16.mxu1 %v5463_v13  ;;  %1615 = vst [vmem:[#allocation2 + $0x108] sm:$0x1] %v5979_v5  ;;  %1616 = vst [vmem:[#allocation2 + $0x120] sm:$0x1] %v5979_v5  ;;  %v615_v13 = vld [vmem:[%s6407_s25 + $0xf8] sm:$0xff]  ;;  %v634_v42 = vld [vmem:[%s6407_s25 + $0x190] sm:$0xff] }
 0x183   : > { %1617 = vst [vmem:[#allocation2 + $0x138] sm:$0x1] %v5979_v5  ;;  %1618 = vst [vmem:[#allocation2 + $0x150] sm:$0x1] %v5979_v5  ;;  %v6616_v48 = vld [vmem:[#allocation8] ss:$0 sm:$0xff] }
 0x184   : > { %1619 = vst [vmem:[#allocation2 + $0x168] sm:$0x1] %v5979_v5  ;;  %1620 = vst [vmem:[#allocation2 + $0x180] sm:$0x1] %v5979_v5  ;;  %v639_v50 = vld [vmem:[%s6407_s25 + $0x1b8] sm:$0xff] }
 0x185   : > { %789 = vmatpush1.bf16.msra.mxu0 %v5465_v14  ;;  %5274 = vmatpush1.bf16.msra.mxu1 %v5465_v14  ;;  %1621 = vst [vmem:[#allocation2 + $0x1c8] sm:$0x1] %v5979_v5  ;;  %1622 = vst [vmem:[#allocation2 + $0x1e0] sm:$0x1] %v5979_v5  ;;  %v663_v14 = vpack.c.bf16 %v615_v13, %v614_v12  ;;  %v6627_v62 = vld [vmem:[#allocation9] ss:$0 sm:$0xff] }
 0x186   : > { %790 = vmatprep.subr.bf16.mxu0 %v5466_v15  ;;  %5267 = vmatprep.subr.bf16.mxu1 %v5466_v15  ;;  %1623 = vst [vmem:[#allocation2 + $0x1f8] sm:$0x1] %v5979_v5  ;;  %1624 = vst [vmem:[#allocation2 + $0x210] sm:$0x1] %v5979_v5  ;;  %v616_v15 = vld [vmem:[%s6407_s25 + $0x100] sm:$0xff]  ;;  %v1804_v7 = vmul.f32 0.0, %v6627_v62 }
 0x187   : > { %1625 = vst [vmem:[#allocation2 + $0x228] sm:$0x1] %v5979_v5  ;;  %1626 = vst [vmem:[#allocation2 + $0x240] sm:$0x1] %v5979_v5  ;;  %v6629_v3 = vld [vmem:[#allocation9 + $0x1] ss:$0 sm:$0xff] }
 0x188   : > { %1627 = vst [vmem:[#allocation2 + $0x258] sm:$0x1] %v5979_v5  ;;  %1628 = vst [vmem:[#allocation2 + $0x270] sm:$0x1] %v5979_v5  ;;  %v1869_v12 = vld [vmem:[#allocation2 + $0x9] sm:$0xff] }
 0x189   : > { %791 = vmatpush1.bf16.msra.mxu0 %v5468_v16  ;;  %5275 = vmatpush1.bf16.msra.mxu1 %v5468_v16  ;;  %1629 = vst [vmem:[#allocation2 + $0x288] sm:$0x1] %v5979_v5  ;;  %1630 = vst [vmem:[#allocation2 + $0x2a0] sm:$0x1] %v5979_v5  ;;  %v617_v16 = vld [vmem:[%s6407_s25 + $0x108] sm:$0xff] }
 0x18a   : > { %1631 = vst [vmem:[#allocation2 + $0x2b8] sm:$0x1] %v5979_v5  ;;  %1632 = vst [vmem:[#allocation2 + $0x2d0] sm:$0x1] %v5979_v5  ;;  %5140 = vmatprep.subr.bf16.mxu1 %v5979_v5  ;;  %v664_v17 = vpack.c.bf16 %v617_v16, %v616_v15  ;;  %v2068_v16 = vld [vmem:[#allocation2 + $0x2] sm:$0xff] }
 0x18b   : > { %1633 = vst [vmem:[#allocation2 + $0x2e8] sm:$0x1] %v5979_v5  ;;  %1634 = vst [vmem:[#allocation2 + $0x300] sm:$0x1] %v5979_v5 }
 0x18c   : > { %809 = vmatmul.mubr.bf16.vlgmr.msra.gmra.mrb[0].mxu0 %v648_v19  ;;  %1089 = vmatmul.mubr.bf16.vlgmr.msra.gmra.mrb[0].mxu1 %v676_v43  ;;  %1635 = vst [vmem:[#allocation2 + $0x318] sm:$0x1] %v5979_v5  ;;  %1636 = vst [vmem:[#allocation2 + $0x330] sm:$0x1] %v5979_v5  ;;  %v619_v19 = vld [vmem:[%s6407_s25 + $0x118] sm:$0xff] }
 0x18d   : > { %818 = vmatprep.mubr.bf16.mxu0 %v5978_v0  ;;  %1098 = vmatprep.mubr.bf16.mxu1 %v5978_v0  ;;  %1637 = vst [vmem:[#allocation2 + $0x29] sm:$0x1] %v5979_v5  ;;  %1638 = vst [vmem:[#allocation2 + $0x41] sm:$0x1] %v5979_v5  ;;  %v665_v20 = vpack.c.bf16 %v619_v19, %v618_v18  ;;  %v635_v43 = vld [vmem:[%s6407_s25 + $0x198] sm:$0xff] }
 0x18e   : > { %1639 = vst [vmem:[#allocation2 + $0x59] sm:$0x1] %v5979_v5  ;;  %1640 = vst [vmem:[#allocation2 + $0x71] sm:$0x1] %v5979_v5  ;;  %v673_v44 = vpack.c.bf16 %v635_v43, %v634_v42 }
 0x18f   : > { %1641 = vst [vmem:[#allocation2 + $0x89] sm:$0x1] %v5979_v5  ;;  %1642 = vst [vmem:[#allocation2 + $0xa1] sm:$0x1] %v5979_v5 }
 0x190   : > { %1643 = vst [vmem:[#allocation2 + $0xb9] sm:$0x1] %v5979_v5  ;;  %1644 = vst [vmem:[#allocation2 + $0xd1] sm:$0x1] %v5979_v5 }
 0x191   : > { %1645 = vst [vmem:[#allocation2 + $0xe9] sm:$0x1] %v5979_v5  ;;  %1646 = vst [vmem:[#allocation2 + $0x101] sm:$0x1] %v5979_v5 }
 0x192   : > { %1647 = vst [vmem:[#allocation2 + $0x119] sm:$0x1] %v5979_v5  ;;  %1648 = vst [vmem:[#allocation2 + $0x131] sm:$0x1] %v5979_v5 }
 0x193   : > { %1649 = vst [vmem:[#allocation2 + $0x149] sm:$0x1] %v5979_v5  ;;  %1650 = vst [vmem:[#allocation2 + $0x161] sm:$0x1] %v5979_v5 }
 0x194   : > { %819 = vmatmul.mubr.bf16.gmra.mrb[4].mxu0 %v649_v22  ;;  %1099 = vmatmul.mubr.bf16.gmra.mrb[4].mxu1 %v677_v49  ;;  %1651 = vst [vmem:[#allocation2 + $0x179] sm:$0x1] %v5979_v5  ;;  %1652 = vst [vmem:[#allocation2 + $0x191] sm:$0x1] %v5979_v5  ;;  %v621_v22 = vld [vmem:[%s6407_s25 + $0x128] sm:$0xff]  ;;  %v638_v49 = vld [vmem:[%s6407_s25 + $0x1b0] sm:$0xff] }
 0x195   : > { %828 = vmatprep.mubr.bf16.mxu0 %v5978_v0  ;;  %1108 = vmatprep.mubr.bf16.mxu1 %v5978_v0  ;;  %1653 = vst [vmem:[#allocation2 + $0x1d9] sm:$0x1] %v5979_v5  ;;  %1654 = vst [vmem:[#allocation2 + $0x1f1] sm:$0x1] %v5979_v5  ;;  %v666_v23 = vpack.c.bf16 %v621_v22, %v620_v21  ;;  %v675_v54 = vpack.c.bf16 %v639_v50, %v638_v49 }
 0x196   : > { %1655 = vst [vmem:[#allocation2 + $0x209] sm:$0x1] %v5979_v5  ;;  %1656 = vst [vmem:[#allocation2 + $0x221] sm:$0x1] %v5979_v5 }
 0x197   : > { %1657 = vst [vmem:[#allocation2 + $0x239] sm:$0x1] %v5979_v5  ;;  %1658 = vst [vmem:[#allocation2 + $0x251] sm:$0x1] %v5979_v5 }
 0x198   : > { %1659 = vst [vmem:[#allocation2 + $0x269] sm:$0x1] %v5979_v5  ;;  %1660 = vst [vmem:[#allocation2 + $0x281] sm:$0x1] %v5979_v5 }
 0x199   : > { %1661 = vst [vmem:[#allocation2 + $0x299] sm:$0x1] %v5979_v5  ;;  %1662 = vst [vmem:[#allocation2 + $0x2b1] sm:$0x1] %v5979_v5 }
 0x19a   : > { %1663 = vst [vmem:[#allocation2 + $0x2c9] sm:$0x1] %v5979_v5  ;;  %1664 = vst [vmem:[#allocation2 + $0x2e1] sm:$0x1] %v5979_v5 }
 0x19b   : > { %1665 = vst [vmem:[#allocation2 + $0x2f9] sm:$0x1] %v5979_v5  ;;  %1666 = vst [vmem:[#allocation2 + $0x311] sm:$0x1] %v5979_v5 }
 0x19c   : > { %829 = vmatmul.mubr.bf16.gmra.mrb[8].mxu0 %v650_v25  ;;  %1109 = vmatmul.mubr.bf16.gmra.mrb[8].mxu1 %v678_v55  ;;  %1667 = vst [vmem:[#allocation2 + $0x329] sm:$0x1] %v5979_v5  ;;  %1668 = vst [vmem:[#allocation2 + $0x341] sm:$0x1] %v5979_v5  ;;  %v623_v25 = vld [vmem:[%s6407_s25 + $0x138] sm:$0xff] }
 0x19d   : > { %838 = vmatprep.mubr.bf16.mxu0 %v5978_v0  ;;  %1118 = vmatprep.mubr.bf16.mxu1 %v5978_v0  ;;  %v667_v26 = vpack.c.bf16 %v623_v25, %v622_v24  ;;  %v2069_v24 = vld [vmem:[#allocation2 + $0xa] sm:$0xff] }
 0x1a4   : > { %839 = vmatmul.mubr.bf16.gmra.mrb[12].mxu0 %v651_v28  ;;  %1119 = vmatmul.mubr.bf16.gmra.mrb[12].mxu1 %v679_v63  ;;  %v625_v28 = vld [vmem:[%s6407_s25 + $0x148] sm:$0xff] }
 0x1a5   : > { %848 = vmatprep.mubr.bf16.mxu0 %v5978_v0  ;;  %v668_v29 = vpack.c.bf16 %v625_v28, %v624_v27 }
 0x1ac   : > { %849 = vmatmul.mubr.bf16.gmra.mrb[16].mxu0 %v652_v31  ;;  %v627_v31 = vld [vmem:[%s6407_s25 + $0x158] sm:$0xff] }
 0x1ad   : > { %858 = vmatprep.mubr.bf16.mxu0 %v5978_v0  ;;  %v669_v32 = vpack.c.bf16 %v627_v31, %v626_v30  ;;  %v6646_v31 = vld [vmem:[#allocation9 + $0x3] ss:$0 sm:$0xff] }
 0x1b4   : > { %859 = vmatmul.mubr.bf16.gmra.mrb[20].mxu0 %v653_v34  ;;  %v629_v34 = vld [vmem:[%s6407_s25 + $0x168] sm:$0xff] }
 0x1b5   : > { %868 = vmatprep.mubr.bf16.mxu0 %v5978_v0  ;;  %v670_v35 = vpack.c.bf16 %v629_v34, %v628_v33 }
 0x1bc   : > { %869 = vmatmul.mubr.bf16.gmra.mrb[24].mxu0 %v654_v37  ;;  %v631_v37 = vld [vmem:[%s6407_s25 + $0x178] sm:$0xff] }
 0x1bd   : > { %878 = vmatprep.mubr.bf16.mxu0 %v5978_v0  ;;  %v671_v38 = vpack.c.bf16 %v631_v37, %v630_v36 }
 0x1c4   : > { %879 = vmatmul.mubr.bf16.gmra.mrb[28].mxu0 %v655_v40  ;;  %v633_v40 = vld [vmem:[%s6407_s25 + $0x188] sm:$0xff] }
 0x1c5   : > { %888 = vmatprep.mubr.bf16.mxu0 %v5978_v0  ;;  %v672_v41 = vpack.c.bf16 %v633_v40, %v632_v39 }
 0x1cc   : > { %889 = vmatmul.mubr.bf16.gmra.mrb[32].mxu0 %v656_v46  ;;  %v637_v46 = vld [vmem:[%s6407_s25 + $0x1a8] sm:$0xff]  ;;  %s5872_s25 = sshll.u32 %s5982_s3, 4  ;;  %s5873_s25 = int_to_ptr.vmem [resolvable:$false] %s5872_s25 }
 0x1cd   : > { %898 = vmatprep.mubr.bf16.mxu0 %v5978_v0  ;;  %v674_v47 = vpack.c.bf16 %v637_v46, %v636_v45  ;;  %s5874_s16 = scalar_lea.vmem %s5873_s25, 16384  ;;  %p5875_p4 = scmp.lt.s32.totalorder %s9479_s20, %s5873_s25 }
 0x1ce   : > { %p5876_p3 = scmp.lt.s32.totalorder %s5874_s16, %s5868_s18 }
 0x1d0   : > { %p5877_p0 = por %p5876_p3, %p5875_p4 }
 0x1d2   : > { %p5878_p5 = pnand %p5877_p0, %p5871_p9 }
 0x1d4   : > { %899 = vmatmul.mubr.bf16.gmra.mrb[36].mxu0 %v657_v52 }
 0x1d5   : > { %908 = vmatprep.mubr.bf16.mxu0 %v5978_v0 }
 0x1dc   : > { %909 = vmatmul.mubr.bf16.gmra.mrb[40].mxu0 %v658_v58 }
 0x1dd   : > { %918 = vmatprep.mubr.bf16.mxu0 %v5978_v0 }
 0x1e4   : > { %919 = vmatmul.mubr.bf16.gmra.mrb[44].mxu0 %v659_v1 }
 0x1e5   : > { %928 = vmatprep.mubr.bf16.mxu0 %v5978_v0 }
 0x1ec   : > { %929 = vmatmul.mubr.bf16.gmra.mrb[48].mxu0 %v660_v4 }
 0x1ed   : > { %938 = vmatprep.mubr.bf16.mxu0 %v5978_v0 }
 0x1f4   : > { %939 = vmatmul.mubr.bf16.gmra.mrb[52].mxu0 %v661_v8 }
 0x1f5   : > { %948 = vmatprep.mubr.bf16.mxu0 %v5978_v0 }
 0x1fc   : > { %949 = vmatmul.mubr.bf16.gmra.mrb[56].mxu0 %v662_v11 }
 0x1fd   : > { %958 = vmatprep.mubr.bf16.mxu0 %v5978_v0 }
 0x204   : > { %959 = vmatmul.mubr.bf16.gmra.mrb[60].mxu0 %v663_v14 }
 0x205   : > { %968 = vmatprep.mubr.bf16.mxu0 %v5978_v0 }
 0x20c   : > { %969 = vmatmul.mubr.bf16.gmra.mrb[64].mxu0 %v664_v17  ;;  %v6639_v17 = vld [vmem:[#allocation9 + $0x2] ss:$0 sm:$0xff] }
 0x20d   : > { %978 = vmatprep.mubr.bf16.mxu0 %v5978_v0  ;;  %v2141_v33 = vmul.f32 %v6639_v17, %v2069_v24 }
 0x214   : > { %979 = vmatmul.mubr.bf16.gmra.mrb[68].mxu0 %v665_v20  ;;  %v1941_v20 = vmul.f32 %v6629_v3, %v1869_v12 }
 0x215   : > { %988 = vmatprep.mubr.bf16.mxu0 %v5978_v0 }
 0x21c   : > { %989 = vmatmul.mubr.bf16.gmra.mrb[72].mxu0 %v666_v23  ;;  %v2140_v23 = vmul.f32 %v6639_v17, %v2068_v16 }
 0x21d   : > { %998 = vmatprep.mubr.bf16.mxu0 %v5978_v0 }
 0x224   : > { %999 = vmatmul.mubr.bf16.gmra.mrb[76].mxu0 %v667_v26 }
 0x225   : > { %1008 = vmatprep.mubr.bf16.mxu0 %v5978_v0 }
 0x22c   : > { %1009 = vmatmul.mubr.bf16.gmra.mrb[80].mxu0 %v668_v29 }
 0x22d   : > { %1018 = vmatprep.mubr.bf16.mxu0 %v5978_v0 }
 0x234   : > { %1019 = vmatmul.mubr.bf16.gmra.mrb[84].mxu0 %v669_v32  ;;  %v2005_v32 = vadd.f32 %v1941_v20, %v1804_v7 }
 0x235   : > { %1028 = vmatprep.mubr.bf16.mxu0 %v5978_v0 }
 0x236   : > { %v2205_v49 = vadd.f32 %v2141_v33, %v2005_v32 }
 0x23c   : > { %1029 = vmatmul.mubr.bf16.gmra.mrb[88].mxu0 %v670_v35 }
 0x23d   : > { %1038 = vmatprep.mubr.bf16.mxu0 %v5978_v0 }
 0x244   : > { %1039 = vmatmul.mubr.bf16.gmra.mrb[92].mxu0 %v671_v38 }
 0x245   : > { %1048 = vmatprep.mubr.bf16.mxu0 %v5978_v0 }
 0x24c   : > { %1049 = vmatmul.mubr.bf16.gmra.mrb[96].mxu0 %v672_v41  ;;  %v6651_v41 = vld [vmem:[#allocation9 + $0x4] ss:$0 sm:$0xff] }
 0x24d   : > { %1058 = vmatprep.mubr.bf16.mxu0 %v5978_v0 }
 0x254   : > { %1059 = vmatmul.mubr.bf16.gmra.mrb[100].mxu0 %v673_v44 }
 0x255   : > { %1068 = vmatprep.mubr.bf16.mxu0 %v5978_v0 }
 0x25c   : > { %1069 = vmatmul.mubr.bf16.gmra.mrb[104].mxu0 %v674_v47 }
 0x25d   : > { %1078 = vmatprep.mubr.bf16.mxu0 %v5978_v0  ;;  %v1868_v0 = vld [vmem:[#allocation2 + $0x1] sm:$0xff] }
 0x25e   : > { %v1940_v8 = vmul.f32 %v6629_v3, %v1868_v0 }
 0x25f   : > { %v810_v51 = vpop.f32.mrb[0].mxu0 }
 0x260   : > { %v1136_v52 = vadd.f32 %v6616_v48, %v810_v51  ;;  %v6622_v53 = vpop.f32.mrb[1].mxu0  ;;  %v2004_v22 = vadd.f32 %v1940_v8, %v1804_v7  ;;  %v6672_v7 = vld [vmem:[#allocation9 + $0x6] ss:$0 sm:$0xff] }
 0x261   : > { %9637 = vst [vmem:[#allocation34_spill] sm:$0xff] %v6622_v53  ;;  %v814_v55 = vpop.f32.mrb[2].mxu0 }
 0x262   : > { %v1271_v56 = vadd.f32 3.0, %v1136_v52  ;;  %v1137_v57 = vadd.f32 %v6616_v48, %v814_v55  ;;  %v6625_v58 = vpop.f32.mrb[3].mxu0  ;;  %v2204_v36 = vadd.f32 %v2140_v23, %v2004_v22  ;;  %v6659_v55 = vld [vmem:[#allocation9 + $0x5] ss:$0 sm:$0xff]  ;;  %v6679_v22 = vld [vmem:[#allocation9 + $0x7] ss:$0 sm:$0xff] }
 0x263   : > { %9638 = vst [vmem:[#allocation35_spill] sm:$0xff] %v6625_v58 }
 0x264   : > { %v1335_v59 = vmax.f32 %v1271_v56, 0.0  ;;  %v1272_v60 = vadd.f32 3.0, %v1137_v57  ;;  %1079 = vmatmul.mubr.bf16.gmra.mrb[108].mxu0 %v675_v54 }
 0x266   : > { %v1399_v61 = vmin.f32 %v1335_v59, 6.0  ;;  %v1336_v63 = vmax.f32 %v1272_v60, 0.0 }
 0x267   : > { %v820_v1 = vpop.f32.mrb[4].mxu0 }
 0x268   : > { %v1463_v2 = vmul.f32 %v1399_v61, %v1136_v52  ;;  %v1400_v4 = vmin.f32 %v1336_v63, 6.0  ;;  %v1138_v5 = vadd.f32 %v6616_v48, %v820_v1  ;;  %v6632_v6 = vpop.f32.mrb[5].mxu0 }
 0x269   : > { %9639 = vst [vmem:[#allocation36_spill] sm:$0xff] %v6632_v6  ;;  %v824_v9 = vpop.f32.mrb[6].mxu0 }
 0x26a   : > { %v1527_v10 = vmul.f32 0.16666667, %v1463_v2  ;;  %v1464_v11 = vmul.f32 %v1400_v4, %v1137_v57  ;;  %v1273_v13 = vadd.f32 3.0, %v1138_v5  ;;  %v1139_v14 = vadd.f32 %v6616_v48, %v824_v9  ;;  %v6637_v15 = vpop.f32.mrb[7].mxu0 }
 0x26b   : > { %9640 = vst [vmem:[#allocation37_spill] sm:$0xff] %v6637_v15 }
 0x26c   : > { %1669 = vst [vmem:[#allocation2 + $0x19] sm:$0xff] %v1527_v10  ;;  %v1528_v18 = vmul.f32 0.16666667, %v1464_v11  ;;  %v1337_v19 = vmax.f32 %v1273_v13, 0.0  ;;  %v1274_v21 = vadd.f32 3.0, %v1139_v14  ;;  %v1942_v45 = vmul.f32 %v6629_v3, %v1527_v10 }
 0x26d   : > { %v2540_v54 = vmul.f32 %v6651_v41, %v1527_v10 }
 0x26e   : > { %1670 = vst [vmem:[#allocation2 + $0x21] sm:$0xff] %v1528_v18  ;;  %v1401_v25 = vmin.f32 %v1337_v19, 6.0  ;;  %v1338_v26 = vmax.f32 %v1274_v21, 0.0  ;;  %v1943_v2 = vmul.f32 %v6629_v3, %v1528_v18  ;;  %v2541_v11 = vmul.f32 %v6651_v41, %v1528_v18 }
 0x26f   : > { %v830_v27 = vpop.f32.mrb[8].mxu0 }
 0x270   : > { %v1465_v28 = vmul.f32 %v1401_v25, %v1138_v5  ;;  %v1140_v29 = vadd.f32 %v6616_v48, %v830_v27  ;;  %v6644_v30 = vpop.f32.mrb[9].mxu0  ;;  %v1402_v34 = vmin.f32 %v1338_v26, 6.0 }
 0x271   : > { %9641 = vst [vmem:[#allocation38_spill] sm:$0xff] %v6644_v30  ;;  %v834_v35 = vpop.f32.mrb[10].mxu0 }
 0x272   : > { %v1529_v37 = vmul.f32 0.16666667, %v1465_v28  ;;  %v1275_v38 = vadd.f32 3.0, %v1140_v29  ;;  %v6649_v39 = vpop.f32.mrb[11].mxu0  ;;  %v1466_v42 = vmul.f32 %v1402_v34, %v1139_v14  ;;  %v6662_v56 = vadd.f32 %v6616_v48, %v834_v35 }
 0x273   : > { %9642 = vst [vmem:[#allocation39_spill] sm:$0xff] %v6649_v39  ;;  %v1735_v40 = vld [vmem:[#allocation2 + $0x18] sm:$0xff] }
 0x274   : > { %v1806_v43 = vmul.f32 %v6627_v62, %v1735_v40  ;;  %v2340_v44 = vmul.f32 %v6646_v31, %v1735_v40  ;;  %1671 = vst [vmem:[#allocation2 + $0x31] sm:$0xff] %v1529_v37  ;;  %v6656_v50 = vmul.f32 0.16666667, %v1466_v42  ;;  %v1339_v51 = vmax.f32 %v1275_v38, 0.0 }
 0x275   : > { %v1736_v46 = vld [vmem:[#allocation2 + $0x20] sm:$0xff]  ;;  %v1944_v12 = vmul.f32 %v6629_v3, %v1529_v37  ;;  %v1276_v13 = vadd.f32 3.0, %v6662_v56  ;;  %v2542_v32 = vmul.f32 %v6651_v41, %v1529_v37 }
 0x276   : > { %v2070_v47 = vld [vmem:[#allocation2 + $0x1a] sm:$0xff]  ;;  %v2404_v52 = vadd.f32 %v2340_v44, %v2204_v36  ;;  %v2006_v57 = vadd.f32 %v1942_v45, %v1806_v43  ;;  %v1807_v59 = vmul.f32 %v6627_v62, %v1736_v46  ;;  %v2341_v61 = vmul.f32 %v6646_v31, %v1736_v46  ;;  %1672 = vst [vmem:[#allocation2 + $0x39] sm:$0xff] %v6656_v50  ;;  %v2071_v10 = vld [vmem:[#allocation2 + $0x22] sm:$0xff] }
 0x277   : > { %v2142_v60 = vmul.f32 %v6639_v17, %v2070_v47  ;;  %v840_v0 = vpop.f32.mrb[12].mxu0  ;;  %v2740_v5 = vmul.f32 %v6659_v55, %v2070_v47  ;;  %v1403_v8 = vmin.f32 %v1339_v51, 6.0  ;;  %v1340_v26 = vmax.f32 %v1276_v13, 0.0 }
 0x278   : > { %v2604_v63 = vadd.f32 %v2540_v54, %v2404_v52  ;;  %v6668_v1 = vpop.f32.mrb[13].mxu0  ;;  %v2405_v4 = vadd.f32 %v2341_v61, %v2205_v49  ;;  %v2007_v16 = vadd.f32 %v1943_v2, %v1807_v59  ;;  %v1142_v18 = vadd.f32 %v6616_v48, %v840_v0 }
 0x279   : > { %9643 = vst [vmem:[#allocation40_spill] sm:$0xff] %v6668_v1  ;;  %v844_v9 = vpop.f32.mrb[14].mxu0  ;;  %v2206_v19 = vadd.f32 %v2142_v60, %v2006_v57  ;;  %v1467_v23 = vmul.f32 %v1403_v8, %v1140_v29  ;;  %v2143_v27 = vmul.f32 %v6639_v17, %v2071_v10  ;;  %v3141_v36 = vmul.f32 %v6679_v22, %v1529_v37 }
 0x27a   : > { %v6677_v14 = vpop.f32.mrb[15].mxu0  ;;  %v2804_v20 = vadd.f32 %v2740_v5, %v2604_v63  ;;  %v2605_v28 = vadd.f32 %v2541_v11, %v2405_v4  ;;  %v1143_v29 = vadd.f32 %v6616_v48, %v844_v9  ;;  %v2741_v42 = vmul.f32 %v6659_v55, %v2071_v10 }
 0x27b   : > { %9644 = vst [vmem:[#allocation41_spill] sm:$0xff] %v6677_v14  ;;  %v1737_v21 = vld [vmem:[#allocation2 + $0x30] sm:$0xff]  ;;  %v6686_v33 = vmul.f32 0.16666667, %v1467_v23  ;;  %v2207_v40 = vadd.f32 %v2143_v27, %v2007_v16  ;;  %v1404_v51 = vmin.f32 %v1340_v26, 6.0  ;;  %v1277_v37 = vadd.f32 3.0, %v1142_v18 }
 0x27c   : > { %v2342_v24 = vmul.f32 %v6646_v31, %v1737_v21  ;;  %v2941_v25 = vmul.f32 %v6672_v7, %v1737_v21  ;;  %v1808_v43 = vmul.f32 %v6627_v62, %v1737_v21  ;;  %v2805_v54 = vadd.f32 %v2741_v42, %v2605_v28 }
 0x27d   : > { %v1738_v38 = vld [vmem:[#allocation2 + $0x38] sm:$0xff]  ;;  %1673 = vst [vmem:[#allocation2 + $0x49] sm:$0xff] %v6686_v33  ;;  %v2543_v59 = vmul.f32 %v6651_v41, %v6656_v50  ;;  %v3142_v0 = vmul.f32 %v6679_v22, %v6656_v50  ;;  %v1278_v63 = vadd.f32 3.0, %v1143_v29  ;;  %v1468_v10 = vmul.f32 %v1404_v51, %v6662_v56 }
 0x27e   : > { %v2406_v34 = vadd.f32 %v2342_v24, %v2206_v19  ;;  %v3005_v35 = vadd.f32 %v2941_v25, %v2804_v20  ;;  %v2343_v44 = vmul.f32 %v6646_v31, %v1738_v38  ;;  %v6696_v49 = vld [vmem:[#allocation2 + $0x32] sm:$0xff]  ;;  %v2942_v60 = vmul.f32 %v6672_v7, %v1738_v38 }
 0x27f   : > { %v850_v45 = vpop.f32.mrb[16].mxu0  ;;  %v2008_v4 = vadd.f32 %v1944_v12, %v1808_v43  ;;  %v2144_v5 = vmul.f32 %v6639_v17, %v6696_v49  ;;  %v1341_v11 = vmax.f32 %v1277_v37, 0.0  ;;  %v2742_v13 = vmul.f32 %v6659_v55, %v6696_v49 }
 0x280   : > { %v2606_v46 = vadd.f32 %v2542_v32, %v2406_v34  ;;  %v6694_v47 = vadd.f32 %v3141_v36, %v3005_v35  ;;  %v6698_v52 = vpop.f32.mrb[17].mxu0  ;;  %v2407_v57 = vadd.f32 %v2343_v44, %v2207_v40  ;;  %v3006_v9 = vadd.f32 %v2942_v60, %v2805_v54  ;;  %v6730_v44 = vld [vmem:[#allocation2 + $0x3a] sm:$0xff] }
 0x281   : > { %9645 = vst [vmem:[#allocation42_spill] sm:$0xff] %v6698_v52  ;;  %v854_v61 = vpop.f32.mrb[18].mxu0  ;;  %v1809_v19 = vmul.f32 %v6627_v62, %v1738_v38  ;;  %v1532_v21 = vmul.f32 0.16666667, %v1468_v10  ;;  %v1405_v23 = vmin.f32 %v1341_v11, 6.0  ;;  %v1342_v24 = vmax.f32 %v1278_v63, 0.0 }
 0x282   : > { %v6705_v2 = vpop.f32.mrb[19].mxu0  ;;  %v2607_v8 = vadd.f32 %v2543_v59, %v2407_v57  ;;  %v6712_v16 = vadd.f32 %v3142_v0, %v3006_v9  ;;  %v2208_v12 = vadd.f32 %v2144_v5, %v2008_v4  ;;  %v2806_v25 = vadd.f32 %v2742_v13, %v2606_v46 }
 0x283   : > { %9646 = vst [vmem:[#allocation43_spill] sm:$0xff] %v6705_v2  ;;  %v1945_v56 = vmul.f32 %v6629_v3, %v6656_v50  ;;  %1674 = vst [vmem:[#allocation2 + $0x51] sm:$0xff] %v1532_v21  ;;  %v1469_v32 = vmul.f32 %v1405_v23, %v1142_v18  ;;  %v6720_v34 = vadd.f32 %v6616_v48, %v850_v45  ;;  %v1406_v18 = vmin.f32 %v1342_v24, 6.0 }
 0x284   : > { %v1739_v20 = vld [vmem:[#allocation2 + $0x48] sm:$0xff]  ;;  %v2544_v38 = vmul.f32 %v6651_v41, %v6686_v33  ;;  %v3143_v42 = vmul.f32 %v6679_v22, %v6686_v33  ;;  %v2145_v60 = vmul.f32 %v6639_v17, %v6730_v44  ;;  %v1946_v0 = vmul.f32 %v6629_v3, %v6686_v33 }
 0x285   : > { %v2344_v26 = vmul.f32 %v6646_v31, %v1739_v20  ;;  %v2943_v27 = vmul.f32 %v6672_v7, %v1739_v20  ;;  %v6732_v50 = vmul.f32 0.16666667, %v1469_v32  ;;  %v2009_v45 = vadd.f32 %v1945_v56, %v1809_v19 }
 0x286   : > { %v1810_v54 = vmul.f32 %v6627_v62, %v1739_v20  ;;  %v1470_v57 = vmul.f32 %v1406_v18, %v1143_v29  ;;  %v1279_v59 = vadd.f32 3.0, %v6720_v34  ;;  %v2743_v5 = vmul.f32 %v6659_v55, %v6730_v44 }
 0x287   : > { %v860_v28 = vpop.f32.mrb[20].mxu0  ;;  %v2408_v36 = vadd.f32 %v2344_v26, %v2208_v12  ;;  %v3007_v40 = vadd.f32 %v2943_v27, %v2806_v25  ;;  %1675 = vst [vmem:[#allocation2 + $0x61] sm:$0xff] %v6732_v50  ;;  %v2209_v4 = vadd.f32 %v2145_v60, %v2009_v45  ;;  %v6752_v11 = vadd.f32 %v6616_v48, %v854_v61 }
 0x288   : > { %v6722_v35 = vpop.f32.mrb[21].mxu0  ;;  %v6745_v63 = vmul.f32 0.16666667, %v1470_v57  ;;  %v2010_v29 = vadd.f32 %v1946_v0, %v1810_v54  ;;  %v1343_v33 = vmax.f32 %v1279_v59, 0.0  ;;  %v2807_v23 = vadd.f32 %v2743_v5, %v2607_v8 }
 0x289   : > { %9647 = vst [vmem:[#allocation44_spill] sm:$0xff] %v6722_v35  ;;  %v6728_v43 = vpop.f32.mrb[22].mxu0  ;;  %v2608_v51 = vadd.f32 %v2544_v38, %v2408_v36  ;;  %v6736_v37 = vadd.f32 %v3143_v42, %v3007_v40  ;;  %v1947_v61 = vmul.f32 %v6629_v3, %v1532_v21  ;;  %v2545_v27 = vmul.f32 %v6651_v41, %v1532_v21 }
 0x28a   : > { %v6734_v46 = vpop.f32.mrb[23].mxu0  ;;  %v1740_v9 = vld [vmem:[#allocation2 + $0x50] sm:$0xff]  ;;  %1676 = vst [vmem:[#allocation2 + $0x69] sm:$0xff] %v6745_v63  ;;  %v3144_v56 = vmul.f32 %v6679_v22, %v1532_v21  ;;  %v1280_v40 = vadd.f32 3.0, %v6752_v11  ;;  %v1146_v42 = vadd.f32 %v6616_v48, %v860_v28  ;;  %v1407_v21 = vmin.f32 %v1343_v33, 6.0 }
 0x28b   : > { %9648 = vst [vmem:[#allocation45_spill] sm:$0xff] %v6734_v46  ;;  %v6749_v10 = vld [vmem:[#allocation2 + $0x4a] sm:$0xff]  ;;  %v2345_v19 = vmul.f32 %v6646_v31, %v1740_v9  ;;  %v1811_v24 = vmul.f32 %v6627_v62, %v1740_v9  ;;  %v2944_v12 = vmul.f32 %v6672_v7, %v1740_v9  ;;  %v6775_v45 = vld [vmem:[#allocation2 + $0x52] sm:$0xff] }
 0x28c   : > { %v2146_v13 = vmul.f32 %v6639_v17, %v6749_v10  ;;  %v2744_v36 = vmul.f32 %v6659_v55, %v6749_v10  ;;  %v2147_v28 = vmul.f32 %v6639_v17, %v6775_v45 }
 0x28d   : > { %v2409_v26 = vadd.f32 %v2345_v19, %v2209_v4  ;;  %v3008_v38 = vadd.f32 %v2944_v12, %v2807_v23  ;;  %v2011_v60 = vadd.f32 %v1947_v61, %v1811_v24  ;;  %v2546_v19 = vmul.f32 %v6651_v41, %v6732_v50 }
 0x28e   : > { %v1741_v8 = vld [vmem:[#allocation2 + $0x60] sm:$0xff]  ;;  %v2210_v54 = vadd.f32 %v2146_v13, %v2010_v29  ;;  %v2808_v0 = vadd.f32 %v2744_v36, %v2608_v51  ;;  %v3145_v29 = vmul.f32 %v6679_v22, %v6732_v50  ;;  %v2745_v51 = vmul.f32 %v6659_v55, %v6775_v45 }
 0x28f   : > { %v6758_v20 = vpop.f32.mrb[24].mxu0  ;;  %v2609_v57 = vadd.f32 %v2545_v27, %v2409_v26  ;;  %v2346_v59 = vmul.f32 %v6646_v31, %v1741_v8  ;;  %v6778_v4 = vadd.f32 %v3144_v56, %v3008_v38  ;;  %v2945_v5 = vmul.f32 %v6672_v7, %v1741_v8 }
 0x290   : > { %v6762_v25 = vpop.f32.mrb[25].mxu0  ;;  %v1471_v24 = vmul.f32 %v1407_v21, %v6720_v34  ;;  %v1344_v61 = vmax.f32 %v1280_v40, 0.0  ;;  %v2211_v27 = vadd.f32 %v2147_v28, %v2011_v60  ;;  %v1281_v38 = vadd.f32 3.0, %v1146_v42 }
 0x291   : > { %9649 = vst [vmem:[#allocation46_spill] sm:$0xff] %v6762_v25  ;;  %v6767_v32 = vpop.f32.mrb[26].mxu0  ;;  %v2410_v9 = vadd.f32 %v2346_v59, %v2210_v54  ;;  %v3009_v23 = vadd.f32 %v2945_v5, %v2808_v0  ;;  %v1742_v13 = vld [vmem:[#allocation2 + $0x68] sm:$0xff]  ;;  %v2809_v59 = vadd.f32 %v2745_v51, %v2609_v57  ;;  %v2547_v34 = vmul.f32 %v6651_v41, %v6745_v63 }
 0x292   : > { %v6773_v18 = vpop.f32.mrb[27].mxu0  ;;  %v2347_v36 = vmul.f32 %v6646_v31, %v1742_v13  ;;  %v2946_v0 = vmul.f32 %v6672_v7, %v1742_v13  ;;  %v1147_v40 = vadd.f32 %v6616_v48, %v6728_v43  ;;  %v1812_v21 = vmul.f32 %v6627_v62, %v1741_v8  ;;  %v6811_v51 = vld [vmem:[#allocation2 + $0x62] sm:$0xff] }
 0x293   : > { %9650 = vst [vmem:[#allocation47_spill] sm:$0xff] %v6773_v18  ;;  %v2610_v33 = vadd.f32 %v2546_v19, %v2410_v9  ;;  %v6794_v56 = vadd.f32 %v3145_v29, %v3009_v23  ;;  %v3146_v9 = vmul.f32 %v6679_v22, %v6745_v63  ;;  %v1535_v19 = vmul.f32 0.16666667, %v1471_v24 }
 0x294   : > { %v2411_v18 = vadd.f32 %v2347_v36, %v2211_v27  ;;  %v3010_v60 = vadd.f32 %v2946_v0, %v2809_v59  ;;  %v1408_v57 = vmin.f32 %v1344_v61, 6.0  ;;  %v1345_v23 = vmax.f32 %v1281_v38, 0.0 }
 0x295   : > { %v1948_v29 = vmul.f32 %v6629_v3, %v6732_v50  ;;  %1677 = vst [vmem:[#allocation2 + $0x79] sm:$0xff] %v1535_v19  ;;  %v1282_v0 = vadd.f32 3.0, %v1147_v40  ;;  %v1813_v61 = vmul.f32 %v6627_v62, %v1742_v13  ;;  %v6823_v50 = vld [vmem:[#allocation2 + $0x6a] sm:$0xff]  ;;  %v2148_v38 = vmul.f32 %v6639_v17, %v6811_v51 }
 0x296   : > { %v2611_v28 = vadd.f32 %v2547_v34, %v2411_v18  ;;  %v6813_v27 = vadd.f32 %v3146_v9, %v3010_v60  ;;  %v1472_v43 = vmul.f32 %v1408_v57, %v6752_v11  ;;  %v1409_v36 = vmin.f32 %v1345_v23, 6.0 }
 0x297   : > { %v6787_v12 = vpop.f32.mrb[28].mxu0  ;;  %v2012_v59 = vadd.f32 %v1948_v29, %v1812_v21  ;;  %v1148_v18 = vadd.f32 %v6616_v48, %v6758_v20  ;;  %v1346_v9 = vmax.f32 %v1282_v0, 0.0  ;;  %v1949_v20 = vmul.f32 %v6629_v3, %v6745_v63 }
 0x298   : > { %v6792_v26 = vpop.f32.mrb[29].mxu0  ;;  %v1536_v34 = vmul.f32 0.16666667, %v1472_v43  ;;  %v1473_v60 = vmul.f32 %v1409_v36, %v1146_v42  ;;  %v2746_v23 = vmul.f32 %v6659_v55, %v6811_v51  ;;  %v2149_v29 = vmul.f32 %v6639_v17, %v6823_v50 }
 0x299   : > { %9651 = vst [vmem:[#allocation48_spill] sm:$0xff] %v6792_v26  ;;  %v6797_v54 = vpop.f32.mrb[30].mxu0  ;;  %v1283_v57 = vadd.f32 3.0, %v1148_v18  ;;  %v1410_v43 = vmin.f32 %v1346_v9, 6.0  ;;  %v2013_v42 = vadd.f32 %v1949_v20, %v1813_v61  ;;  %v2212_v36 = vadd.f32 %v2148_v38, %v2012_v59 }
 0x29a   : > { %v6800_v5 = vpop.f32.mrb[31].mxu0  ;;  %1678 = vst [vmem:[#allocation2 + $0x81] sm:$0xff] %v1536_v34  ;;  %v6835_v13 = vmul.f32 0.16666667, %v1473_v60  ;;  %v2747_v60 = vmul.f32 %v6659_v55, %v6823_v50  ;;  %v1950_v2 = vmul.f32 %v6629_v3, %v1535_v19  ;;  %v2548_v61 = vmul.f32 %v6651_v41, %v1535_v19 }
 0x29b   : > { %9652 = vst [vmem:[#allocation49_spill] sm:$0xff] %v6800_v5  ;;  %v1474_v26 = vmul.f32 %v1410_v43, %v1147_v40  ;;  %v6854_v20 = vadd.f32 %v6616_v48, %v6767_v32 }
 0x29c   : > { %v1743_v0 = vld [vmem:[#allocation2 + $0x78] sm:$0xff]  ;;  %1679 = vst [vmem:[#allocation2 + $0x91] sm:$0xff] %v6835_v13  ;;  %v2811_v46 = vadd.f32 %v2747_v60, %v2611_v28 }
 0x29d   : > { %v1814_v5 = vmul.f32 %v6627_v62, %v1743_v0  ;;  %v2348_v63 = vmul.f32 %v6646_v31, %v1743_v0  ;;  %v2947_v25 = vmul.f32 %v6672_v7, %v1743_v0 }
 0x29f   : > { %v6816_v8 = vpop.f32.mrb[32].mxu0  ;;  %v2412_v38 = vadd.f32 %v2348_v63, %v2212_v36  ;;  %v2014_v52 = vadd.f32 %v1950_v2, %v1814_v5  ;;  %v2549_v2 = vmul.f32 %v6651_v41, %v1536_v34 }
 0x2a0   : > { %v6820_v24 = vpop.f32.mrb[33].mxu0 }
 0x2a1   : > { %9653 = vst [vmem:[#allocation50_spill] sm:$0xff] %v6820_v24  ;;  %v6827_v11 = vpop.f32.mrb[34].mxu0  ;;  %v2810_v24 = vadd.f32 %v2746_v23, %v2610_v33  ;;  %v3147_v33 = vmul.f32 %v6679_v22, %v1535_v19  ;;  %v2213_v23 = vadd.f32 %v2149_v29, %v2013_v42  ;;  %v2612_v35 = vadd.f32 %v2548_v61, %v2412_v38  ;;  %v1744_v39 = vld [vmem:[#allocation2 + $0x80] sm:$0xff] }
 0x2a2   : > { %v6829_v21 = vpop.f32.mrb[35].mxu0  ;;  %v6862_v36 = vld [vmem:[#allocation2 + $0x7a] sm:$0xff]  ;;  %v1815_v32 = vmul.f32 %v6627_v62, %v1744_v39  ;;  %v2349_v28 = vmul.f32 %v6646_v31, %v1744_v39  ;;  %v2948_v5 = vmul.f32 %v6672_v7, %v1744_v39  ;;  %v1284_v29 = vadd.f32 3.0, %v6854_v20 }
 0x2a3   : > { %9654 = vst [vmem:[#allocation51_spill] sm:$0xff] %v6829_v21  ;;  %v1347_v21 = vmax.f32 %v1283_v57, 0.0  ;;  %v3011_v9 = vadd.f32 %v2947_v25, %v2810_v24  ;;  %v6850_v57 = vmul.f32 0.16666667, %v1474_v26  ;;  %v1951_v26 = vmul.f32 %v6629_v3, %v1536_v34 }
 0x2a4   : > { %v2150_v24 = vmul.f32 %v6639_v17, %v6862_v36  ;;  %v1150_v42 = vadd.f32 %v6616_v48, %v6787_v12  ;;  %v2413_v63 = vadd.f32 %v2349_v28, %v2213_v23  ;;  %v2748_v60 = vmul.f32 %v6659_v55, %v6862_v36 }
 0x2a5   : > { %v1411_v43 = vmin.f32 %v1347_v21, 6.0  ;;  %v6860_v19 = vadd.f32 %v3147_v33, %v3011_v9  ;;  %1680 = vst [vmem:[#allocation2 + $0x99] sm:$0xff] %v6850_v57  ;;  %v1745_v21 = vld [vmem:[#allocation2 + $0x90] sm:$0xff]  ;;  %v3148_v61 = vmul.f32 %v6679_v22, %v1536_v34  ;;  %v2015_v38 = vadd.f32 %v1951_v26, %v1815_v32  ;;  %v6880_v9 = vld [vmem:[#allocation2 + $0x82] sm:$0xff] }
 0x2a6   : > { %v2550_v39 = vmul.f32 %v6651_v41, %v6835_v13  ;;  %v2613_v14 = vadd.f32 %v2549_v2, %v2413_v63  ;;  %v2812_v30 = vadd.f32 %v2748_v60, %v2612_v35  ;;  %v2350_v1 = vmul.f32 %v6646_v31, %v1745_v21 }
 0x2a7   : > { %v6848_v59 = vpop.f32.mrb[36].mxu0  ;;  %v1475_v33 = vmul.f32 %v1411_v43, %v1148_v18  ;;  %v2949_v12 = vmul.f32 %v6672_v7, %v1745_v21  ;;  %v3149_v18 = vmul.f32 %v6679_v22, %v6835_v13  ;;  %v1348_v34 = vmax.f32 %v1284_v29, 0.0  ;;  %v6905_v29 = vld [vmem:[#allocation9 + $0x8] ss:$0 sm:$0xff] }
 0x2a8   : > { %v6856_v40 = vpop.f32.mrb[37].mxu0  ;;  %v1285_v43 = vadd.f32 3.0, %v1150_v42 }
 0x2a9   : > { %9655 = vst [vmem:[#allocation52_spill] sm:$0xff] %v6856_v40  ;;  %v6858_v0 = vpop.f32.mrb[38].mxu0  ;;  %v3012_v40 = vadd.f32 %v2948_v5, %v2811_v46  ;;  %v2151_v46 = vmul.f32 %v6639_v17, %v6880_v9  ;;  %v3013_v35 = vadd.f32 %v2949_v12, %v2812_v30  ;;  %v1816_v5 = vmul.f32 %v6627_v62, %v1745_v21 }
 0x2aa   : > { %v6865_v25 = vpop.f32.mrb[39].mxu0  ;;  %v1349_v12 = vmax.f32 %v1285_v43, 0.0 }
 0x2ab   : > { %9656 = vst [vmem:[#allocation53_spill] sm:$0xff] %v6865_v25  ;;  %v2214_v25 = vadd.f32 %v2150_v24, %v2014_v52  ;;  %v6888_v28 = vadd.f32 %v3148_v61, %v3012_v40  ;;  %v6896_v24 = vmul.f32 0.16666667, %v1475_v33  ;;  %v2749_v40 = vmul.f32 %v6659_v55, %v6880_v9 }
 0x2ac   : > { %v1746_v26 = vld [vmem:[#allocation2 + $0x98] sm:$0xff]  ;;  %v2215_v60 = vadd.f32 %v2151_v46, %v2015_v38  ;;  %v1412_v33 = vmin.f32 %v1348_v34, 6.0  ;;  %v6922_v46 = vadd.f32 %v6616_v48, %v6797_v54  ;;  %v3341_v54 = vmul.f32 %v6905_v29, %v6696_v49 }
 0x2ad   : > { %v2414_v32 = vadd.f32 %v2350_v1, %v2214_v25  ;;  %v2351_v30 = vmul.f32 %v6646_v31, %v1746_v26  ;;  %1681 = vst [vmem:[#allocation2 + $0xa9] sm:$0xff] %v6896_v24  ;;  %v1952_v1 = vmul.f32 %v6629_v3, %v6835_v13  ;;  %v6913_v25 = vld [vmem:[#allocation2 + $0x92] sm:$0xff]  ;;  %v2813_v21 = vadd.f32 %v2749_v40, %v2613_v14 }
 0x2ae   : > { %v2950_v38 = vmul.f32 %v6672_v7, %v1746_v26  ;;  %v2152_v13 = vmul.f32 %v6639_v17, %v6913_v25  ;;  %v3150_v14 = vmul.f32 %v6679_v22, %v6850_v57  ;;  %v1476_v40 = vmul.f32 %v1412_v33, %v6854_v20 }
 0x2af   : > { %v6886_v23 = vpop.f32.mrb[40].mxu0  ;;  %v2614_v61 = vadd.f32 %v2550_v39, %v2414_v32  ;;  %v2415_v58 = vadd.f32 %v2351_v30, %v2215_v60  ;;  %v3342_v39 = vmul.f32 %v6905_v29, %v6730_v44  ;;  %v1413_v44 = vmin.f32 %v1349_v12, 6.0  ;;  %v6952_v12 = vld [vmem:[#allocation11] ss:$0 sm:$0xff] }
 0x2b0   : > { %v6892_v52 = vpop.f32.mrb[41].mxu0  ;;  %v3014_v43 = vadd.f32 %v2950_v38, %v2813_v21  ;;  %v2750_v60 = vmul.f32 %v6659_v55, %v6913_v25  ;;  %v6947_v20 = vadd.f32 %v6616_v48, %v6816_v8  ;;  %v3405_v49 = vadd.f32 %v3341_v54, %v6694_v47 }
 0x2b1   : > { %9657 = vst [vmem:[#allocation54_spill] sm:$0xff] %v6892_v52  ;;  %v6898_v2 = vpop.f32.mrb[42].mxu0  ;;  %v6907_v52 = vadd.f32 %v3149_v18, %v3013_v35  ;;  %v2016_v18 = vadd.f32 %v1952_v1, %v1816_v5  ;;  %v3406_v35 = vadd.f32 %v3342_v39, %v6712_v16  ;;  %v6942_v1 = vmul.f32 0.16666667, %v1476_v40 }
 0x2b2   : > { %v6903_v63 = vpop.f32.mrb[43].mxu0  ;;  %v1477_v21 = vmul.f32 %v1413_v44, %v1150_v42  ;;  %v1286_v16 = vadd.f32 3.0, %v6922_v46  ;;  %v1817_v38 = vmul.f32 %v6627_v62, %v1746_v26  ;;  %v3343_v42 = vmul.f32 %v6905_v29, %v6749_v10 }
 0x2b3   : > { %9658 = vst [vmem:[#allocation55_spill] sm:$0xff] %v6903_v63  ;;  %v2551_v63 = vmul.f32 %v6651_v41, %v6850_v57  ;;  %v2216_v39 = vadd.f32 %v2152_v13, %v2016_v18  ;;  %v2814_v40 = vadd.f32 %v2750_v60, %v2614_v61  ;;  %1682 = vst [vmem:[#allocation2 + $0xb1] sm:$0xff] %v6942_v1  ;;  %v6969_v13 = vld [vmem:[#allocation2 + $0x9a] sm:$0xff]  ;;  %v1287_v54 = vadd.f32 3.0, %v6947_v20 }
 0x2b4   : > { %v1747_v30 = vld [vmem:[#allocation2 + $0xa8] sm:$0xff]  ;;  %v1953_v47 = vmul.f32 %v6629_v3, %v6850_v57  ;;  %v2552_v26 = vmul.f32 %v6651_v41, %v6896_v24  ;;  %v6967_v18 = vmul.f32 0.16666667, %v1477_v21  ;;  %v3151_v10 = vmul.f32 %v6679_v22, %v6896_v24 }
 0x2b5   : > { %v2615_v34 = vadd.f32 %v2551_v63, %v2415_v58  ;;  %v6938_v58 = vadd.f32 %v3150_v14, %v3014_v43  ;;  %v2352_v43 = vmul.f32 %v6646_v31, %v1747_v30  ;;  %v6957_v14 = vadd.f32 %v6952_v12, %v3406_v35 }
 0x2b6   : > { %v2951_v8 = vmul.f32 %v6672_v7, %v1747_v30  ;;  %v1350_v61 = vmax.f32 %v1286_v16, 0.0  ;;  %v3407_v60 = vadd.f32 %v3343_v42, %v6736_v37  ;;  %v1818_v57 = vmul.f32 %v6627_v62, %v1747_v30  ;;  %1683 = vst [vmem:[#allocation2 + $0xc1] sm:$0xff] %v6967_v18 }
 0x2b7   : > { %v6928_v32 = vpop.f32.mrb[44].mxu0  ;;  %9661 = vst [vmem:[#allocation58_spill] sm:$0xff] %v6957_v14  ;;  %v2416_v44 = vadd.f32 %v2352_v43, %v2216_v39  ;;  %v6980_v21 = vadd.f32 %v6952_v12, %v3405_v49  ;;  %v3344_v16 = vmul.f32 %v6905_v29, %v6775_v45  ;;  %v2153_v37 = vmul.f32 %v6639_v17, %v6969_v13 }
 0x2b8   : > { %v6932_v5 = vpop.f32.mrb[45].mxu0  ;;  %v3015_v35 = vadd.f32 %v2951_v8, %v2814_v40  ;;  %v1954_v30 = vmul.f32 %v6629_v3, %v6896_v24 }
 0x2b9   : > { %9659 = vst [vmem:[#allocation56_spill] sm:$0xff] %v6932_v5  ;;  %v6940_v63 = vpop.f32.mrb[46].mxu0  ;;  %v2616_v39 = vadd.f32 %v2552_v26, %v2416_v44  ;;  %9662 = vst [vmem:[#allocation59_spill] sm:$0xff] %v6980_v21  ;;  %v3540_v49 = vadd.f32 %v6957_v14, %v6980_v21  ;;  %v1351_v44 = vmax.f32 %v1287_v54, 0.0  ;;  %v3408_v45 = vadd.f32 %v3344_v16, %v6778_v4 }
 0x2ba   : > { %v6949_v33 = vpop.f32.mrb[47].mxu0  ;;  %v6982_v40 = vadd.f32 %v3151_v10, %v3015_v35  ;;  %v7002_v35 = vadd.f32 %v6952_v12, %v3407_v60  ;;  %v1748_v24 = vld [vmem:[#allocation2 + $0xb0] sm:$0xff]  ;;  %v2553_v54 = vmul.f32 %v6651_v41, %v6942_v1  ;;  %v7019_v60 = vadd.f32 %v6616_v48, %v6848_v59 }
 0x2bb   : > { %9660 = vst [vmem:[#allocation57_spill] sm:$0xff] %v6949_v33  ;;  %v2017_v33 = vadd.f32 %v1953_v47, %v1817_v38  ;;  %v1414_v38 = vmin.f32 %v1350_v61, 6.0  ;;  %v2751_v47 = vmul.f32 %v6659_v55, %v6969_v13  ;;  %v7004_v61 = vld [vmem:[#allocation2 + $0xaa] sm:$0xff]  ;;  %v2353_v53 = vmul.f32 %v6646_v31, %v1748_v24 }
 0x2bc   : > { %9663 = vst [vmem:[#allocation60_spill] sm:$0xff] %v6982_v40  ;;  %9666 = vst [vmem:[#allocation63_spill] sm:$0xff] %v7002_v35  ;;  %v2154_v15 = vmul.f32 %v6639_v17, %v7004_v61  ;;  %v3152_v16 = vmul.f32 %v6679_v22, %v6942_v1 }
 0x2bd   : > { %v2217_v10 = vadd.f32 %v2153_v37, %v2017_v33  ;;  %v2815_v5 = vadd.f32 %v2751_v47, %v2615_v34  ;;  %v1478_v4 = vmul.f32 %v1414_v38, %v6922_v46  ;;  %v7015_v33 = vadd.f32 %v6616_v48, %v6827_v11  ;;  %v1749_v37 = vld [vmem:[#allocation2 + $0xc0] sm:$0xff] }
 0x2be   : > { %v2554_v46 = vmul.f32 %v6651_v41, %v6967_v18  ;;  %v3153_v11 = vmul.f32 %v6679_v22, %v6967_v18  ;;  %v2953_v14 = vmul.f32 %v6672_v7, %v1749_v37 }
 0x2bf   : > { %v6977_v43 = vpop.f32.mrb[48].mxu0  ;;  %v2417_v34 = vadd.f32 %v2353_v53, %v2217_v10  ;;  %v2354_v10 = vmul.f32 %v6646_v31, %v1749_v37 }
 0x2c0   : > { %v6984_v8 = vpop.f32.mrb[49].mxu0 }
 0x2c1   : > { %9664 = vst [vmem:[#allocation61_spill] sm:$0xff] %v6984_v8  ;;  %v6992_v42 = vpop.f32.mrb[50].mxu0  ;;  %v2018_v8 = vadd.f32 %v1954_v30, %v1818_v57  ;;  %v2752_v57 = vmul.f32 %v6659_v55, %v7004_v61  ;;  %v1415_v30 = vmin.f32 %v1351_v44, 6.0  ;;  %v2617_v59 = vadd.f32 %v2553_v54, %v2417_v34 }
 0x2c2   : > { %v6998_v26 = vpop.f32.mrb[51].mxu0 }
 0x2c3   : > { %9665 = vst [vmem:[#allocation62_spill] sm:$0xff] %v6998_v26  ;;  %v2952_v26 = vmul.f32 %v6672_v7, %v1748_v24  ;;  %v2218_v47 = vadd.f32 %v2154_v15, %v2018_v8  ;;  %v2816_v53 = vadd.f32 %v2752_v57, %v2616_v39  ;;  %v7037_v15 = vmul.f32 0.16666667, %v1478_v4 }
 0x2c4   : > { %v1289_v8 = vadd.f32 3.0, %v7019_v60  ;;  %v1479_v34 = vmul.f32 %v1415_v30, %v6947_v20  ;;  %v1955_v4 = vmul.f32 %v6629_v3, %v6942_v1 }
 0x2c5   : > { %v3016_v6 = vadd.f32 %v2952_v26, %v2815_v5  ;;  %v1288_v5 = vadd.f32 3.0, %v7015_v33  ;;  %v1819_v26 = vmul.f32 %v6627_v62, %v1748_v24  ;;  %v2418_v54 = vadd.f32 %v2354_v10, %v2218_v47  ;;  %1684 = vst [vmem:[#allocation2 + $0xc9] sm:$0xff] %v7037_v15  ;;  %v7057_v24 = vld [vmem:[#allocation2 + $0xb2] sm:$0xff] }
 0x2c6   : > { %v3017_v39 = vadd.f32 %v2953_v14, %v2816_v53  ;;  %v7061_v30 = vmul.f32 0.16666667, %v1479_v34  ;;  %v1353_v53 = vmax.f32 %v1289_v8, 0.0  ;;  %v1820_v10 = vmul.f32 %v6627_v62, %v1749_v37 }
 0x2c7   : > { %v7029_v38 = vpop.f32.mrb[52].mxu0  ;;  %v7035_v40 = vadd.f32 %v3152_v16, %v3016_v6  ;;  %v3345_v6 = vmul.f32 %v6905_v29, %v6811_v51  ;;  %v7055_v16 = vadd.f32 %v6616_v48, %v6858_v0  ;;  %v2618_v14 = vadd.f32 %v2554_v46, %v2418_v54 }
 0x2c8   : > { %v7033_v21 = vpop.f32.mrb[53].mxu0  ;;  %v7059_v20 = vadd.f32 %v3153_v11, %v3017_v39  ;;  %v7068_v51 = vadd.f32 %v6952_v12, %v3408_v45  ;;  %v1352_v47 = vmax.f32 %v1288_v5, 0.0  ;;  %v2019_v0 = vadd.f32 %v1955_v4, %v1819_v26  ;;  %1685 = vst [vmem:[#allocation2 + $0xd9] sm:$0xff] %v7061_v30 }
 0x2c9   : > { %9667 = vst [vmem:[#allocation64_spill] sm:$0xff] %v7033_v21  ;;  %v7041_v44 = vpop.f32.mrb[54].mxu0  ;;  %v3541_v21 = vadd.f32 %v3540_v49, %v7002_v35  ;;  %v7065_v49 = vadd.f32 %v6616_v48, %v6886_v23  ;;  %v3409_v1 = vadd.f32 %v3345_v6, %v6794_v56  ;;  %v3346_v46 = vmul.f32 %v6905_v29, %v6823_v50 }
 0x2ca   : > { %v7045_v57 = vpop.f32.mrb[55].mxu0  ;;  %9669 = vst [vmem:[#allocation66_spill] sm:$0xff] %v7059_v20  ;;  %9670 = vst [vmem:[#allocation67_spill] sm:$0xff] %v7068_v51  ;;  %v2155_v11 = vmul.f32 %v6639_v17, %v7057_v24  ;;  %v1956_v23 = vmul.f32 %v6629_v3, %v6967_v18  ;;  %v2753_v56 = vmul.f32 %v6659_v55, %v7057_v24  ;;  %v1416_v5 = vmin.f32 %v1352_v47, 6.0 }
 0x2cb   : > { %9668 = vst [vmem:[#allocation65_spill] sm:$0xff] %v7045_v57  ;;  %v1290_v8 = vadd.f32 3.0, %v7055_v16  ;;  %v1291_v37 = vadd.f32 3.0, %v7065_v49  ;;  %v3542_v50 = vadd.f32 %v3541_v21, %v7068_v51  ;;  %v7089_v54 = vadd.f32 %v6952_v12, %v3409_v1 }
 0x2cc   : > { %v1417_v39 = vmin.f32 %v1353_v53, 6.0  ;;  %v3410_v18 = vadd.f32 %v3346_v46, %v6813_v27  ;;  %v2219_v6 = vadd.f32 %v2155_v11, %v2019_v0  ;;  %v2817_v4 = vadd.f32 %v2753_v56, %v2617_v59  ;;  %v1750_v47 = vld [vmem:[#allocation2 + $0xc8] sm:$0xff] }
 0x2cd   : > { %9673 = vst [vmem:[#allocation70_spill] sm:$0xff] %v7089_v54  ;;  %v2020_v57 = vadd.f32 %v1956_v23, %v1820_v10  ;;  %v7094_v35 = vld [vmem:[#allocation2 + $0xc2] sm:$0xff]  ;;  %v2555_v21 = vmul.f32 %v6651_v41, %v7037_v15  ;;  %v3154_v1 = vmul.f32 %v6679_v22, %v7037_v15  ;;  %v2954_v27 = vmul.f32 %v6672_v7, %v1750_v47 }
 0x2ce   : > { %v2156_v20 = vmul.f32 %v6639_v17, %v7094_v35  ;;  %v1480_v59 = vmul.f32 %v1416_v5, %v7015_v33  ;;  %v1354_v0 = vmax.f32 %v1290_v8, 0.0  ;;  %v1355_v10 = vmax.f32 %v1291_v37, 0.0 }
 0x2cf   : > { %v7079_v45 = vpop.f32.mrb[56].mxu0  ;;  %v2754_v11 = vmul.f32 %v6659_v55, %v7094_v35  ;;  %v1751_v23 = vld [vmem:[#allocation2 + $0xd8] sm:$0xff]  ;;  %v1481_v56 = vmul.f32 %v1417_v39, %v7019_v60  ;;  %v7112_v51 = vadd.f32 %v6616_v48, %v6898_v2  ;;  %v3155_v33 = vmul.f32 %v6679_v22, %v7061_v30 }
 0x2d0   : > { %9671 = vst [vmem:[#allocation68_spill] sm:$0xff] %v7079_v45  ;;  %v7085_v26 = vpop.f32.mrb[57].mxu0  ;;  %v3018_v45 = vadd.f32 %v2954_v27, %v2817_v4  ;;  %v2356_v37 = vmul.f32 %v6646_v31, %v1751_v23  ;;  %v7124_v48 = vmul.f32 0.16666667, %v1480_v59  ;;  %v1418_v2 = vmin.f32 %v1354_v0, 6.0 }
 0x2d1   : > { %9672 = vst [vmem:[#allocation69_spill] sm:$0xff] %v7085_v26  ;;  %v7091_v34 = vpop.f32.mrb[58].mxu0  ;;  %v2355_v26 = vmul.f32 %v6646_v31, %v1750_v47  ;;  %v2818_v8 = vadd.f32 %v2754_v11, %v2618_v14  ;;  %v7128_v27 = vmul.f32 0.16666667, %v1481_v56  ;;  %v1292_v14 = vadd.f32 3.0, %v7112_v51 }
 0x2d2   : > { %9674 = vst [vmem:[#allocation71_spill] sm:$0xff] %v7091_v34  ;;  %v7103_v53 = vpop.f32.mrb[59].mxu0  ;;  %v2220_v34 = vadd.f32 %v2156_v20, %v2020_v57  ;;  %v7122_v60 = vadd.f32 %v3154_v1, %v3018_v45  ;;  %v1419_v57 = vmin.f32 %v1355_v10, 6.0  ;;  %v1821_v45 = vmul.f32 %v6627_v62, %v1750_v47  ;;  %1686 = vst [vmem:[#allocation2 + $0xe1] sm:$0xff] %v7124_v48  ;;  %v7150_v47 = vld [vmem:[#allocation2 + $0xca] sm:$0xff] }
 0x2d3   : > { %9675 = vst [vmem:[#allocation72_spill] sm:$0xff] %v7103_v53  ;;  %v2419_v46 = vadd.f32 %v2355_v26, %v2219_v6  ;;  %v2556_v53 = vmul.f32 %v6651_v41, %v7061_v30  ;;  %v2955_v26 = vmul.f32 %v6672_v7, %v1751_v23  ;;  %v3543_v59 = vadd.f32 %v3542_v50, %v7089_v54  ;;  %v7152_v56 = vld [vmem:[#allocation9] ss:$0 sm:$0xff] }
 0x2d4   : > { %v2420_v39 = vadd.f32 %v2356_v37, %v2220_v34  ;;  %1687 = vst [vmem:[#allocation2 + $0xf1] sm:$0xff] %v7128_v27  ;;  %v7144_v10 = vadd.f32 %v6952_v12, %v3410_v18  ;;  %v1482_v62 = vmul.f32 %v1418_v2, %v7055_v16  ;;  %v1822_v50 = vmul.f32 %v7152_v56, %v1751_v23 }
 0x2d5   : > { %v2619_v5 = vadd.f32 %v2555_v21, %v2419_v46  ;;  %v3019_v4 = vadd.f32 %v2955_v26, %v2818_v8  ;;  %v3347_v46 = vmul.f32 %v6905_v29, %v6862_v36  ;;  %v1957_v36 = vmul.f32 %v6629_v3, %v7037_v15  ;;  %v7156_v8 = vld [vmem:[#allocation8] ss:$0 sm:$0xff]  ;;  %v7166_v15 = vld [vmem:[#allocation9 + $0x1] ss:$0 sm:$0xff] }
 0x2d6   : > { %v2620_v0 = vadd.f32 %v2556_v53, %v2420_v39  ;;  %9678 = vst [vmem:[#allocation75_spill] sm:$0xff] %v7144_v10  ;;  %v1483_v53 = vmul.f32 %v1419_v57, %v7065_v49  ;;  %v7160_v18 = vadd.f32 %v7156_v8, %v6928_v32  ;;  %v7162_v37 = vmul.f32 0.16666667, %v1482_v62 }
 0x2d7   : > { %v7120_v6 = vpop.f32.mrb[60].mxu0  ;;  %v7140_v34 = vadd.f32 %v3155_v33, %v3019_v4  ;;  %v3411_v11 = vadd.f32 %v3347_v46, %v6860_v19  ;;  %v1356_v33 = vmax.f32 %v1292_v14, 0.0  ;;  %v2021_v19 = vadd.f32 %v1957_v36, %v1821_v45  ;;  %v7199_v36 = vld [vmem:[#allocation9 + $0x2] ss:$0 sm:$0xff] }
 0x2d8   : > { %v7126_v20 = vpop.f32.mrb[61].mxu0  ;;  %v3348_v3 = vmul.f32 %v6905_v29, %v6880_v9  ;;  %v1958_v16 = vmul.f32 %v7166_v15, %v7061_v30  ;;  %v7170_v23 = vmul.f32 0.16666667, %v1483_v53  ;;  %v7175_v2 = vadd.f32 %v3543_v59, %v7144_v10  ;;  %1688 = vst [vmem:[#allocation2 + $0xf9] sm:$0xff] %v7162_v37 }
 0x2d9   : > { %9676 = vst [vmem:[#allocation73_spill] sm:$0xff] %v7126_v20  ;;  %v7131_v21 = vpop.f32.mrb[62].mxu0  ;;  %v1420_v49 = vmin.f32 %v1356_v33, 6.0  ;;  %v7178_v32 = vadd.f32 %v6952_v12, %v3411_v11  ;;  %v2157_v57 = vmul.f32 %v6639_v17, %v7150_v47  ;;  %v2755_v39 = vmul.f32 %v6659_v55, %v7150_v47  ;;  %v1752_v14 = vld [vmem:[#allocation2 + $0xe0] sm:$0xff] }
 0x2da   : > { %v7137_v1 = vpop.f32.mrb[63].mxu0  ;;  %v7186_v30 = vadd.f32 %v3348_v3, %v6888_v28  ;;  %v2022_v4 = vadd.f32 %v1958_v16, %v1822_v50  ;;  %v7190_v46 = vld [vmem:[#allocation2 + $0xda] sm:$0xff]  ;;  %1689 = vst [vmem:[#allocation2 + $0x109] sm:$0xff] %v7170_v23  ;;  %v7194_v45 = vadd.f32 3.0, %v7160_v18  ;;  %v1823_v11 = vmul.f32 %v7152_v56, %v1752_v14 }
 0x2db   : > { %9677 = vst [vmem:[#allocation74_spill] sm:$0xff] %v7137_v1  ;;  %9679 = vst [vmem:[#allocation76_spill] sm:$0xff] %v7178_v32  ;;  %v2221_v59 = vadd.f32 %v2157_v57, %v2021_v19  ;;  %v2158_v28 = vmul.f32 %v7199_v36, %v7190_v46  ;;  %v2357_v62 = vmul.f32 %v6646_v31, %v1752_v14  ;;  %v1753_v50 = vld [vmem:[#allocation2 + $0xf0] sm:$0xff]  ;;  %v7210_v57 = vld [vmem:[#allocation2 + $0xe2] sm:$0xff] }
 0x2dc   : > { %v2819_v33 = vadd.f32 %v2755_v39, %v2619_v5  ;;  %v1959_v3 = vmul.f32 %v7166_v15, %v7124_v48  ;;  %v2956_v16 = vmul.f32 %v6672_v7, %v1752_v14  ;;  %v1484_v19 = vmul.f32 %v1420_v49, %v7112_v51  ;;  %v7219_v51 = vld [vmem:[#allocation9 + $0x3] ss:$0 sm:$0xff] }
 0x2dd   : > { %v2557_v1 = vmul.f32 %v6651_v41, %v7124_v48  ;;  %v2756_v31 = vmul.f32 %v6659_v55, %v7190_v46  ;;  %v2222_v39 = vadd.f32 %v2158_v28, %v2022_v4  ;;  %v1824_v10 = vmul.f32 %v7152_v56, %v1753_v50 }
 0x2de   : > { %v2023_v5 = vadd.f32 %v1959_v3, %v1823_v11  ;;  %v3020_v20 = vadd.f32 %v2956_v16, %v2819_v33  ;;  %v2358_v49 = vmul.f32 %v7219_v51, %v1753_v50  ;;  %v2159_v41 = vmul.f32 %v7199_v36, %v7210_v57  ;;  %v7243_v33 = vld [vmem:[#allocation9 + $0x5] ss:$0 sm:$0xff] }
 0x2df   : > { %v7172_v26 = vpop.f32.mrb[64].mxu0  ;;  %v2820_v54 = vadd.f32 %v2756_v31, %v2620_v0  ;;  %v1754_v4 = vld [vmem:[#allocation2 + $0xf8] sm:$0xff]  ;;  %v7231_v28 = vmul.f32 0.16666667, %v1484_v19  ;;  %v2757_v3 = vmul.f32 %v7243_v33, %v7210_v57 }
 0x2e0   : > { %v7183_v9 = vpop.f32.mrb[65].mxu0  ;;  %v7229_v11 = vld [vmem:[#allocation2 + $0xf2] sm:$0xff]  ;;  %v2422_v0 = vadd.f32 %v2358_v49, %v2222_v39  ;;  %v1825_v19 = vmul.f32 %v7152_v56, %v1754_v4  ;;  %v3545_v49 = vadd.f32 %v7175_v2, %v7178_v32  ;;  %v7275_v32 = vld [vmem:[#allocation9 + $0x7] ss:$0 sm:$0xff] }
 0x2e1   : > { %9680 = vst [vmem:[#allocation77_spill] sm:$0xff] %v7183_v9  ;;  %v7196_v17 = vpop.f32.mrb[66].mxu0  ;;  %v2421_v9 = vadd.f32 %v2357_v62, %v2221_v59  ;;  %v2957_v59 = vmul.f32 %v6672_v7, %v1753_v50  ;;  %1690 = vst [vmem:[#allocation2 + $0x111] sm:$0xff] %v7231_v28 }
 0x2e2   : > { %9681 = vst [vmem:[#allocation78_spill] sm:$0xff] %v7196_v17  ;;  %v7204_v53 = vpop.f32.mrb[67].mxu0 }
 0x2e3   : > { %9682 = vst [vmem:[#allocation79_spill] sm:$0xff] %v7204_v53  ;;  %v3156_v53 = vmul.f32 %v6679_v22, %v7124_v48  ;;  %v2621_v14 = vadd.f32 %v2557_v1, %v2421_v9  ;;  %v1960_v48 = vmul.f32 %v7166_v15, %v7128_v27  ;;  %v7235_v9 = vld [vmem:[#allocation9 + $0x4] ss:$0 sm:$0xff]  ;;  %v3021_v62 = vadd.f32 %v2957_v59, %v2820_v54 }
 0x2e4   : > { %v2558_v7 = vmul.f32 %v7235_v9, %v7128_v27  ;;  %v1961_v59 = vmul.f32 %v7166_v15, %v7162_v37 }
 0x2e5   : > { %v7225_v55 = vadd.f32 %v3156_v53, %v3020_v20  ;;  %v3157_v20 = vmul.f32 %v6679_v22, %v7128_v27  ;;  %v2223_v53 = vadd.f32 %v2159_v41, %v2023_v5  ;;  %v2024_v16 = vadd.f32 %v1960_v48, %v1824_v10  ;;  %v1755_v41 = vld [vmem:[#allocation2 + $0x108] sm:$0xff] }
 0x2e6   : > { %v2622_v39 = vadd.f32 %v2558_v7, %v2422_v0  ;;  %v2160_v22 = vmul.f32 %v7199_v36, %v7229_v11  ;;  %v2359_v27 = vmul.f32 %v7219_v51, %v1754_v4  ;;  %v3349_v10 = vmul.f32 %v6905_v29, %v6913_v25 }
 0x2e7   : > { %v7233_v1 = vpop.f32.mrb[68].mxu0  ;;  %v7251_v54 = vadd.f32 %v3157_v20, %v3021_v62  ;;  %v1159_v48 = vadd.f32 %v7156_v8, %v6940_v63  ;;  %v2821_v0 = vadd.f32 %v2757_v3, %v2621_v14  ;;  %v2559_v62 = vmul.f32 %v7235_v9, %v7162_v37  ;;  %v7268_v20 = vld [vmem:[#allocation9 + $0x6] ss:$0 sm:$0xff] }
 0x2e8   : > { %9683 = vst [vmem:[#allocation80_spill] sm:$0xff] %v7233_v1  ;;  %v7241_v50 = vpop.f32.mrb[69].mxu0  ;;  %v2423_v7 = vadd.f32 %v2359_v27, %v2223_v53  ;;  %v2025_v2 = vadd.f32 %v1961_v59, %v1825_v19  ;;  %v2758_v25 = vmul.f32 %v7243_v33, %v7229_v11  ;;  %v3158_v63 = vmul.f32 %v7275_v32, %v7162_v37 }
 0x2e9   : > { %9684 = vst [vmem:[#allocation81_spill] sm:$0xff] %v7241_v50  ;;  %v7249_v31 = vpop.f32.mrb[70].mxu0  ;;  %9686 = vst [vmem:[#allocation83_spill] sm:$0xff] %v7251_v54  ;;  %v7271_v50 = vld [vmem:[#allocation2 + $0xfa] sm:$0xff]  ;;  %v1357_v14 = vmax.f32 %v7194_v45, 0.0  ;;  %v2224_v53 = vadd.f32 %v2160_v22, %v2024_v16  ;;  %v1294_v19 = vadd.f32 3.0, %v1159_v48  ;;  %v1160_v59 = vadd.f32 %v7156_v8, %v6977_v43 }
 0x2ea   : > { %9685 = vst [vmem:[#allocation82_spill] sm:$0xff] %v7249_v31  ;;  %v7256_v5 = vpop.f32.mrb[71].mxu0  ;;  %v2623_v3 = vadd.f32 %v2559_v62, %v2423_v7  ;;  %v2360_v31 = vmul.f32 %v7219_v51, %v1755_v41  ;;  %v2822_v1 = vadd.f32 %v2758_v25, %v2622_v39  ;;  %v2161_v54 = vmul.f32 %v7199_v36, %v7271_v50  ;;  %v1756_v22 = vld [vmem:[#allocation2 + $0x110] sm:$0xff] }
 0x2eb   : > { %9687 = vst [vmem:[#allocation84_spill] sm:$0xff] %v7256_v5  ;;  %v2958_v5 = vmul.f32 %v7268_v20, %v1754_v4  ;;  %v2959_v4 = vmul.f32 %v7268_v20, %v1755_v41  ;;  %v2560_v16 = vmul.f32 %v7235_v9, %v7170_v23  ;;  %v7296_v39 = vadd.f32 %v6952_v12, %v7186_v30 }
 0x2ec   : > { %v2424_v45 = vadd.f32 %v2360_v31, %v2224_v53  ;;  %v3413_v43 = vadd.f32 %v3349_v10, %v6907_v52  ;;  %v3159_v7 = vmul.f32 %v7275_v32, %v7170_v23  ;;  %v2225_v25 = vadd.f32 %v2161_v54, %v2025_v2 }
 0x2ed   : > { %v3022_v27 = vadd.f32 %v2958_v5, %v2821_v0  ;;  %9689 = vst [vmem:[#allocation86_spill] sm:$0xff] %v7296_v39  ;;  %v3023_v0 = vadd.f32 %v2959_v4, %v2822_v1  ;;  %v2759_v31 = vmul.f32 %v7243_v33, %v7271_v50  ;;  %v2361_v53 = vmul.f32 %v7219_v51, %v1756_v22 }
 0x2ee   : > { %v1358_v52 = vmax.f32 %v1294_v19, 0.0  ;;  %v1295_v1 = vadd.f32 3.0, %v1160_v59  ;;  %v2960_v54 = vmul.f32 %v7268_v20, %v1756_v22  ;;  %v3350_v2 = vmul.f32 %v6905_v29, %v6969_v13 }
 0x2ef   : > { %v7284_v17 = vpop.f32.mrb[72].mxu0  ;;  %v7288_v37 = vadd.f32 %v3158_v63, %v3022_v27  ;;  %v7305_v63 = vadd.f32 %v2560_v16, %v2424_v45  ;;  %v7310_v30 = vadd.f32 %v3159_v7, %v3023_v0  ;;  %v2823_v10 = vadd.f32 %v2759_v31, %v2623_v3 }
 0x2f0   : > { %v7292_v5 = vpop.f32.mrb[73].mxu0  ;;  %v2425_v4 = vadd.f32 %v2361_v53, %v2225_v25  ;;  %v7318_v45 = vadd.f32 %v6952_v12, %v3413_v43  ;;  %v3414_v3 = vadd.f32 %v3350_v2, %v6938_v58  ;;  %v1422_v7 = vmin.f32 %v1358_v52, 6.0 }
 0x2f1   : > { %9688 = vst [vmem:[#allocation85_spill] sm:$0xff] %v7292_v5  ;;  %v7301_v62 = vpop.f32.mrb[74].mxu0  ;;  %v1421_v5 = vmin.f32 %v1357_v14, 6.0  ;;  %v3024_v0 = vadd.f32 %v2960_v54, %v2823_v10  ;;  %v3160_v14 = vmul.f32 %v7275_v32, %v7231_v28  ;;  %v1359_v25 = vmax.f32 %v1295_v1, 0.0 }
 0x2f2   : > { %9690 = vst [vmem:[#allocation87_spill] sm:$0xff] %v7301_v62  ;;  %v7308_v27 = vpop.f32.mrb[75].mxu0  ;;  %v2561_v62 = vmul.f32 %v7235_v9, %v7231_v28  ;;  %9692 = vst [vmem:[#allocation89_spill] sm:$0xff] %v7318_v45  ;;  %v3546_v53 = vadd.f32 %v3545_v49, %v7296_v39  ;;  %v3351_v13 = vmul.f32 %v6905_v29, %v7004_v61  ;;  %v7341_v49 = vld [vmem:[#allocation2 + $0x10a] sm:$0xff] }
 0x2f3   : > { %9691 = vst [vmem:[#allocation88_spill] sm:$0xff] %v7308_v27  ;;  %v1485_v19 = vmul.f32 %v1421_v5, %v7160_v18  ;;  %v7331_v43 = vadd.f32 %v3160_v14, %v3024_v0  ;;  %v1826_v58 = vmul.f32 %v7152_v56, %v1755_v41  ;;  %v1486_v18 = vmul.f32 %v1422_v7, %v1159_v48  ;;  %v9699_v0 = vld [vmem:[#allocation60_spill] sm:$0xff]  ;;  %v7354_v27 = vld [vmem:[#allocation2 + $0x112] sm:$0xff] }
 0x2f4   : > { %v7320_v16 = vadd.f32 %v2561_v62, %v2425_v4  ;;  %v1161_v62 = vadd.f32 %v7156_v8, %v6992_v42  ;;  %v1423_v5 = vmin.f32 %v1359_v25, 6.0  ;;  %v1827_v1 = vmul.f32 %v7152_v56, %v1756_v22 }
 0x2f5   : > { %9694 = vst [vmem:[#allocation91_spill] sm:$0xff] %v7331_v43  ;;  %v1549_v4 = vmul.f32 0.16666667, %v1485_v19  ;;  %v7346_v2 = vadd.f32 %v6952_v12, %v3414_v3  ;;  %v3547_v42 = vadd.f32 %v3546_v53, %v7318_v45  ;;  %v3415_v14 = vadd.f32 %v3351_v13, %v9699_v0 }
 0x2f6   : > { %v1296_v54 = vadd.f32 3.0, %v1161_v62  ;;  %v1962_v41 = vmul.f32 %v7166_v15, %v7170_v23  ;;  %v1963_v48 = vmul.f32 %v7166_v15, %v7231_v28  ;;  %v1550_v22 = vmul.f32 0.16666667, %v1486_v18 }
 0x2f7   : > { %v7326_v31 = vpop.f32.mrb[76].mxu0  ;;  %9698 = vst [vmem:[#allocation95_spill] sm:$0xff] %v7346_v2  ;;  %1691 = vst [vmem:[#allocation2 + $0x121] sm:$0xff] %v1549_v4  ;;  %v1487_v19 = vmul.f32 %v1423_v5, %v1160_v59  ;;  %v2162_v3 = vmul.f32 %v7199_v36, %v7341_v49  ;;  %v7360_v53 = vadd.f32 %v7156_v8, %v7029_v38 }
 0x2f8   : > { %9693 = vst [vmem:[#allocation90_spill] sm:$0xff] %v7326_v31  ;;  %v7335_v10 = vpop.f32.mrb[77].mxu0  ;;  %v1360_v7 = vmax.f32 %v1296_v54, 0.0  ;;  %v2026_v25 = vadd.f32 %v1962_v41, %v1826_v58  ;;  %v3352_v23 = vmul.f32 %v6905_v29, %v7057_v24  ;;  %v2027_v13 = vadd.f32 %v1963_v48, %v1827_v1  ;;  %1692 = vst [vmem:[#allocation2 + $0x129] sm:$0xff] %v1550_v22 }
 0x2f9   : > { %9695 = vst [vmem:[#allocation92_spill] sm:$0xff] %v7335_v10  ;;  %v7338_v52 = vpop.f32.mrb[78].mxu0  ;;  %v7365_v28 = vadd.f32 %v3547_v42, %v7346_v2  ;;  %v7367_v59 = vmul.f32 0.16666667, %v1487_v19  ;;  %v7375_v54 = vadd.f32 %v6952_v12, %v3415_v14  ;;  %v2163_v38 = vmul.f32 %v7199_v36, %v7354_v27 }
 0x2fa   : > { %9696 = vst [vmem:[#allocation93_spill] sm:$0xff] %v7338_v52  ;;  %v7343_v61 = vpop.f32.mrb[79].mxu0  ;;  %v1424_v58 = vmin.f32 %v1360_v7, 6.0  ;;  %v7372_v5 = vadd.f32 %v3352_v23, %v7035_v40  ;;  %v2760_v24 = vmul.f32 %v7243_v33, %v7341_v49  ;;  %v3353_v42 = vmul.f32 %v6905_v29, %v7094_v35 }
 0x2fb   : > { %9697 = vst [vmem:[#allocation94_spill] sm:$0xff] %v7343_v61  ;;  %9701 = vst [vmem:[#allocation96_spill] sm:$0xff] %v7375_v54  ;;  %v2226_v0 = vadd.f32 %v2162_v3, %v2026_v25  ;;  %v1297_v40 = vadd.f32 3.0, %v7360_v53  ;;  %v2227_v14 = vadd.f32 %v2163_v38, %v2027_v13  ;;  %v2761_v19 = vmul.f32 %v7243_v33, %v7354_v27 }
 0x2fc   : > { %1693 = vst [vmem:[#allocation2 + $0x139] sm:$0xff] %v7367_v59  ;;  %v1488_v41 = vmul.f32 %v1424_v58, %v1161_v62  ;;  %v2824_v7 = vadd.f32 %v2760_v24, %v7305_v63  ;;  %v1964_v38 = vmul.f32 %v7166_v15, %v1549_v4  ;;  %v2562_v63 = vmul.f32 %v7235_v9, %v1549_v4 }
 0x2fd   : > { %v2825_v13 = vadd.f32 %v2761_v19, %v7320_v16  ;;  %v3161_v24 = vmul.f32 %v7275_v32, %v1549_v4 }
 0x2fe   : > { %v1757_v23 = vld [vmem:[#allocation2 + $0x120] sm:$0xff]  ;;  %v7401_v58 = vmul.f32 0.16666667, %v1488_v41 }
 0x2ff   : > { %v7369_v18 = vpop.f32.mrb[80].mxu0  ;;  %v1828_v25 = vmul.f32 %v7152_v56, %v1757_v23  ;;  %v2362_v62 = vmul.f32 %v7219_v51, %v1757_v23  ;;  %v2961_v3 = vmul.f32 %v7268_v20, %v1757_v23  ;;  %v1758_v10 = vld [vmem:[#allocation2 + $0x128] sm:$0xff]  ;;  %v1361_v23 = vmax.f32 %v1297_v40, 0.0 }
 0x300   : > { %9700 = vst [vmem:[#allocation60_spill] sm:$0xff] %v7369_v18  ;;  %v7381_v1 = vpop.f32.mrb[81].mxu0  ;;  %v7408_v2 = vld [vmem:[#allocation2 + $0x122] sm:$0xff]  ;;  %1694 = vst [vmem:[#allocation2 + $0x141] sm:$0xff] %v7401_v58  ;;  %v1829_v45 = vmul.f32 %v7152_v56, %v1758_v10  ;;  %v2363_v19 = vmul.f32 %v7219_v51, %v1758_v10 }
 0x301   : > { %9702 = vst [vmem:[#allocation97_spill] sm:$0xff] %v7381_v1  ;;  %v7387_v48 = vpop.f32.mrb[82].mxu0  ;;  %v7394_v1 = vadd.f32 %v7156_v8, %v7041_v44  ;;  %v2426_v44 = vadd.f32 %v2362_v62, %v2226_v0  ;;  %v3025_v61 = vadd.f32 %v2961_v3, %v2824_v7  ;;  %9705 = vst [vmem:[#allocation100_spill] sm:$0xff] %v7408_v2  ;;  %v9707_v7 = vld [vmem:[#allocation68_spill] sm:$0xff] }
 0x302   : > { %9703 = vst [vmem:[#allocation98_spill] sm:$0xff] %v7387_v48  ;;  %v7396_v35 = vpop.f32.mrb[83].mxu0  ;;  %v2028_v41 = vadd.f32 %v1964_v38, %v1828_v25  ;;  %v2164_v16 = vmul.f32 %v7199_v36, %v7408_v2  ;;  %v7420_v62 = vadd.f32 %v7156_v8, %v9707_v7  ;;  %v2427_v40 = vadd.f32 %v2363_v19, %v2227_v14  ;;  %v9710_v7 = vld [vmem:[#allocation71_spill] sm:$0xff] }
 0x303   : > { %9704 = vst [vmem:[#allocation99_spill] sm:$0xff] %v7396_v35  ;;  %v1965_v35 = vmul.f32 %v7166_v15, %v1550_v22  ;;  %v2626_v39 = vadd.f32 %v2562_v63, %v2426_v44  ;;  %v7415_v4 = vadd.f32 %v3161_v24, %v3025_v61  ;;  %v1298_v0 = vadd.f32 3.0, %v7394_v1  ;;  %v1759_v18 = vld [vmem:[#allocation2 + $0x138] sm:$0xff]  ;;  %v7429_v63 = vld [vmem:[#allocation2 + $0x12a] sm:$0xff] }
 0x304   : > { %v2563_v25 = vmul.f32 %v7235_v9, %v1550_v22  ;;  %v2962_v38 = vmul.f32 %v7268_v20, %v1758_v10  ;;  %v3162_v48 = vmul.f32 %v7275_v32, %v1550_v22  ;;  %v2762_v24 = vmul.f32 %v7243_v33, %v7408_v2 }
 0x305   : > { %9706 = vst [vmem:[#allocation101_spill] sm:$0xff] %v7415_v4  ;;  %v2029_v61 = vadd.f32 %v1965_v35, %v1829_v45  ;;  %v1425_v44 = vmin.f32 %v1361_v23, 6.0  ;;  %v2228_v19 = vadd.f32 %v2164_v16, %v2028_v41  ;;  %v2364_v22 = vmul.f32 %v7219_v51, %v1759_v18  ;;  %v9712_v16 = vld [vmem:[#allocation66_spill] sm:$0xff] }
 0x306   : > { %v2627_v10 = vadd.f32 %v2563_v25, %v2427_v40  ;;  %v3026_v31 = vadd.f32 %v2962_v38, %v2825_v13  ;;  %v2826_v45 = vadd.f32 %v2762_v24, %v2626_v39  ;;  %v2963_v35 = vmul.f32 %v7268_v20, %v1759_v18 }
 0x307   : > { %v7422_v3 = vpop.f32.mrb[84].mxu0  ;;  %v1299_v2 = vadd.f32 3.0, %v7420_v62  ;;  %v2165_v23 = vmul.f32 %v7199_v36, %v7429_v63  ;;  %v2428_v43 = vadd.f32 %v2364_v22, %v2228_v19  ;;  %v2564_v41 = vmul.f32 %v7235_v9, %v7367_v59  ;;  %v1760_v13 = vld [vmem:[#allocation2 + $0x140] sm:$0xff] }
 0x308   : > { %9708 = vst [vmem:[#allocation68_spill] sm:$0xff] %v7422_v3  ;;  %v7427_v52 = vpop.f32.mrb[85].mxu0  ;;  %v7435_v3 = vadd.f32 %v7156_v8, %v9710_v7  ;;  %v7446_v7 = vadd.f32 %v3162_v48, %v3026_v31  ;;  %v3417_v40 = vadd.f32 %v3353_v42, %v9712_v16  ;;  %v3027_v25 = vadd.f32 %v2963_v35, %v2826_v45  ;;  %v7458_v48 = vpop.f32.mrb[0].mxu1 }
 0x309   : > { %9709 = vst [vmem:[#allocation102_spill] sm:$0xff] %v7427_v52  ;;  %v7437_v14 = vpop.f32.mrb[86].mxu0  ;;  %v1362_v52 = vmax.f32 %v1298_v0, 0.0  ;;  %v3163_v39 = vmul.f32 %v7275_v32, %v7367_v59  ;;  %v2229_v38 = vadd.f32 %v2165_v23, %v2029_v61  ;;  %v7454_v24 = vadd.f32 %v2564_v41, %v2428_v43  ;;  %9713 = vst [vmem:[#allocation66_spill] sm:$0xff] %v7458_v48  ;;  %v7476_v41 = vpop.f32.mrb[1].mxu1 }
 0x30a   : > { %v7440_v4 = vpop.f32.mrb[87].mxu0  ;;  %v1300_v0 = vadd.f32 3.0, %v7435_v3  ;;  %v1489_v31 = vmul.f32 %v1425_v44, %v7360_v53  ;;  %v2763_v19 = vmul.f32 %v7243_v33, %v7429_v63  ;;  %v1363_v45 = vmax.f32 %v1299_v2, 0.0  ;;  %9716 = vst [vmem:[#allocation105_spill] sm:$0xff] %v7476_v41 }
 0x30b   : > { %9711 = vst [vmem:[#allocation71_spill] sm:$0xff] %v7440_v4  ;;  %v2365_v4 = vmul.f32 %v7219_v51, %v1760_v13  ;;  %v7462_v22 = vadd.f32 %v3163_v39, %v3027_v25  ;;  %v1426_v42 = vmin.f32 %v1362_v52, 6.0  ;;  %v7468_v61 = vadd.f32 %v6952_v12, %v7372_v5 }
 0x30c   : > { %v3549_v43 = vadd.f32 %v7365_v28, %v7375_v54  ;;  %v2565_v53 = vmul.f32 %v7235_v9, %v7401_v58  ;;  %v7479_v52 = vadd.f32 %v6952_v12, %v3417_v40  ;;  %v2827_v2 = vadd.f32 %v2763_v19, %v2627_v10 }
 0x30d   : > { %9714 = vst [vmem:[#allocation103_spill] sm:$0xff] %v7468_v61  ;;  %v2429_v23 = vadd.f32 %v2365_v4, %v2229_v38  ;;  %v2964_v16 = vmul.f32 %v7268_v20, %v1760_v13  ;;  %v1364_v25 = vmax.f32 %v1300_v0, 0.0  ;;  %v1830_v39 = vmul.f32 %v7152_v56, %v1759_v18 }
 0x30e   : > { %9717 = vst [vmem:[#allocation106_spill] sm:$0xff] %v7479_v52  ;;  %v3164_v4 = vmul.f32 %v7275_v32, %v7401_v58  ;;  %v1553_v38 = vmul.f32 0.16666667, %v1489_v31  ;;  %v1831_v41 = vmul.f32 %v7152_v56, %v1760_v13  ;;  %v1490_v40 = vmul.f32 %v1426_v42, %v7394_v1 }
 0x30f   : > { %v7464_v35 = vpop.f32.mrb[88].mxu0  ;;  %v2629_v28 = vadd.f32 %v2565_v53, %v2429_v23  ;;  %v1427_v10 = vmin.f32 %v1363_v45, 6.0  ;;  %v3550_v19 = vadd.f32 %v3549_v43, %v7468_v61  ;;  %v3354_v0 = vmul.f32 %v6905_v29, %v7150_v47  ;;  %v7496_v23 = vld [vmem:[#allocation2 + $0x13a] sm:$0xff]  ;;  %v7500_v53 = vld [vmem:[#allocation2 + $0x142] sm:$0xff]  ;;  %v7506_v47 = vpop.f32.mrb[2].mxu1 }
 0x310   : > { %v7474_v44 = vpop.f32.mrb[89].mxu0  ;;  %v1966_v18 = vmul.f32 %v7166_v15, %v7367_v59  ;;  %1695 = vst [vmem:[#allocation2 + $0x151] sm:$0xff] %v1553_v38  ;;  %v1967_v31 = vmul.f32 %v7166_v15, %v7401_v58  ;;  %v1554_v1 = vmul.f32 0.16666667, %v1490_v40  ;;  %v1428_v43 = vmin.f32 %v1364_v25, 6.0  ;;  %9719 = vst [vmem:[#allocation108_spill] sm:$0xff] %v7506_v47 }
 0x311   : > { %9715 = vst [vmem:[#allocation104_spill] sm:$0xff] %v7474_v44  ;;  %v7482_v5 = vpop.f32.mrb[90].mxu0  ;;  %v3028_v44 = vadd.f32 %v2964_v16, %v2827_v2  ;;  %v1491_v42 = vmul.f32 %v1427_v10, %v7420_v62  ;;  %v3418_v45 = vadd.f32 %v3354_v0, %v7122_v60  ;;  %v7509_v59 = vadd.f32 %v3550_v19, %v7479_v52 }
 0x312   : > { %v7487_v54 = vpop.f32.mrb[91].mxu0  ;;  %v2030_v2 = vadd.f32 %v1966_v18, %v1830_v39  ;;  %v2031_v16 = vadd.f32 %v1967_v31, %v1831_v41  ;;  %v2166_v58 = vmul.f32 %v7199_v36, %v7496_v23  ;;  %1696 = vst [vmem:[#allocation2 + $0x159] sm:$0xff] %v1554_v1  ;;  %v3355_v62 = vmul.f32 %v6905_v29, %v7190_v46 }
 0x313   : > { %9718 = vst [vmem:[#allocation107_spill] sm:$0xff] %v7487_v54  ;;  %v7502_v13 = vadd.f32 %v3164_v4, %v3028_v44  ;;  %v7515_v44 = vpop.f32.mrb[3].mxu1  ;;  %v2167_v60 = vmul.f32 %v7199_v36, %v7500_v53  ;;  %v7521_v25 = vmul.f32 0.16666667, %v1491_v42  ;;  %v1492_v4 = vmul.f32 %v1428_v43, %v7435_v3 }
 0x314   : > { %9721 = vst [vmem:[#allocation110_spill] sm:$0xff] %v7515_v44  ;;  %v2764_v41 = vmul.f32 %v7243_v33, %v7496_v23  ;;  %v2765_v40 = vmul.f32 %v7243_v33, %v7500_v53  ;;  %v7532_v10 = vadd.f32 %v7156_v8, %v7120_v6  ;;  %v7536_v46 = vadd.f32 %v7156_v8, %v7131_v21 }
 0x315   : > { %v7541_v3 = vadd.f32 %v6952_v12, %v3418_v45  ;;  %v7545_v0 = vmul.f32 %v6905_v29, %v7210_v57  ;;  %v7548_v18 = vadd.f32 %v3355_v62, %v7140_v34  ;;  %1697 = vst [vmem:[#allocation2 + $0x169] sm:$0xff] %v7521_v25  ;;  %v7551_v6 = vmul.f32 0.16666667, %v1492_v4 }
 0x316   : > { %v2230_v21 = vadd.f32 %v2166_v58, %v2030_v2  ;;  %v2231_v42 = vadd.f32 %v2167_v60, %v2031_v16  ;;  %v2828_v43 = vadd.f32 %v2764_v41, %v7454_v24  ;;  %v2829_v44 = vadd.f32 %v2765_v40, %v2629_v28 }
 0x317   : > { %v7513_v54 = vpop.f32.mrb[92].mxu0  ;;  %9724 = vst [vmem:[#allocation113_spill] sm:$0xff] %v7541_v3  ;;  %v1761_v12 = vld [vmem:[#allocation2 + $0x150] sm:$0xff]  ;;  %v1968_v29 = vmul.f32 %v7166_v15, %v1553_v38  ;;  %1698 = vst [vmem:[#allocation2 + $0x171] sm:$0xff] %v7551_v6  ;;  %v2566_v62 = vmul.f32 %v7235_v9, %v1553_v38  ;;  %v3165_v4 = vmul.f32 %v7275_v32, %v1553_v38  ;;  %v1301_v2 = vadd.f32 3.0, %v7532_v10 }
 0x318   : > { %9720 = vst [vmem:[#allocation109_spill] sm:$0xff] %v7513_v54  ;;  %v7524_v39 = vpop.f32.mrb[93].mxu0  ;;  %v1832_v45 = vmul.f32 %v7152_v56, %v1761_v12  ;;  %v2366_v57 = vmul.f32 %v7219_v51, %v1761_v12  ;;  %v2965_v34 = vmul.f32 %v7268_v20, %v1761_v12  ;;  %v1302_v24 = vadd.f32 3.0, %v7536_v46 }
 0x319   : > { %9722 = vst [vmem:[#allocation111_spill] sm:$0xff] %v7524_v39  ;;  %v7538_v19 = vpop.f32.mrb[94].mxu0  ;;  %v1762_v58 = vld [vmem:[#allocation2 + $0x158] sm:$0xff]  ;;  %v1969_v60 = vmul.f32 %v7166_v15, %v1554_v1  ;;  %v7570_v40 = vadd.f32 %v7156_v8, %v7172_v26  ;;  %v1365_v48 = vmax.f32 %v1301_v2, 0.0 }
 0x31a   : > { %9723 = vst [vmem:[#allocation112_spill] sm:$0xff] %v7538_v19  ;;  %v7553_v31 = vpop.f32.mrb[95].mxu0  ;;  %v2430_v28 = vadd.f32 %v2366_v57, %v2230_v21  ;;  %v3029_v16 = vadd.f32 %v2965_v34, %v2828_v43  ;;  %v7566_v41 = vld [vmem:[#allocation2 + $0x152] sm:$0xff]  ;;  %v2032_v12 = vadd.f32 %v1968_v29, %v1832_v45  ;;  %v2367_v39 = vmul.f32 %v7219_v51, %v1762_v58  ;;  %v7584_v26 = vld [vmem:[#allocation2 + $0x15a] sm:$0xff] }
 0x31b   : > { %9725 = vst [vmem:[#allocation114_spill] sm:$0xff] %v7553_v31  ;;  %v1833_v31 = vmul.f32 %v7152_v56, %v1762_v58  ;;  %v2168_v38 = vmul.f32 %v7199_v36, %v7566_v41  ;;  %v2567_v57 = vmul.f32 %v7235_v9, %v1554_v1  ;;  %v3166_v34 = vmul.f32 %v7275_v32, %v1554_v1 }
 0x31c   : > { %v2630_v21 = vadd.f32 %v2566_v62, %v2430_v28  ;;  %v7578_v43 = vadd.f32 %v3165_v4, %v3029_v16  ;;  %v2431_v45 = vadd.f32 %v2367_v39, %v2231_v42  ;;  %v2966_v29 = vmul.f32 %v7268_v20, %v1762_v58  ;;  %v7587_v47 = vld [vmem:[#allocation2 + $0x168] sm:$0xff] }
 0x31d   : > { %v1366_v19 = vmax.f32 %v1302_v24, 0.0  ;;  %v2033_v62 = vadd.f32 %v1969_v60, %v1833_v31  ;;  %v2766_v4 = vmul.f32 %v7243_v33, %v7566_v41  ;;  %v2568_v1 = vmul.f32 %v7235_v9, %v7521_v25  ;;  %v7604_v31 = vpop.f32.mrb[4].mxu1 }
 0x31e   : > { %v1303_v28 = vadd.f32 3.0, %v7570_v40  ;;  %v2232_v39 = vadd.f32 %v2168_v38, %v2032_v12  ;;  %v7598_v42 = vadd.f32 %v2567_v57, %v2431_v45  ;;  %v3030_v58 = vadd.f32 %v2966_v29, %v2829_v44  ;;  %v7602_v24 = vld [vmem:[#allocation2 + $0x170] sm:$0xff]  ;;  %9731 = vst [vmem:[#allocation120_spill] sm:$0xff] %v7604_v31 }
 0x31f   : > { %v7576_v52 = vpop.f32.mrb[96].mxu0  ;;  %v2368_v2 = vmul.f32 %v7219_v51, %v7587_v47  ;;  %v2169_v60 = vmul.f32 %v7199_v36, %v7584_v26  ;;  %v3167_v12 = vmul.f32 %v7275_v32, %v7521_v25  ;;  %v1429_v57 = vmin.f32 %v1365_v48, 6.0 }
 0x320   : > { %9726 = vst [vmem:[#allocation115_spill] sm:$0xff] %v7576_v52  ;;  %v7582_v61 = vpop.f32.mrb[97].mxu0  ;;  %9730 = vst [vmem:[#allocation119_spill] sm:$0xff] %v7598_v42  ;;  %v7612_v38 = vadd.f32 %v3166_v34, %v3030_v58  ;;  %v1430_v45 = vmin.f32 %v1366_v19, 6.0  ;;  %v2369_v31 = vmul.f32 %v7219_v51, %v7602_v24  ;;  %v1367_v52 = vmax.f32 %v1303_v28, 0.0  ;;  %v9737_v28 = vld [vmem:[#allocation83_spill] sm:$0xff] }
 0x321   : > { %9727 = vst [vmem:[#allocation116_spill] sm:$0xff] %v7582_v61  ;;  %v7589_v54 = vpop.f32.mrb[98].mxu0  ;;  %v2830_v61 = vadd.f32 %v2766_v4, %v2630_v21  ;;  %v2432_v44 = vadd.f32 %v2368_v2, %v2232_v39  ;;  %v2233_v29 = vadd.f32 %v2169_v60, %v2033_v62  ;;  %v3420_v21 = vadd.f32 %v7545_v0, %v7225_v55  ;;  %v7618_v4 = vld [vmem:[#allocation11] ss:$0 sm:$0xff]  ;;  %v7624_v34 = vld [vmem:[#allocation9 + $0x8] ss:$0 sm:$0xff] }
 0x322   : > { %9728 = vst [vmem:[#allocation117_spill] sm:$0xff] %v7589_v54  ;;  %v7596_v16 = vpop.f32.mrb[99].mxu0  ;;  %v2967_v54 = vmul.f32 %v7268_v20, %v7587_v47  ;;  %v7622_v42 = vadd.f32 %v7618_v4, %v7548_v18  ;;  %v3357_v48 = vmul.f32 %v7624_v34, %v7229_v11  ;;  %v2569_v55 = vmul.f32 %v7235_v9, %v7551_v6 }
 0x323   : > { %9729 = vst [vmem:[#allocation118_spill] sm:$0xff] %v7596_v16  ;;  %v7628_v19 = vadd.f32 %v2568_v1, %v2432_v44  ;;  %v2433_v62 = vadd.f32 %v2369_v31, %v2233_v29  ;;  %v3552_v18 = vadd.f32 %v7509_v59, %v7541_v3  ;;  %v1493_v1 = vmul.f32 %v1429_v57, %v7532_v10  ;;  %v7647_v31 = vpop.f32.mrb[5].mxu1  ;;  %v9743_v10 = vld [vmem:[#allocation78_spill] sm:$0xff]  ;;  %v9754_v3 = vld [vmem:[#allocation91_spill] sm:$0xff] }
 0x324   : > { %v3031_v16 = vadd.f32 %v2967_v54, %v2830_v61  ;;  %9732 = vst [vmem:[#allocation121_spill] sm:$0xff] %v7622_v42  ;;  %v3421_v39 = vadd.f32 %v3357_v48, %v9737_v28  ;;  %v1431_v2 = vmin.f32 %v1367_v52, 6.0  ;;  %9740 = vst [vmem:[#allocation127_spill] sm:$0xff] %v7647_v31  ;;  %v7650_v60 = vadd.f32 %v7618_v4, %v3420_v21  ;;  %v7655_v44 = vpop.f32.mrb[6].mxu1  ;;  %v1900_v52 = vld [vmem:[#allocation2 + $0x1b1] sm:$0xff] }
 0x325   : > { %9733 = vst [vmem:[#allocation122_spill] sm:$0xff] %v7628_v19  ;;  %v7643_v11 = vadd.f32 %v2569_v55, %v2433_v62  ;;  %v3358_v59 = vmul.f32 %v7624_v34, %v7271_v50  ;;  %9742 = vst [vmem:[#allocation129_spill] sm:$0xff] %v7655_v44  ;;  %v1557_v29 = vmul.f32 0.16666667, %v1493_v1  ;;  %v3359_v21 = vmul.f32 %v7624_v34, %v7341_v49  ;;  %v9755_v19 = vld [vmem:[#allocation100_spill] sm:$0xff] }
 0x326   : > { %v7632_v61 = vadd.f32 %v3167_v12, %v3031_v16  ;;  %v1494_v16 = vmul.f32 %v1430_v45, %v7536_v46  ;;  %9741 = vst [vmem:[#allocation128_spill] sm:$0xff] %v7650_v60  ;;  %v3553_v12 = vadd.f32 %v3552_v18, %v7622_v42  ;;  %v1495_v62 = vmul.f32 %v1431_v2, %v7570_v40  ;;  %v9745_v40 = vld [vmem:[#allocation80_spill] sm:$0xff]  ;;  %v1901_v42 = vld [vmem:[#allocation2 + $0x1b9] sm:$0xff] }
 0x327   : > { %v7630_v54 = vpop.f32.mrb[100].mxu0  ;;  %9739 = vst [vmem:[#allocation126_spill] sm:$0xff] %v7643_v11  ;;  %v1169_v46 = vadd.f32 %v7156_v8, %v9743_v10  ;;  %v3422_v57 = vadd.f32 %v3358_v59, %v7288_v37  ;;  %v7662_v45 = vadd.f32 %v7618_v4, %v3421_v39  ;;  %1699 = vst [vmem:[#allocation2 + $0x181] sm:$0xff] %v1557_v29  ;;  %v7673_v37 = vld [vmem:[#allocation2] sm:$0xff] }
 0x328   : > { %9734 = vst [vmem:[#allocation123_spill] sm:$0xff] %v7630_v54  ;;  %9735 = vst [vmem:[#allocation124_spill] sm:$0xff] %v7632_v61  ;;  %v7636_v0 = vpop.f32.mrb[101].mxu0  ;;  %v1558_v48 = vmul.f32 0.16666667, %v1494_v16  ;;  %v3554_v55 = vadd.f32 %v3553_v12, %v7650_v60  ;;  %v1170_v28 = vadd.f32 %v7156_v8, %v9745_v40  ;;  %v3423_v1 = vadd.f32 %v3359_v21, %v7310_v30  ;;  %v9746_v16 = vld [vmem:[#allocation82_spill] sm:$0xff] }
 0x329   : > { %9736 = vst [vmem:[#allocation125_spill] sm:$0xff] %v7636_v0  ;;  %v7641_v58 = vpop.f32.mrb[102].mxu0  ;;  %9744 = vst [vmem:[#allocation78_spill] sm:$0xff] %v7662_v45  ;;  %v7666_v50 = vmul.f32 0.16666667, %v1495_v62  ;;  %v1304_v18 = vadd.f32 3.0, %v1169_v46  ;;  %v1836_v39 = vmul.f32 %v7673_v37, %v7152_v56  ;;  %v1972_v49 = vmul.f32 %v7166_v15, %v1900_v52 }
 0x32a   : > { %9738 = vst [vmem:[#allocation83_spill] sm:$0xff] %v7641_v58  ;;  %1700 = vst [vmem:[#allocation2 + $0x189] sm:$0xff] %v1558_v48  ;;  %v1171_v2 = vadd.f32 %v7156_v8, %v9746_v16  ;;  %v7680_v59 = vpop.f32.mrb[103].mxu0  ;;  %v2100_v12 = vld [vmem:[#allocation2 + $0x1b2] sm:$0xff]  ;;  %v1305_v48 = vadd.f32 3.0, %v1170_v28  ;;  %v1172_v30 = vadd.f32 %v7156_v8, %v7284_v17  ;;  %v7684_v62 = vpop.f32.mrb[7].mxu1  ;;  %v7687_v10 = vadd.f32 %v7618_v4, %v3422_v57 }
 0x32b   : > { %1701 = vst [vmem:[#allocation2 + $0x1c9] sm:$0xff] %v7666_v50  ;;  %9747 = vst [vmem:[#allocation80_spill] sm:$0xff] %v7680_v59  ;;  %v1368_v29 = vmax.f32 %v1304_v18, 0.0  ;;  %v3555_v21 = vadd.f32 %v3554_v55, %v7662_v45  ;;  %v9750_v52 = vld [vmem:[#allocation87_spill] sm:$0xff]  ;;  %v7692_v16 = vpop.f32.mrb[8].mxu1  ;;  %v3360_v18 = vmul.f32 %v7624_v34, %v7354_v27  ;;  %v7697_v17 = vadd.f32 %v7618_v4, %v3423_v1 }
 0x32c   : > { %9748 = vst [vmem:[#allocation82_spill] sm:$0xff] %v7684_v62  ;;  %9749 = vst [vmem:[#allocation130_spill] sm:$0xff] %v7687_v10  ;;  %v1306_v40 = vadd.f32 3.0, %v1171_v2  ;;  %v1173_v31 = vadd.f32 %v7156_v8, %v9750_v52  ;;  %v1369_v0 = vmax.f32 %v1305_v48, 0.0  ;;  %v1307_v60 = vadd.f32 3.0, %v1172_v30  ;;  %v7700_v45 = vpop.f32.mrb[9].mxu1 }
 0x32d   : > { %9751 = vst [vmem:[#allocation87_spill] sm:$0xff] %v7692_v16  ;;  %v1432_v59 = vmin.f32 %v1368_v29, 6.0  ;;  %9752 = vst [vmem:[#allocation131_spill] sm:$0xff] %v7697_v17  ;;  %v2036_v62 = vadd.f32 %v1972_v49, %v1836_v39  ;;  %v2172_v57 = vmul.f32 %v7199_v36, %v2100_v12  ;;  %v3424_v52 = vadd.f32 %v3360_v18, %v9754_v3  ;;  %v2101_v54 = vld [vmem:[#allocation2 + $0x1ba] sm:$0xff] }
 0x32e   : > { %v1370_v55 = vmax.f32 %v1306_v40, 0.0  ;;  %9753 = vst [vmem:[#allocation132_spill] sm:$0xff] %v7700_v45  ;;  %v1433_v11 = vmin.f32 %v1369_v0, 6.0  ;;  %v1371_v16 = vmax.f32 %v1307_v60, 0.0  ;;  %v3556_v27 = vadd.f32 %v3555_v21, %v7687_v10 }
 0x32f   : > { %v1496_v61 = vmul.f32 %v1432_v59, %v1169_v46  ;;  %v1308_v29 = vadd.f32 3.0, %v1173_v31  ;;  %v1973_v1 = vmul.f32 %v7166_v15, %v1901_v42  ;;  %v3361_v12 = vmul.f32 %v7624_v34, %v9755_v19  ;;  %v7708_v46 = vpop.f32.mrb[104].mxu0 }
 0x330   : > { %v1497_v58 = vmul.f32 %v1433_v11, %v1170_v28  ;;  %v1434_v49 = vmin.f32 %v1370_v55, 6.0  ;;  %v2236_v40 = vadd.f32 %v2172_v57, %v2036_v62  ;;  %v1435_v3 = vmin.f32 %v1371_v16, 6.0  ;;  %v9757_v11 = vld [vmem:[#allocation101_spill] sm:$0xff]  ;;  %v7715_v19 = vpop.f32.mrb[105].mxu0  ;;  %v9759_v57 = vld [vmem:[#allocation90_spill] sm:$0xff] }
 0x331   : > { %v1560_v44 = vmul.f32 0.16666667, %v1496_v61  ;;  %v7711_v0 = vadd.f32 %v7618_v4, %v3424_v52  ;;  %v3557_v60 = vadd.f32 %v3556_v27, %v7697_v17  ;;  %v3425_v28 = vadd.f32 %v3361_v12, %v9757_v11  ;;  %9758 = vst [vmem:[#allocation100_spill] sm:$0xff] %v7715_v19  ;;  %v7724_v52 = vpop.f32.mrb[106].mxu0 }
 0x332   : > { %v1767_v48 = vld [vmem:[#allocation2 + $0x1c8] sm:$0xff]  ;;  %v1561_v61 = vmul.f32 0.16666667, %v1497_v58  ;;  %v1498_v42 = vmul.f32 %v1434_v49, %v1171_v2  ;;  %v1499_v59 = vmul.f32 %v1435_v3, %v1172_v30  ;;  %v1372_v21 = vmax.f32 %v1308_v29, 0.0  ;;  %9760 = vst [vmem:[#allocation101_spill] sm:$0xff] %v7724_v52  ;;  %v7743_v49 = vpop.f32.mrb[10].mxu1 }
 0x333   : > { %v2372_v45 = vmul.f32 %v7219_v51, %v1767_v48  ;;  %9756 = vst [vmem:[#allocation91_spill] sm:$0xff] %v7711_v0  ;;  %1702 = vst [vmem:[#allocation2 + $0x1d1] sm:$0xff] %v1560_v44  ;;  %v2037_v62 = vadd.f32 %v1973_v1, %v1836_v39  ;;  %v2173_v18 = vmul.f32 %v7199_v36, %v2101_v54  ;;  %v9763_v3 = vld [vmem:[#allocation93_spill] sm:$0xff] }
 0x334   : > { %1703 = vst [vmem:[#allocation2 + $0x1e1] sm:$0xff] %v1561_v61  ;;  %v7718_v16 = vmul.f32 0.16666667, %v1498_v42  ;;  %v7722_v55 = vadd.f32 %v7156_v8, %v9759_v57  ;;  %v1838_v58 = vmul.f32 %v7152_v56, %v1767_v48  ;;  %v7727_v27 = vmul.f32 0.16666667, %v1499_v59  ;;  %9762 = vst [vmem:[#allocation133_spill] sm:$0xff] %v7743_v49 }
 0x335   : > { %v2436_v2 = vadd.f32 %v2372_v45, %v2236_v40  ;;  %v1436_v30 = vmin.f32 %v1372_v21, 6.0  ;;  %v7730_v29 = vadd.f32 %v3557_v60, %v7711_v0  ;;  %v3362_v54 = vmul.f32 %v7624_v34, %v7429_v63 }
 0x336   : > { %1704 = vst [vmem:[#allocation2 + $0x1e9] sm:$0xff] %v7718_v16  ;;  %v7736_v39 = vadd.f32 %v7618_v4, %v3425_v28  ;;  %v1974_v1 = vmul.f32 %v7166_v15, %v7666_v50  ;;  %v2572_v45 = vmul.f32 %v7235_v9, %v7666_v50  ;;  %1705 = vst [vmem:[#allocation2 + $0x1f9] sm:$0xff] %v7727_v27 }
 0x337   : > { %v1500_v48 = vmul.f32 %v1436_v30, %v1173_v31  ;;  %v7746_v12 = vadd.f32 %v3362_v54, %v7446_v7  ;;  %v7750_v63 = vmul.f32 %v7624_v34, %v7496_v23  ;;  %v2237_v40 = vadd.f32 %v2173_v18, %v2037_v62 }
 0x338   : > { %9761 = vst [vmem:[#allocation90_spill] sm:$0xff] %v7736_v39  ;;  %v7754_v60 = vadd.f32 %v7156_v8, %v9763_v3  ;;  %v2038_v42 = vadd.f32 %v1974_v1, %v1838_v58  ;;  %v2636_v11 = vadd.f32 %v2572_v45, %v2436_v2  ;;  %v1309_v31 = vadd.f32 3.0, %v7722_v55 }
 0x339   : > { %v7756_v59 = vmul.f32 0.16666667, %v1500_v48  ;;  %v1975_v21 = vmul.f32 %v7166_v15, %v1560_v44  ;;  %v2573_v8 = vmul.f32 %v7235_v9, %v1560_v44  ;;  %v1976_v2 = vmul.f32 %v7166_v15, %v1561_v61 }
 0x33a   : > { %v1768_v50 = vld [vmem:[#allocation2 + $0x1d0] sm:$0xff]  ;;  %v2574_v30 = vmul.f32 %v7235_v9, %v1561_v61  ;;  %v3173_v48 = vmul.f32 %v7275_v32, %v1561_v61  ;;  %v1373_v52 = vmax.f32 %v1309_v31, 0.0 }
 0x33b   : > { %v2102_v28 = vld [vmem:[#allocation2 + $0x1ca] sm:$0xff]  ;;  %v1839_v7 = vmul.f32 %v7152_v56, %v1768_v50  ;;  %v2373_v62 = vmul.f32 %v7219_v51, %v1768_v50  ;;  %v2103_v18 = vld [vmem:[#allocation2 + $0x1d2] sm:$0xff]  ;;  %v1769_v58 = vld [vmem:[#allocation2 + $0x1e0] sm:$0xff]  ;;  %1706 = vst [vmem:[#allocation2 + $0x201] sm:$0xff] %v7756_v59 }
 0x33c   : > { %v2174_v23 = vmul.f32 %v7199_v36, %v2102_v28  ;;  %v2772_v57 = vmul.f32 %v7243_v33, %v2102_v28  ;;  %v1840_v45 = vmul.f32 %v7152_v56, %v1769_v58  ;;  %v2374_v19 = vmul.f32 %v7219_v51, %v1769_v58 }
 0x33d   : > { %v2039_v54 = vadd.f32 %v1975_v21, %v1839_v7  ;;  %v2437_v1 = vadd.f32 %v2373_v62, %v2237_v40  ;;  %v2973_v44 = vmul.f32 %v7268_v20, %v1769_v58  ;;  %v1770_v28 = vld [vmem:[#allocation2 + $0x1e8] sm:$0xff]  ;;  %v2175_v17 = vmul.f32 %v7199_v36, %v2103_v18 }
 0x33e   : > { %v2238_v3 = vadd.f32 %v2174_v23, %v2038_v42  ;;  %v2836_v50 = vadd.f32 %v2772_v57, %v2636_v11  ;;  %v7772_v0 = vld [vmem:[#allocation2 + $0x1e2] sm:$0xff]  ;;  %v2040_v49 = vadd.f32 %v1976_v2, %v1840_v45  ;;  %v1841_v21 = vmul.f32 %v7152_v56, %v1770_v28  ;;  %v1771_v57 = vld [vmem:[#allocation2 + $0x1f8] sm:$0xff] }
 0x33f   : > { %v2637_v10 = vadd.f32 %v2573_v8, %v2437_v1  ;;  %v2176_v61 = vmul.f32 %v7199_v36, %v7772_v0  ;;  %v2239_v42 = vadd.f32 %v2175_v17, %v2039_v54  ;;  %v2773_v11 = vmul.f32 %v7243_v33, %v2103_v18  ;;  %v7791_v54 = vld [vmem:[#allocation2 + $0x1ea] sm:$0xff] }
 0x340   : > { %v2438_v7 = vadd.f32 %v2374_v19, %v2238_v3  ;;  %v3037_v40 = vadd.f32 %v2973_v44, %v2836_v50  ;;  %v1977_v23 = vmul.f32 %v7166_v15, %v7718_v16  ;;  %v2375_v62 = vmul.f32 %v7219_v51, %v1770_v28 }
 0x341   : > { %v2575_v19 = vmul.f32 %v7235_v9, %v7718_v16  ;;  %v3174_v56 = vmul.f32 %v7275_v32, %v7718_v16  ;;  %v2837_v31 = vadd.f32 %v2773_v11, %v2637_v10  ;;  %v2774_v17 = vmul.f32 %v7243_v33, %v7772_v0 }
 0x342   : > { %v2638_v58 = vadd.f32 %v2574_v30, %v2438_v7  ;;  %v7782_v8 = vadd.f32 %v3173_v48, %v3037_v40  ;;  %v2439_v2 = vadd.f32 %v2375_v62, %v2239_v42  ;;  %v2974_v18 = vmul.f32 %v7268_v20, %v1770_v28  ;;  %v7810_v62 = vld [vmem:[#allocation8] ss:$0 sm:$0xff] }
 0x343   : > { %v2041_v15 = vadd.f32 %v1977_v23, %v1841_v21  ;;  %v2240_v1 = vadd.f32 %v2176_v61, %v2040_v49  ;;  %v2376_v30 = vmul.f32 %v7219_v51, %v1771_v57  ;;  %v1310_v45 = vadd.f32 3.0, %v7754_v60  ;;  %v1772_v49 = vld [vmem:[#allocation2 + $0x200] sm:$0xff] }
 0x344   : > { %v2639_v48 = vadd.f32 %v2575_v19, %v2439_v2  ;;  %v2838_v3 = vadd.f32 %v2774_v17, %v2638_v58  ;;  %v3038_v50 = vadd.f32 %v2974_v18, %v2837_v31  ;;  %v2975_v16 = vmul.f32 %v7268_v20, %v1771_v57  ;;  %v9764_v58 = vld [vmem:[#allocation60_spill] sm:$0xff] }
 0x345   : > { %v3364_v10 = vmul.f32 %v7624_v34, %v7500_v53  ;;  %v2440_v44 = vadd.f32 %v2376_v30, %v2240_v1  ;;  %v2576_v28 = vmul.f32 %v7235_v9, %v7727_v27  ;;  %v3175_v7 = vmul.f32 %v7275_v32, %v7727_v27 }
 0x346   : > { %v2177_v40 = vmul.f32 %v7199_v36, %v7791_v54  ;;  %v7804_v21 = vadd.f32 %v3174_v56, %v3038_v50  ;;  %v3039_v61 = vadd.f32 %v2975_v16, %v2838_v3  ;;  %v1437_v42 = vmin.f32 %v1373_v52, 6.0  ;;  %v9765_v56 = vld [vmem:[#allocation98_spill] sm:$0xff]  ;;  %v7819_v52 = vpop.f32.mrb[11].mxu1  ;;  %v7835_v16 = vpop.f32.mrb[107].mxu0 }
 0x347   : > { %v2775_v11 = vmul.f32 %v7243_v33, %v7791_v54  ;;  %v7808_v23 = vadd.f32 %v2576_v28, %v2440_v44  ;;  %v1374_v53 = vmax.f32 %v1310_v45, 0.0  ;;  %v1176_v19 = vadd.f32 %v7810_v62, %v9764_v58  ;;  %9766 = vst [vmem:[#allocation93_spill] sm:$0xff] %v7819_v52  ;;  %9769 = vst [vmem:[#allocation134_spill] sm:$0xff] %v7835_v16 }
 0x348   : > { %v2241_v31 = vadd.f32 %v2177_v40, %v2041_v15  ;;  %v7814_v2 = vadd.f32 %v3175_v7, %v3039_v61  ;;  %v2377_v36 = vmul.f32 %v7219_v51, %v1772_v49  ;;  %v1177_v17 = vadd.f32 %v7810_v62, %v9765_v56  ;;  %v7828_v15 = vpop.f32.mrb[12].mxu1  ;;  %v2106_v56 = vld [vmem:[#allocation2 + $0x1fa] sm:$0xff] }
 0x349   : > { %v7823_v33 = vadd.f32 %v7618_v4, %v7746_v12  ;;  %v3559_v18 = vadd.f32 %v7730_v29, %v7736_v39  ;;  %v2839_v1 = vadd.f32 %v2775_v11, %v2639_v48  ;;  %v2976_v30 = vmul.f32 %v7268_v20, %v1772_v49  ;;  %9768 = vst [vmem:[#allocation98_spill] sm:$0xff] %v7828_v15  ;;  %v7837_v12 = vpop.f32.mrb[13].mxu1 }
 0x34a   : > { %v3427_v51 = vadd.f32 %v7750_v63, %v7462_v22  ;;  %v3428_v45 = vadd.f32 %v3364_v10, %v7502_v13  ;;  %v2441_v3 = vadd.f32 %v2377_v36, %v2241_v31  ;;  %v2577_v50 = vmul.f32 %v7235_v9, %v7756_v59  ;;  %9770 = vst [vmem:[#allocation135_spill] sm:$0xff] %v7837_v12  ;;  %v7844_v13 = vld [vmem:[#allocation9] ss:$0 sm:$0xff]  ;;  %v7937_v12 = vld [vmem:[#allocation9 + $0x3] ss:$0 sm:$0xff] }
 0x34b   : > { %9767 = vst [vmem:[#allocation60_spill] sm:$0xff] %v7823_v33  ;;  %v3040_v44 = vadd.f32 %v2976_v30, %v2839_v1  ;;  %v3176_v29 = vmul.f32 %v7275_v32, %v7756_v59  ;;  %v1501_v20 = vmul.f32 %v1437_v42, %v7722_v55  ;;  %v1438_v48 = vmin.f32 %v1374_v53, 6.0  ;;  %v9771_v55 = vld [vmem:[#allocation68_spill] sm:$0xff]  ;;  %v7857_v53 = vpop.f32.mrb[14].mxu1  ;;  %v7873_v1 = vpop.f32.mrb[108].mxu0 }
 0x34c   : > { %v7842_v28 = vadd.f32 %v2577_v50, %v2441_v3  ;;  %v1311_v22 = vadd.f32 3.0, %v1176_v19  ;;  %v1312_v63 = vadd.f32 3.0, %v1177_v17  ;;  %v1842_v10 = vmul.f32 %v7844_v13, %v1771_v57  ;;  %9772 = vst [vmem:[#allocation68_spill] sm:$0xff] %v7857_v53  ;;  %v7879_v50 = vpop.f32.mrb[109].mxu0 }
 0x34d   : > { %v7847_v9 = vadd.f32 %v3176_v29, %v3040_v44  ;;  %v7849_v7 = vmul.f32 0.16666667, %v1501_v20  ;;  %v1502_v40 = vmul.f32 %v1438_v48, %v7754_v60  ;;  %v1843_v61 = vmul.f32 %v7844_v13, %v1772_v49  ;;  %v7868_v60 = vld [vmem:[#allocation9 + $0x1] ss:$0 sm:$0xff]  ;;  %9776 = vst [vmem:[#allocation139_spill] sm:$0xff] %v7879_v50  ;;  %v7896_v20 = vpop.f32.mrb[110].mxu0 }
 0x34e   : > { %v1375_v11 = vmax.f32 %v1311_v22, 0.0  ;;  %v1376_v58 = vmax.f32 %v1312_v63, 0.0  ;;  %v7855_v42 = vadd.f32 %v7810_v62, %v9771_v55  ;;  %v7860_v31 = vadd.f32 %v3559_v18, %v7823_v33  ;;  %v7893_v29 = vld [vmem:[#allocation2 + $0x202] sm:$0xff]  ;;  %9778 = vst [vmem:[#allocation141_spill] sm:$0xff] %v7896_v20 }
 0x34f   : > { %v7863_v57 = vadd.f32 %v7618_v4, %v3427_v51  ;;  %v7866_v36 = vadd.f32 %v7618_v4, %v3428_v45  ;;  %v1978_v49 = vmul.f32 %v7868_v60, %v7727_v27  ;;  %1707 = vst [vmem:[#allocation2 + $0x211] sm:$0xff] %v7849_v7  ;;  %v1979_v18 = vmul.f32 %v7868_v60, %v7756_v59  ;;  %v7898_v63 = vld [vmem:[#allocation9 + $0x2] ss:$0 sm:$0xff] }
 0x350   : > { %9773 = vst [vmem:[#allocation136_spill] sm:$0xff] %v7860_v31  ;;  %v7877_v30 = vmul.f32 0.16666667, %v1502_v40  ;;  %v1439_v51 = vmin.f32 %v1375_v11, 6.0  ;;  %v1440_v3 = vmin.f32 %v1376_v58, 6.0  ;;  %v7883_v45 = vmul.f32 %v7868_v60, %v7521_v25 }
 0x351   : > { %9774 = vst [vmem:[#allocation137_spill] sm:$0xff] %v7863_v57  ;;  %9775 = vst [vmem:[#allocation138_spill] sm:$0xff] %v7866_v36  ;;  %v7887_v27 = vmul.f32 %v7868_v60, %v7551_v6  ;;  %v7891_v44 = vmul.f32 %v7275_v32, %v7551_v6  ;;  %v1313_v59 = vadd.f32 3.0, %v7855_v42  ;;  %v2042_v48 = vadd.f32 %v1978_v49, %v1842_v10  ;;  %v7902_v11 = vld [vmem:[#allocation9 + $0x5] ss:$0 sm:$0xff] }
 0x352   : > { %v2043_v22 = vadd.f32 %v1979_v18, %v1843_v61  ;;  %v2178_v25 = vmul.f32 %v7898_v63, %v2106_v56  ;;  %1708 = vst [vmem:[#allocation2 + $0x219] sm:$0xff] %v7877_v30  ;;  %v1503_v40 = vmul.f32 %v1439_v51, %v1176_v19  ;;  %v7906_v32 = vmul.f32 %v7902_v11, %v7584_v26 }
 0x353   : > { %9777 = vst [vmem:[#allocation140_spill] sm:$0xff] %v7891_v44  ;;  %v7910_v6 = vmul.f32 %v7624_v34, %v7566_v41  ;;  %v1504_v58 = vmul.f32 %v1440_v3, %v1177_v17  ;;  %v1377_v10 = vmax.f32 %v1313_v59, 0.0  ;;  %v7914_v61 = vmul.f32 %v7844_v13, %v7587_v47 }
 0x354   : > { %v3374_v55 = vmul.f32 %v7624_v34, %v7791_v54  ;;  %v2179_v19 = vmul.f32 %v7898_v63, %v7893_v29  ;;  %v7920_v49 = vmul.f32 0.16666667, %v1503_v40  ;;  %v7924_v18 = vmul.f32 %v7624_v34, %v7772_v0 }
 0x355   : > { %v2776_v41 = vmul.f32 %v7902_v11, %v2106_v56  ;;  %v7927_v17 = vmul.f32 0.16666667, %v1504_v58  ;;  %v1441_v51 = vmin.f32 %v1377_v10, 6.0  ;;  %v2242_v3 = vadd.f32 %v2178_v25, %v2042_v48  ;;  %v7940_v10 = vld [vmem:[#allocation9 + $0x6] ss:$0 sm:$0xff] }
 0x356   : > { %v7930_v47 = vadd.f32 %v3374_v55, %v7804_v21  ;;  %v2243_v59 = vadd.f32 %v2179_v19, %v2043_v22  ;;  %v2777_v54 = vmul.f32 %v7902_v11, %v7893_v29  ;;  %v1773_v52 = vld [vmem:[#allocation2 + $0x210] sm:$0xff]  ;;  %1709 = vst [vmem:[#allocation2 + $0x229] sm:$0xff] %v7920_v49  ;;  %v7945_v48 = vmul.f32 %v7624_v34, %v2106_v56  ;;  %v7949_v25 = vld [vmem:[#allocation9 + $0x4] ss:$0 sm:$0xff] }
 0x357   : > { %v2840_v40 = vadd.f32 %v2776_v41, %v7808_v23  ;;  %v1844_v0 = vmul.f32 %v7844_v13, %v1773_v52  ;;  %v2378_v58 = vmul.f32 %v7937_v12, %v1773_v52  ;;  %v2977_v21 = vmul.f32 %v7940_v10, %v1773_v52  ;;  %1710 = vst [vmem:[#allocation2 + $0x231] sm:$0xff] %v7927_v17  ;;  %v7957_v52 = vld [vmem:[#allocation9 + $0x7] ss:$0 sm:$0xff] }
 0x358   : > { %v1980_v22 = vmul.f32 %v7868_v60, %v7849_v7  ;;  %v2578_v23 = vmul.f32 %v7949_v25, %v7849_v7  ;;  %v7955_v55 = vadd.f32 %v7810_v62, %v7437_v14  ;;  %v3177_v56 = vmul.f32 %v7957_v52, %v7849_v7 }
 0x359   : > { %v2442_v19 = vadd.f32 %v2378_v58, %v2242_v3  ;;  %v3041_v41 = vadd.f32 %v2977_v21, %v2840_v40  ;;  %v1774_v16 = vld [vmem:[#allocation2 + $0x218] sm:$0xff]  ;;  %v1505_v33 = vmul.f32 %v1441_v51, %v7855_v42  ;;  %v2841_v3 = vadd.f32 %v2777_v54, %v7842_v28 }
 0x35a   : > { %v7961_v50 = vld [vmem:[#allocation2 + $0x212] sm:$0xff]  ;;  %v2044_v39 = vadd.f32 %v1980_v22, %v1844_v0  ;;  %v1845_v36 = vmul.f32 %v7844_v13, %v1774_v16  ;;  %v2379_v14 = vmul.f32 %v7937_v12, %v1774_v16  ;;  %v1981_v7 = vmul.f32 %v7868_v60, %v7877_v30  ;;  %v7977_v22 = vld [vmem:[#allocation2 + $0x21a] sm:$0xff] }
 0x35b   : > { %v2180_v31 = vmul.f32 %v7898_v63, %v7961_v50  ;;  %v2642_v40 = vadd.f32 %v2578_v23, %v2442_v19  ;;  %v7969_v58 = vadd.f32 %v3177_v56, %v3041_v41  ;;  %v2579_v42 = vmul.f32 %v7949_v25, %v7877_v30 }
 0x35c   : > { %v2443_v21 = vadd.f32 %v2379_v14, %v2243_v59  ;;  %v2978_v51 = vmul.f32 %v7940_v10, %v1774_v16  ;;  %v1314_v0 = vadd.f32 3.0, %v7955_v55  ;;  %v2778_v57 = vmul.f32 %v7902_v11, %v7961_v50  ;;  %v7989_v14 = vpop.f32.mrb[111].mxu0 }
 0x35d   : > { %v3178_v28 = vmul.f32 %v7957_v52, %v7877_v30  ;;  %v1775_v54 = vld [vmem:[#allocation2 + $0x228] sm:$0xff]  ;;  %v7983_v23 = vmul.f32 0.16666667, %v1505_v33  ;;  %v7987_v59 = vadd.f32 %v7810_v62, %v7464_v35  ;;  %v2045_v19 = vadd.f32 %v1981_v7, %v1845_v36  ;;  %9779 = vst [vmem:[#allocation142_spill] sm:$0xff] %v7989_v14 }
 0x35e   : > { %v2244_v41 = vadd.f32 %v2180_v31, %v2044_v39  ;;  %v2643_v16 = vadd.f32 %v2579_v42, %v2443_v21  ;;  %v3042_v56 = vadd.f32 %v2978_v51, %v2841_v3  ;;  %v2842_v44 = vadd.f32 %v2778_v57, %v2642_v40  ;;  %v1776_v15 = vld [vmem:[#allocation2 + $0x230] sm:$0xff] }
 0x35f   : > { %v1846_v53 = vmul.f32 %v7844_v13, %v1775_v54  ;;  %v2380_v20 = vmul.f32 %v7937_v12, %v1775_v54  ;;  %v2979_v30 = vmul.f32 %v7940_v10, %v1775_v54  ;;  %1711 = vst [vmem:[#allocation2 + $0x241] sm:$0xff] %v7983_v23  ;;  %v2181_v35 = vmul.f32 %v7898_v63, %v7977_v22  ;;  %v8001_v31 = vld [vmem:[#allocation2 + $0x22a] sm:$0xff] }
 0x360   : > { %v7997_v33 = vadd.f32 %v3178_v28, %v3042_v56  ;;  %v1982_v39 = vmul.f32 %v7868_v60, %v7920_v49  ;;  %v1378_v57 = vmax.f32 %v1314_v0, 0.0  ;;  %v2580_v3 = vmul.f32 %v7949_v25, %v7920_v49 }
 0x361   : > { %v2444_v36 = vadd.f32 %v2380_v20, %v2244_v41  ;;  %v3043_v40 = vadd.f32 %v2979_v30, %v2842_v44  ;;  %v3179_v7 = vmul.f32 %v7957_v52, %v7920_v49  ;;  %v2245_v21 = vadd.f32 %v2181_v35, %v2045_v19 }
 0x362   : > { %v2779_v42 = vmul.f32 %v7902_v11, %v7977_v22  ;;  %v2381_v51 = vmul.f32 %v7937_v12, %v1776_v15  ;;  %v1315_v28 = vadd.f32 3.0, %v7987_v59  ;;  %v2046_v54 = vadd.f32 %v1982_v39, %v1846_v53 }
 0x363   : > { %v2644_v56 = vadd.f32 %v2580_v3, %v2444_v36  ;;  %v8011_v14 = vadd.f32 %v3179_v7, %v3043_v40  ;;  %v2182_v20 = vmul.f32 %v7898_v63, %v8001_v31  ;;  %v3437_v44 = vadd.f32 %v7924_v18, %v7782_v8 }
 0x364   : > { %v2445_v0 = vadd.f32 %v2381_v51, %v2245_v21  ;;  %v2581_v49 = vmul.f32 %v7949_v25, %v7927_v17  ;;  %v1442_v19 = vmin.f32 %v1378_v57, 6.0  ;;  %v8021_v41 = vadd.f32 %v7618_v4, %v7930_v47 }
 0x365   : > { %v3439_v53 = vadd.f32 %v7945_v48, %v7814_v2  ;;  %v2843_v30 = vadd.f32 %v2779_v42, %v2643_v16  ;;  %v2980_v35 = vmul.f32 %v7940_v10, %v1776_v15  ;;  %v2780_v8 = vmul.f32 %v7902_v11, %v8001_v31 }
 0x366   : > { %9780 = vst [vmem:[#allocation143_spill] sm:$0xff] %v8021_v41  ;;  %v8026_v39 = vadd.f32 %v2581_v49, %v2445_v0  ;;  %v1777_v18 = vld [vmem:[#allocation2 + $0x240] sm:$0xff]  ;;  %v1379_v36 = vmax.f32 %v1315_v28, 0.0  ;;  %v1181_v57 = vadd.f32 %v7810_v62, %v7482_v5  ;;  %v2246_v3 = vadd.f32 %v2182_v20, %v2046_v54 }
 0x367   : > { %v3044_v40 = vadd.f32 %v2980_v35, %v2843_v30  ;;  %v3180_v47 = vmul.f32 %v7957_v52, %v7927_v17  ;;  %v2382_v2 = vmul.f32 %v7937_v12, %v1777_v18  ;;  %v3376_v48 = vmul.f32 %v7624_v34, %v7893_v29  ;;  %v8056_v30 = vpop.f32.mrb[15].mxu1 }
 0x368   : > { %v2844_v16 = vadd.f32 %v2780_v8, %v2644_v56  ;;  %v2981_v7 = vmul.f32 %v7940_v10, %v1777_v18  ;;  %v1506_v21 = vmul.f32 %v1442_v19, %v7955_v55  ;;  %v2582_v5 = vmul.f32 %v7949_v25, %v7983_v23  ;;  %9783 = vst [vmem:[#allocation146_spill] sm:$0xff] %v8056_v30 }
 0x369   : > { %v8039_v42 = vadd.f32 %v3180_v47, %v3044_v40  ;;  %v2446_v51 = vadd.f32 %v2382_v2, %v2246_v3  ;;  %v3181_v28 = vmul.f32 %v7957_v52, %v7983_v23  ;;  %v1443_v0 = vmin.f32 %v1379_v36, 6.0 }
 0x36a   : > { %v3045_v54 = vadd.f32 %v2981_v7, %v2844_v16  ;;  %v8045_v20 = vmul.f32 0.16666667, %v1506_v21  ;;  %v1316_v49 = vadd.f32 3.0, %v1181_v57  ;;  %v8048_v29 = vadd.f32 %v7618_v4, %v3437_v44  ;;  %v8095_v16 = vld [vmem:[#allocation2 + $0x232] sm:$0xff]  ;;  %v9788_v7 = vld [vmem:[#allocation119_spill] sm:$0xff] }
 0x36b   : > { %v3440_v56 = vadd.f32 %v3376_v48, %v7847_v9  ;;  %v8052_v55 = vadd.f32 %v7618_v4, %v3439_v53  ;;  %v8054_v19 = vadd.f32 %v2582_v5, %v2446_v51  ;;  %v8060_v35 = vmul.f32 %v7624_v34, %v7584_v26  ;;  %v8072_v53 = vld [vmem:[#allocation2 + $0x16a] sm:$0xff]  ;;  %v9789_v5 = vld [vmem:[#allocation115_spill] sm:$0xff] }
 0x36c   : > { %9781 = vst [vmem:[#allocation144_spill] sm:$0xff] %v8048_v29  ;;  %v8064_v8 = vadd.f32 %v7910_v6, %v7578_v43  ;;  %v1847_v44 = vmul.f32 %v7844_v13, %v1776_v15  ;;  %v8067_v36 = vadd.f32 %v3181_v28, %v3045_v54  ;;  %1712 = vst [vmem:[#allocation2 + $0x249] sm:$0xff] %v8045_v20  ;;  %v1380_v40 = vmax.f32 %v1316_v49, 0.0  ;;  %v9785_v6 = vld [vmem:[#allocation109_spill] sm:$0xff] }
 0x36d   : > { %9782 = vst [vmem:[#allocation145_spill] sm:$0xff] %v8052_v55  ;;  %v1835_v9 = vmul.f32 %v7844_v13, %v7602_v24  ;;  %v3577_v3 = vadd.f32 %v8021_v41, %v8048_v29  ;;  %v1507_v26 = vmul.f32 %v1443_v0, %v7987_v59  ;;  %v8079_v43 = vadd.f32 %v7883_v45, %v7914_v61  ;;  %v9786_v24 = vld [vmem:[#allocation112_spill] sm:$0xff] }
 0x36e   : > { %9784 = vst [vmem:[#allocation147_spill] sm:$0xff] %v8064_v8  ;;  %v1983_v15 = vmul.f32 %v7868_v60, %v7927_v17  ;;  %v8085_v47 = vadd.f32 %v7810_v62, %v9785_v6  ;;  %v8089_v2 = vadd.f32 %v7810_v62, %v9786_v24  ;;  %v8092_v48 = vadd.f32 %v7618_v4, %v3440_v56 }
 0x36f   : > { %v3578_v59 = vadd.f32 %v3577_v3, %v8052_v55  ;;  %v8097_v45 = vmul.f32 0.16666667, %v1507_v26  ;;  %v1444_v61 = vmin.f32 %v1380_v40, 6.0  ;;  %v8101_v17 = vadd.f32 %v7906_v32, %v9788_v7 }
 0x370   : > { %9787 = vst [vmem:[#allocation109_spill] sm:$0xff] %v8092_v48  ;;  %v8105_v21 = vmul.f32 %v7898_v63, %v8072_v53  ;;  %v2047_v51 = vadd.f32 %v1983_v15, %v1847_v44  ;;  %v8109_v28 = vadd.f32 %v7810_v62, %v9789_v5  ;;  %v8112_v54 = vadd.f32 %v7887_v27, %v1835_v9  ;;  %v5469_v27 = vld [vmem:[#allocation12] sm:$0xff]   ;;  %v5470_v5 = vld [vmem:[#allocation12 + $0x8] sm:$0xff]  }
 0x371   : > { %v3377_v0 = vmul.f32 %v7624_v34, %v7961_v50  ;;  %v1848_v49 = vmul.f32 %v7844_v13, %v1777_v18  ;;  %1713 = vst [vmem:[#allocation2 + $0x259] sm:$0xff] %v8097_v45  ;;  %v1508_v32 = vmul.f32 %v1444_v61, %v1181_v57  ;;  %v2183_v56 = vmul.f32 %v7898_v63, %v8095_v16 }
 0x372   : > { %v2781_v44 = vmul.f32 %v7902_v11, %v8095_v16  ;;  %v1317_v3 = vadd.f32 3.0, %v8085_v47  ;;  %v1318_v26 = vadd.f32 3.0, %v8089_v2  ;;  %v3579_v9 = vadd.f32 %v3578_v59, %v8092_v48  ;;  %5141 = vmatpush3.bf16.msra.mxu1 %v5469_v27 }
 0x373   : > { %v3441_v50 = vadd.f32 %v3377_v0, %v7969_v58  ;;  %v1984_v18 = vmul.f32 %v7868_v60, %v7983_v23  ;;  %v1778_v40 = vld [vmem:[#allocation2 + $0x248] sm:$0xff]  ;;  %v8130_v15 = vmul.f32 0.16666667, %v1508_v32  ;;  %v2247_v6 = vadd.f32 %v2183_v56, %v2047_v51  ;;  %5142 = vmatprep.subr.bf16.mxu1 %v7673_v37 }
 0x374   : > { %v8128_v57 = vld [vmem:[#allocation2 + $0x242] sm:$0xff]  ;;  %v2845_v24 = vadd.f32 %v2781_v44, %v8026_v39  ;;  %v2383_v61 = vmul.f32 %v7937_v12, %v1778_v40  ;;  %v1319_v7 = vadd.f32 3.0, %v8109_v28  ;;  %v1849_v58 = vmul.f32 %v7844_v13, %v1778_v40  ;;  %v8154_v48 = vld [vmem:[#allocation2 + $0x24a] sm:$0xff] }
 0x375   : > { %v2048_v59 = vadd.f32 %v1984_v18, %v1848_v49  ;;  %v2184_v23 = vmul.f32 %v7898_v63, %v8128_v57  ;;  %v2982_v0 = vmul.f32 %v7940_v10, %v1778_v40  ;;  %1714 = vst [vmem:[#allocation2 + $0x261] sm:$0xff] %v8130_v15  ;;  %v2583_v39 = vmul.f32 %v7949_v25, %v8045_v20 }
 0x376   : > { %v2447_v51 = vadd.f32 %v2383_v61, %v2247_v6  ;;  %v1381_v32 = vmax.f32 %v1317_v3, 0.0  ;;  %v1382_v56 = vmax.f32 %v1318_v26, 0.0  ;;  %v8144_v44 = vadd.f32 %v7618_v4, %v3441_v50  ;;  %5143 = vmatpush3.bf16.msra.mxu1 %v5470_v5  ;;  %v5471_v26 = vld [vmem:[#allocation12 + $0x10] sm:$0xff]  }
 0x377   : > { %v1985_v49 = vmul.f32 %v7868_v60, %v8045_v20  ;;  %v3046_v27 = vadd.f32 %v2982_v0, %v2845_v24  ;;  %v3182_v18 = vmul.f32 %v7957_v52, %v8045_v20  ;;  %v3378_v40 = vmul.f32 %v7624_v34, %v7977_v22  ;;  %5144 = vmatprep.subr.bf16.mxu1 %v7673_v37 }
 0x378   : > { %9790 = vst [vmem:[#allocation112_spill] sm:$0xff] %v8144_v44  ;;  %v2647_v30 = vadd.f32 %v2583_v39, %v2447_v51  ;;  %v2782_v6 = vmul.f32 %v7902_v11, %v8128_v57  ;;  %v1779_v61 = vld [vmem:[#allocation2 + $0x258] sm:$0xff]  ;;  %v1383_v3 = vmax.f32 %v1319_v7, 0.0  ;;  %v2248_v55 = vadd.f32 %v2184_v23, %v2048_v59 }
 0x379   : > { %v2049_v50 = vadd.f32 %v1985_v49, %v1849_v58  ;;  %v8156_v41 = vadd.f32 %v3182_v18, %v3046_v27  ;;  %v2384_v24 = vmul.f32 %v7937_v12, %v1779_v61  ;;  %v2983_v20 = vmul.f32 %v7940_v10, %v1779_v61  ;;  %v9791_v27 = vld [vmem:[#allocation117_spill] sm:$0xff] }
 0x37a   : > { %v2846_v22 = vadd.f32 %v2782_v6, %v8054_v19  ;;  %v1445_v0 = vmin.f32 %v1381_v32, 6.0  ;;  %v1446_v51 = vmin.f32 %v1382_v56, 6.0  ;;  %v3442_v7 = vadd.f32 %v3378_v40, %v7997_v33  ;;  %5145 = vmatpush3.bf16.msra.mxu1 %v5471_v26  ;;  %v5472_v33 = vld [vmem:[#allocation12 + $0x18] sm:$0xff]  }
 0x37b   : > { %v3580_v5 = vadd.f32 %v3579_v9, %v8144_v44  ;;  %v2448_v58 = vadd.f32 %v2384_v24, %v2248_v55  ;;  %v2584_v59 = vmul.f32 %v7949_v25, %v8097_v45  ;;  %v2185_v23 = vmul.f32 %v7898_v63, %v8154_v48  ;;  %5146 = vmatprep.subr.bf16.mxu1 %v7673_v37 }
 0x37c   : > { %v3047_v39 = vadd.f32 %v2983_v20, %v2846_v22  ;;  %v3183_v49 = vmul.f32 %v7957_v52, %v8097_v45  ;;  %v1780_v19 = vld [vmem:[#allocation2 + $0x260] sm:$0xff]  ;;  %v8172_v32 = vadd.f32 %v7810_v62, %v9791_v27  ;;  %v2783_v55 = vmul.f32 %v7902_v11, %v8154_v48 }
 0x37d   : > { %v8176_v9 = vadd.f32 %v2584_v59, %v2448_v58  ;;  %v1509_v56 = vmul.f32 %v1445_v0, %v8085_v47  ;;  %v1510_v18 = vmul.f32 %v1446_v51, %v8089_v2  ;;  %v2249_v40 = vadd.f32 %v2185_v23, %v2049_v50  ;;  %v8193_v2 = vld [vmem:[#allocation2 + $0x172] sm:$0xff]  ;;  %v8198_v23 = vld [vmem:[#allocation2 + $0x25a] sm:$0xff] }
 0x37e   : > { %v8181_v6 = vadd.f32 %v3183_v49, %v3047_v39  ;;  %v2385_v24 = vmul.f32 %v7937_v12, %v1780_v19  ;;  %v1447_v22 = vmin.f32 %v1383_v3, 6.0  ;;  %v8185_v26 = vadd.f32 %v7618_v4, %v3442_v7  ;;  %5147 = vmatpush3.bf16.msra.mxu1 %v5472_v33  ;;  %v5473_v7 = vld [vmem:[#allocation12 + $0x20] sm:$0xff]  }
 0x37f   : > { %v3379_v20 = vmul.f32 %v7624_v34, %v8001_v31  ;;  %v1986_v58 = vmul.f32 %v7868_v60, %v8097_v45  ;;  %v2585_v47 = vmul.f32 %v7949_v25, %v8130_v15  ;;  %v2847_v50 = vadd.f32 %v2783_v55, %v2647_v30  ;;  %5148 = vmatprep.subr.bf16.mxu1 %v7673_v37 }
 0x380   : > { %9792 = vst [vmem:[#allocation119_spill] sm:$0xff] %v8185_v26  ;;  %v1850_v0 = vmul.f32 %v7844_v13, %v1779_v61  ;;  %v2449_v51 = vadd.f32 %v2385_v24, %v2249_v40  ;;  %v2984_v3 = vmul.f32 %v7940_v10, %v1780_v19  ;;  %v1851_v59 = vmul.f32 %v7844_v13, %v1780_v19  ;;  %v8221_v24 = vld [vmem:[#allocation2 + $0x262] sm:$0xff] }
 0x381   : > { %v1573_v31 = vmul.f32 0.16666667, %v1509_v56  ;;  %v8200_v39 = vmul.f32 0.16666667, %v1510_v18  ;;  %v1320_v45 = vadd.f32 3.0, %v8172_v32  ;;  %v3184_v61 = vmul.f32 %v7957_v52, %v8130_v15  ;;  %v9793_v56 = vld [vmem:[#allocation66_spill] sm:$0xff] }
 0x382   : > { %v2649_v49 = vadd.f32 %v2585_v47, %v2449_v51  ;;  %v3048_v30 = vadd.f32 %v2984_v3, %v2847_v50  ;;  %v1511_v27 = vmul.f32 %v1447_v22, %v8109_v28  ;;  %v2171_v33 = vmul.f32 %v7898_v63, %v8193_v2  ;;  %5149 = vmatpush3.bf16.msra.mxu1 %v5473_v7 }
 0x383   : > { %v3443_v19 = vadd.f32 %v3379_v20, %v8011_v14  ;;  %v1987_v55 = vmul.f32 %v7868_v60, %v8130_v15  ;;  %1715 = vst [vmem:[#allocation2 + $0x271] sm:$0xff] %v1573_v31  ;;  %1716 = vst [vmem:[#allocation2 + $0x279] sm:$0xff] %v8200_v39  ;;  %v8215_v18 = vadd.f32 %v7810_v62, %v9793_v56  ;;  %v5474_v15 = vld [vmem:[#allocation12 + $0x28] sm:$0xff]   ;;  %5150 = vmatprep.subr.bf16.mxu1 %v7673_v37 }
 0x384   : > { %v8219_v40 = vadd.f32 %v8060_v35, %v7612_v38  ;;  %v2050_v28 = vadd.f32 %v1986_v58, %v1850_v0  ;;  %v2186_v14 = vmul.f32 %v7898_v63, %v8198_v23  ;;  %v8225_v22 = vadd.f32 %v3184_v61, %v3048_v30 }
 0x385   : > { %v8229_v20 = vadd.f32 %v8105_v21, %v8079_v43  ;;  %v8233_v47 = vmul.f32 %v7902_v11, %v8072_v53  ;;  %v2051_v38 = vadd.f32 %v1987_v55, %v1851_v59  ;;  %v8235_v35 = vmul.f32 0.16666667, %v1511_v27  ;;  %v9796_v59 = vld [vmem:[#allocation123_spill] sm:$0xff] }
 0x386   : > { %9794 = vst [vmem:[#allocation115_spill] sm:$0xff] %v8219_v40  ;;  %v8239_v58 = vadd.f32 %v2171_v33, %v8112_v54  ;;  %v8242_v50 = vadd.f32 %v3580_v5, %v8185_v26  ;;  %v3380_v0 = vmul.f32 %v7624_v34, %v8095_v16  ;;  %v1384_v43 = vmax.f32 %v1320_v45, 0.0  ;;  %5151 = vmatpush3.bf16.msra.mxu1 %v5474_v15  ;;  %v5475_v45 = vld [vmem:[#allocation12 + $0x30] sm:$0xff]  }
 0x387   : > { %v8247_v21 = vadd.f32 %v7618_v4, %v3443_v19  ;;  %v2187_v51 = vmul.f32 %v7898_v63, %v8221_v24  ;;  %v2784_v3 = vmul.f32 %v7902_v11, %v8198_v23  ;;  %1717 = vst [vmem:[#allocation2 + $0x289] sm:$0xff] %v8235_v35  ;;  %v1327_v54 = vadd.f32 3.0, %v8215_v18  ;;  %5152 = vmatprep.subr.bf16.mxu1 %v7673_v37 }
 0x388   : > { %v8256_v5 = vadd.f32 %v3380_v0, %v8039_v42  ;;  %v3381_v16 = vmul.f32 %v7624_v34, %v8128_v57  ;;  %v2250_v7 = vadd.f32 %v2186_v14, %v2050_v28  ;;  %v8262_v4 = vadd.f32 %v7810_v62, %v9796_v59  ;;  %v9797_v28 = vld [vmem:[#allocation108_spill] sm:$0xff] }
 0x389   : > { %9795 = vst [vmem:[#allocation117_spill] sm:$0xff] %v8247_v21  ;;  %v2251_v30 = vadd.f32 %v2187_v51, %v2051_v38  ;;  %v2785_v61 = vmul.f32 %v7902_v11, %v8221_v24  ;;  %v2848_v27 = vadd.f32 %v2784_v3, %v8176_v9  ;;  %v1988_v33 = vmul.f32 %v7868_v60, %v1573_v31 }
 0x38a   : > { %v1781_v42 = vld [vmem:[#allocation2 + $0x270] sm:$0xff]  ;;  %v2586_v34 = vmul.f32 %v7949_v25, %v1573_v31  ;;  %v3185_v57 = vmul.f32 %v7957_v52, %v1573_v31  ;;  %v1782_v19 = vld [vmem:[#allocation2 + $0x278] sm:$0xff]  ;;  %v1448_v56 = vmin.f32 %v1384_v43, 6.0  ;;  %v8275_v14 = vadd.f32 %v7810_v62, %v9797_v28  ;;  %5153 = vmatpush3.bf16.msra.mxu1 %v5475_v45  ;;  %v5476_v43 = vld [vmem:[#allocation12 + $0x38] sm:$0xff]  }
 0x38b   : > { %v8271_v55 = vld [vmem:[#allocation2 + $0x272] sm:$0xff]  ;;  %v1852_v15 = vmul.f32 %v7844_v13, %v1781_v42  ;;  %v2386_v9 = vmul.f32 %v7937_v12, %v1781_v42  ;;  %v2985_v38 = vmul.f32 %v7940_v10, %v1781_v42  ;;  %v1391_v0 = vmax.f32 %v1327_v54, 0.0  ;;  %5154 = vmatprep.subr.bf16.mxu1 %v7673_v37 }
 0x38c   : > { %v2849_v51 = vadd.f32 %v2785_v61, %v2649_v49  ;;  %v2387_v3 = vmul.f32 %v7937_v12, %v1782_v19  ;;  %v2587_v31 = vmul.f32 %v7949_v25, %v8200_v39  ;;  %v1321_v59 = vadd.f32 3.0, %v8262_v4 }
 0x38d   : > { %v2052_v26 = vadd.f32 %v1988_v33, %v1852_v15  ;;  %v2450_v28 = vadd.f32 %v2386_v9, %v2250_v7  ;;  %v3049_v44 = vadd.f32 %v2985_v38, %v2848_v27  ;;  %v2188_v29 = vmul.f32 %v7898_v63, %v8271_v55 }
 0x38e   : > { %v2451_v42 = vadd.f32 %v2387_v3, %v2251_v30  ;;  %v2986_v49 = vmul.f32 %v7940_v10, %v1782_v19  ;;  %v8288_v54 = vld [vmem:[#allocation2 + $0x288] sm:$0xff]  ;;  %v1512_v61 = vmul.f32 %v1448_v56, %v8172_v32  ;;  %v1328_v40 = vadd.f32 3.0, %v8275_v14  ;;  %5155 = vmatpush3.bf16.msra.mxu1 %v5476_v43 }
 0x38f   : > { %v2650_v8 = vadd.f32 %v2586_v34, %v2450_v28  ;;  %v8292_v45 = vadd.f32 %v3185_v57, %v3049_v44  ;;  %v2786_v7 = vmul.f32 %v7902_v11, %v8271_v55  ;;  %v1455_v27 = vmin.f32 %v1391_v0, 6.0  ;;  %5160 = vmatprep.subr.bf16.mxu1 %v7673_v37 }
 0x390   : > { %v8296_v33 = vadd.f32 %v2587_v31, %v2451_v42  ;;  %v3050_v15 = vadd.f32 %v2986_v49, %v2849_v51  ;;  %v3186_v30 = vmul.f32 %v7957_v52, %v8200_v39  ;;  %v2588_v9 = vmul.f32 %v7949_v25, %v8235_v35 }
 0x391   : > { %v2252_v32 = vadd.f32 %v2188_v29, %v2052_v26  ;;  %v2850_v56 = vadd.f32 %v2786_v7, %v2650_v8  ;;  %v2388_v44 = vmul.f32 %v7937_v12, %v8288_v54  ;;  %v2987_v34 = vmul.f32 %v7940_v10, %v8288_v54  ;;  %v5514_v26 = vld [vmem:[#allocation2 + $0x170] sm:$0xff] }
 0x392   : > { %v8307_v57 = vadd.f32 %v3186_v30, %v3050_v15  ;;  %v8309_v38 = vmul.f32 0.16666667, %v1512_v61  ;;  %v1385_v0 = vmax.f32 %v1321_v59, 0.0  ;;  %v1392_v51 = vmax.f32 %v1328_v40, 0.0  ;;  %v8320_v40 = vld [vmem:[#allocation11] ss:$0 sm:$0xff] }
 0x393   : > { %v2452_v3 = vadd.f32 %v2388_v44, %v2252_v32  ;;  %v3051_v31 = vadd.f32 %v2987_v34, %v2850_v56  ;;  %v3187_v29 = vmul.f32 %v7957_v52, %v8235_v35  ;;  %v1519_v8 = vmul.f32 %v1455_v27, %v8215_v18  ;;  %v9800_v7 = vld [vmem:[#allocation122_spill] sm:$0xff] }
 0x394   : > { %v2968_v43 = vmul.f32 %v5514_v26, %v7940_v10  ;;  %v3582_v28 = vadd.f32 %v8242_v50, %v8247_v21  ;;  %v3445_v37 = vadd.f32 %v3381_v16, %v8067_v36  ;;  %v1853_v42 = vmul.f32 %v7844_v13, %v1782_v19  ;;  %1718 = vst [vmem:[#allocation2 + $0x291] sm:$0xff] %v8309_v38 }
 0x395   : > { %v8324_v59 = vadd.f32 %v8320_v40, %v8256_v5  ;;  %v8326_v49 = vadd.f32 %v2588_v9, %v2452_v3  ;;  %v8328_v18 = vadd.f32 %v3187_v29, %v3051_v31  ;;  %v8330_v61 = vmul.f32 0.16666667, %v1519_v8  ;;  %v8342_v5 = vld [vmem:[#allocation9 + $0x8] ss:$0 sm:$0xff]  ;;  %v8350_v9 = vld [vmem:[#allocation2 + $0x27a] sm:$0xff] }
 0x396   : > { %v8334_v50 = vmul.f32 %v7902_v11, %v8193_v2  ;;  %v1989_v36 = vmul.f32 %v7868_v60, %v8200_v39  ;;  %v1449_v16 = vmin.f32 %v1385_v0, 6.0  ;;  %v1456_v19 = vmin.f32 %v1392_v51, 6.0  ;;  %v9802_v39 = vld [vmem:[#allocation83_spill] sm:$0xff] }
 0x397   : > { %9798 = vst [vmem:[#allocation66_spill] sm:$0xff] %v8324_v59  ;;  %v8340_v27 = vadd.f32 %v8233_v47, %v9800_v7  ;;  %v8346_v15 = vmul.f32 %v8342_v5, %v8072_v53  ;;  %v3382_v30 = vmul.f32 %v8342_v5, %v8154_v48  ;;  %1725 = vst [vmem:[#allocation2 + $0x2e9] sm:$0xff] %v8330_v61  ;;  %v5517_v0 = vld [vmem:[#allocation2 + $0x181] sm:$0xff] }
 0x398   : > { %9799 = vst [vmem:[#allocation123_spill] sm:$0xff] %v8334_v50  ;;  %v8355_v32 = vadd.f32 %v7810_v62, %v9802_v39  ;;  %v8358_v47 = vadd.f32 %v8320_v40, %v3445_v37  ;;  %v2053_v56 = vadd.f32 %v1989_v36, %v1853_v42  ;;  %v1513_v44 = vmul.f32 %v1449_v16, %v8262_v4  ;;  %v9806_v39 = vld [vmem:[#allocation120_spill] sm:$0xff] }
 0x399   : > { %9801 = vst [vmem:[#allocation108_spill] sm:$0xff] %v8346_v15  ;;  %v1520_v53 = vmul.f32 %v1456_v19, %v8275_v14  ;;  %v8363_v34 = vadd.f32 %v2968_v43, %v8101_v17  ;;  %v8367_v48 = vmul.f32 %v8342_v5, %v8193_v2  ;;  %v8370_v51 = vmul.f32 %v5517_v0, %v7949_v25  ;;  %v8383_v2 = vld [vmem:[#allocation2 + $0x189] sm:$0xff] }
 0x39a   : > { %9803 = vst [vmem:[#allocation122_spill] sm:$0xff] %v8358_v47  ;;  %v3583_v3 = vadd.f32 %v3582_v28, %v8324_v59  ;;  %v3446_v31 = vadd.f32 %v3382_v30, %v8156_v41  ;;  %v2189_v4 = vmul.f32 %v7898_v63, %v8350_v9  ;;  %v8376_v29 = vmul.f32 0.16666667, %v1513_v44  ;;  %9805 = vst [vmem:[#allocation148_spill] sm:$0xff] %v8383_v2  ;;  %v8451_v59 = vld [vmem:[#allocation2 + $0x182] sm:$0xff] }
 0x39b   : > { %9804 = vst [vmem:[#allocation83_spill] sm:$0xff] %v8367_v48  ;;  %v8378_v14 = vmul.f32 0.16666667, %v1520_v53  ;;  %v8381_v17 = vmul.f32 %v5517_v0, %v7957_v52  ;;  %v8387_v8 = vmul.f32 %v8383_v2, %v7949_v25  ;;  %v2787_v26 = vmul.f32 %v7902_v11, %v8350_v9  ;;  %v8391_v41 = vld [vmem:[#allocation2 + $0x290] sm:$0xff]  ;;  %v2298_v0 = vld [vmem:[#allocation2 + $0x180] sm:$0xff]  ;;  %9810 = vst [vmem:[#allocation149_spill] sm:$0xff] %v8451_v59 }
 0x39c   : > { %v1322_v43 = vadd.f32 3.0, %v8355_v32  ;;  %v3584_v28 = vadd.f32 %v3583_v3, %v8358_v47  ;;  %v2253_v37 = vadd.f32 %v2189_v4, %v2053_v56  ;;  %v1854_v42 = vmul.f32 %v7844_v13, %v8288_v54  ;;  %1719 = vst [vmem:[#allocation2 + $0x2a1] sm:$0xff] %v8376_v29  ;;  %v8404_v7 = vld [vmem:[#allocation2 + $0x28a] sm:$0xff] }
 0x39d   : > { %v2389_v36 = vmul.f32 %v7937_v12, %v8391_v41  ;;  %1726 = vst [vmem:[#allocation2 + $0x2f1] sm:$0xff] %v8378_v14  ;;  %v3383_v16 = vmul.f32 %v8342_v5, %v8198_v23  ;;  %v2851_v19 = vadd.f32 %v2787_v26, %v8296_v33  ;;  %v2988_v30 = vmul.f32 %v7940_v10, %v8391_v41 }
 0x39e   : > { %v1194_v54 = vadd.f32 %v7810_v62, %v9806_v39  ;;  %v8411_v56 = vadd.f32 %v8320_v40, %v3446_v31  ;;  %v1990_v44 = vmul.f32 %v7868_v60, %v8235_v35  ;;  %v2589_v23 = vmul.f32 %v7949_v25, %v8309_v38 }
 0x39f   : > { %v2453_v53 = vadd.f32 %v2389_v36, %v2253_v37  ;;  %v3447_v33 = vadd.f32 %v3383_v16, %v8181_v6  ;;  %v3052_v3 = vadd.f32 %v2988_v30, %v2851_v19  ;;  %v3188_v4 = vmul.f32 %v7957_v52, %v8309_v38  ;;  %v9808_v16 = vld [vmem:[#allocation129_spill] sm:$0xff] }
 0x3a0   : > { %9807 = vst [vmem:[#allocation120_spill] sm:$0xff] %v8411_v56  ;;  %v1386_v26 = vmax.f32 %v1322_v43, 0.0  ;;  %v3384_v39 = vmul.f32 %v8342_v5, %v8221_v24  ;;  %v2054_v31 = vadd.f32 %v1990_v44, %v1854_v42  ;;  %v2190_v47 = vmul.f32 %v7898_v63, %v8404_v7 }
 0x3a1   : > { %v8424_v35 = vadd.f32 %v2589_v23, %v2453_v53  ;;  %v3385_v37 = vmul.f32 %v8342_v5, %v8271_v55  ;;  %v8428_v36 = vadd.f32 %v3188_v4, %v3052_v3  ;;  %v1329_v6 = vadd.f32 3.0, %v1194_v54  ;;  %v2299_v4 = vld [vmem:[#allocation2 + $0x188] sm:$0xff] }
 0x3a2   : > { %v1195_v19 = vadd.f32 %v7810_v62, %v9808_v16  ;;  %v2370_v43 = vmul.f32 %v7937_v12, %v2298_v0  ;;  %v8434_v30 = vmul.f32 %v7940_v10, %v2298_v0  ;;  %v3585_v24 = vadd.f32 %v3584_v28, %v8411_v56 }
 0x3a3   : > { %v2788_v42 = vmul.f32 %v7902_v11, %v8404_v7  ;;  %v3448_v44 = vadd.f32 %v3384_v39, %v8225_v22  ;;  %v8441_v55 = vadd.f32 %v8320_v40, %v3447_v33  ;;  %v3449_v53 = vadd.f32 %v3385_v37, %v8292_v45  ;;  %v8444_v23 = vld [vmem:[#allocation2 + $0x2a0] sm:$0xff] }
 0x3a4   : > { %v1450_v3 = vmin.f32 %v1386_v26, 6.0  ;;  %v2254_v16 = vadd.f32 %v2190_v47, %v2054_v31  ;;  %v2390_v28 = vmul.f32 %v7937_v12, %v8444_v23  ;;  %v2989_v56 = vmul.f32 %v7940_v10, %v8444_v23  ;;  %v9811_v39 = vld [vmem:[#allocation87_spill] sm:$0xff] }
 0x3a5   : > { %9809 = vst [vmem:[#allocation129_spill] sm:$0xff] %v8441_v55  ;;  %v2852_v0 = vadd.f32 %v2788_v42, %v8326_v49  ;;  %v1393_v22 = vmax.f32 %v1329_v6, 0.0  ;;  %v1330_v33 = vadd.f32 3.0, %v1195_v19  ;;  %v1188_v45 = vadd.f32 %v7810_v62, %v7708_v46 }
 0x3a6   : > { %v1196_v26 = vadd.f32 %v7810_v62, %v9811_v39  ;;  %v2454_v37 = vadd.f32 %v2390_v28, %v2254_v16  ;;  %v2590_v49 = vmul.f32 %v7949_v25, %v8376_v29  ;;  %v3189_v31 = vmul.f32 %v7957_v52, %v8376_v29 }
 0x3a7   : > { %v3053_v47 = vadd.f32 %v2989_v56, %v2852_v0  ;;  %v8462_v42 = vmul.f32 %v7937_v12, %v2299_v4  ;;  %v8465_v6 = vadd.f32 %v8320_v40, %v3448_v44  ;;  %v3586_v21 = vadd.f32 %v3585_v24, %v8441_v55 }
 0x3a8   : > { %v3386_v46 = vmul.f32 %v8342_v5, %v8350_v9  ;;  %v8472_v62 = vmul.f32 %v7902_v11, %v8451_v59  ;;  %v8475_v56 = vmul.f32 %v7940_v10, %v2299_v4  ;;  %v8477_v16 = vadd.f32 %v2590_v49, %v2454_v37 }
 0x3a9   : > { %9812 = vst [vmem:[#allocation87_spill] sm:$0xff] %v8465_v6  ;;  %v8479_v0 = vadd.f32 %v3189_v31, %v3053_v47  ;;  %v8483_v44 = vadd.f32 %v8320_v40, %v3449_v53  ;;  %v1514_v24 = vmul.f32 %v1450_v3, %v8355_v32  ;;  %v1457_v39 = vmin.f32 %v1393_v22, 6.0  ;;  %v8496_v47 = vld [vmem:[#allocation2 + $0x2e8] sm:$0xff] }
 0x3aa   : > { %9813 = vst [vmem:[#allocation150_spill] sm:$0xff] %v8472_v62  ;;  %9814 = vst [vmem:[#allocation151_spill] sm:$0xff] %v8475_v56  ;;  %v3450_v28 = vadd.f32 %v3386_v46, %v8307_v57  ;;  %v8487_v9 = vadd.f32 %v2370_v43, %v8229_v20  ;;  %v1394_v55 = vmax.f32 %v1330_v33, 0.0  ;;  %v1323_v48 = vadd.f32 3.0, %v1188_v45  ;;  %v8509_v33 = vld [vmem:[#allocation2 + $0x2f0] sm:$0xff] }
 0x3ab   : > { %9815 = vst [vmem:[#allocation152_spill] sm:$0xff] %v8483_v44  ;;  %v1331_v15 = vadd.f32 3.0, %v1196_v26  ;;  %v3587_v4 = vadd.f32 %v3586_v21, %v8465_v6  ;;  %v1855_v37 = vmul.f32 %v7844_v13, %v8391_v41  ;;  %v8492_v49 = vmul.f32 0.16666667, %v1514_v24 }
 0x3ac   : > { %v1521_v57 = vmul.f32 %v1457_v39, %v1194_v54  ;;  %v1991_v53 = vmul.f32 %v7868_v60, %v8309_v38  ;;  %v1458_v32 = vmin.f32 %v1394_v55, 6.0  ;;  %v1387_v3 = vmax.f32 %v1323_v48, 0.0  ;;  %v2119_v54 = vld [vmem:[#allocation2 + $0x292] sm:$0xff]  ;;  %v8523_v39 = vld [vmem:[#allocation2 + $0x2ea] sm:$0xff] }
 0x3ad   : > { %v1395_v20 = vmax.f32 %v1331_v15, 0.0  ;;  %v8499_v43 = vadd.f32 %v8320_v40, %v3450_v28  ;;  %v3588_v22 = vadd.f32 %v3587_v4, %v8483_v44  ;;  %v1998_v21 = vmul.f32 %v7868_v60, %v8330_v61  ;;  %1720 = vst [vmem:[#allocation2 + $0x2a9] sm:$0xff] %v8492_v49 }
 0x3ae   : > { %v8505_v41 = vmul.f32 0.16666667, %v1521_v57  ;;  %v3387_v38 = vmul.f32 %v8342_v5, %v8404_v7  ;;  %v1522_v48 = vmul.f32 %v1458_v32, %v1195_v19  ;;  %v1451_v15 = vmin.f32 %v1387_v3, 6.0 }
 0x3af   : > { %9816 = vst [vmem:[#allocation153_spill] sm:$0xff] %v8499_v43  ;;  %v1459_v55 = vmin.f32 %v1395_v20, 6.0  ;;  %v2055_v31 = vadd.f32 %v1991_v53, %v1855_v37  ;;  %v1862_v46 = vmul.f32 %v7844_v13, %v8496_v47  ;;  %v8515_v28 = vmul.f32 %v7949_v25, %v8330_v61  ;;  %v8534_v20 = vld [vmem:[#allocation2 + $0x2f2] sm:$0xff] }
 0x3b0   : > { %v8519_v24 = vmul.f32 %v7957_v52, %v8330_v61  ;;  %1727 = vst [vmem:[#allocation2 + $0x301] sm:$0xff] %v8505_v41  ;;  %v3451_v7 = vadd.f32 %v3387_v38, %v8328_v18  ;;  %v8525_v19 = vmul.f32 0.16666667, %v1522_v48  ;;  %v1515_v4 = vmul.f32 %v1451_v15, %v1188_v45  ;;  %v8539_v45 = vld [vmem:[#allocation8] ss:$0 sm:$0xff]  ;;  %v9820_v38 = vld [vmem:[#allocation133_spill] sm:$0xff] }
 0x3b1   : > { %9817 = vst [vmem:[#allocation154_spill] sm:$0xff] %v8515_v28  ;;  %v1523_v37 = vmul.f32 %v1459_v55, %v1196_v26  ;;  %v3589_v57 = vadd.f32 %v3588_v22, %v8499_v43  ;;  %v2191_v53 = vmul.f32 %v7898_v63, %v2119_v54  ;;  %v1863_v32 = vmul.f32 %v7844_v13, %v8509_v33  ;;  %v9819_v26 = vld [vmem:[#allocation101_spill] sm:$0xff] }
 0x3b2   : > { %9818 = vst [vmem:[#allocation155_spill] sm:$0xff] %v8519_v24  ;;  %v1999_v61 = vmul.f32 %v7868_v60, %v8378_v14  ;;  %v2789_v3 = vmul.f32 %v7902_v11, %v2119_v54  ;;  %1728 = vst [vmem:[#allocation2 + $0x309] sm:$0xff] %v8525_v19  ;;  %v8537_v18 = vmul.f32 0.16666667, %v1515_v4  ;;  %v8543_v22 = vadd.f32 %v8539_v45, %v9819_v26  ;;  %v8588_v24 = vld [vmem:[#allocation9] ss:$0 sm:$0xff] }
 0x3b3   : > { %v8547_v48 = vadd.f32 %v8539_v45, %v9820_v38  ;;  %v3388_v15 = vmul.f32 %v8342_v5, %v2119_v54  ;;  %v2062_v55 = vadd.f32 %v1998_v21, %v1862_v46  ;;  %v2198_v43 = vmul.f32 %v7898_v63, %v8523_v39 }
 0x3b4   : > { %v8552_v44 = vmul.f32 0.16666667, %v1523_v37  ;;  %v2255_v4 = vadd.f32 %v2191_v53, %v2055_v31  ;;  %v8555_v6 = vadd.f32 %v8320_v40, %v3451_v7  ;;  %v8559_v26 = vmul.f32 %v7937_v12, %v8496_v47  ;;  %v8563_v59 = vld [vmem:[#allocation2 + $0x2a8] sm:$0xff]  ;;  %1721 = vst [vmem:[#allocation2 + $0x2b9] sm:$0xff] %v8537_v18 }
 0x3b5   : > { %v1856_v38 = vmul.f32 %v7844_v13, %v8444_v23  ;;  %v1992_v21 = vmul.f32 %v7868_v60, %v8376_v29  ;;  %v2063_v54 = vadd.f32 %v1999_v61, %v1863_v32  ;;  %v2199_v31 = vmul.f32 %v7898_v63, %v8534_v20  ;;  %v8584_v50 = vld [vmem:[#allocation2 + $0x2a2] sm:$0xff] }
 0x3b6   : > { %9821 = vst [vmem:[#allocation101_spill] sm:$0xff] %v8555_v6  ;;  %9822 = vst [vmem:[#allocation133_spill] sm:$0xff] %v8559_v26  ;;  %v2391_v46 = vmul.f32 %v7937_v12, %v8563_v59  ;;  %v2853_v7 = vadd.f32 %v2789_v3, %v8424_v35  ;;  %v2990_v13 = vmul.f32 %v7940_v10, %v8563_v59  ;;  %v1324_v37 = vadd.f32 3.0, %v8543_v22 }
 0x3b7   : > { %1729 = vst [vmem:[#allocation2 + $0x319] sm:$0xff] %v8552_v44  ;;  %v8576_v23 = vld [vmem:[#allocation2 + $0x300] sm:$0xff]  ;;  %v1332_v29 = vadd.f32 3.0, %v8547_v48  ;;  %v2262_v53 = vadd.f32 %v2198_v43, %v2062_v55  ;;  %v2591_v61 = vmul.f32 %v7949_v25, %v8492_v49  ;;  %v2000_v2 = vmul.f32 %v7868_v60, %v8505_v41 }
 0x3b8   : > { %v2455_v32 = vadd.f32 %v2391_v46, %v2255_v4  ;;  %v2056_v56 = vadd.f32 %v1992_v21, %v1856_v38  ;;  %v3054_v35 = vadd.f32 %v2990_v13, %v2853_v7  ;;  %v3190_v3 = vmul.f32 %v7957_v52, %v8492_v49 }
 0x3b9   : > { %v1864_v28 = vmul.f32 %v8588_v24, %v8576_v23  ;;  %v2263_v43 = vadd.f32 %v2199_v31, %v2063_v54  ;;  %v2398_v4 = vmul.f32 %v7937_v12, %v8576_v23  ;;  %v2598_v60 = vmul.f32 %v7949_v25, %v8505_v41  ;;  %v8598_v38 = vld [vmem:[#allocation2 + $0x308] sm:$0xff] }
 0x3ba   : > { %v8592_v55 = vadd.f32 %v2591_v61, %v2455_v32  ;;  %9823 = vst [vmem:[#allocation156_spill] sm:$0xff] %v8598_v38  ;;  %v8600_v21 = vadd.f32 %v3190_v3, %v3054_v35  ;;  %v8602_v46 = vld [vmem:[#allocation2 + $0x302] sm:$0xff]  ;;  %v1388_v7 = vmax.f32 %v1324_v37, 0.0  ;;  %v1396_v13 = vmax.f32 %v1332_v29, 0.0 }
 0x3bb   : > { %9824 = vst [vmem:[#allocation157_spill] sm:$0xff] %v8602_v46  ;;  %v8606_v26 = vadd.f32 %v8539_v45, %v7873_v1  ;;  %v2192_v54 = vmul.f32 %v7898_v63, %v8584_v50  ;;  %v2064_v31 = vadd.f32 %v2000_v2, %v1864_v28  ;;  %v2462_v32 = vadd.f32 %v2398_v4, %v2262_v53 }
 0x3bc   : > { %v2200_v61 = vmul.f32 %v7898_v63, %v8602_v46  ;;  %v3452_v62 = vadd.f32 %v3388_v15, %v8428_v36  ;;  %v8615_v35 = vmul.f32 %v7940_v10, %v8496_v47  ;;  %v2399_v37 = vmul.f32 %v7937_v12, %v8598_v38  ;;  %v8628_v36 = vld [vmem:[#allocation2 + $0x2b8] sm:$0xff]  ;;  %v8634_v15 = vld [vmem:[#allocation9 + $0x5] ss:$0 sm:$0xff] }
 0x3bd   : > { %v2599_v1 = vmul.f32 %v7949_v25, %v8525_v19  ;;  %v3590_v29 = vadd.f32 %v3589_v57, %v8555_v6  ;;  %v8624_v2 = vmul.f32 %v7949_v25, %v8378_v14  ;;  %v2662_v28 = vadd.f32 %v2598_v60, %v2462_v32 }
 0x3be   : > { %9825 = vst [vmem:[#allocation158_spill] sm:$0xff] %v8615_v35  ;;  %v2798_v63 = vmul.f32 %v7902_v11, %v8602_v46  ;;  %v8632_v47 = vmul.f32 %v7957_v52, %v8378_v14  ;;  %v2790_v53 = vmul.f32 %v8634_v15, %v8584_v50  ;;  %v2463_v57 = vadd.f32 %v2399_v37, %v2263_v43 }
 0x3bf   : > { %9826 = vst [vmem:[#allocation159_spill] sm:$0xff] %v8624_v2  ;;  %v1452_v3 = vmin.f32 %v1388_v7, 6.0  ;;  %v2256_v4 = vadd.f32 %v2192_v54, %v2056_v56  ;;  %v2264_v6 = vadd.f32 %v2200_v61, %v2064_v31  ;;  %v1460_v2 = vmin.f32 %v1396_v13, 6.0  ;;  %v9828_v7 = vld [vmem:[#allocation98_spill] sm:$0xff] }
 0x3c0   : > { %9827 = vst [vmem:[#allocation160_spill] sm:$0xff] %v8632_v47  ;;  %v1325_v60 = vadd.f32 3.0, %v8606_v26  ;;  %v2854_v11 = vadd.f32 %v2790_v53, %v8477_v16  ;;  %v8640_v32 = vadd.f32 %v2599_v1, %v2463_v57  ;;  %v2392_v14 = vmul.f32 %v7937_v12, %v8628_v36  ;;  %v8646_v47 = vld [vmem:[#allocation2 + $0x318] sm:$0xff]  ;;  %v8661_v1 = vld [vmem:[#allocation9 + $0x6] ss:$0 sm:$0xff] }
 0x3c1   : > { %v2991_v46 = vmul.f32 %v7940_v10, %v8628_v36  ;;  %v2862_v35 = vadd.f32 %v2798_v63, %v2662_v28  ;;  %v2592_v56 = vmul.f32 %v7949_v25, %v8537_v18  ;;  %v2400_v43 = vmul.f32 %v7937_v12, %v8646_v47 }
 0x3c2   : > { %v1198_v16 = vadd.f32 %v8539_v45, %v9828_v7  ;;  %v2456_v13 = vadd.f32 %v2392_v14, %v2256_v4  ;;  %v3191_v31 = vmul.f32 %v7957_v52, %v8537_v18  ;;  %v2600_v10 = vmul.f32 %v7949_v25, %v8552_v44  ;;  %v8700_v7 = vld [vmem:[#allocation9 + $0x1] ss:$0 sm:$0xff] }
 0x3c3   : > { %v3055_v54 = vadd.f32 %v2991_v46, %v2854_v11  ;;  %v8659_v61 = vadd.f32 %v8320_v40, %v3452_v62  ;;  %v2464_v37 = vadd.f32 %v2400_v43, %v2264_v6  ;;  %v2999_v12 = vmul.f32 %v8661_v1, %v8646_v47  ;;  %v8675_v11 = vld [vmem:[#allocation9 + $0x3] ss:$0 sm:$0xff] }
 0x3c4   : > { %v3199_v28 = vmul.f32 %v7957_v52, %v8552_v44  ;;  %v8667_v63 = vadd.f32 %v2592_v56, %v2456_v13  ;;  %v1516_v53 = vmul.f32 %v1452_v3, %v8543_v22  ;;  %v1524_v25 = vmul.f32 %v1460_v2, %v8547_v48 }
 0x3c5   : > { %9829 = vst [vmem:[#allocation98_spill] sm:$0xff] %v8659_v61  ;;  %v8669_v46 = vadd.f32 %v3191_v31, %v3055_v54  ;;  %v8673_v57 = vadd.f32 %v2600_v10, %v2464_v37  ;;  %v3063_v62 = vadd.f32 %v2999_v12, %v2862_v35  ;;  %v1389_v6 = vmax.f32 %v1325_v60, 0.0  ;;  %v2121_v12 = vld [vmem:[#allocation2 + $0x2aa] sm:$0xff] }
 0x3c6   : > { %v1333_v4 = vadd.f32 3.0, %v1198_v16  ;;  %v8679_v14 = vmul.f32 %v8675_v11, %v8509_v33  ;;  %v1857_v52 = vmul.f32 %v8588_v24, %v8563_v59  ;;  %v8683_v56 = vmul.f32 0.16666667, %v1516_v53 }
 0x3c7   : > { %v8685_v43 = vmul.f32 0.16666667, %v1524_v25  ;;  %v3389_v22 = vmul.f32 %v8342_v5, %v8584_v50  ;;  %v8689_v48 = vadd.f32 %v3199_v28, %v3063_v62  ;;  %v1453_v35 = vmin.f32 %v1389_v6, 6.0  ;;  %v9836_v25 = vld [vmem:[#allocation141_spill] sm:$0xff] }
 0x3c8   : > { %9830 = vst [vmem:[#allocation161_spill] sm:$0xff] %v8679_v14  ;;  %v1397_v2 = vmax.f32 %v1333_v4, 0.0  ;;  %v3591_v3 = vadd.f32 %v3590_v29, %v8659_v61  ;;  %v8694_v60 = vmul.f32 %v8634_v15, %v8523_v39  ;;  %v8698_v59 = vmul.f32 %v8634_v15, %v8534_v20  ;;  %1722 = vst [vmem:[#allocation2 + $0x2c1] sm:$0xff] %v8683_v56  ;;  %v8740_v4 = vld [vmem:[#allocation2] sm:$0xff] }
 0x3c9   : > { %9831 = vst [vmem:[#allocation162_spill] sm:$0xff] %v8689_v48  ;;  %v1993_v13 = vmul.f32 %v8700_v7, %v8492_v49  ;;  %1730 = vst [vmem:[#allocation2 + $0x321] sm:$0xff] %v8685_v43  ;;  %v8708_v50 = vmul.f32 %v8661_v1, %v8509_v33  ;;  %v3453_v29 = vadd.f32 %v3389_v22, %v8479_v0  ;;  %5156 = vmatprep.mubr.msk.bf16.mxu1 %vm5980_vm0, %v8740_v4  ;;  %v8754_v22 = vld [vmem:[#allocation2 + $0x30a] sm:$0xff] }
 0x3ca   : > { %9832 = vst [vmem:[#allocation163_spill] sm:$0xff] %v8694_v60  ;;  %9833 = vst [vmem:[#allocation164_spill] sm:$0xff] %v8698_v59  ;;  %v1517_v54 = vmul.f32 %v1453_v35, %v8606_v26  ;;  %v1461_v31 = vmin.f32 %v1397_v2, 6.0  ;;  %v8714_v10 = vmul.f32 %v8342_v5, %v8523_v39  ;;  %v1865_v49 = vmul.f32 %v8588_v24, %v8598_v38  ;;  %v8730_v39 = vld [vmem:[#allocation9 + $0x7] ss:$0 sm:$0xff] }
 0x3cb   : > { %9834 = vst [vmem:[#allocation165_spill] sm:$0xff] %v8708_v50  ;;  %v2057_v37 = vadd.f32 %v1993_v13, %v1857_v52  ;;  %v2001_v28 = vmul.f32 %v8700_v7, %v8525_v19  ;;  %v8724_v0 = vadd.f32 %v8539_v45, %v9836_v25  ;;  %v8728_v26 = vmul.f32 %v8342_v5, %v8534_v20 }
 0x3cc   : > { %9835 = vst [vmem:[#allocation166_spill] sm:$0xff] %v8714_v10  ;;  %v8720_v53 = vmul.f32 0.16666667, %v1517_v54  ;;  %v1525_v33 = vmul.f32 %v1461_v31, %v1198_v16  ;;  %v8734_v62 = vmul.f32 %v8730_v39, %v8505_v41  ;;  %v8738_v6 = vmul.f32 %v8730_v39, %v8525_v19  ;;  %9840 = vst [vmem:[#allocation169_spill] sm:$0xff] %v8740_v4  ;;  %v8748_v16 = vld [vmem:[#allocation9 + $0x2] ss:$0 sm:$0xff] }
 0x3cd   : > { %9837 = vst [vmem:[#allocation141_spill] sm:$0xff] %v8728_v26  ;;  %v8746_v20 = vadd.f32 %v8370_v51, %v8487_v9  ;;  %v2193_v52 = vmul.f32 %v8748_v16, %v2121_v12  ;;  %v8752_v41 = vadd.f32 %v8320_v40, %v3453_v29  ;;  %9842 = vst [vmem:[#allocation171_spill] sm:$0xff] %v8754_v22 }
 0x3ce   : > { %9838 = vst [vmem:[#allocation167_spill] sm:$0xff] %v8734_v62  ;;  %9839 = vst [vmem:[#allocation168_spill] sm:$0xff] %v8738_v6  ;;  %v1994_v19 = vmul.f32 %v8700_v7, %v8537_v18  ;;  %v8759_v35 = vmul.f32 0.16666667, %v1525_v33  ;;  %v2791_v2 = vmul.f32 %v8634_v15, %v2121_v12  ;;  %v3390_v51 = vmul.f32 %v8342_v5, %v2121_v12 }
 0x3cf   : > { %9841 = vst [vmem:[#allocation170_spill] sm:$0xff] %v8752_v41  ;;  %1723 = vst [vmem:[#allocation2 + $0x2d1] sm:$0xff] %v8720_v53  ;;  %v2065_v9 = vadd.f32 %v2001_v28, %v1865_v49  ;;  %v2201_v13 = vmul.f32 %v8748_v16, %v8754_v22  ;;  %v2257_v54 = vadd.f32 %v2193_v52, %v2057_v37  ;;  %v1788_v31 = vld [vmem:[#allocation2 + $0x2c0] sm:$0xff]  ;;  %v1326_v33 = vadd.f32 3.0, %v8724_v0 }
 0x3d0   : > { %v8767_v29 = vmul.f32 %v8661_v1, %v8576_v23  ;;  %v1858_v18 = vmul.f32 %v8588_v24, %v8628_v36  ;;  %1731 = vst [vmem:[#allocation2 + $0x331] sm:$0xff] %v8759_v35  ;;  %v1866_v12 = vmul.f32 %v8588_v24, %v8646_v47  ;;  %v2002_v49 = vmul.f32 %v8700_v7, %v8552_v44  ;;  %v9844_v28 = vld [vmem:[#allocation68_spill] sm:$0xff]  ;;  %v2122_v26 = vld [vmem:[#allocation2 + $0x2ba] sm:$0xff] }
 0x3d1   : > { %v2393_v37 = vmul.f32 %v8675_v11, %v1788_v31  ;;  %v1199_v23 = vadd.f32 %v8539_v45, %v9844_v28  ;;  %v2855_v25 = vadd.f32 %v2791_v2, %v8592_v55  ;;  %v3454_v36 = vadd.f32 %v3390_v51, %v8600_v21  ;;  %v8786_v44 = vld [vmem:[#allocation9 + $0x4] ss:$0 sm:$0xff]  ;;  %v8792_v21 = vld [vmem:[#allocation2 + $0x31a] sm:$0xff] }
 0x3d2   : > { %9843 = vst [vmem:[#allocation172_spill] sm:$0xff] %v8767_v29  ;;  %v3592_v52 = vadd.f32 %v3591_v3, %v8752_v41  ;;  %v2992_v61 = vmul.f32 %v8661_v1, %v1788_v31  ;;  %v2265_v48 = vadd.f32 %v2201_v13, %v2065_v9  ;;  %v2799_v47 = vmul.f32 %v8634_v15, %v8754_v22  ;;  %v1796_v9 = vld [vmem:[#allocation2 + $0x320] sm:$0xff] }
 0x3d3   : > { %v2457_v6 = vadd.f32 %v2393_v37, %v2257_v54  ;;  %v2593_v10 = vmul.f32 %v8786_v44, %v8683_v56  ;;  %v2058_v45 = vadd.f32 %v1994_v19, %v1858_v18  ;;  %v3192_v55 = vmul.f32 %v8730_v39, %v8683_v56  ;;  %9845 = vst [vmem:[#allocation68_spill] sm:$0xff] %v8792_v21 }
 0x3d4   : > { %v3056_v28 = vadd.f32 %v2992_v61, %v2855_v25  ;;  %v1390_v3 = vmax.f32 %v1326_v33, 0.0  ;;  %v2066_v2 = vadd.f32 %v2002_v49, %v1866_v12  ;;  %v2202_v13 = vmul.f32 %v8748_v16, %v8792_v21 }
 0x3d5   : > { %v8794_v51 = vadd.f32 %v2593_v10, %v2457_v6  ;;  %v1334_v54 = vadd.f32 3.0, %v1199_v23  ;;  %v2194_v37 = vmul.f32 %v8748_v16, %v2122_v26  ;;  %v2401_v61 = vmul.f32 %v8675_v11, %v1796_v9 }
 0x3d6   : > { %v8799_v41 = vadd.f32 %v3192_v55, %v3056_v28  ;;  %v2601_v19 = vmul.f32 %v8786_v44, %v8685_v43  ;;  %v8805_v18 = vadd.f32 %v8320_v40, %v3454_v36  ;;  %v2863_v10 = vadd.f32 %v2799_v47, %v8640_v32  ;;  %v1789_v33 = vld [vmem:[#allocation2 + $0x2d0] sm:$0xff] }
 0x3d7   : > { %v2003_v6 = vmul.f32 %v8700_v7, %v8685_v43  ;;  %v2594_v12 = vmul.f32 %v8786_v44, %v8720_v53  ;;  %v2465_v49 = vadd.f32 %v2401_v61, %v2265_v48  ;;  %v2800_v25 = vmul.f32 %v8634_v15, %v8792_v21  ;;  %v2330_v61 = vld [vmem:[#allocation2 + $0x330] sm:$0xff] }
 0x3d8   : > { %v3193_v28 = vmul.f32 %v8730_v39, %v8720_v53  ;;  %v1454_v55 = vmin.f32 %v1390_v3, 6.0  ;;  %v2792_v36 = vmul.f32 %v8634_v15, %v2122_v26  ;;  %v2266_v22 = vadd.f32 %v2202_v13, %v2066_v2 }
 0x3d9   : > { %v2602_v32 = vmul.f32 %v8786_v44, %v8759_v35  ;;  %v1398_v47 = vmax.f32 %v1334_v54, 0.0  ;;  %v1859_v62 = vmul.f32 %v8588_v24, %v1788_v31  ;;  %v2258_v29 = vadd.f32 %v2194_v37, %v2058_v45 }
 0x3da   : > { %v2665_v59 = vadd.f32 %v2601_v19, %v2465_v49  ;;  %v2394_v48 = vmul.f32 %v8675_v11, %v1789_v33  ;;  %v2856_v21 = vadd.f32 %v2792_v36, %v8667_v63  ;;  %v3391_v38 = vmul.f32 %v8342_v5, %v2122_v26 }
 0x3db   : > { %v2993_v3 = vmul.f32 %v8661_v1, %v1789_v33  ;;  %v2402_v4 = vmul.f32 %v8675_v11, %v2330_v61  ;;  %v2864_v2 = vadd.f32 %v2800_v25, %v8673_v57  ;;  %v3000_v13 = vmul.f32 %v8661_v1, %v1796_v9 }
 0x3dc   : > { %v2458_v54 = vadd.f32 %v2394_v48, %v2258_v29  ;;  %v1518_v31 = vmul.f32 %v1454_v55, %v8724_v0  ;;  %v3001_v19 = vmul.f32 %v8661_v1, %v2330_v61  ;;  %v1462_v49 = vmin.f32 %v1398_v47, 6.0 }
 0x3dd   : > { %v3057_v45 = vadd.f32 %v2993_v3, %v2856_v21  ;;  %v2466_v37 = vadd.f32 %v2402_v4, %v2266_v22  ;;  %v3455_v63 = vadd.f32 %v3391_v38, %v8669_v46  ;;  %v1867_v26 = vmul.f32 %v8588_v24, %v1796_v9  ;;  %v2123_v46 = vld [vmem:[#allocation2 + $0x2c2] sm:$0xff]  ;;  %v9847_v3 = vld [vmem:[#allocation150_spill] sm:$0xff] }
 0x3de   : > { %v2658_v36 = vadd.f32 %v2594_v12, %v2458_v54  ;;  %v1582_v50 = vmul.f32 0.16666667, %v1518_v31  ;;  %v1526_v14 = vmul.f32 %v1462_v49, %v1199_v23  ;;  %v3033_v29 = vadd.f32 %v8434_v30, %v8340_v27  ;;  %v8842_v21 = vld [vmem:[#allocation2 + $0x322] sm:$0xff] }
 0x3df   : > { %v8831_v60 = vadd.f32 %v3193_v28, %v3057_v45  ;;  %v8833_v57 = vadd.f32 %v2602_v32, %v2466_v37  ;;  %v3593_v0 = vadd.f32 %v3592_v52, %v8805_v18  ;;  %v1995_v4 = vmul.f32 %v8700_v7, %v8683_v56  ;;  %v2699_v52 = vld [vmem:[#allocation2 + $0x18a] sm:$0xff] }
 0x3e0   : > { %v3064_v22 = vadd.f32 %v3000_v13, %v2863_v10  ;;  %v3200_v38 = vmul.f32 %v8730_v39, %v8685_v43  ;;  %1724 = vst [vmem:[#allocation2 + $0x2d9] sm:$0xff] %v1582_v50  ;;  %v3201_v23 = vmul.f32 %v8730_v39, %v8759_v35  ;;  %v8846_v9 = vmul.f32 0.16666667, %v1526_v14  ;;  %v9846_v14 = vld [vmem:[#allocation140_spill] sm:$0xff] }
 0x3e1   : > { %v2435_v27 = vadd.f32 %v8462_v42, %v8239_v58  ;;  %v3065_v30 = vadd.f32 %v3001_v19, %v2864_v2  ;;  %v2059_v12 = vadd.f32 %v1995_v4, %v1859_v62  ;;  %v8851_v56 = vadd.f32 %v8320_v40, %v3455_v63 }
 0x3e2   : > { %v2203_v43 = vmul.f32 %v8748_v16, %v8842_v21  ;;  %v1860_v10 = vmul.f32 %v8588_v24, %v1789_v33  ;;  %v2067_v25 = vadd.f32 %v2003_v6, %v1867_v26  ;;  %v2801_v35 = vmul.f32 %v8634_v15, %v8842_v21  ;;  %1732 = vst [vmem:[#allocation2 + $0x339] sm:$0xff] %v8846_v9 }
 0x3e3   : > { %v8861_v58 = vadd.f32 %v9846_v14, %v8363_v34  ;;  %v8864_v42 = vadd.f32 %v8381_v17, %v3033_v29  ;;  %v2195_v62 = vmul.f32 %v8748_v16, %v2123_v46  ;;  %v2793_v28 = vmul.f32 %v8634_v15, %v2123_v46 }
 0x3e4   : > { %v1996_v33 = vmul.f32 %v8700_v7, %v8720_v53  ;;  %v8870_v6 = vadd.f32 %v3200_v38, %v3064_v22  ;;  %v3392_v55 = vmul.f32 %v8342_v5, %v2123_v46  ;;  %v2635_v32 = vadd.f32 %v8387_v8, %v2435_v27 }
 0x3e5   : > { %v2771_v47 = vmul.f32 %v8634_v15, %v2699_v52  ;;  %v8875_v34 = vadd.f32 %v3201_v23, %v3065_v30  ;;  %v2259_v48 = vadd.f32 %v2195_v62, %v2059_v12  ;;  %v2857_v17 = vadd.f32 %v2793_v28, %v8794_v51  ;;  %v9848_v30 = vld [vmem:[#allocation133_spill] sm:$0xff]  ;;  %v9851_v62 = vld [vmem:[#allocation154_spill] sm:$0xff] }
 0x3e6   : > { %v2060_v61 = vadd.f32 %v1996_v33, %v1860_v10  ;;  %v8880_v2 = vadd.f32 %v9847_v3, %v8746_v20  ;;  %v3456_v53 = vadd.f32 %v3392_v55, %v8799_v41  ;;  %v3594_v13 = vadd.f32 %v3593_v0, %v8851_v56  ;;  %v9852_v55 = vld [vmem:[#allocation155_spill] sm:$0xff] }
 0x3e7   : > { %v2267_v54 = vadd.f32 %v2203_v43, %v2067_v25  ;;  %v1790_v31 = vld [vmem:[#allocation2 + $0x2d8] sm:$0xff]  ;;  %v2865_v37 = vadd.f32 %v2801_v35, %v2665_v59  ;;  %v1997_v49 = vmul.f32 %v8700_v7, %v1582_v50  ;;  %v2595_v20 = vmul.f32 %v8786_v44, %v1582_v50 }
 0x3e8   : > { %v2124_v45 = vld [vmem:[#allocation2 + $0x2d2] sm:$0xff]  ;;  %v2125_v8 = vld [vmem:[#allocation2 + $0x2da] sm:$0xff]  ;;  %v1861_v19 = vmul.f32 %v8588_v24, %v1790_v31  ;;  %v2395_v63 = vmul.f32 %v8675_v11, %v1790_v31  ;;  %v2994_v41 = vmul.f32 %v8661_v1, %v1790_v31  ;;  %v3194_v29 = vmul.f32 %v8730_v39, %v1582_v50 }
 0x3e9   : > { %v2196_v51 = vmul.f32 %v8748_v16, %v2124_v45  ;;  %v2794_v26 = vmul.f32 %v8634_v15, %v2124_v45  ;;  %v2197_v4 = vmul.f32 %v8748_v16, %v2125_v8  ;;  %v2331_v24 = vld [vmem:[#allocation2 + $0x338] sm:$0xff]  ;;  %v2603_v23 = vmul.f32 %v8786_v44, %v8846_v9 }
 0x3ea   : > { %v2061_v0 = vadd.f32 %v1997_v49, %v1861_v19  ;;  %v2459_v22 = vadd.f32 %v2395_v63, %v2259_v48  ;;  %v3058_v7 = vadd.f32 %v2994_v41, %v2857_v17  ;;  %v2403_v46 = vmul.f32 %v8675_v11, %v2331_v24  ;;  %v9849_v50 = vld [vmem:[#allocation158_spill] sm:$0xff]  ;;  %v9853_v3 = vld [vmem:[#allocation159_spill] sm:$0xff]  ;;  %v9855_v49 = vld [vmem:[#allocation165_spill] sm:$0xff] }
 0x3eb   : > { %v2260_v59 = vadd.f32 %v2196_v51, %v2060_v61  ;;  %v2858_v38 = vadd.f32 %v2794_v26, %v2658_v36  ;;  %v2795_v43 = vmul.f32 %v8634_v15, %v2125_v8  ;;  %v3393_v16 = vmul.f32 %v8342_v5, %v2124_v45  ;;  %v9850_v36 = vld [vmem:[#allocation161_spill] sm:$0xff]  ;;  %v9854_v45 = vld [vmem:[#allocation163_spill] sm:$0xff] }
 0x3ec   : > { %v2261_v27 = vadd.f32 %v2197_v4, %v2061_v0  ;;  %v2659_v12 = vadd.f32 %v2595_v20, %v2459_v22  ;;  %v3258_v25 = vadd.f32 %v3194_v29, %v3058_v7  ;;  %v3002_v35 = vmul.f32 %v8661_v1, %v2331_v24  ;;  %v9857_v29 = vld [vmem:[#allocation156_spill] sm:$0xff] }
 0x3ed   : > { %v2460_v52 = vadd.f32 %v9848_v30, %v2260_v59  ;;  %v3059_v10 = vadd.f32 %v9849_v50, %v2858_v38  ;;  %v2467_v33 = vadd.f32 %v2403_v46, %v2267_v54  ;;  %v8904_v44 = vadd.f32 %v8320_v40, %v3456_v53  ;;  %v9856_v53 = vld [vmem:[#allocation169_spill] sm:$0xff]  ;;  %v9858_v0 = vld [vmem:[#allocation164_spill] sm:$0xff]  ;;  %v3099_v38 = vld [vmem:[#allocation2 + $0x199] sm:$0xff] }
 0x3ee   : > { %v2461_v14 = vadd.f32 %v9850_v36, %v2261_v27  ;;  %v2859_v28 = vadd.f32 %v2795_v43, %v2659_v12  ;;  %v3457_v17 = vadd.f32 %v3393_v16, %v8831_v60  ;;  %v3202_v61 = vmul.f32 %v8730_v39, %v8846_v9  ;;  %v9859_v4 = vld [vmem:[#allocation160_spill] sm:$0xff]  ;;  %v9864_v12 = vld [vmem:[#allocation167_spill] sm:$0xff]  ;;  %v2730_v50 = vld [vmem:[#allocation2 + $0x332] sm:$0xff] }
 0x3ef   : > { %v2660_v11 = vadd.f32 %v9851_v62, %v2460_v52  ;;  %v3259_v48 = vadd.f32 %v9852_v55, %v3059_v10  ;;  %v2667_v63 = vadd.f32 %v2603_v23, %v2467_v33  ;;  %v3394_v20 = vmul.f32 %v8342_v5, %v2125_v8  ;;  %v9860_v22 = vld [vmem:[#allocation172_spill] sm:$0xff]  ;;  %v9865_v10 = vld [vmem:[#allocation151_spill] sm:$0xff]  ;;  %v9866_v62 = vld [vmem:[#allocation166_spill] sm:$0xff] }
 0x3f0   : > { %v2661_v31 = vadd.f32 %v9853_v3, %v2461_v14  ;;  %v3060_v51 = vadd.f32 %v9855_v49, %v2859_v28  ;;  %v2835_v54 = vadd.f32 %v2771_v47, %v2635_v32  ;;  %v8916_v26 = vmul.f32 %v9856_v53, %v8661_v1  ;;  %v9861_v32 = vld [vmem:[#allocation126_spill] sm:$0xff]  ;;  %v9862_v47 = vld [vmem:[#allocation123_spill] sm:$0xff]  ;;  %v3131_v36 = vld [vmem:[#allocation2 + $0x349] sm:$0xff] }
 0x3f1   : > { %v2860_v19 = vadd.f32 %v9854_v45, %v2660_v11  ;;  %v3066_v41 = vadd.f32 %v3002_v35, %v2865_v37  ;;  %v2998_v60 = vmul.f32 %v8661_v1, %v9857_v29  ;;  %v3458_v7 = vadd.f32 %v3394_v20, %v3258_v25  ;;  %v3100_v23 = vld [vmem:[#allocation2 + $0x1a1] sm:$0xff]  ;;  %v9863_v37 = vld [vmem:[#allocation157_spill] sm:$0xff] }
 0x3f2   : > { %v2861_v9 = vadd.f32 %v9858_v0, %v2661_v31  ;;  %v3260_v59 = vadd.f32 %v9859_v4, %v3060_v51  ;;  %v8924_v46 = vadd.f32 %v8320_v40, %v3457_v17  ;;  %v2833_v8 = vadd.f32 %v9862_v47, %v9861_v32  ;;  %v3132_v33 = vld [vmem:[#allocation2 + $0x351] sm:$0xff]  ;;  %v9867_v55 = vld [vmem:[#allocation168_spill] sm:$0xff]  ;;  %v9870_v49 = vld [vmem:[#allocation171_spill] sm:$0xff] }
 0x3f3   : > { %v3061_v24 = vadd.f32 %v9860_v22, %v2860_v19  ;;  %v8928_v27 = vadd.f32 %v3202_v61, %v3066_v41  ;;  %v3397_v1 = vmul.f32 %v8342_v5, %v9863_v37  ;;  %v3595_v30 = vadd.f32 %v3594_v13, %v8904_v44  ;;  %v9869_v45 = vld [vmem:[#allocation141_spill] sm:$0xff]  ;;  %v9871_v51 = vld [vmem:[#allocation68_spill] sm:$0xff]  ;;  %v2731_v41 = vld [vmem:[#allocation2 + $0x33a] sm:$0xff] }
 0x3f4   : > { %v3062_v52 = vadd.f32 %v2998_v60, %v2861_v9  ;;  %v3034_v25 = vadd.f32 %v9865_v10, %v2833_v8  ;;  %v3035_v16 = vadd.f32 %v8916_v26, %v8880_v2  ;;  %v3036_v35 = vadd.f32 %v8916_v26, %v2835_v54  ;;  %v9868_v2 = vld [vmem:[#allocation148_spill] sm:$0xff]  ;;  %v9872_v47 = vld [vmem:[#allocation149_spill] sm:$0xff] }
 0x3f5   : > { %v3261_v43 = vadd.f32 %v9864_v12, %v3061_v24  ;;  %v3171_v14 = vmul.f32 %v8730_v39, %v3099_v38  ;;  %v3459_v11 = vadd.f32 %v9866_v62, %v3259_v48  ;;  %v2802_v28 = vmul.f32 %v8634_v15, %v2730_v50  ;;  %v3298_v4 = vld [vmem:[#allocation2 + $0x18a] sm:$0xff] }
 0x3f6   : > { %v3172_v13 = vmul.f32 %v8730_v39, %v3100_v23  ;;  %v3262_v17 = vadd.f32 %v9867_v55, %v3062_v52  ;;  %v8944_v61 = vadd.f32 %v8320_v40, %v3458_v7  ;;  %v3596_v3 = vadd.f32 %v3595_v30, %v8924_v46  ;;  %v3299_v7 = vld [vmem:[#allocation2 + $0x19a] sm:$0xff]  ;;  %v9873_v37 = vld [vmem:[#allocation124_spill] sm:$0xff]  ;;  %v9876_v12 = vld [vmem:[#allocation137_spill] sm:$0xff] }
 0x3f7   : > { %v3170_v31 = vmul.f32 %v8730_v39, %v9868_v2  ;;  %v3460_v19 = vadd.f32 %v9869_v45, %v3260_v59  ;;  %v3398_v48 = vmul.f32 %v8342_v5, %v9870_v49  ;;  %v3399_v20 = vmul.f32 %v8342_v5, %v9871_v51  ;;  %v9875_v30 = vld [vmem:[#allocation147_spill] sm:$0xff]  ;;  %v9880_v55 = vld [vmem:[#allocation138_spill] sm:$0xff] }
 0x3f8   : > { %v3400_v54 = vmul.f32 %v8342_v5, %v8842_v21  ;;  %v3203_v29 = vmul.f32 %v8730_v39, %v3131_v36  ;;  %v2803_v60 = vmul.f32 %v8634_v15, %v2731_v41  ;;  %v3204_v0 = vmul.f32 %v8730_v39, %v3132_v33  ;;  %v9879_v33 = vld [vmem:[#allocation115_spill] sm:$0xff]  ;;  %v9881_v2 = vld [vmem:[#allocation162_spill] sm:$0xff] }
 0x3f9   : > { %v3234_v9 = vadd.f32 %v3170_v31, %v3034_v25  ;;  %v3461_v22 = vadd.f32 %v3397_v1, %v3261_v43  ;;  %v2866_v59 = vadd.f32 %v2802_v28, %v8833_v57  ;;  %v3235_v24 = vadd.f32 %v3171_v14, %v3035_v16  ;;  %v9874_v1 = vld [vmem:[#allocation108_spill] sm:$0xff] }
 0x3fa   : > { %v3236_v38 = vadd.f32 %v3172_v13, %v3036_v35  ;;  %v8961_v32 = vadd.f32 %v8320_v40, %v3459_v11  ;;  %v3597_v21 = vadd.f32 %v3596_v3, %v8944_v61  ;;  %v3369_v8 = vmul.f32 %v8342_v5, %v9872_v47  ;;  %v9877_v43 = vld [vmem:[#allocation136_spill] sm:$0xff]  ;;  %v9878_v11 = vld [vmem:[#allocation83_spill] sm:$0xff] }
 0x3fb   : > { %v3462_v23 = vadd.f32 %v3398_v48, %v3262_v17  ;;  %v8967_v15 = vadd.f32 %v8320_v40, %v3460_v19  ;;  %v3370_v39 = vmul.f32 %v8342_v5, %v3298_v4  ;;  %v3431_v57 = vadd.f32 %v9874_v1, %v9873_v37  ;;  %v3300_v16 = vld [vmem:[#allocation2 + $0x1a2] sm:$0xff]  ;;  %v3332_v4 = vld [vmem:[#allocation2 + $0x352] sm:$0xff] }
 0x3fc   : > { %v8974_v52 = vadd.f32 %v8320_v40, %v9875_v30  ;;  %v3561_v10 = vadd.f32 %v9877_v43, %v9876_v12  ;;  %v2867_v25 = vadd.f32 %v2803_v60, %v2667_v63  ;;  %v3371_v35 = vmul.f32 %v8342_v5, %v3299_v7  ;;  %v3331_v63 = vld [vmem:[#allocation2 + $0x34a] sm:$0xff] }
 0x3fd   : > { %v8980_v36 = vadd.f32 %v8320_v40, %v3461_v22  ;;  %v3598_v14 = vadd.f32 %v3597_v21, %v8961_v32  ;;  %v3067_v62 = vadd.f32 %v8916_v26, %v2866_v59  ;;  %v3432_v28 = vadd.f32 %v9878_v11, %v8861_v58  ;;  %v5529_v30 = vld [vmem:[#allocation11] ss:$0 sm:$0xff] }
 0x3fe   : > { %v8988_v13 = vadd.f32 %v8320_v40, %v9879_v33  ;;  %v3562_v17 = vadd.f32 %v3561_v10, %v9880_v55  ;;  %v3401_v3 = vmul.f32 %v8342_v5, %v2730_v50  ;;  %v3463_v31 = vadd.f32 %v3399_v20, %v9881_v2 }
 0x3ff   : > { %v8994_v45 = vadd.f32 %v8320_v40, %v3462_v23  ;;  %v3599_v19 = vadd.f32 %v3598_v14, %v8967_v15  ;;  %v3372_v49 = vmul.f32 %v8342_v5, %v3300_v16  ;;  %v3433_v58 = vadd.f32 %v3369_v8, %v8864_v42 }
 0x400   : > { %v9000_v48 = vadd.f32 %v8320_v40, %v3431_v57  ;;  %v3563_v51 = vadd.f32 %v3562_v17, %v8974_v52  ;;  %v3068_v60 = vadd.f32 %v8916_v26, %v2867_v25  ;;  %v3402_v50 = vmul.f32 %v8342_v5, %v2731_v41 }
 0x401   : > { %v3464_v20 = vadd.f32 %v3400_v54, %v8870_v6  ;;  %v3600_v22 = vadd.f32 %v3599_v19, %v8980_v36  ;;  %v3403_v59 = vmul.f32 %v8342_v5, %v3331_v63  ;;  %v3434_v7 = vadd.f32 %v3370_v39, %v3234_v9 }
 0x402   : > { %v9009_v21 = vadd.f32 %v8320_v40, %v3432_v28  ;;  %v3564_v42 = vadd.f32 %v3563_v51, %v8988_v13  ;;  %v3267_v47 = vadd.f32 %v3203_v29, %v3067_v62  ;;  %v3465_v8 = vadd.f32 %v3401_v3, %v8875_v34 }
 0x403   : > { %v9014_v26 = vadd.f32 %v8320_v40, %v3463_v31  ;;  %v3601_v41 = vadd.f32 %v3600_v22, %v8994_v45  ;;  %v3404_v6 = vmul.f32 %v8342_v5, %v3332_v4  ;;  %v3435_v54 = vadd.f32 %v3371_v35, %v3235_v24 }
 0x404   : > { %v9019_v23 = vadd.f32 %v8320_v40, %v3433_v58  ;;  %v3565_v9 = vadd.f32 %v3564_v42, %v9000_v48  ;;  %v3268_v39 = vadd.f32 %v3204_v0, %v3068_v60  ;;  %v3466_v37 = vadd.f32 %v3402_v50, %v8928_v27 }
 0x405   : > { %v9024_v29 = vadd.f32 %v8320_v40, %v3464_v20  ;;  %v3602_v34 = vadd.f32 %v3601_v41, %v9014_v26  ;;  %v3436_v1 = vadd.f32 %v3372_v49, %v3236_v38  ;;  %v9028_v57 = vadd.f32 %v8320_v40, %v3434_v7 }
 0x406   : > { %v3566_v5 = vadd.f32 %v3565_v9, %v9009_v21  ;;  %v3467_v24 = vadd.f32 %v3403_v59, %v3267_v47  ;;  %v9031_v43 = vadd.f32 %v5529_v30, %v3465_v8  ;;  %v9034_v0 = vadd.f32 %v5529_v30, %v3435_v54  ;;  %v5477_v54 = vld [vmem:[#allocation15] sm:$0xff]  }
 0x407   : > { %v3603_v10 = vadd.f32 %v3602_v34, %v9024_v29  ;;  %v3468_v25 = vadd.f32 %v3404_v6, %v3268_v39  ;;  %v9037_v16 = vadd.f32 %v5529_v30, %v3466_v37  ;;  %v9040_v35 = vadd.f32 %v5529_v30, %v3436_v1  ;;  %v5478_v39 = vld [vmem:[#allocation15 + $0x8] sm:$0xff]   ;;  %v5479_v37 = vld [vmem:[#allocation15 + $0x10] sm:$0xff]   ;;  %v5480_v34 = vld [vmem:[#allocation15 + $0x18] sm:$0xff]  }
 0x408   : > { %v3567_v27 = vadd.f32 %v3566_v5, %v9019_v23  ;;  %v9043_v14 = vadd.f32 %v5529_v30, %v3467_v24  ;;  %v5481_v1 = vld [vmem:[#allocation15 + $0x20] sm:$0xff]   ;;  %v5482_v5 = vld [vmem:[#allocation15 + $0x28] sm:$0xff]   ;;  %v5483_v24 = vld [vmem:[#allocation15 + $0x30] sm:$0xff]  }
 0x409   : > { %v3604_v38 = vadd.f32 %v3603_v10, %v9031_v43  ;;  %v9047_v28 = vadd.f32 %v5529_v30, %v3468_v25  ;;  %v5484_v30 = vld [vmem:[#allocation15 + $0x38] sm:$0xff]  }
 0x40a   : > { %v3568_v40 = vadd.f32 %v3567_v27, %v9028_v57  ;;  %v5045_v10 = vld [vmem:[#allocation14] ss:$0 sm:$0xff] }
 0x40b   : > { %v3605_v62 = vadd.f32 %v3604_v38, %v9037_v16  ;;  %9882 = vst [vmem:[#allocation140_spill] sm:$0xff] %v9047_v28 }
 0x40c   : > { %v3569_v11 = vadd.f32 %v3568_v40, %v9034_v0 }
 0x40d   : > { %v3606_v33 = vadd.f32 %v3605_v62, %v9043_v14 }
 0x40e   : > { %v3570_v17 = vadd.f32 %v3569_v11, %v9040_v35 }
 0x40f   : > { %v3607_v63 = vadd.f32 %v3606_v33, %v9047_v28 }
 0x410   : > { %v3571_v3 = vrot.slane %v3570_v17, 4 }
 0x411   : > { %v3608_v2 = vrot.slane %v3607_v63, 4 }
 0x412   : > { %v3572_v31 = vadd.f32 %v3571_v3, %v3570_v17  ;;  %v5485_v17 = vld [vmem:[#allocation18] sm:$0xff]   ;;  %v5487_v3 = vld [vmem:[#allocation18 + $0x10] sm:$0xff]  }
 0x413   : > { %v3609_v19 = vadd.f32 %v3608_v2, %v3607_v63  ;;  %v5486_v63 = vld [vmem:[#allocation18 + $0x8] sm:$0xff]   ;;  %v5488_v2 = vld [vmem:[#allocation18 + $0x18] sm:$0xff]  }
 0x414   : > { %v3573_v49 = vrot.slane %v3572_v31, 2 }
 0x415   : > { %v3610_v58 = vrot.slane %v3609_v19, 2 }
 0x416   : > { %v3574_v51 = vadd.f32 %v3573_v49, %v3572_v31  ;;  %v5490_v31 = vld [vmem:[#allocation18 + $0x28] sm:$0xff]   ;;  %v5492_v49 = vld [vmem:[#allocation18 + $0x38] sm:$0xff]  }
 0x417   : > { %v3611_v60 = vadd.f32 %v3610_v58, %v3609_v19  ;;  %v5491_v19 = vld [vmem:[#allocation18 + $0x30] sm:$0xff]   ;;  %v5054_v58 = vld [vmem:[#allocation17] ss:$0 sm:$0xff] }
 0x418   : > { %v3575_v4 = vrot.slane %v3574_v51, 1 }
 0x419   : > { %v3612_v50 = vrot.slane %v3611_v60, 1 }
 0x41a   : > { %v3576_v20 = vadd.f32 %v3575_v4, %v3574_v51  ;;  %v5981_v51 = vmov 1966171168   ;;  %v3859_v4 = vlaneseq }
 0x41b   : > { %v3613_v22 = vadd.f32 %v3612_v50, %v3611_v60  ;;  %v3857_v60 = vunpack.c.l.s4 %v5981_v51 }
 0x41c   : > { %v3615_v59 = vmul.f32 0.00390625, %v3576_v20 }
 0x41d   : > { %v3616_v7 = vmul.f32 0.00390625, %v3613_v22 }
 0x41e   : > { %v3617_v42 = vpack.c.bf16 %v3615_v59, %v3615_v59 }
 0x41f   : > { %v3618_v47 = vpack.c.bf16 %v3616_v7, %v3616_v7 }
 0x420   : > { %v3644_v8 = vunpack.c.l.b16 %v3617_v42  ;;  %v3858_v42 = vunpack.c.0.s8 %v3857_v60 }
 0x421   : > { %v3645_v41 = vunpack.c.l.b16 %v3618_v47  ;;  %v9061_v47 = vshrl.u32 %v3859_v4, 7 }
 0x423   : > { %v3647_v6 = vsel %vm3646_vm1, %v3645_v41, %v3644_v8 }
 0x424   : > { %v3648_v9 = vpack.c.b16 %v3647_v6, %v3647_v6 }
 0x426   : > { %5157 = vmatmul.mubr.bf16.vlgmr.msra.gmra.mrb[16].mxu1 %v3648_v9 }
 0x427   : > { %5161 = vmatpush3.bf16.msra.mxu1 %v5477_v54  ;;  %5176 = vmatprep.mubr.msk.bf16.mxu1 %vm5980_vm0, %v9856_v53  ;;  %v9064_v54 = vsub.s32 %v3858_v42, %v9061_v47 }
 0x428   : > { %5162 = vmatprep.subr.bf16.mxu1 %v9856_v53 }
 0x42b   : > { %5163 = vmatpush3.bf16.msra.mxu1 %v5478_v39 }
 0x42c   : > { %5164 = vmatprep.subr.bf16.mxu1 %v9856_v53 }
 0x42f   : > { %5165 = vmatpush3.bf16.msra.mxu1 %v5479_v37  ;;  %v9600_v37 = vsub.s32 0, %v9061_v47 }
 0x430   : > { %5166 = vmatprep.subr.bf16.mxu1 %v9856_v53 }
 0x433   : > { %5167 = vmatpush3.bf16.msra.mxu1 %v5480_v34 }
 0x434   : > { %5168 = vmatprep.subr.bf16.mxu1 %v9856_v53 }
 0x437   : > { %5169 = vmatpush3.bf16.msra.mxu1 %v5481_v1 }
 0x438   : > { %5170 = vmatprep.subr.bf16.mxu1 %v9856_v53 }
 0x43b   : > { %5171 = vmatpush3.bf16.msra.mxu1 %v5482_v5  ;;  %v9883_v5 = vld [vmem:[#allocation59_spill] sm:$0xff] }
 0x43c   : > { %5172 = vmatprep.subr.bf16.mxu1 %v9856_v53 }
 0x43f   : > { %5173 = vmatpush3.bf16.msra.mxu1 %v5483_v24 }
 0x440   : > { %5174 = vmatprep.subr.bf16.mxu1 %v9856_v53  ;;  %v5489_v53 = vld [vmem:[#allocation18 + $0x20] sm:$0xff]  }
 0x443   : > { %5175 = vmatpush3.bf16.msra.mxu1 %v5484_v30  ;;  %v9884_v30 = vld [vmem:[#allocation58_spill] sm:$0xff] }
 0x444   : > { %5180 = vmatprep.subr.bf16.mxu1 %v5485_v17 }
 0x4f9   : > { %v3732_v27 = vpop.f32.mrb[16].mxu1 }
 0x4fa   : > { %v3733_v25 = vadd.f32 %v5045_v10, %v3732_v27  ;;  %v5158_v38 = vpop.f32.mrb[17].mxu1  ;;  %v9885_v27 = vld [vmem:[#allocation63_spill] sm:$0xff] }
 0x4fb   : > { %v3735_v40 = vpop.f32.mrb[18].mxu1  ;;  %v9886_v38 = vld [vmem:[#allocation67_spill] sm:$0xff] }
 0x4fc   : > { %v3738_v62 = vmax.f32 %v3733_v25, 0.0  ;;  %v5159_v11 = vpop.f32.mrb[19].mxu1 }
 0x4fe   : > { %v3739_v33 = vpack.c.bf16 %v3738_v62, %v3738_v62  ;;  %v9887_v62 = vld [vmem:[#allocation70_spill] sm:$0xff] }
 0x500   : > { %5177 = vmatmul.mubr.bf16.vlgmr.msra.gmra.mrb[20].mxu1 %v3739_v33  ;;  %v9888_v33 = vld [vmem:[#allocation75_spill] sm:$0xff] }
 0x501   : > { %5181 = vmatpush3.bf16.msra.mxu1 %v5485_v17 }
 0x502   : > { %5182 = vmatprep.subr.bf16.mxu1 %v5486_v63 }
 0x505   : > { %5183 = vmatpush3.bf16.msra.mxu1 %v5486_v63  ;;  %v9889_v63 = vld [vmem:[#allocation76_spill] sm:$0xff] }
 0x506   : > { %5184 = vmatprep.subr.bf16.mxu1 %v5487_v3 }
 0x509   : > { %5185 = vmatpush3.bf16.msra.mxu1 %v5487_v3 }
 0x50a   : > { %5186 = vmatprep.subr.bf16.mxu1 %v5488_v2 }
 0x50d   : > { %5187 = vmatpush3.bf16.msra.mxu1 %v5488_v2 }
 0x50e   : > { %5188 = vmatprep.subr.bf16.mxu1 %v5489_v53 }
 0x511   : > { %5189 = vmatpush3.bf16.msra.mxu1 %v5489_v53 }
 0x512   : > { %5190 = vmatprep.subr.bf16.mxu1 %v5490_v31 }
 0x515   : > { %5191 = vmatpush3.bf16.msra.mxu1 %v5490_v31 }
 0x516   : > { %5192 = vmatprep.subr.bf16.mxu1 %v5491_v19 }
 0x519   : > { %5193 = vmatpush3.bf16.msra.mxu1 %v5491_v19  ;;  %v9890_v19 = vld [vmem:[#allocation86_spill] sm:$0xff] }
 0x51a   : > { %5194 = vmatprep.subr.bf16.mxu1 %v5492_v49 }
 0x51d   : > { %5195 = vmatpush3.bf16.msra.mxu1 %v5492_v49 }
 0x5d3   : > { %v3845_v50 = vpop.f32.mrb[20].mxu1 }
 0x5d4   : > { %v3846_v20 = vadd.f32 %v5054_v58, %v3845_v50  ;;  %v5178_v22 = vpop.f32.mrb[21].mxu1 }
 0x5d5   : > { %v3848_v59 = vpop.f32.mrb[22].mxu1 }
 0x5d6   : > { %v3851_v7 = vadd.f32 3.0, %v3846_v20  ;;  %v5179_v8 = vpop.f32.mrb[23].mxu1 }
 0x5d8   : > { %v3852_v41 = vmax.f32 %v3851_v7, 0.0 }
 0x5da   : > { %v3853_v6 = vmin.f32 %v3852_v41, 6.0 }
 0x5dc   : > { %v3854_v9 = vmul.f32 0.16666667, %v3853_v6 }
 0x5de   : > { %v9067_v39 = vrot.slane %v3854_v9, %v9064_v54 }
 0x5e0   : > { %v3870_v34 = vrot.slane %v9067_v39, %v9064_v54 }
 0x5e2   : > { %v9074_v1 = vrot.slane %v3870_v34, %v9600_v37 }
 0x5e4   : > { %v3888_v24 = vmul.f32 %v9074_v1, %v9883_v5  ;;  %v3889_v10 = vmul.f32 %v9074_v1, %v9884_v30  ;;  %v3890_v25 = vmul.f32 %v9074_v1, %v9885_v27  ;;  %v3891_v40 = vmul.f32 %v9074_v1, %v9886_v38 }
 0x5e5   : > { %v3892_v11 = vmul.f32 %v9074_v1, %v9887_v62  ;;  %v3893_v17 = vmul.f32 %v9074_v1, %v9888_v33  ;;  %v3894_v3 = vmul.f32 %v9074_v1, %v9889_v63  ;;  %v3895_v49 = vmul.f32 %v9074_v1, %v9890_v19 }
 0x5e6   : > { %v3952_v2 = vadd.f32 3.0, %v3888_v24  ;;  %v3953_v53 = vadd.f32 3.0, %v3889_v10  ;;  %v3954_v31 = vadd.f32 3.0, %v3890_v25  ;;  %v3955_v58 = vadd.f32 3.0, %v3891_v40 }
 0x5e7   : > { %v3956_v51 = vadd.f32 3.0, %v3892_v11  ;;  %v3957_v60 = vadd.f32 3.0, %v3893_v17  ;;  %v3958_v4 = vadd.f32 3.0, %v3894_v3  ;;  %v3959_v59 = vadd.f32 3.0, %v3895_v49 }
 0x5e8   : > { %v4016_v50 = vmax.f32 %v3952_v2, 0.0  ;;  %v4017_v20 = vmax.f32 %v3953_v53, 0.0  ;;  %v4018_v22 = vmax.f32 %v3954_v31, 0.0  ;;  %v4019_v7 = vmax.f32 %v3955_v58, 0.0 }
 0x5e9   : > { %v4020_v42 = vmax.f32 %v3956_v51, 0.0  ;;  %v4021_v8 = vmax.f32 %v3957_v60, 0.0  ;;  %v4022_v41 = vmax.f32 %v3958_v4, 0.0  ;;  %v4023_v5 = vmax.f32 %v3959_v59, 0.0  ;;  %v9891_v59 = vld [vmem:[#allocation89_spill] sm:$0xff] }
 0x5ea   : > { %v4080_v6 = vmin.f32 %v4016_v50, 6.0  ;;  %v4081_v9 = vmin.f32 %v4017_v20, 6.0  ;;  %v4082_v34 = vmin.f32 %v4018_v22, 6.0  ;;  %v4083_v30 = vmin.f32 %v4019_v7, 6.0 }
 0x5eb   : > { %v4084_v27 = vmin.f32 %v4020_v42, 6.0  ;;  %v4085_v38 = vmin.f32 %v4021_v8, 6.0  ;;  %v4086_v62 = vmin.f32 %v4022_v41, 6.0  ;;  %v4087_v37 = vmin.f32 %v4023_v5, 6.0 }
 0x5ec   : > { %v4144_v33 = vmul.f32 %v4080_v6, %v3888_v24  ;;  %v4145_v63 = vmul.f32 %v4081_v9, %v3889_v10  ;;  %v4146_v19 = vmul.f32 %v4082_v34, %v3890_v25  ;;  %v4147_v2 = vmul.f32 %v4083_v30, %v3891_v40  ;;  %v9892_v10 = vld [vmem:[#allocation95_spill] sm:$0xff]  ;;  %v9895_v34 = vld [vmem:[#allocation106_spill] sm:$0xff] }
 0x5ed   : > { %v4148_v53 = vmul.f32 %v4084_v27, %v3892_v11  ;;  %v4149_v31 = vmul.f32 %v4085_v38, %v3893_v17  ;;  %v4150_v28 = vmul.f32 %v4086_v62, %v3894_v3  ;;  %v4151_v4 = vmul.f32 %v4087_v37, %v3895_v49  ;;  %v9893_v3 = vld [vmem:[#allocation96_spill] sm:$0xff]  ;;  %v9894_v6 = vld [vmem:[#allocation103_spill] sm:$0xff]  ;;  %v9896_v27 = vld [vmem:[#allocation113_spill] sm:$0xff] }
 0x5ee   : > { %v4208_v58 = vmul.f32 0.16666667, %v4144_v33  ;;  %v4209_v51 = vmul.f32 0.16666667, %v4145_v63  ;;  %v4210_v60 = vmul.f32 0.16666667, %v4146_v19  ;;  %v3896_v7 = vmul.f32 %v9074_v1, %v9891_v59 }
 0x5ef   : > { %v4211_v50 = vmul.f32 0.16666667, %v4147_v2  ;;  %v4212_v20 = vmul.f32 0.16666667, %v4148_v53  ;;  %v4213_v22 = vmul.f32 0.16666667, %v4149_v31  ;;  %v3897_v25 = vmul.f32 %v9074_v1, %v9892_v10 }
 0x5f0   : > { %v4272_v42 = vpack.c.bf16 %v4209_v51, %v4208_v58  ;;  %v4214_v8 = vmul.f32 0.16666667, %v4150_v28  ;;  %v4215_v24 = vmul.f32 0.16666667, %v4151_v4  ;;  %v3960_v17 = vadd.f32 3.0, %v3896_v7  ;;  %v9897_v62 = vld [vmem:[#allocation121_spill] sm:$0xff] }
 0x5f1   : > { %v4273_v40 = vpack.c.bf16 %v4211_v50, %v4210_v60  ;;  %v4274_v11 = vpack.c.bf16 %v4213_v22, %v4212_v20  ;;  %v3898_v41 = vmul.f32 %v9074_v1, %v9893_v3  ;;  %v3961_v49 = vadd.f32 3.0, %v3897_v25  ;;  %v9898_v53 = vld [vmem:[#allocation128_spill] sm:$0xff] }
 0x5f2   : > { %5196 = vmatprep.mubr.bf16.mxu1 %v4272_v42  ;;  %v4275_v37 = vpack.c.bf16 %v4215_v24, %v4214_v8  ;;  %v3899_v9 = vmul.f32 %v9074_v1, %v9894_v6  ;;  %v3900_v5 = vmul.f32 %v9074_v1, %v9895_v34  ;;  %v4024_v28 = vmax.f32 %v3960_v17, 0.0 }
 0x5f3   : > { %5197 = vmatmul.mubr.bf16.vlgmr.msra.gmra.mrb[24].mxu1 %v4273_v40  ;;  %v3962_v30 = vadd.f32 3.0, %v3898_v41  ;;  %v3901_v38 = vmul.f32 %v9074_v1, %v9896_v27  ;;  %v3902_v33 = vmul.f32 %v9074_v1, %v9897_v62  ;;  %v4025_v63 = vmax.f32 %v3961_v49, 0.0 }
 0x5f4   : > { %5200 = vmatprep.mubr.bf16.mxu1 %v4274_v11  ;;  %v3963_v19 = vadd.f32 3.0, %v3899_v9  ;;  %v3964_v2 = vadd.f32 3.0, %v3900_v5  ;;  %v3903_v31 = vmul.f32 %v9074_v1, %v9898_v53  ;;  %v4088_v58 = vmin.f32 %v4024_v28, 6.0 }
 0x5f5   : > { %v4026_v51 = vmax.f32 %v3962_v30, 0.0  ;;  %v3965_v60 = vadd.f32 3.0, %v3901_v38  ;;  %v3966_v4 = vadd.f32 3.0, %v3902_v33  ;;  %v4089_v50 = vmin.f32 %v4025_v63, 6.0 }
 0x5f6   : > { %v4027_v20 = vmax.f32 %v3963_v19, 0.0  ;;  %v4028_v22 = vmax.f32 %v3964_v2, 0.0  ;;  %v3967_v59 = vadd.f32 3.0, %v3903_v31  ;;  %v4152_v42 = vmul.f32 %v4088_v58, %v3896_v7  ;;  %v9899_v7 = vld [vmem:[#allocation78_spill] sm:$0xff] }
 0x5f7   : > { %v4090_v8 = vmin.f32 %v4026_v51, 6.0  ;;  %v4029_v24 = vmax.f32 %v3965_v60, 0.0  ;;  %v4030_v10 = vmax.f32 %v3966_v4, 0.0  ;;  %v4153_v40 = vmul.f32 %v4089_v50, %v3897_v25  ;;  %v9900_v50 = vld [vmem:[#allocation130_spill] sm:$0xff] }
 0x5f8   : > { %v4091_v11 = vmin.f32 %v4027_v20, 6.0  ;;  %v4092_v17 = vmin.f32 %v4028_v22, 6.0  ;;  %v4031_v3 = vmax.f32 %v3967_v59, 0.0  ;;  %v4216_v49 = vmul.f32 0.16666667, %v4152_v42  ;;  %v9901_v22 = vld [vmem:[#allocation131_spill] sm:$0xff] }
 0x5f9   : > { %v4154_v6 = vmul.f32 %v4090_v8, %v3898_v41  ;;  %v4093_v34 = vmin.f32 %v4029_v24, 6.0  ;;  %v4094_v27 = vmin.f32 %v4030_v10, 6.0  ;;  %v4217_v28 = vmul.f32 0.16666667, %v4153_v40  ;;  %v9903_v10 = vld [vmem:[#allocation90_spill] sm:$0xff] }
 0x5fa   : > { %v4155_v30 = vmul.f32 %v4091_v11, %v3899_v9  ;;  %v4156_v62 = vmul.f32 %v4092_v17, %v3900_v5  ;;  %v4095_v53 = vmin.f32 %v4031_v3, 6.0  ;;  %v3904_v58 = vmul.f32 %v9074_v1, %v9899_v7  ;;  %v9904_v3 = vld [vmem:[#allocation60_spill] sm:$0xff] }
 0x5fb   : > { %5201 = vmatmul.mubr.bf16.gmra.mrb[28].mxu1 %v4275_v37  ;;  %v4218_v63 = vmul.f32 0.16666667, %v4154_v6  ;;  %v4157_v19 = vmul.f32 %v4093_v34, %v3901_v38  ;;  %v4158_v2 = vmul.f32 %v4094_v27, %v3902_v33  ;;  %v4276_v51 = vpack.c.bf16 %v4217_v28, %v4216_v49  ;;  %v9902_v33 = vld [vmem:[#allocation91_spill] sm:$0xff] }
 0x5fc   : > { %v4219_v25 = vmul.f32 0.16666667, %v4155_v30  ;;  %v4220_v60 = vmul.f32 0.16666667, %v4156_v62  ;;  %v3863_v4 = vcombine.high %v9067_v39, %v9067_v39  ;;  %v3905_v20 = vmul.f32 %v9074_v1, %v9900_v50 }
 0x5fd   : > { %v4221_v41 = vmul.f32 0.16666667, %v4157_v19  ;;  %v3968_v9 = vadd.f32 3.0, %v3904_v58  ;;  %5204 = vmatprep.mubr.bf16.mxu1 %v4276_v51  ;;  %v4159_v5 = vmul.f32 %v4095_v53, %v3903_v31  ;;  %v4222_v37 = vmul.f32 0.16666667, %v4158_v2 }
 0x5fe   : > { %v3906_v38 = vmul.f32 %v9074_v1, %v9901_v22  ;;  %v3907_v59 = vmul.f32 %v9074_v1, %v9902_v33  ;;  %v4277_v42 = vpack.c.bf16 %v4219_v25, %v4218_v63  ;;  %v3969_v8 = vadd.f32 3.0, %v3905_v20 }
 0x5ff   : > { %v4032_v24 = vmax.f32 %v3968_v9, 0.0  ;;  %v3908_v39 = vmul.f32 %v9074_v1, %v9903_v10  ;;  %v4278_v40 = vpack.c.bf16 %v4221_v41, %v4220_v60  ;;  %v3909_v49 = vmul.f32 %v9074_v1, %v9904_v3 }
 0x600   : > { %v3970_v11 = vadd.f32 3.0, %v3906_v38  ;;  %v3971_v17 = vadd.f32 3.0, %v3907_v59  ;;  %v4033_v31 = vmax.f32 %v3969_v8, 0.0  ;;  %v3910_v27 = vmul.f32 %v9074_v1, %v9876_v12 }
 0x601   : > { %v4096_v6 = vmin.f32 %v4032_v24, 6.0  ;;  %v3972_v34 = vadd.f32 3.0, %v3908_v39  ;;  %v3973_v62 = vadd.f32 3.0, %v3909_v49  ;;  %v3911_v53 = vmul.f32 %v9074_v1, %v9880_v55 }
 0x602   : > { %v4034_v28 = vmax.f32 %v3970_v11, 0.0  ;;  %v4035_v30 = vmax.f32 %v3971_v17, 0.0  ;;  %v4097_v63 = vmin.f32 %v4033_v31, 6.0  ;;  %v3974_v7 = vadd.f32 3.0, %v3910_v27 }
 0x603   : > { %5205 = vmatmul.mubr.bf16.gmra.mrb[32].mxu1 %v4277_v42  ;;  %v4160_v19 = vmul.f32 %v4096_v6, %v3904_v58  ;;  %v4036_v2 = vmax.f32 %v3972_v34, 0.0  ;;  %v4037_v60 = vmax.f32 %v3973_v62, 0.0  ;;  %v3975_v41 = vadd.f32 3.0, %v3911_v53 }
 0x604   : > { %5208 = vmatprep.mubr.bf16.mxu1 %v4278_v40  ;;  %v4098_v51 = vmin.f32 %v4034_v28, 6.0  ;;  %v4099_v25 = vmin.f32 %v4035_v30, 6.0  ;;  %v4223_v50 = vmul.f32 0.16666667, %v4159_v5  ;;  %v4161_v9 = vmul.f32 %v4097_v63, %v3905_v20 }
 0x605   : > { %v4100_v22 = vmin.f32 %v4036_v2, 6.0  ;;  %v4038_v12 = vmax.f32 %v3974_v7, 0.0  ;;  %v4224_v33 = vmul.f32 0.16666667, %v4160_v19  ;;  %v4101_v24 = vmin.f32 %v4037_v60, 6.0 }
 0x606   : > { %v4162_v8 = vmul.f32 %v4098_v51, %v3906_v38  ;;  %v4225_v10 = vmul.f32 0.16666667, %v4161_v9  ;;  %v4039_v11 = vmax.f32 %v3975_v41, 0.0  ;;  %v3912_v55 = vmul.f32 %v9074_v1, %v8974_v52 }
 0x607   : > { %v4163_v58 = vmul.f32 %v4099_v25, %v3907_v59  ;;  %v4164_v42 = vmul.f32 %v4100_v22, %v3908_v39  ;;  %v3877_v40 = vrot.slane %v3863_v4, %v9064_v54  ;;  %v4279_v17 = vpack.c.bf16 %v4223_v50, %v4222_v37 }
 0x608   : > { %v4102_v3 = vmin.f32 %v4038_v12, 6.0  ;;  %v3913_v5 = vmul.f32 %v9074_v1, %v8988_v13  ;;  %v4280_v20 = vpack.c.bf16 %v4225_v10, %v4224_v33  ;;  %v4226_v31 = vmul.f32 0.16666667, %v4162_v8 }
 0x609   : > { %v4165_v6 = vmul.f32 %v4101_v24, %v3909_v49  ;;  %v3976_v34 = vadd.f32 3.0, %v3912_v55  ;;  %v4103_v38 = vmin.f32 %v4039_v11, 6.0  ;;  %v3914_v30 = vmul.f32 %v9074_v1, %v9000_v48  ;;  %v9906_v11 = vld [vmem:[#allocation144_spill] sm:$0xff] }
 0x60a   : > { %v3977_v28 = vadd.f32 3.0, %v3913_v5  ;;  %v3915_v52 = vmul.f32 %v9074_v1, %v9009_v21  ;;  %v4227_v54 = vmul.f32 0.16666667, %v4163_v58  ;;  %v4228_v4 = vmul.f32 0.16666667, %v4164_v42 }
 0x60b   : > { %5209 = vmatmul.mubr.bf16.gmra.mrb[36].mxu1 %v4279_v17  ;;  %v4040_v37 = vmax.f32 %v3976_v34, 0.0  ;;  %v3916_v13 = vmul.f32 %v9074_v1, %v9019_v23  ;;  %v3978_v39 = vadd.f32 3.0, %v3914_v30  ;;  %v3917_v62 = vmul.f32 %v9074_v1, %v9028_v57 }
 0x60c   : > { %5212 = vmatprep.mubr.bf16.mxu1 %v4280_v20  ;;  %v4041_v59 = vmax.f32 %v3977_v28, 0.0  ;;  %v3979_v49 = vadd.f32 3.0, %v3915_v52  ;;  %v4229_v63 = vmul.f32 0.16666667, %v4165_v6  ;;  %v4166_v19 = vmul.f32 %v4102_v3, %v3910_v27  ;;  %v9908_v6 = vld [vmem:[#allocation145_spill] sm:$0xff] }
 0x60d   : > { %v4104_v2 = vmin.f32 %v4040_v37, 6.0  ;;  %v3980_v48 = vadd.f32 3.0, %v3916_v13  ;;  %v4167_v7 = vmul.f32 %v4103_v38, %v3911_v53  ;;  %v3981_v21 = vadd.f32 3.0, %v3917_v62 }
 0x60e   : > { %v4105_v51 = vmin.f32 %v4041_v59, 6.0  ;;  %v3918_v25 = vmul.f32 %v9074_v1, %v9034_v0  ;;  %v9905_v60 = vsub.s32 0, %v9061_v47  ;;  %v4042_v23 = vmax.f32 %v3978_v39, 0.0 }
 0x60f   : > { %v4043_v50 = vmax.f32 %v3979_v49, 0.0  ;;  %v4281_v9 = vpack.c.bf16 %v4227_v54, %v4226_v31  ;;  %v4044_v22 = vmax.f32 %v3980_v48, 0.0  ;;  %v3919_v57 = vmul.f32 %v9074_v1, %v9040_v35  ;;  %v9907_v35 = vld [vmem:[#allocation143_spill] sm:$0xff] }
 0x610   : > { %v9143_v41 = vrot.slane %v3877_v40, %v9905_v60  ;;  %v4282_v27 = vpack.c.bf16 %v4229_v63, %v4228_v4  ;;  %v4168_v12 = vmul.f32 %v4104_v2, %v3912_v55  ;;  %v4169_v33 = vmul.f32 %v4105_v51, %v3913_v5  ;;  %v9909_v4 = vld [vmem:[#allocation109_spill] sm:$0xff]  ;;  %v9910_v63 = vld [vmem:[#allocation112_spill] sm:$0xff]  ;;  %v9911_v51 = vld [vmem:[#allocation119_spill] sm:$0xff] }
 0x611   : > { %v4045_v53 = vmax.f32 %v3981_v21, 0.0  ;;  %v4230_v8 = vmul.f32 0.16666667, %v4166_v19  ;;  %v4231_v24 = vmul.f32 0.16666667, %v4167_v7  ;;  %v3982_v10 = vadd.f32 3.0, %v3918_v25 }
 0x612   : > { %v4106_v0 = vmin.f32 %v4042_v23, 6.0  ;;  %v4107_v47 = vmin.f32 %v4043_v50, 6.0  ;;  %v3920_v58 = vmul.f32 %v9143_v41, %v9906_v11  ;;  %v4108_v42 = vmin.f32 %v4044_v22, 6.0 }
 0x613   : > { %5213 = vmatmul.mubr.bf16.gmra.mrb[40].mxu1 %v4281_v9  ;;  %v3983_v40 = vadd.f32 3.0, %v3919_v57  ;;  %v4232_v17 = vmul.f32 0.16666667, %v4168_v12  ;;  %v4233_v3 = vmul.f32 0.16666667, %v4169_v33  ;;  %v4109_v20 = vmin.f32 %v4045_v53, 6.0 }
 0x614   : > { %5216 = vmatprep.mubr.bf16.mxu1 %v4282_v27  ;;  %v3921_v1 = vmul.f32 %v9143_v41, %v9907_v35  ;;  %v4283_v55 = vpack.c.bf16 %v4231_v24, %v4230_v8  ;;  %v4046_v5 = vmax.f32 %v3982_v10, 0.0  ;;  %v3984_v31 = vadd.f32 3.0, %v3920_v58  ;;  %v9912_v24 = vld [vmem:[#allocation117_spill] sm:$0xff] }
 0x615   : > { %v3922_v34 = vmul.f32 %v9143_v41, %v9908_v6  ;;  %v4170_v38 = vmul.f32 %v4106_v0, %v3914_v30  ;;  %v4171_v28 = vmul.f32 %v4107_v47, %v3915_v52  ;;  %v3923_v37 = vmul.f32 %v9143_v41, %v9909_v4 }
 0x616   : > { %v3985_v54 = vadd.f32 3.0, %v3921_v1  ;;  %v4172_v59 = vmul.f32 %v4108_v42, %v3916_v13  ;;  %v4047_v39 = vmax.f32 %v3983_v40, 0.0  ;;  %v4048_v49 = vmax.f32 %v3984_v31, 0.0  ;;  %v9913_v42 = vld [vmem:[#allocation66_spill] sm:$0xff] }
 0x617   : > { %v3924_v19 = vmul.f32 %v9143_v41, %v9910_v63  ;;  %v4284_v2 = vpack.c.bf16 %v4233_v3, %v4232_v17  ;;  %v4173_v48 = vmul.f32 %v4109_v20, %v3917_v62  ;;  %v3925_v21 = vmul.f32 %v9143_v41, %v9911_v51 }
 0x618   : > { %v4049_v7 = vmax.f32 %v3985_v54, 0.0  ;;  %v3986_v60 = vadd.f32 3.0, %v3922_v34  ;;  %v3987_v30 = vadd.f32 3.0, %v3923_v37  ;;  %v4234_v52 = vmul.f32 0.16666667, %v4170_v38  ;;  %v9915_v54 = vld [vmem:[#allocation120_spill] sm:$0xff] }
 0x619   : > { %v4110_v23 = vmin.f32 %v4046_v5, 6.0  ;;  %v3988_v50 = vadd.f32 3.0, %v3924_v19  ;;  %v3989_v9 = vadd.f32 3.0, %v3925_v21  ;;  %v4235_v13 = vmul.f32 0.16666667, %v4171_v28  ;;  %v9914_v5 = vld [vmem:[#allocation122_spill] sm:$0xff] }
 0x61a   : > { %v4111_v22 = vmin.f32 %v4047_v39, 6.0  ;;  %v4112_v27 = vmin.f32 %v4048_v49, 6.0  ;;  %v4113_v12 = vmin.f32 %v4049_v7, 6.0  ;;  %v4236_v33 = vmul.f32 0.16666667, %v4172_v59 }
 0x61b   : > { %5217 = vmatmul.mubr.bf16.gmra.mrb[44].mxu1 %v4283_v55  ;;  %v4237_v53 = vmul.f32 0.16666667, %v4173_v48  ;;  %v4050_v8 = vmax.f32 %v3986_v60, 0.0  ;;  %v4051_v62 = vmax.f32 %v3987_v30, 0.0  ;;  %v3926_v10 = vmul.f32 %v9143_v41, %v9912_v24 }
 0x61c   : > { %5220 = vmatprep.mubr.bf16.mxu1 %v4284_v2  ;;  %v4174_v0 = vmul.f32 %v4110_v23, %v3918_v25  ;;  %v4052_v47 = vmax.f32 %v3988_v50, 0.0  ;;  %v4053_v11 = vmax.f32 %v3989_v9, 0.0  ;;  %v3927_v40 = vmul.f32 %v9143_v41, %v9913_v42  ;;  %v9916_v23 = vld [vmem:[#allocation129_spill] sm:$0xff] }
 0x61d   : > { %v4285_v17 = vpack.c.bf16 %v4235_v13, %v4234_v52  ;;  %v4175_v3 = vmul.f32 %v4111_v22, %v3919_v57  ;;  %v4176_v20 = vmul.f32 %v4112_v27, %v3920_v58  ;;  %v4177_v35 = vmul.f32 %v4113_v12, %v3921_v1  ;;  %v9917_v22 = vld [vmem:[#allocation87_spill] sm:$0xff] }
 0x61e   : > { %v4286_v55 = vpack.c.bf16 %v4237_v53, %v4236_v33  ;;  %v3928_v31 = vmul.f32 %v9143_v41, %v9914_v5  ;;  %v4114_v6 = vmin.f32 %v4050_v8, 6.0  ;;  %v4115_v38 = vmin.f32 %v4051_v62, 6.0  ;;  %v9918_v53 = vld [vmem:[#allocation152_spill] sm:$0xff]  ;;  %v9919_v62 = vld [vmem:[#allocation153_spill] sm:$0xff] }
 0x61f   : > { %v3990_v28 = vadd.f32 3.0, %v3926_v10  ;;  %v3929_v25 = vmul.f32 %v9143_v41, %v9915_v54  ;;  %v4238_v4 = vmul.f32 0.16666667, %v4174_v0  ;;  %v4116_v59 = vmin.f32 %v4052_v47, 6.0  ;;  %v9920_v5 = vld [vmem:[#allocation101_spill] sm:$0xff] }
 0x620   : > { %v4117_v39 = vmin.f32 %v4053_v11, 6.0  ;;  %v3991_v49 = vadd.f32 3.0, %v3927_v40  ;;  %v4239_v63 = vmul.f32 0.16666667, %v4175_v3  ;;  %v4240_v57 = vmul.f32 0.16666667, %v4176_v20 }
 0x621   : > { %v4241_v58 = vmul.f32 0.16666667, %v4177_v35  ;;  %v3992_v1 = vadd.f32 3.0, %v3928_v31  ;;  %v3993_v2 = vadd.f32 3.0, %v3929_v25  ;;  %v4178_v48 = vmul.f32 %v4114_v6, %v3922_v34 }
 0x622   : > { %v4179_v7 = vmul.f32 %v4115_v38, %v3923_v37  ;;  %v4054_v51 = vmax.f32 %v3990_v28, 0.0  ;;  %v4180_v60 = vmul.f32 %v4116_v59, %v3924_v19  ;;  %v4181_v30 = vmul.f32 %v4117_v39, %v3925_v21  ;;  %v9921_v39 = vld [vmem:[#allocation98_spill] sm:$0xff] }
 0x623   : > { %5221 = vmatmul.mubr.bf16.gmra.mrb[48].mxu1 %v4285_v17  ;;  %v4055_v52 = vmax.f32 %v3991_v49, 0.0  ;;  %v3930_v50 = vmul.f32 %v9143_v41, %v9916_v23  ;;  %v4287_v9 = vpack.c.bf16 %v4239_v63, %v4238_v4  ;;  %v4288_v13 = vpack.c.bf16 %v4241_v58, %v4240_v57  ;;  %v9922_v63 = vld [vmem:[#allocation170_spill] sm:$0xff] }
 0x624   : > { %5224 = vmatprep.mubr.bf16.mxu1 %v4286_v55  ;;  %v3931_v27 = vmul.f32 %v9143_v41, %v9917_v22  ;;  %v4056_v12 = vmax.f32 %v3992_v1, 0.0  ;;  %v4057_v33 = vmax.f32 %v3993_v2, 0.0  ;;  %v3932_v8 = vmul.f32 %v9143_v41, %v9918_v53 }
 0x625   : > { %v3933_v34 = vmul.f32 %v9143_v41, %v9919_v62  ;;  %v4242_v37 = vmul.f32 0.16666667, %v4178_v48  ;;  %v4243_v19 = vmul.f32 0.16666667, %v4179_v7  ;;  %v4118_v21 = vmin.f32 %v4054_v51, 6.0 }
 0x626   : > { %v4244_v24 = vmul.f32 0.16666667, %v4180_v60  ;;  %v4245_v0 = vmul.f32 0.16666667, %v4181_v30  ;;  %v4119_v47 = vmin.f32 %v4055_v52, 6.0  ;;  %v3994_v11 = vadd.f32 3.0, %v3930_v50 }
 0x627   : > { %v3995_v42 = vadd.f32 3.0, %v3931_v27  ;;  %v4120_v17 = vmin.f32 %v4056_v12, 6.0  ;;  %v4121_v3 = vmin.f32 %v4057_v33, 6.0  ;;  %v3996_v20 = vadd.f32 3.0, %v3932_v8 }
 0x628   : > { %v3997_v35 = vadd.f32 3.0, %v3933_v34  ;;  %v4289_v55 = vpack.c.bf16 %v4243_v19, %v4242_v37  ;;  %v3934_v6 = vmul.f32 %v9143_v41, %v9920_v5  ;;  %v4290_v38 = vpack.c.bf16 %v4245_v0, %v4244_v24 }
 0x629   : > { %v4182_v28 = vmul.f32 %v4118_v21, %v3926_v10  ;;  %v4183_v54 = vmul.f32 %v4119_v47, %v3927_v40  ;;  %v4058_v4 = vmax.f32 %v3994_v11, 0.0  ;;  %v4059_v59 = vmax.f32 %v3995_v42, 0.0 }
 0x62a   : > { %v3935_v49 = vmul.f32 %v9143_v41, %v9921_v39  ;;  %v3936_v57 = vmul.f32 %v9143_v41, %v9922_v63  ;;  %v3937_v58 = vmul.f32 %v9143_v41, %v8805_v18  ;;  %v4184_v1 = vmul.f32 %v4120_v17, %v3928_v31 }
 0x62b   : > { %5225 = vmatmul.mubr.bf16.gmra.mrb[52].mxu1 %v4287_v9  ;;  %v4185_v2 = vmul.f32 %v4121_v3, %v3929_v25  ;;  %v4060_v48 = vmax.f32 %v3996_v20, 0.0  ;;  %v4061_v7 = vmax.f32 %v3997_v35, 0.0  ;;  %v3998_v51 = vadd.f32 3.0, %v3934_v6 }
 0x62c   : > { %5228 = vmatprep.mubr.bf16.mxu1 %v4288_v13  ;;  %v4246_v10 = vmul.f32 0.16666667, %v4182_v28  ;;  %v4247_v40 = vmul.f32 0.16666667, %v4183_v54  ;;  %v4122_v60 = vmin.f32 %v4058_v4, 6.0  ;;  %v4123_v30 = vmin.f32 %v4059_v59, 6.0 }
 0x62d   : > { %v3999_v52 = vadd.f32 3.0, %v3935_v49  ;;  %v4000_v23 = vadd.f32 3.0, %v3936_v57  ;;  %v4001_v9 = vadd.f32 3.0, %v3937_v58  ;;  %v4248_v13 = vmul.f32 0.16666667, %v4184_v1 }
 0x62e   : > { %v4249_v22 = vmul.f32 0.16666667, %v4185_v2  ;;  %v4124_v12 = vmin.f32 %v4060_v48, 6.0  ;;  %v4125_v33 = vmin.f32 %v4061_v7, 6.0  ;;  %v4062_v53 = vmax.f32 %v3998_v51, 0.0 }
 0x62f   : > { %v3938_v18 = vmul.f32 %v9143_v41, %v8851_v56  ;;  %v3939_v31 = vmul.f32 %v9143_v41, %v8904_v44  ;;  %v4291_v25 = vpack.c.bf16 %v4247_v40, %v4246_v10  ;;  %v4186_v62 = vmul.f32 %v4122_v60, %v3930_v50 }
 0x630   : > { %v3940_v37 = vmul.f32 %v9143_v41, %v8924_v46  ;;  %v3941_v19 = vmul.f32 %v9143_v41, %v8944_v61  ;;  %v4187_v21 = vmul.f32 %v4123_v30, %v3931_v27  ;;  %v4063_v24 = vmax.f32 %v3999_v52, 0.0 }
 0x631   : > { %v4064_v0 = vmax.f32 %v4000_v23, 0.0  ;;  %v4065_v47 = vmax.f32 %v4001_v9, 0.0  ;;  %v4292_v11 = vpack.c.bf16 %v4249_v22, %v4248_v13  ;;  %v4188_v42 = vmul.f32 %v4124_v12, %v3932_v8 }
 0x632   : > { %v4189_v17 = vmul.f32 %v4125_v33, %v3933_v34  ;;  %v4126_v56 = vmin.f32 %v4062_v53, 6.0  ;;  %v4002_v3 = vadd.f32 3.0, %v3938_v18  ;;  %v4003_v20 = vadd.f32 3.0, %v3939_v31 }
 0x633   : > { %5229 = vmatmul.mubr.bf16.gmra.mrb[56].mxu1 %v4289_v55  ;;  %v4250_v44 = vmul.f32 0.16666667, %v4186_v62  ;;  %v4004_v50 = vadd.f32 3.0, %v3940_v37  ;;  %v4005_v35 = vadd.f32 3.0, %v3941_v19  ;;  %v4251_v55 = vmul.f32 0.16666667, %v4187_v21 }
 0x634   : > { %5232 = vmatprep.mubr.bf16.mxu1 %v4290_v38  ;;  %v4127_v46 = vmin.f32 %v4063_v24, 6.0  ;;  %v4128_v5 = vmin.f32 %v4064_v0, 6.0  ;;  %v4129_v38 = vmin.f32 %v4065_v47, 6.0  ;;  %v4252_v61 = vmul.f32 0.16666667, %v4188_v42 }
 0x635   : > { %v4253_v27 = vmul.f32 0.16666667, %v4189_v17  ;;  %v4190_v28 = vmul.f32 %v4126_v56, %v3934_v6  ;;  %v4066_v54 = vmax.f32 %v4002_v3, 0.0  ;;  %v4067_v4 = vmax.f32 %v4003_v20, 0.0 }
 0x636   : > { %v4068_v59 = vmax.f32 %v4004_v50, 0.0  ;;  %v4069_v8 = vmax.f32 %v4005_v35, 0.0  ;;  %v3942_v34 = vmul.f32 %v9143_v41, %v8961_v32  ;;  %v3943_v39 = vmul.f32 %v9143_v41, %v8967_v15 }
 0x637   : > { %v4293_v63 = vpack.c.bf16 %v4251_v55, %v4250_v44  ;;  %v4191_v1 = vmul.f32 %v4127_v46, %v3935_v49  ;;  %v4192_v2 = vmul.f32 %v4128_v5, %v3936_v57  ;;  %v4193_v48 = vmul.f32 %v4129_v38, %v3937_v58  ;;  %v9923_v38 = vld [vmem:[#allocation140_spill] sm:$0xff] }
 0x638   : > { %v4294_v7 = vpack.c.bf16 %v4253_v27, %v4252_v61  ;;  %v3944_v51 = vmul.f32 %v9143_v41, %v8980_v36  ;;  %v3945_v6 = vmul.f32 %v9143_v41, %v8994_v45  ;;  %v4254_v10 = vmul.f32 0.16666667, %v4190_v28 }
 0x639   : > { %v4130_v40 = vmin.f32 %v4066_v54, 6.0  ;;  %v4131_v60 = vmin.f32 %v4067_v4, 6.0  ;;  %v4132_v32 = vmin.f32 %v4068_v59, 6.0  ;;  %v4133_v30 = vmin.f32 %v4069_v8, 6.0 }
 0x63a   : > { %v4006_v52 = vadd.f32 3.0, %v3942_v34  ;;  %v4007_v15 = vadd.f32 3.0, %v3943_v39  ;;  %v4255_v23 = vmul.f32 0.16666667, %v4191_v1  ;;  %v4256_v49 = vmul.f32 0.16666667, %v4192_v2 }
 0x63b   : > { %5233 = vmatmul.mubr.bf16.gmra.mrb[60].mxu1 %v4291_v25  ;;  %v4257_v57 = vmul.f32 0.16666667, %v4193_v48  ;;  %v4008_v58 = vadd.f32 3.0, %v3944_v51  ;;  %v4009_v9 = vadd.f32 3.0, %v3945_v6  ;;  %v4194_v13 = vmul.f32 %v4130_v40, %v3938_v18 }
 0x63c   : > { %5236 = vmatprep.mubr.bf16.mxu1 %v4292_v11  ;;  %v4195_v22 = vmul.f32 %v4131_v60, %v3939_v31  ;;  %v4196_v36 = vmul.f32 %v4132_v32, %v3940_v37  ;;  %v4197_v12 = vmul.f32 %v4133_v30, %v3941_v19  ;;  %v4070_v33 = vmax.f32 %v4006_v52, 0.0 }
 0x63d   : > { %v4071_v45 = vmax.f32 %v4007_v15, 0.0  ;;  %v4295_v53 = vpack.c.bf16 %v4255_v23, %v4254_v10  ;;  %v4296_v25 = vpack.c.bf16 %v4257_v57, %v4256_v49  ;;  %v3946_v62 = vmul.f32 %v9143_v41, %v9014_v26 }
 0x63e   : > { %v3947_v21 = vmul.f32 %v9143_v41, %v9024_v29  ;;  %v4072_v24 = vmax.f32 %v4008_v58, 0.0  ;;  %v4073_v0 = vmax.f32 %v4009_v9, 0.0  ;;  %v3948_v47 = vmul.f32 %v9143_v41, %v9031_v43 }
 0x63f   : > { %v3949_v18 = vmul.f32 %v9143_v41, %v9037_v16  ;;  %v4258_v31 = vmul.f32 0.16666667, %v4194_v13  ;;  %v4259_v37 = vmul.f32 0.16666667, %v4195_v22  ;;  %v4260_v19 = vmul.f32 0.16666667, %v4196_v36 }
 0x640   : > { %v4261_v11 = vmul.f32 0.16666667, %v4197_v12  ;;  %v4134_v42 = vmin.f32 %v4070_v33, 6.0  ;;  %v4135_v17 = vmin.f32 %v4071_v45, 6.0  ;;  %v4010_v26 = vadd.f32 3.0, %v3946_v62 }
 0x641   : > { %v4011_v56 = vadd.f32 3.0, %v3947_v21  ;;  %v4136_v3 = vmin.f32 %v4072_v24, 6.0  ;;  %v4137_v29 = vmin.f32 %v4073_v0, 6.0  ;;  %v4012_v20 = vadd.f32 3.0, %v3948_v47 }
 0x642   : > { %v4013_v44 = vadd.f32 3.0, %v3949_v18  ;;  %v4297_v50 = vpack.c.bf16 %v4259_v37, %v4258_v31  ;;  %v4298_v35 = vpack.c.bf16 %v4261_v11, %v4260_v19  ;;  %v4198_v43 = vmul.f32 %v4134_v42, %v3942_v34  ;;  %v9926_v11 = vld [vmem:[#allocation37_spill] sm:$0xff] }
 0x643   : > { %5237 = vmatmul.mubr.bf16.gmra.mrb[64].mxu1 %v4293_v63  ;;  %v4199_v55 = vmul.f32 %v4135_v17, %v3943_v39  ;;  %v4074_v46 = vmax.f32 %v4010_v26, 0.0  ;;  %v4075_v16 = vmax.f32 %v4011_v56, 0.0  ;;  %v3950_v5 = vmul.f32 %v9143_v41, %v9043_v14 }
 0x644   : > { %5240 = vmatprep.mubr.bf16.mxu1 %v4294_v7  ;;  %v3951_v61 = vmul.f32 %v9143_v41, %v9923_v38  ;;  %v4200_v27 = vmul.f32 %v4136_v3, %v3944_v51  ;;  %v4201_v28 = vmul.f32 %v4137_v29, %v3945_v6  ;;  %v4076_v54 = vmax.f32 %v4012_v20, 0.0  ;;  %v9927_v3 = vld [vmem:[#allocation35_spill] sm:$0xff]  ;;  %v9929_v38 = vld [vmem:[#allocation38_spill] sm:$0xff] }
 0x645   : > { %v4077_v4 = vmax.f32 %v4013_v44, 0.0  ;;  %v4262_v59 = vmul.f32 0.16666667, %v4198_v43  ;;  %v4263_v8 = vmul.f32 0.16666667, %v4199_v55  ;;  %v4138_v63 = vmin.f32 %v4074_v46, 6.0 }
 0x646   : > { %v4139_v1 = vmin.f32 %v4075_v16, 6.0  ;;  %v4014_v34 = vadd.f32 3.0, %v3950_v5  ;;  %v4015_v39 = vadd.f32 3.0, %v3951_v61  ;;  %v4264_v2 = vmul.f32 0.16666667, %v4200_v27  ;;  %v9928_v55 = vld [vmem:[#allocation40_spill] sm:$0xff] }
 0x647   : > { %v4265_v48 = vmul.f32 0.16666667, %v4201_v28  ;;  %v4140_v7 = vmin.f32 %v4076_v54, 6.0  ;;  %v4141_v10 = vmin.f32 %v4077_v4, 6.0  ;;  %v4299_v14 = vpack.c.bf16 %v4263_v8, %v4262_v59  ;;  %v9930_v54 = vld [vmem:[#allocation41_spill] sm:$0xff] }
 0x648   : > { %v4202_v40 = vmul.f32 %v4138_v63, %v3946_v62  ;;  %v4203_v60 = vmul.f32 %v4139_v1, %v3947_v21  ;;  %v4078_v41 = vmax.f32 %v4014_v34, 0.0  ;;  %v4079_v51 = vmax.f32 %v4015_v39, 0.0  ;;  %v9924_v21 = vld [vmem:[#allocation36_spill] sm:$0xff]  ;;  %v9931_v1 = vld [vmem:[#allocation39_spill] sm:$0xff] }
 0x649   : > { %v4300_v6 = vpack.c.bf16 %v4265_v48, %v4264_v2  ;;  %v4204_v32 = vmul.f32 %v4140_v7, %v3948_v47  ;;  %v4205_v30 = vmul.f32 %v4141_v10, %v3949_v18  ;;  %v9925_v18 = vld [vmem:[#allocation34_spill] sm:$0xff] }
 0x64a   : > { %v4266_v52 = vmul.f32 0.16666667, %v4202_v40  ;;  %v4267_v15 = vmul.f32 0.16666667, %v4203_v60  ;;  %v4142_v23 = vmin.f32 %v4078_v41, 6.0  ;;  %v4143_v49 = vmin.f32 %v4079_v51, 6.0 }
 0x64b   : > { %5241 = vmatmul.mubr.bf16.gmra.mrb[68].mxu1 %v4295_v53  ;;  %v4268_v57 = vmul.f32 0.16666667, %v4204_v32  ;;  %v4269_v58 = vmul.f32 0.16666667, %v4205_v30  ;;  %v9211_v53 = vld [vmem:[#allocation20] ss:$0 sm:$0xff] }
 0x64c   : > { %5244 = vmatprep.mubr.bf16.mxu1 %v4296_v25  ;;  %v4301_v9 = vpack.c.bf16 %v4267_v15, %v4266_v52  ;;  %v4206_v13 = vmul.f32 %v4142_v23, %v3950_v5  ;;  %v4207_v22 = vmul.f32 %v4143_v49, %v3951_v61  ;;  %v9213_v25 = vld [vmem:[#allocation21] ss:$0 sm:$0xff]  ;;  %v9933_v51 = vld [vmem:[#allocation42_spill] sm:$0xff] }
 0x64d   : > { %v4302_v36 = vpack.c.bf16 %v4269_v58, %v4268_v57  ;;  %v1209_v24 = vadd.f32 %v9213_v25, %v9924_v21  ;;  %v1207_v31 = vadd.f32 %v9213_v25, %v9925_v18  ;;  %v1210_v42 = vadd.f32 %v9213_v25, %v9926_v11  ;;  %v9934_v52 = vld [vmem:[#allocation45_spill] sm:$0xff]  ;;  %v9935_v58 = vld [vmem:[#allocation43_spill] sm:$0xff] }
 0x64e   : > { %v4270_v12 = vmul.f32 0.16666667, %v4206_v13  ;;  %v4271_v33 = vmul.f32 0.16666667, %v4207_v22  ;;  %v1208_v29 = vadd.f32 %v9213_v25, %v9927_v3  ;;  %v1213_v46 = vadd.f32 %v9213_v25, %v9928_v55 }
 0x64f   : > { %v1211_v61 = vadd.f32 %v9213_v25, %v9929_v38  ;;  %v1214_v4 = vadd.f32 %v9213_v25, %v9930_v54  ;;  %v1212_v34 = vadd.f32 %v9213_v25, %v9931_v1  ;;  %v1218_v15 = vadd.f32 %v9213_v25, %v9934_v52 }
 0x650   : > { %v4303_v45 = vpack.c.bf16 %v4271_v33, %v4270_v12 }
 0x653   : > { %5245 = vmatmul.mubr.bf16.gmra.mrb[72].mxu1 %v4297_v50 }
 0x654   : > { %5248 = vmatprep.mubr.bf16.mxu1 %v4298_v35 }
 0x65b   : > { %5249 = vmatmul.mubr.bf16.gmra.mrb[76].mxu1 %v4299_v14  ;;  %v9932_v14 = vld [vmem:[#allocation44_spill] sm:$0xff] }
 0x65c   : > { %5252 = vmatprep.mubr.bf16.mxu1 %v4300_v6  ;;  %v1217_v40 = vadd.f32 %v9213_v25, %v9932_v14  ;;  %v1215_v6 = vadd.f32 %v9213_v25, %v9933_v51 }
 0x663   : > { %5253 = vmatmul.mubr.bf16.gmra.mrb[80].mxu1 %v4301_v9  ;;  %v1216_v9 = vadd.f32 %v9213_v25, %v9935_v58 }
 0x664   : > { %5256 = vmatprep.mubr.bf16.mxu1 %v4302_v36 }
 0x66b   : > { %5257 = vmatmul.mubr.bf16.gmra.mrb[84].mxu1 %v4303_v45  ;;  %v9936_v45 = vld [vmem:[#allocation48_spill] sm:$0xff] }
 0x6c6   : > { %v5198_v62 = vpop.f32.mrb[24].mxu1 }
 0x6c7   : > { %v4418_v0 = vadd.f32 %v5198_v62, %v9211_v53  ;;  %v4409_v47 = vpop.f32.mrb[25].mxu1  ;;  %v1221_v62 = vadd.f32 %v9213_v25, %v9936_v45 }
 0x6c8   : > { %v4410_v37 = vadd.f32 %v9211_v53, %v4409_v47  ;;  %v5199_v19 = vpop.f32.mrb[26].mxu1 }
 0x6c9   : > { %v4666_v17 = vadd.f32 %v4418_v0, %v1209_v24  ;;  %v4421_v26 = vadd.f32 %v5199_v19, %v9211_v53  ;;  %v4412_v56 = vpop.f32.mrb[27].mxu1  ;;  %v9937_v0 = vld [vmem:[#allocation46_spill] sm:$0xff] }
 0x6ca   : > { %v4664_v20 = vadd.f32 %v4410_v37, %v1207_v31  ;;  %v4413_v44 = vadd.f32 %v9211_v53, %v4412_v56  ;;  %v1219_v47 = vadd.f32 %v9213_v25, %v9937_v0  ;;  %v9938_v37 = vld [vmem:[#allocation49_spill] sm:$0xff] }
 0x6cb   : > { %4730 = vst [vmem:[%s9229_s29 + $0x10] sm:$0xff] %v4666_v17  ;;  %v4667_v50 = vadd.f32 %v4421_v26, %v1210_v42  ;;  %v1222_v19 = vadd.f32 %v9213_v25, %v9938_v37  ;;  %v9939_v26 = vld [vmem:[#allocation47_spill] sm:$0xff] }
 0x6cc   : > { %4728 = vst [vmem:[%s9229_s29] sm:$0xff] %v4664_v20  ;;  %v4665_v35 = vadd.f32 %v4413_v44, %v1208_v29  ;;  %v1220_v56 = vadd.f32 %v9213_v25, %v9939_v26 }
 0x6cd   : > { %4731 = vst [vmem:[%s9229_s29 + $0x18] sm:$0xff] %v4667_v50 }
 0x6ce   : > { %4729 = vst [vmem:[%s9229_s29 + $0x8] sm:$0xff] %v4665_v35  ;;  %v5202_v43 = vpop.f32.mrb[28].mxu1  ;;  %v9940_v35 = vld [vmem:[#allocation52_spill] sm:$0xff] }
 0x6cf   : > { %v4434_v16 = vadd.f32 %v5202_v43, %v9211_v53  ;;  %v4425_v5 = vpop.f32.mrb[29].mxu1  ;;  %v1225_v43 = vadd.f32 %v9213_v25, %v9940_v35 }
 0x6d0   : > { %v4426_v27 = vadd.f32 %v9211_v53, %v4425_v5  ;;  %v5203_v28 = vpop.f32.mrb[30].mxu1 }
 0x6d1   : > { %v4670_v59 = vadd.f32 %v4434_v16, %v1213_v46  ;;  %v4437_v8 = vadd.f32 %v5203_v28, %v9211_v53  ;;  %v4428_v63 = vpop.f32.mrb[31].mxu1  ;;  %v9941_v16 = vld [vmem:[#allocation50_spill] sm:$0xff] }
 0x6d2   : > { %v4668_v39 = vadd.f32 %v4426_v27, %v1211_v61  ;;  %v4429_v2 = vadd.f32 %v9211_v53, %v4428_v63  ;;  %v1223_v5 = vadd.f32 %v9213_v25, %v9941_v16  ;;  %v9942_v27 = vld [vmem:[#allocation53_spill] sm:$0xff] }
 0x6d3   : > { %4734 = vst [vmem:[%s9229_s29 + $0x30] sm:$0xff] %v4670_v59  ;;  %v4671_v48 = vadd.f32 %v4437_v8, %v1214_v4  ;;  %v1226_v28 = vadd.f32 %v9213_v25, %v9942_v27  ;;  %v9943_v8 = vld [vmem:[#allocation51_spill] sm:$0xff] }
 0x6d4   : > { %4732 = vst [vmem:[%s9229_s29 + $0x20] sm:$0xff] %v4668_v39  ;;  %v4669_v7 = vadd.f32 %v4429_v2, %v1212_v34  ;;  %v1224_v63 = vadd.f32 %v9213_v25, %v9943_v8 }
 0x6d5   : > { %4735 = vst [vmem:[%s9229_s29 + $0x38] sm:$0xff] %v4671_v48 }
 0x6d6   : > { %4733 = vst [vmem:[%s9229_s29 + $0x28] sm:$0xff] %v4669_v7  ;;  %v5206_v10 = vpop.f32.mrb[32].mxu1  ;;  %v9944_v7 = vld [vmem:[#allocation56_spill] sm:$0xff] }
 0x6d7   : > { %v4450_v60 = vadd.f32 %v5206_v10, %v9211_v53  ;;  %v4441_v41 = vpop.f32.mrb[33].mxu1  ;;  %v1229_v10 = vadd.f32 %v9213_v25, %v9944_v7 }
 0x6d8   : > { %v4442_v32 = vadd.f32 %v9211_v53, %v4441_v41  ;;  %v5207_v30 = vpop.f32.mrb[34].mxu1 }
 0x6d9   : > { %v4674_v23 = vadd.f32 %v4450_v60, %v1217_v40  ;;  %v4453_v49 = vadd.f32 %v5207_v30, %v9211_v53  ;;  %v4444_v57 = vpop.f32.mrb[35].mxu1  ;;  %v9945_v60 = vld [vmem:[#allocation54_spill] sm:$0xff] }
 0x6da   : > { %v4672_v13 = vadd.f32 %v4442_v32, %v1215_v6  ;;  %v4445_v22 = vadd.f32 %v9211_v53, %v4444_v57  ;;  %v1227_v41 = vadd.f32 %v9213_v25, %v9945_v60  ;;  %v9946_v32 = vld [vmem:[#allocation57_spill] sm:$0xff] }
 0x6db   : > { %4738 = vst [vmem:[%s9229_s29 + $0x50] sm:$0xff] %v4674_v23  ;;  %v4675_v36 = vadd.f32 %v4453_v49, %v1218_v15  ;;  %v1230_v30 = vadd.f32 %v9213_v25, %v9946_v32  ;;  %v9947_v49 = vld [vmem:[#allocation55_spill] sm:$0xff] }
 0x6dc   : > { %4736 = vst [vmem:[%s9229_s29 + $0x40] sm:$0xff] %v4672_v13  ;;  %v4673_v12 = vadd.f32 %v4445_v22, %v1216_v9  ;;  %v1228_v57 = vadd.f32 %v9213_v25, %v9947_v49 }
 0x6dd   : > { %4739 = vst [vmem:[%s9229_s29 + $0x58] sm:$0xff] %v4675_v36 }
 0x6de   : > { %4737 = vst [vmem:[%s9229_s29 + $0x48] sm:$0xff] %v4673_v12  ;;  %v5210_v33 = vpop.f32.mrb[36].mxu1  ;;  %v9948_v12 = vld [vmem:[#allocation64_spill] sm:$0xff] }
 0x6df   : > { %v4466_v21 = vadd.f32 %v5210_v33, %v9211_v53  ;;  %v4457_v24 = vpop.f32.mrb[37].mxu1  ;;  %v1233_v33 = vadd.f32 %v9213_v25, %v9948_v12 }
 0x6e0   : > { %v4458_v18 = vadd.f32 %v9211_v53, %v4457_v24  ;;  %v5211_v31 = vpop.f32.mrb[38].mxu1 }
 0x6e1   : > { %v4678_v11 = vadd.f32 %v4466_v21, %v1221_v62  ;;  %v4469_v42 = vadd.f32 %v5211_v31, %v9211_v53  ;;  %v4460_v17 = vpop.f32.mrb[39].mxu1  ;;  %v9949_v21 = vld [vmem:[#allocation61_spill] sm:$0xff] }
 0x6e2   : > { %v4676_v3 = vadd.f32 %v4458_v18, %v1219_v47  ;;  %v4461_v29 = vadd.f32 %v9211_v53, %v4460_v17  ;;  %v1231_v24 = vadd.f32 %v9213_v25, %v9949_v21  ;;  %v9950_v18 = vld [vmem:[#allocation65_spill] sm:$0xff] }
 0x6e3   : > { %4742 = vst [vmem:[%s9229_s29 + $0x70] sm:$0xff] %v4678_v11  ;;  %v4679_v20 = vadd.f32 %v4469_v42, %v1222_v19  ;;  %v1234_v31 = vadd.f32 %v9213_v25, %v9950_v18  ;;  %v9951_v42 = vld [vmem:[#allocation62_spill] sm:$0xff] }
 0x6e4   : > { %4740 = vst [vmem:[%s9229_s29 + $0x60] sm:$0xff] %v4676_v3  ;;  %v4677_v44 = vadd.f32 %v4461_v29, %v1220_v56  ;;  %v1232_v17 = vadd.f32 %v9213_v25, %v9951_v42 }
 0x6e5   : > { %4743 = vst [vmem:[%s9229_s29 + $0x78] sm:$0xff] %v4679_v20 }
 0x6e6   : > { %4741 = vst [vmem:[%s9229_s29 + $0x68] sm:$0xff] %v4677_v44  ;;  %v5214_v50 = vpop.f32.mrb[40].mxu1  ;;  %v9952_v44 = vld [vmem:[#allocation73_spill] sm:$0xff] }
 0x6e7   : > { %v4482_v55 = vadd.f32 %v5214_v50, %v9211_v53  ;;  %v4473_v46 = vpop.f32.mrb[41].mxu1  ;;  %v1237_v50 = vadd.f32 %v9213_v25, %v9952_v44 }
 0x6e8   : > { %v4474_v38 = vadd.f32 %v9211_v53, %v4473_v46  ;;  %v5215_v61 = vpop.f32.mrb[42].mxu1 }
 0x6e9   : > { %v4682_v54 = vadd.f32 %v4482_v55, %v1225_v43  ;;  %v4485_v4 = vadd.f32 %v5215_v61, %v9211_v53  ;;  %v4476_v59 = vpop.f32.mrb[43].mxu1  ;;  %v9953_v55 = vld [vmem:[#allocation69_spill] sm:$0xff] }
 0x6ea   : > { %v4680_v1 = vadd.f32 %v4474_v38, %v1223_v5  ;;  %v4477_v34 = vadd.f32 %v9211_v53, %v4476_v59  ;;  %v1235_v46 = vadd.f32 %v9213_v25, %v9953_v55  ;;  %v9954_v38 = vld [vmem:[#allocation74_spill] sm:$0xff] }
 0x6eb   : > { %4746 = vst [vmem:[%s9229_s29 + $0x90] sm:$0xff] %v4682_v54  ;;  %v4683_v39 = vadd.f32 %v4485_v4, %v1226_v28  ;;  %v1238_v61 = vadd.f32 %v9213_v25, %v9954_v38  ;;  %v9955_v4 = vld [vmem:[#allocation72_spill] sm:$0xff] }
 0x6ec   : > { %4744 = vst [vmem:[%s9229_s29 + $0x80] sm:$0xff] %v4680_v1  ;;  %v4681_v2 = vadd.f32 %v4477_v34, %v1224_v63  ;;  %v1236_v59 = vadd.f32 %v9213_v25, %v9955_v4 }
 0x6ed   : > { %4747 = vst [vmem:[%s9229_s29 + $0x98] sm:$0xff] %v4683_v39 }
 0x6ee   : > { %4745 = vst [vmem:[%s9229_s29 + $0x88] sm:$0xff] %v4681_v2  ;;  %v5218_v48 = vpop.f32.mrb[44].mxu1  ;;  %v9956_v2 = vld [vmem:[#allocation81_spill] sm:$0xff] }
 0x6ef   : > { %v4498_v14 = vadd.f32 %v5218_v48, %v9211_v53  ;;  %v4489_v40 = vpop.f32.mrb[45].mxu1  ;;  %v1241_v48 = vadd.f32 %v9213_v25, %v9956_v2 }
 0x6f0   : > { %v4490_v51 = vadd.f32 %v9211_v53, %v4489_v40  ;;  %v5219_v6 = vpop.f32.mrb[46].mxu1 }
 0x6f1   : > { %v4686_v52 = vadd.f32 %v4498_v14, %v1229_v10  ;;  %v4501_v15 = vadd.f32 %v5219_v6, %v9211_v53  ;;  %v4492_v23 = vpop.f32.mrb[47].mxu1  ;;  %v9957_v14 = vld [vmem:[#allocation77_spill] sm:$0xff] }
 0x6f2   : > { %v4684_v58 = vadd.f32 %v4490_v51, %v1227_v41  ;;  %v4493_v9 = vadd.f32 %v9211_v53, %v4492_v23  ;;  %v1239_v40 = vadd.f32 %v9213_v25, %v9957_v14  ;;  %v9958_v51 = vld [vmem:[#allocation84_spill] sm:$0xff] }
 0x6f3   : > { %4750 = vst [vmem:[%s9229_s29 + $0xb0] sm:$0xff] %v4686_v52  ;;  %v4687_v13 = vadd.f32 %v4501_v15, %v1230_v30  ;;  %v1242_v6 = vadd.f32 %v9213_v25, %v9958_v51  ;;  %v9959_v15 = vld [vmem:[#allocation79_spill] sm:$0xff] }
 0x6f4   : > { %4748 = vst [vmem:[%s9229_s29 + $0xa0] sm:$0xff] %v4684_v58  ;;  %v4685_v22 = vadd.f32 %v4493_v9, %v1228_v57  ;;  %v1240_v23 = vadd.f32 %v9213_v25, %v9959_v15 }
 0x6f5   : > { %4751 = vst [vmem:[%s9229_s29 + $0xb8] sm:$0xff] %v4687_v13 }
 0x6f6   : > { %4749 = vst [vmem:[%s9229_s29 + $0xa8] sm:$0xff] %v4685_v22  ;;  %v5222_v36 = vpop.f32.mrb[48].mxu1  ;;  %v9960_v22 = vld [vmem:[#allocation92_spill] sm:$0xff] }
 0x6f7   : > { %v4514_v45 = vadd.f32 %v5222_v36, %v9211_v53  ;;  %v4505_v62 = vpop.f32.mrb[49].mxu1  ;;  %v1245_v36 = vadd.f32 %v9213_v25, %v9960_v22 }
 0x6f8   : > { %v4506_v0 = vadd.f32 %v9211_v53, %v4505_v62  ;;  %v5223_v47 = vpop.f32.mrb[50].mxu1 }
 0x6f9   : > { %v4690_v37 = vadd.f32 %v4514_v45, %v1233_v33  ;;  %v4517_v19 = vadd.f32 %v5223_v47, %v9211_v53  ;;  %v4508_v11 = vpop.f32.mrb[51].mxu1  ;;  %v9961_v45 = vld [vmem:[#allocation85_spill] sm:$0xff] }
 0x6fa   : > { %v4688_v26 = vadd.f32 %v4506_v0, %v1231_v24  ;;  %v4509_v56 = vadd.f32 %v9211_v53, %v4508_v11  ;;  %v1243_v62 = vadd.f32 %v9213_v25, %v9961_v45  ;;  %v9962_v0 = vld [vmem:[#allocation94_spill] sm:$0xff] }
 0x6fb   : > { %4754 = vst [vmem:[%s9229_s29 + $0xd0] sm:$0xff] %v4690_v37  ;;  %v4691_v3 = vadd.f32 %v4517_v19, %v1234_v31  ;;  %v1246_v47 = vadd.f32 %v9213_v25, %v9962_v0  ;;  %v9963_v19 = vld [vmem:[#allocation88_spill] sm:$0xff] }
 0x6fc   : > { %4752 = vst [vmem:[%s9229_s29 + $0xc0] sm:$0xff] %v4688_v26  ;;  %v4689_v29 = vadd.f32 %v4509_v56, %v1232_v17  ;;  %v1244_v11 = vadd.f32 %v9213_v25, %v9963_v19 }
 0x6fd   : > { %4755 = vst [vmem:[%s9229_s29 + $0xd8] sm:$0xff] %v4691_v3 }
 0x6fe   : > { %4753 = vst [vmem:[%s9229_s29 + $0xc8] sm:$0xff] %v4689_v29  ;;  %v5226_v20 = vpop.f32.mrb[52].mxu1  ;;  %v9964_v29 = vld [vmem:[#allocation102_spill] sm:$0xff] }
 0x6ff   : > { %v4530_v35 = vadd.f32 %v5226_v20, %v9211_v53  ;;  %v4521_v43 = vpop.f32.mrb[53].mxu1  ;;  %v1249_v20 = vadd.f32 %v9213_v25, %v9964_v29 }
 0x700   : > { %v4522_v16 = vadd.f32 %v9211_v53, %v4521_v43  ;;  %v5227_v5 = vpop.f32.mrb[54].mxu1 }
 0x701   : > { %v4694_v27 = vadd.f32 %v4530_v35, %v1237_v50  ;;  %v4533_v28 = vadd.f32 %v5227_v5, %v9211_v53  ;;  %v4524_v54 = vpop.f32.mrb[55].mxu1  ;;  %v9965_v35 = vld [vmem:[#allocation97_spill] sm:$0xff] }
 0x702   : > { %v4692_v8 = vadd.f32 %v4522_v16, %v1235_v46  ;;  %v4525_v63 = vadd.f32 %v9211_v53, %v4524_v54  ;;  %v1247_v43 = vadd.f32 %v9213_v25, %v9965_v35  ;;  %v9966_v16 = vld [vmem:[#allocation71_spill] sm:$0xff] }
 0x703   : > { %4758 = vst [vmem:[%s9229_s29 + $0xf0] sm:$0xff] %v4694_v27  ;;  %v4695_v1 = vadd.f32 %v4533_v28, %v1238_v61  ;;  %v1250_v5 = vadd.f32 %v9213_v25, %v9966_v16  ;;  %v9967_v28 = vld [vmem:[#allocation99_spill] sm:$0xff] }
 0x704   : > { %4756 = vst [vmem:[%s9229_s29 + $0xe0] sm:$0xff] %v4692_v8  ;;  %v4693_v34 = vadd.f32 %v4525_v63, %v1236_v59  ;;  %v1248_v54 = vadd.f32 %v9213_v25, %v9967_v28 }
 0x705   : > { %4759 = vst [vmem:[%s9229_s29 + $0xf8] sm:$0xff] %v4695_v1 }
 0x706   : > { %4757 = vst [vmem:[%s9229_s29 + $0xe8] sm:$0xff] %v4693_v34  ;;  %v5230_v39 = vpop.f32.mrb[56].mxu1  ;;  %v9968_v34 = vld [vmem:[#allocation111_spill] sm:$0xff] }
 0x707   : > { %v4546_v7 = vadd.f32 %v5230_v39, %v9211_v53  ;;  %v4537_v10 = vpop.f32.mrb[57].mxu1  ;;  %v1253_v39 = vadd.f32 %v9213_v25, %v9968_v34 }
 0x708   : > { %v4538_v60 = vadd.f32 %v9211_v53, %v4537_v10  ;;  %v5231_v41 = vpop.f32.mrb[58].mxu1 }
 0x709   : > { %v4698_v32 = vadd.f32 %v4546_v7, %v1241_v48  ;;  %v4549_v30 = vadd.f32 %v5231_v41, %v9211_v53  ;;  %v4540_v52 = vpop.f32.mrb[59].mxu1  ;;  %v9969_v7 = vld [vmem:[#allocation104_spill] sm:$0xff] }
 0x70a   : > { %v4696_v49 = vadd.f32 %v4538_v60, %v1239_v40  ;;  %v4541_v57 = vadd.f32 %v9211_v53, %v4540_v52  ;;  %v1251_v10 = vadd.f32 %v9213_v25, %v9969_v7  ;;  %v9970_v60 = vld [vmem:[#allocation114_spill] sm:$0xff] }
 0x70b   : > { %4762 = vst [vmem:[%s9229_s29 + $0x110] sm:$0xff] %v4698_v32  ;;  %v4699_v58 = vadd.f32 %v4549_v30, %v1242_v6  ;;  %v1254_v41 = vadd.f32 %v9213_v25, %v9970_v60  ;;  %v9971_v30 = vld [vmem:[#allocation107_spill] sm:$0xff] }
 0x70c   : > { %4760 = vst [vmem:[%s9229_s29 + $0x100] sm:$0xff] %v4696_v49  ;;  %v4697_v9 = vadd.f32 %v4541_v57, %v1240_v23  ;;  %v1252_v52 = vadd.f32 %v9213_v25, %v9971_v30 }
 0x70d   : > { %4763 = vst [vmem:[%s9229_s29 + $0x118] sm:$0xff] %v4699_v58 }
 0x70e   : > { %4761 = vst [vmem:[%s9229_s29 + $0x108] sm:$0xff] %v4697_v9  ;;  %v5234_v13 = vpop.f32.mrb[60].mxu1  ;;  %v9972_v9 = vld [vmem:[#allocation125_spill] sm:$0xff] }
 0x70f   : > { %v4562_v12 = vadd.f32 %v5234_v13, %v9211_v53  ;;  %v4553_v33 = vpop.f32.mrb[61].mxu1  ;;  %v1257_v13 = vadd.f32 %v9213_v25, %v9972_v9 }
 0x710   : > { %v4554_v21 = vadd.f32 %v9211_v53, %v4553_v33  ;;  %v5235_v24 = vpop.f32.mrb[62].mxu1 }
 0x711   : > { %v4702_v18 = vadd.f32 %v4562_v12, %v1245_v36  ;;  %v4565_v31 = vadd.f32 %v5235_v24, %v9211_v53  ;;  %v4556_v37 = vpop.f32.mrb[63].mxu1  ;;  %v9973_v12 = vld [vmem:[#allocation116_spill] sm:$0xff] }
 0x712   : > { %v4700_v42 = vadd.f32 %v4554_v21, %v1243_v62  ;;  %v4557_v17 = vadd.f32 %v9211_v53, %v4556_v37  ;;  %v1255_v33 = vadd.f32 %v9213_v25, %v9973_v12  ;;  %v9974_v21 = vld [vmem:[#allocation80_spill] sm:$0xff] }
 0x713   : > { %4766 = vst [vmem:[%s9229_s29 + $0x130] sm:$0xff] %v4702_v18  ;;  %v4703_v26 = vadd.f32 %v4565_v31, %v1246_v47  ;;  %v1258_v24 = vadd.f32 %v9213_v25, %v9974_v21  ;;  %v9975_v31 = vld [vmem:[#allocation118_spill] sm:$0xff] }
 0x714   : > { %4764 = vst [vmem:[%s9229_s29 + $0x120] sm:$0xff] %v4700_v42  ;;  %v4701_v56 = vadd.f32 %v4557_v17, %v1244_v11  ;;  %v1256_v37 = vadd.f32 %v9213_v25, %v9975_v31 }
 0x715   : > { %4767 = vst [vmem:[%s9229_s29 + $0x138] sm:$0xff] %v4703_v26 }
 0x716   : > { %4765 = vst [vmem:[%s9229_s29 + $0x128] sm:$0xff] %v4701_v56  ;;  %v5238_v3 = vpop.f32.mrb[64].mxu1  ;;  %v9976_v56 = vld [vmem:[#allocation139_spill] sm:$0xff] }
 0x717   : > { %v4578_v44 = vadd.f32 %v5238_v3, %v9211_v53  ;;  %v4569_v50 = vpop.f32.mrb[65].mxu1  ;;  %v1261_v3 = vadd.f32 %v9213_v25, %v9976_v56 }
 0x718   : > { %v4570_v55 = vadd.f32 %v9211_v53, %v4569_v50  ;;  %v5239_v46 = vpop.f32.mrb[66].mxu1 }
 0x719   : > { %v4706_v38 = vadd.f32 %v4578_v44, %v1249_v20  ;;  %v4581_v61 = vadd.f32 %v5239_v46, %v9211_v53  ;;  %v4572_v27 = vpop.f32.mrb[67].mxu1  ;;  %v9977_v44 = vld [vmem:[#allocation100_spill] sm:$0xff] }
 0x71a   : > { %v4704_v4 = vadd.f32 %v4570_v55, %v1247_v43  ;;  %v4573_v59 = vadd.f32 %v9211_v53, %v4572_v27  ;;  %v1259_v50 = vadd.f32 %v9213_v25, %v9977_v44  ;;  %v9978_v55 = vld [vmem:[#allocation142_spill] sm:$0xff] }
 0x71b   : > { %4770 = vst [vmem:[%s9229_s29 + $0x150] sm:$0xff] %v4706_v38  ;;  %v4707_v8 = vadd.f32 %v4581_v61, %v1250_v5  ;;  %v1262_v46 = vadd.f32 %v9213_v25, %v9978_v55  ;;  %v9979_v61 = vld [vmem:[#allocation134_spill] sm:$0xff] }
 0x71c   : > { %4768 = vst [vmem:[%s9229_s29 + $0x140] sm:$0xff] %v4704_v4  ;;  %v4705_v63 = vadd.f32 %v4573_v59, %v1248_v54  ;;  %v1260_v27 = vadd.f32 %v9213_v25, %v9979_v61 }
 0x71d   : > { %4771 = vst [vmem:[%s9229_s29 + $0x158] sm:$0xff] %v4707_v8 }
 0x71e   : > { %4769 = vst [vmem:[%s9229_s29 + $0x148] sm:$0xff] %v4705_v63  ;;  %v5242_v1 = vpop.f32.mrb[68].mxu1  ;;  %v9980_v63 = vld [vmem:[#allocation127_spill] sm:$0xff] }
 0x71f   : > { %v4594_v2 = vadd.f32 %v5242_v1, %v9211_v53  ;;  %v4585_v48 = vpop.f32.mrb[69].mxu1  ;;  %v1265_v1 = vadd.f32 %v9213_v25, %v9980_v63 }
 0x720   : > { %v4586_v14 = vadd.f32 %v9211_v53, %v4585_v48  ;;  %v5243_v40 = vpop.f32.mrb[70].mxu1 }
 0x721   : > { %v4710_v51 = vadd.f32 %v4594_v2, %v1253_v39  ;;  %v4597_v6 = vadd.f32 %v5243_v40, %v9211_v53  ;;  %v4588_v32 = vpop.f32.mrb[71].mxu1  ;;  %v9981_v2 = vld [vmem:[#allocation105_spill] sm:$0xff] }
 0x722   : > { %v4708_v15 = vadd.f32 %v4586_v14, %v1251_v10  ;;  %v4589_v23 = vadd.f32 %v9211_v53, %v4588_v32  ;;  %v1263_v48 = vadd.f32 %v9213_v25, %v9981_v2  ;;  %v9982_v14 = vld [vmem:[#allocation82_spill] sm:$0xff] }
 0x723   : > { %4774 = vst [vmem:[%s9229_s29 + $0x170] sm:$0xff] %v4710_v51  ;;  %v4711_v49 = vadd.f32 %v4597_v6, %v1254_v41  ;;  %v1266_v40 = vadd.f32 %v9213_v25, %v9982_v14  ;;  %v9983_v6 = vld [vmem:[#allocation110_spill] sm:$0xff] }
 0x724   : > { %4772 = vst [vmem:[%s9229_s29 + $0x160] sm:$0xff] %v4708_v15  ;;  %v4709_v57 = vadd.f32 %v4589_v23, %v1252_v52  ;;  %v1264_v32 = vadd.f32 %v9213_v25, %v9983_v6 }
 0x725   : > { %4775 = vst [vmem:[%s9229_s29 + $0x178] sm:$0xff] %v4711_v49 }
 0x726   : > { %4773 = vst [vmem:[%s9229_s29 + $0x168] sm:$0xff] %v4709_v57  ;;  %v5246_v58 = vpop.f32.mrb[72].mxu1  ;;  %v9984_v57 = vld [vmem:[#allocation135_spill] sm:$0xff] }
 0x727   : > { %v4610_v22 = vadd.f32 %v5246_v58, %v9211_v53  ;;  %v4601_v36 = vpop.f32.mrb[73].mxu1  ;;  %v1269_v58 = vadd.f32 %v9213_v25, %v9984_v57 }
 0x728   : > { %v4602_v45 = vadd.f32 %v9211_v53, %v4601_v36  ;;  %v5247_v62 = vpop.f32.mrb[74].mxu1 }
 0x729   : > { %v4714_v0 = vadd.f32 %v4610_v22, %v1257_v13  ;;  %v4613_v47 = vadd.f32 %v5247_v62, %v9211_v53  ;;  %v4604_v18 = vpop.f32.mrb[75].mxu1  ;;  %v9985_v22 = vld [vmem:[#allocation132_spill] sm:$0xff] }
 0x72a   : > { %v4712_v19 = vadd.f32 %v4602_v45, %v1255_v33  ;;  %v4605_v11 = vadd.f32 %v9211_v53, %v4604_v18  ;;  %v1267_v36 = vadd.f32 %v9213_v25, %v9985_v22  ;;  %v9986_v45 = vld [vmem:[#allocation146_spill] sm:$0xff] }
 0x72b   : > { %4778 = vst [vmem:[%s9229_s29 + $0x190] sm:$0xff] %v4714_v0  ;;  %v4715_v42 = vadd.f32 %v4613_v47, %v1258_v24  ;;  %v1270_v62 = vadd.f32 %v9213_v25, %v9986_v45  ;;  %v9987_v47 = vld [vmem:[#allocation93_spill] sm:$0xff] }
 0x72c   : > { %4776 = vst [vmem:[%s9229_s29 + $0x180] sm:$0xff] %v4712_v19  ;;  %v4713_v17 = vadd.f32 %v4605_v11, %v1256_v37  ;;  %v1268_v18 = vadd.f32 %v9213_v25, %v9987_v47 }
 0x72d   : > { %4779 = vst [vmem:[%s9229_s29 + $0x198] sm:$0xff] %v4715_v42 }
 0x72e   : > { %4777 = vst [vmem:[%s9229_s29 + $0x188] sm:$0xff] %v4713_v17  ;;  %v5250_v26 = vpop.f32.mrb[76].mxu1 }
 0x72f   : > { %v4626_v29 = vadd.f32 %v5250_v26, %v9211_v53  ;;  %v4617_v20 = vpop.f32.mrb[77].mxu1 }
 0x730   : > { %v4618_v35 = vadd.f32 %v9211_v53, %v4617_v20  ;;  %v5251_v43 = vpop.f32.mrb[78].mxu1 }
 0x731   : > { %v4718_v16 = vadd.f32 %v4626_v29, %v1261_v3  ;;  %v4629_v5 = vadd.f32 %v5251_v43, %v9211_v53  ;;  %v4620_v38 = vpop.f32.mrb[79].mxu1 }
 0x732   : > { %v4716_v28 = vadd.f32 %v4618_v35, %v1259_v50  ;;  %v4621_v54 = vadd.f32 %v9211_v53, %v4620_v38 }
 0x733   : > { %4782 = vst [vmem:[%s9229_s29 + $0x1b0] sm:$0xff] %v4718_v16  ;;  %v4719_v4 = vadd.f32 %v4629_v5, %v1262_v46 }
 0x734   : > { %4780 = vst [vmem:[%s9229_s29 + $0x1a0] sm:$0xff] %v4716_v28  ;;  %v4717_v59 = vadd.f32 %v4621_v54, %v1260_v27 }
 0x735   : > { %4783 = vst [vmem:[%s9229_s29 + $0x1b8] sm:$0xff] %v4719_v4 }
 0x736   : > { %4781 = vst [vmem:[%s9229_s29 + $0x1a8] sm:$0xff] %v4717_v59  ;;  %v5254_v8 = vpop.f32.mrb[80].mxu1 }
 0x737   : > { %v4642_v34 = vadd.f32 %v5254_v8, %v9211_v53  ;;  %v4633_v39 = vpop.f32.mrb[81].mxu1 }
 0x738   : > { %v4634_v7 = vadd.f32 %v9211_v53, %v4633_v39  ;;  %v5255_v10 = vpop.f32.mrb[82].mxu1 }
 0x739   : > { %v4722_v60 = vadd.f32 %v4642_v34, %v1265_v1  ;;  %v4645_v41 = vadd.f32 %v5255_v10, %v9211_v53  ;;  %v4636_v51 = vpop.f32.mrb[83].mxu1 }
 0x73a   : > { %v4720_v30 = vadd.f32 %v4634_v7, %v1263_v48  ;;  %v4637_v52 = vadd.f32 %v9211_v53, %v4636_v51 }
 0x73b   : > { %4786 = vst [vmem:[%s9229_s29 + $0x1d0] sm:$0xff] %v4722_v60  ;;  %v4723_v15 = vadd.f32 %v4645_v41, %v1266_v40 }
 0x73c   : > { %4784 = vst [vmem:[%s9229_s29 + $0x1c0] sm:$0xff] %v4720_v30  ;;  %v4721_v23 = vadd.f32 %v4637_v52, %v1264_v32 }
 0x73d   : > { %4787 = vst [vmem:[%s9229_s29 + $0x1d8] sm:$0xff] %v4723_v15 }
 0x73e   : > { %4785 = vst [vmem:[%s9229_s29 + $0x1c8] sm:$0xff] %v4721_v23  ;;  %v5258_v49 = vpop.f32.mrb[84].mxu1 }
 0x73f   : > { %v4658_v9 = vadd.f32 %v5258_v49, %v9211_v53  ;;  %v4649_v13 = vpop.f32.mrb[85].mxu1 }
 0x740   : > { %v4650_v12 = vadd.f32 %v9211_v53, %v4649_v13  ;;  %v5259_v33 = vpop.f32.mrb[86].mxu1 }
 0x741   : > { %v4726_v21 = vadd.f32 %v4658_v9, %v1269_v58  ;;  %v4661_v24 = vadd.f32 %v5259_v33, %v9211_v53  ;;  %v4652_v0 = vpop.f32.mrb[87].mxu1 }
 0x742   : > { %v4724_v31 = vadd.f32 %v4650_v12, %v1267_v36  ;;  %v4653_v37 = vadd.f32 %v9211_v53, %v4652_v0 }
 0x743   : > { %4790 = vst [vmem:[%s9229_s29 + $0x1f0] sm:$0xff] %v4726_v21  ;;  %v4727_v19 = vadd.f32 %v4661_v24, %v1270_v62 }
 0x744   : > { %4788 = vst [vmem:[%s9229_s29 + $0x1e0] sm:$0xff] %v4724_v31  ;;  %v4725_v11 = vadd.f32 %v4653_v37, %v1268_v18 }
 0x745   : > { %4791 = vst [vmem:[%s9229_s29 + $0x1f8] sm:$0xff] %v4727_v19 }
 0x746   : > { %4789 = vst [vmem:[%s9229_s29 + $0x1e8] sm:$0xff] %v4725_v11 }
 0x747   : > { %5881 = shalt.err (!%p5878_p5)
}
 0x748   : > { %s5882_s29 = scalar_lea.hbm %s9477_s30, 8192  ;;  %s5886_s12 = scalar_lea.hbm %s9988_s27, 16384 }
 0x749   : > { %p5883_p2 = scmp.ne.s32.totalorder %s9477_s30, %s5882_s29  ;;  %p5887_p1 = scmp.lt.u32.totalorder %s9477_s30, %s9988_s27 }
 0x74a   : > { %p5888_p11 = scmp.lt.u32.totalorder %s5886_s12, %s5882_s29  ;;  %p5890_p13 = scmp.lt.u32.totalorder %s5882_s29, %s9477_s30 }
 0x74b   : > { %p5884_p7 = pnand %p5883_p2, %p9989_p8 }
 0x74c   : > { %p5889_p12 = por %p5888_p11, %p5887_p1 }
 0x74d   : > { %p5885_p10 = pneg %p5884_p7 }
 0x74e   : > { %p5891_p6 = por %p5890_p13, %p5889_p12 }
 0x750   : > { %p5892_p9 = pnand %p5891_p6, %p5885_p10 }
 0x752   : > { %5895 = shalt.err (!%p5892_p9)
}
 0x753   : > { %s5983_s18 = smov 128   ;;  %s5984_s16 = smov 8  }
 0x754   : > { %5322 = dma.vmem_to_hbm [thread:$0]  (%p9989_p8), %s9479_s20, 8192, %s9477_s30, %s4793_s14, %s5983_s18, %s5983_s18, %s5984_s16  }
 0x755 PF: > { %s4822_s17 = sand.u32 1, %s5946_s21   ;;  %p9990_p4 = scmp.ne.s32.totalorder %s9617_s1, 0 }
 0x756   : > { %p9991_p3 = scmp.ge.s32.totalorder %s5958_s24, 2  ;;  %s4823_s29 = scalar_lea.sflag [#allocation5], %s4822_s17 }
 0x758   : > { %p5363_p0 = pnand %p9991_p3, %p9990_p4 }
 0x75a   : > { %5941 = dma.done.wait (!%p5363_p0), %s4823_s29, 8192  }
 0x75b   : > { %5943 = vsyncadd (!%p5363_p0), %s4823_s29, 4294959104  ;;  %p31_p5 = scmp.ge.s32.totalorder %s6325_s13, 4   ;;  %s9992_s21 = smov %s5950_s22 }
 0x75c   : > { %s9993_s22 = smov %s5954_s23  ;;  %s9994_s23 = smov %s6337_s19 }
 0x75d   : > { %s9995_s24 = smov %s6325_s13  ;;  %33 = sbr.rel (!%p31_p5) target bundleno = 16 (0x10), region = 168 }
 0x764   :  { %4828 = vsyncpa [#allocation4], 1 }
 0x765   :  { %4830 = vsyncpa [#allocation4 + $0x1], 1 }
 0x766   :  { %4831 = vsyncpa [#allocation7], 1 }
 0x767   :  { %4832 = vsyncpa [#allocation10], 1 }
 0x768   :  { %4833 = vsyncpa [#allocation13], 1 }
 0x769   :  { %4834 = vsyncpa [#allocation16], 1 }
 0x76a   :  { %4835 = vsyncpa [#allocation19], 1 }
 0x76b   :  { %4836 = vsyncpa [#allocation22], 1 }
 0x76c   :  { %4837 = vsyncpa [#allocation5], 1 }
 0x76d   :  { %4839 = vsyncpa [#allocation5 + $0x1], 1 }

</bundles_post_ra>
